<compile_context>
chip_gen: v7x
topology: tpu7x:2x2x1
jax: 0.10.0
libtpu: 0.0.40
codegen_flags: <defaults>
</compile_context>

<pallas_src>
import functools

import jax
import jax.numpy as jnp
import numpy as np
from jax.experimental import pallas as pl
from jax.experimental.pallas import tpu as pltpu

NUM_CLASSES = 5
IN_CHANNELS = 7
PADDED_IN = 8          # conv1 contraction dim padded 7 -> 8 (sublane aligned)
PADDED_OUT = 8         # conv7 output rows padded 5 -> 8 (one sublane tile)
EPS = 1e-5

BF16 = jnp.bfloat16
F32 = jnp.float32

# Parameter orderings (must match the kernel signatures below).
_CONV123 = ('w1', 'b1', 'w2', 'b2', 'w3', 'b3')
_GLOBAL_MLP = ('wf1', 'bf1', 'wf2', 'bf2', 'wf3', 'bf3')
_HEAD = ('w4a', 'w4b', 'b4', 'w5', 'b5', 'w6', 'b6', 'w7', 'b7')
_MONO = _CONV123 + _GLOBAL_MLP + _HEAD

# MAC counts for advisory cost estimates.
_MACS_LOCAL = PADDED_IN * 64 + 64 * 128 + 128 * 1024                 # per point
_MACS_HEAD = 1024 * 512 + 512 * 256 + 256 * 128 + 128 * PADDED_OUT  # per point
_MACS_GLOBAL = 1024 * 512 + 512 * 256 + 256 * 128 + 128 * 512       # per batch


# ----------------------------------------------------------------------------
# In-kernel building blocks (shared by all three kernels).
# ----------------------------------------------------------------------------
def _mm(w_ref, h):
    # (Cout, Cin) @ (Cin, TN): bf16 MXU inputs, f32 accumulation.
    return jnp.dot(w_ref[...], h, preferred_element_type=F32)


def _bias_relu(acc_f32, b_ref, ew_bf16):
    # Bias-add + ReLU; activations are stored in bf16 exactly once per layer.
    if ew_bf16:
        # v6e/v7x: packed bf16 VALU path (halves elementwise cost & vreg traffic).
        return jnp.maximum(acc_f32.astype(BF16) + b_ref[...].astype(BF16), 0.0)
    # v5e and older: no bf16 VPU path; keep elementwise in f32, cast once after.
    return jnp.maximum(acc_f32 + b_ref[...], 0.0).astype(BF16)


def _local_features(x_ref, w1, b1, w2, b2, w3, b3, ew_bf16):
    x = x_ref[...]                                            # (8, TN) bf16
    h = _bias_relu(_mm(w1, x), b1, ew_bf16)                   # (64, TN) bf16
    h = _bias_relu(_mm(w2, h), b2, ew_bf16)                   # (128, TN)
    return _bias_relu(_mm(w3, h), b3, ew_bf16)                # (1024, TN)


def _global_mlp(g1024, wf1, bf1, wf2, bf2, wf3, bf3, ew_bf16):
    # fc1..fc3 on the pooled (1024, 1) feature; dropout == identity (eval mode).
    g = _bias_relu(_mm(wf1, g1024), bf1, ew_bf16)             # (512, 1)
    g = _bias_relu(_mm(wf2, g), bf2, ew_bf16)                 # (256, 1)
    return _bias_relu(_mm(wf3, g), bf3, ew_bf16)              # (128, 1) bf16


def _seg_head(h3, g128, w4a, w4b, b4, w5, b5, w6, b6, w7, b7, ew_bf16):
    # conv4 on concat([h3, tile(g)]) == W4a @ h3 + (W4b @ g) broadcast over TN.
    acc4 = _mm(w4a, h3) + _mm(w4b, g128)                      # (512, TN) f32
    h = _bias_relu(acc4, b4, ew_bf16)
    h = _bias_relu(_mm(w5, h), b5, ew_bf16)                   # (256, TN)
    h = _bias_relu(_mm(w6, h), b6, ew_bf16)                   # (128, TN)
    return _mm(w7, h) + b7[...]                               # (8, TN) f32, no BN/ReLU


# ----------------------------------------------------------------------------
# Kernels
# ----------------------------------------------------------------------------
def _monolithic_kernel(x_ref,
                       w1, b1, w2, b2, w3, b3,
                       wf1, bf1, wf2, bf2, wf3, bf3,
                       w4a, w4b, b4, w5, b5, w6, b6, w7, b7,
                       o_ref, *, ew_bf16):
    # One full point cloud per grid step (N small enough to sit in VMEM).
    h3 = _local_features(x_ref, w1, b1, w2, b2, w3, b3, ew_bf16)   # (1024, N) bf16
    g1024 = jnp.max(h3, axis=1, keepdims=True)                     # (1024, 1)
    g128 = _global_mlp(g1024, wf1, bf1, wf2, bf2, wf3, bf3, ew_bf16)
    o_ref[...] = _seg_head(h3, g128, w4a, w4b, b4, w5, b5, w6, b6, w7, b7, ew_bf16)


def _global_feature_kernel(x_ref,
                           w1, b1, w2, b2, w3, b3,
                           wf1, bf1, wf2, bf2, wf3, bf3,
                           g_ref, max_sc, *, ew_bf16):
    # Tiled pass 1: conv1-3 per point tile, running lane-max accumulator,
    # fc1-3 on the last tile.  Grid = (B, N // TN), point axis "arbitrary".
    j = pl.program_id(1)
    h3 = _local_features(x_ref, w1, b1, w2, b2, w3, b3, ew_bf16)   # (1024, TN) bf16
    tmax = jnp.max(h3, axis=1, keepdims=True)                      # (1024, 1) bf16

    @pl.when(j == 0)
    def _():
        max_sc[...] = tmax

    @pl.when(j != 0)
    def _():
        max_sc[...] = jnp.maximum(max_sc[...], tmax)

    @pl.when(j == pl.num_programs(1) - 1)
    def _():
        g_ref[...] = _global_mlp(max_sc[...], wf1, bf1, wf2, bf2, wf3, bf3, ew_bf16)


def _seg_head_kernel(x_ref, g_ref,
                     w1, b1, w2, b2, w3, b3,
                     w4a, w4b, b4, w5, b5, w6, b6, w7, b7,
                     o_ref, *, ew_bf16):
    # Tiled pass 2: recompute conv1-3 per tile (cheaper than streaming the
    # (1024, N) feature back from HBM), then conv4-7 with the global feature.
    h3 = _local_features(x_ref, w1, b1, w2, b2, w3, b3, ew_bf16)
    o_ref[...] = _seg_head(h3, g_ref[...], w4a, w4b, b4, w5, b5, w6, b6, w7, b7,
                           ew_bf16)


# ----------------------------------------------------------------------------
# Wrapper
# ----------------------------------------------------------------------------
def _elementwise_bf16():
    """bf16 VALU exists on v6e / v7x; older generations keep bias+ReLU in f32."""
    try:
        kind = jax.devices()[0].device_kind.lower()
    except Exception:
        return False
    return not any(v in kind for v in ("v2", "v3", "v4", "v5"))


def _vmem_limit(tile_points):
    # ~12 KiB of peak live activations per point (f32 conv3/conv4 accumulators +
    # bf16 copies) + resident bf16 weights, block double-buffers and margin.
    est = (16 << 20) + tile_points * 12 * 1024
    return int(min(100 << 20, max(32 << 20, est)))


def _resident_specs(weights, n_grid_axes):
    # Whole-array blocks with constant index_maps -> weights stay resident in
    # VMEM across grid steps (no re-DMA between tiles / batches).
    specs = []
    for a in weights:
        if n_grid_axes == 1:
            specs.append(pl.BlockSpec(a.shape, lambda b, _n=a.ndim: (0,) * _n))
        else:
            specs.append(pl.BlockSpec(a.shape, lambda b, j, _n=a.ndim: (0,) * _n))
    return specs


def _weight_bytes(ws):
    return sum(int(a.size) * a.dtype.itemsize for a in ws)


def _forward_monolithic(xp, kp, ew_bf16):
    B, C8, N = xp.shape
    weights = [kp[k] for k in _MONO]
    flops = 2 * B * (N * (_MACS_LOCAL + _MACS_HEAD) + _MACS_GLOBAL)
    bytes_acc = int(xp.size * xp.dtype.itemsize + B * PADDED_OUT * N * 4
                    + _weight_bytes(weights))
    return pl.pallas_call(
        functools.partial(_monolithic_kernel, ew_bf16=ew_bf16),
        out_shape=jax.ShapeDtypeStruct((B, PADDED_OUT, N), F32),
        grid=(B,),
        in_specs=[pl.BlockSpec((None, C8, N), lambda b: (b, 0, 0))]
                 + _resident_specs(weights, 1),
        out_specs=pl.BlockSpec((None, PADDED_OUT, N), lambda b: (b, 0, 0)),
        compiler_params=pltpu.CompilerParams(
            dimension_semantics=("parallel",),
            vmem_limit_bytes=_vmem_limit(N)),
        cost_estimate=pl.CostEstimate(flops=flops, transcendentals=0,
                                      bytes_accessed=bytes_acc),
    )(xp, *weights)


def _forward_tiled(xp, kp, tile_n, ew_bf16):
    B, C8, N = xp.shape
    nt = N // tile_n

    # ---- Pass 1: global feature (running max over point tiles + fc1-3) ----
    wa = [kp[k] for k in _CONV123 + _GLOBAL_MLP]
    flops_a = 2 * B * (N * _MACS_LOCAL + _MACS_GLOBAL)
    bytes_a = int(xp.size * xp.dtype.itemsize + B * 128 * 2 + _weight_bytes(wa))
    g = pl.pallas_call(
        functools.partial(_global_feature_kernel, ew_bf16=ew_bf16),
        out_shape=jax.ShapeDtypeStruct((B, 128, 1), BF16),
        grid=(B, nt),
        in_specs=[pl.BlockSpec((None, C8, tile_n), lambda b, j: (b, 0, j))]
                 + _resident_specs(wa, 2),
        out_specs=pl.BlockSpec((None, 128, 1), lambda b, j: (b, 0, 0)),
        scratch_shapes=[pltpu.VMEM((1024, 1), BF16)],
        compiler_params=pltpu.CompilerParams(
            dimension_semantics=("parallel", "arbitrary"),
            vmem_limit_bytes=_vmem_limit(tile_n)),
        cost_estimate=pl.CostEstimate(flops=flops_a, transcendentals=0,
                                      bytes_accessed=bytes_a),
    )(xp, *wa)

    # ---- Pass 2: segmentation head (fully parallel over batches & tiles) ----
    wb = [kp[k] for k in _CONV123 + _HEAD]
    flops_b = 2 * B * N * (_MACS_LOCAL + _MACS_HEAD)
    bytes_b = int(xp.size * xp.dtype.itemsize + B * 128 * 2
                  + B * PADDED_OUT * N * 4 + _weight_bytes(wb))
    out = pl.pallas_call(
        functools.partial(_seg_head_kernel, ew_bf16=ew_bf16),
        out_shape=jax.ShapeDtypeStruct((B, PADDED_OUT, N), F32),
        grid=(B, nt),
        in_specs=[pl.BlockSpec((None, C8, tile_n), lambda b, j: (b, 0, j)),
                  pl.BlockSpec((None, 128, 1), lambda b, j: (b, 0, 0))]
                 + _resident_specs(wb, 2),
        out_specs=pl.BlockSpec((None, PADDED_OUT, tile_n), lambda b, j: (b, 0, j)),
        compiler_params=pltpu.CompilerParams(
            dimension_semantics=("parallel", "parallel"),
            vmem_limit_bytes=_vmem_limit(tile_n)),
        cost_estimate=pl.CostEstimate(flops=flops_b, transcendentals=0,
                                      bytes_accessed=bytes_b),
    )(xp, g, *wb)
    return out


def pointnet_forward(x_bcn, kp, *, point_tile=1024):
    """x_bcn: (B, 7, N) float32 (PyTorch NCL). Returns (B, num_classes, N) f32."""
    B, C, N = x_bcn.shape
    assert C == IN_CHANNELS
    ew_bf16 = _elementwise_bf16()
    # Pad the contraction dim 7 -> 8 and pre-cast to bf16 (halves the input DMA).
    xp = jnp.pad(x_bcn, ((0, 0), (0, PADDED_IN - C), (0, 0))).astype(BF16)

    if N <= point_tile:
        out = _forward_monolithic(xp, kp, ew_bf16)
    else:
        # TODO(synk): ragged N needs an in-kernel lane mask before the max pool.
        assert N % point_tile == 0, "N must be a multiple of point_tile"
        out = _forward_tiled(xp, kp, point_tile, ew_bf16)
    # conv7 rows are padded 5 -> 8 inside the kernel (aligned sublane store).
    return out[:, :NUM_CLASSES, :]


# ----------------------------------------------------------------------------
# Deterministic synthetic parameters (PyTorch-style shapes) + BN folding glue.
# ----------------------------------------------------------------------------
def make_params(key):
    def nxt():
        nonlocal key
        key, sub = jax.random.split(key)
        return sub

    def lin(cout, cin):
        W = 0.1 * jax.random.normal(nxt(), (cout, cin), jnp.float32)
        b = 0.05 * jax.random.normal(nxt(), (cout,), jnp.float32)
        return W, b

    def bn(c):
        gamma = 1.0 + 0.1 * jax.random.normal(nxt(), (c,), jnp.float32)
        beta = 0.05 * jax.random.normal(nxt(), (c,), jnp.float32)
        mean = 0.1 * jax.random.normal(nxt(), (c,), jnp.float32)
        var = jax.random.uniform(nxt(), (c,), jnp.float32, minval=0.5, maxval=1.5)
        return gamma, beta, mean, var

    p = {}
    p['conv1'] = lin(64, IN_CHANNELS);  p['bn1'] = bn(64)
    p['conv2'] = lin(128, 64);          p['bn2'] = bn(128)
    p['conv3'] = lin(1024, 128);        p['bn3'] = bn(1024)
    p['fc1'] = lin(512, 1024);          p['bn4'] = bn(512)
    p['fc2'] = lin(256, 512);           p['bn5'] = bn(256)
    p['fc3'] = lin(128, 256);           p['bn6'] = bn(128)
    p['conv4'] = lin(512, 1152);        p['bn7'] = bn(512)
    p['conv5'] = lin(256, 512);         p['bn8'] = bn(256)
    p['conv6'] = lin(128, 256);         p['bn9'] = bn(128)
    p['conv7'] = lin(NUM_CLASSES, 128)
    return p


def kernel_params(p):
    """Fold eval-mode BN into bf16 weights / f32 bias columns, pad for alignment."""
    def fold(name_wb, name_bn):
        W, b = p[name_wb]
        gamma, beta, mean, var = p[name_bn]
        scale = gamma / jnp.sqrt(var + EPS)
        Wf = (W * scale[:, None]).astype(BF16)                    # (Cout, Cin) bf16
        bf = (b * scale + beta - mean * scale)[:, None].astype(F32)  # (Cout, 1) f32
        return Wf, bf

    kp = {}
    w1, b1 = fold('conv1', 'bn1')
    # Zero-pad the contraction dim 7 -> 8 (matches the zero-padded input rows).
    kp['w1'] = jnp.pad(w1, ((0, 0), (0, PADDED_IN - IN_CHANNELS)))
    kp['b1'] = b1
    kp['w2'], kp['b2'] = fold('conv2', 'bn2')
    kp['w3'], kp['b3'] = fold('conv3', 'bn3')
    kp['wf1'], kp['bf1'] = fold('fc1', 'bn4')
    kp['wf2'], kp['bf2'] = fold('fc2', 'bn5')
    kp['wf3'], kp['bf3'] = fold('fc3', 'bn6')
    w4, b4 = fold('conv4', 'bn7')                                  # (512, 1152)
    kp['w4a'], kp['w4b'], kp['b4'] = w4[:, :1024], w4[:, 1024:], b4
    kp['w5'], kp['b5'] = fold('conv5', 'bn8')
    kp['w6'], kp['b6'] = fold('conv6', 'bn9')
    W7, B7 = p['conv7']
    # Pad the 5 output classes to 8 rows (one sublane tile); wrapper slices back.
    kp['w7'] = jnp.pad(W7.astype(BF16), ((0, PADDED_OUT - NUM_CLASSES), (0, 0)))
    kp['b7'] = jnp.pad(B7[:, None].astype(F32), ((0, PADDED_OUT - NUM_CLASSES), (0, 0)))
    return kp


# ----------------------------------------------------------------------------
# Pure-JAX f32 reference (un-folded BN, PyTorch NCL layout) for validation.
# ----------------------------------------------------------------------------
def reference_forward(x, p):
    def conv(x, name, bn_name, relu=True):
        W, b = p[name]
        y = jnp.einsum('oc,bcn->bon', W, x) + b[None, :, None]
        if bn_name is not None:
            g, be, m, v = p[bn_name]
            y = g[None, :, None] * (y - m[None, :, None]) / jnp.sqrt(v[None, :, None] + EPS) \
                + be[None, :, None]
        if relu:
            y = jnp.maximum(y, 0.0)
        return y

    def fc(x, name, bn_name):
        W, b = p[name]
        y = x @ W.T + b[None, :]
        g, be, m, v = p[bn_name]
        y = g[None, :] * (y - m[None, :]) / jnp.sqrt(v[None, :] + EPS) + be[None, :]
        return jnp.maximum(y, 0.0)

    h = conv(x, 'conv1', 'bn1')
    h = conv(h, 'conv2', 'bn2')
    h3 = conv(h, 'conv3', 'bn3')
    g = jnp.max(h3, axis=2)
    g = fc(g, 'fc1', 'bn4')
    g = fc(g, 'fc2', 'bn5')
    g = fc(g, 'fc3', 'bn6')
    gtile = jnp.repeat(g[:, :, None], h3.shape[2], axis=2)
    h = jnp.concatenate([h3, gtile], axis=1)
    h = conv(h, 'conv4', 'bn7')
    h = conv(h, 'conv5', 'bn8')
    h = conv(h, 'conv6', 'bn9')
    return conv(h, 'conv7', None, relu=False)


if __name__ == "__main__":
    key = jax.random.PRNGKey(0)
    key, pkey, xkey, xkey2 = jax.random.split(key, 4)

    params = make_params(pkey)
    kp = kernel_params(params)

    # Tolerance covers the documented bf16 tradeoff: bf16 weights, bf16 matmul
    # inputs, bf16 activation storage and (on v6e/v7x) bf16 bias-add / ReLU.
    RTOL = ATOL = 1e-1

    # Monolithic path: B=2, N=256 (lane-dense, fills the 256-wide v6e/v7x MXU).
    B, N = 2, 256
    x = jax.random.normal(xkey, (B, IN_CHANNELS, N), jnp.float32)
    out = jax.block_until_ready(pointnet_forward(x, kp))
    ref = reference_forward(x, params)
    assert out.shape == (B, NUM_CLASSES, N), out.shape
    np.testing.assert_allclose(np.asarray(out), np.asarray(ref), rtol=RTOL, atol=ATOL)

    # Tiled two-pass path (what large clouds use on v7x): N=1024 in 256-pt tiles.
    B2, N2 = 1, 1024
    x2 = jax.random.normal(xkey2, (B2, IN_CHANNELS, N2), jnp.float32)
    out2 = jax.block_until_ready(pointnet_forward(x2, kp, point_tile=256))
    ref2 = reference_forward(x2, params)
    assert out2.shape == (B2, NUM_CLASSES, N2), out2.shape
    np.testing.assert_allclose(np.asarray(out2), np.asarray(ref2), rtol=RTOL, atol=ATOL)

    print("KERNEL_OK")
</pallas_src>

<mosaic_0001>
module attributes {stable_mosaic.version = 11 : i64} {
  func.func @_monolithic_kernel(%arg0: i32, %arg1: memref<1x8x256xbf16, #tpu.memory_space<vmem>>, %arg2: memref<64x8xbf16, #tpu.memory_space<vmem>>, %arg3: memref<64x1xf32, #tpu.memory_space<vmem>>, %arg4: memref<128x64xbf16, #tpu.memory_space<vmem>>, %arg5: memref<128x1xf32, #tpu.memory_space<vmem>>, %arg6: memref<1024x128xbf16, #tpu.memory_space<vmem>>, %arg7: memref<1024x1xf32, #tpu.memory_space<vmem>>, %arg8: memref<512x1024xbf16, #tpu.memory_space<vmem>>, %arg9: memref<512x1xf32, #tpu.memory_space<vmem>>, %arg10: memref<256x512xbf16, #tpu.memory_space<vmem>>, %arg11: memref<256x1xf32, #tpu.memory_space<vmem>>, %arg12: memref<128x256xbf16, #tpu.memory_space<vmem>>, %arg13: memref<128x1xf32, #tpu.memory_space<vmem>>, %arg14: memref<512x1024xbf16, #tpu.memory_space<vmem>>, %arg15: memref<512x128xbf16, #tpu.memory_space<vmem>>, %arg16: memref<512x1xf32, #tpu.memory_space<vmem>>, %arg17: memref<256x512xbf16, #tpu.memory_space<vmem>>, %arg18: memref<256x1xf32, #tpu.memory_space<vmem>>, %arg19: memref<128x256xbf16, #tpu.memory_space<vmem>>, %arg20: memref<128x1xf32, #tpu.memory_space<vmem>>, %arg21: memref<8x128xbf16, #tpu.memory_space<vmem>>, %arg22: memref<8x1xf32, #tpu.memory_space<vmem>>, %arg23: memref<1x8x256xf32, #tpu.memory_space<vmem>>) attributes {dimension_semantics = [#tpu.dimension_semantics<parallel>], iteration_bounds = array<i64: 2>, scalar_prefetch = 0 : i64, scratch_operands = 0 : i64, tpu.core_type = #tpu.core_type<tc>, window_params = [{transform_indices = @transform_0, window_bounds = array<i64: 1, 8, 256>}, {pipeline_mode = #tpu.pipeline_mode<synchronous>, transform_indices = @transform_1, window_bounds = array<i64: 64, 8>}, {pipeline_mode = #tpu.pipeline_mode<synchronous>, transform_indices = @transform_2, window_bounds = array<i64: 64, 1>}, {pipeline_mode = #tpu.pipeline_mode<synchronous>, transform_indices = @transform_3, window_bounds = array<i64: 128, 64>}, {pipeline_mode = #tpu.pipeline_mode<synchronous>, transform_indices = @transform_4, window_bounds = array<i64: 128, 1>}, {pipeline_mode = #tpu.pipeline_mode<synchronous>, transform_indices = @transform_5, window_bounds = array<i64: 1024, 128>}, {pipeline_mode = #tpu.pipeline_mode<synchronous>, transform_indices = @transform_6, window_bounds = array<i64: 1024, 1>}, {pipeline_mode = #tpu.pipeline_mode<synchronous>, transform_indices = @transform_7, window_bounds = array<i64: 512, 1024>}, {pipeline_mode = #tpu.pipeline_mode<synchronous>, transform_indices = @transform_8, window_bounds = array<i64: 512, 1>}, {pipeline_mode = #tpu.pipeline_mode<synchronous>, transform_indices = @transform_9, window_bounds = array<i64: 256, 512>}, {pipeline_mode = #tpu.pipeline_mode<synchronous>, transform_indices = @transform_10, window_bounds = array<i64: 256, 1>}, {pipeline_mode = #tpu.pipeline_mode<synchronous>, transform_indices = @transform_11, window_bounds = array<i64: 128, 256>}, {pipeline_mode = #tpu.pipeline_mode<synchronous>, transform_indices = @transform_12, window_bounds = array<i64: 128, 1>}, {pipeline_mode = #tpu.pipeline_mode<synchronous>, transform_indices = @transform_13, window_bounds = array<i64: 512, 1024>}, {pipeline_mode = #tpu.pipeline_mode<synchronous>, transform_indices = @transform_14, window_bounds = array<i64: 512, 128>}, {pipeline_mode = #tpu.pipeline_mode<synchronous>, transform_indices = @transform_15, window_bounds = array<i64: 512, 1>}, {pipeline_mode = #tpu.pipeline_mode<synchronous>, transform_indices = @transform_16, window_bounds = array<i64: 256, 512>}, {pipeline_mode = #tpu.pipeline_mode<synchronous>, transform_indices = @transform_17, window_bounds = array<i64: 256, 1>}, {pipeline_mode = #tpu.pipeline_mode<synchronous>, transform_indices = @transform_18, window_bounds = array<i64: 128, 256>}, {pipeline_mode = #tpu.pipeline_mode<synchronous>, transform_indices = @transform_19, window_bounds = array<i64: 128, 1>}, {pipeline_mode = #tpu.pipeline_mode<synchronous>, transform_indices = @transform_20, window_bounds = array<i64: 8, 128>}, {pipeline_mode = #tpu.pipeline_mode<synchronous>, transform_indices = @transform_21, window_bounds = array<i64: 8, 1>}, {transform_indices = @transform_22, window_bounds = array<i64: 1, 8, 256>}]} {
    %c0 = arith.constant 0 : index
    %c0_0 = arith.constant 0 : index
    %c0_1 = arith.constant 0 : index
    %0 = vector.load %arg1[%c0, %c0_0, %c0_1] : memref<1x8x256xbf16, #tpu.memory_space<vmem>>, vector<1x8x256xbf16>
    %1 = vector.shape_cast %0 : vector<1x8x256xbf16> to vector<8x256xbf16>
    %c0_2 = arith.constant 0 : index
    %c0_3 = arith.constant 0 : index
    %2 = vector.load %arg2[%c0_2, %c0_3] : memref<64x8xbf16, #tpu.memory_space<vmem>>, vector<64x8xbf16>
    %cst = arith.constant dense<0.000000e+00> : vector<64x256xf32>
    %3 = tpu.matmul %2, %1, %cst {dimension_numbers = #tpu.dot_dimension_numbers<[1], [0], [0], [1], [0, 0, 1, 1], [], []>} : vector<64x8xbf16>, vector<8x256xbf16>, vector<64x256xf32> -> vector<64x256xf32>
    %4 = arith.truncf %3 : vector<64x256xf32> to vector<64x256xbf16>
    %c0_4 = arith.constant 0 : index
    %c0_5 = arith.constant 0 : index
    %5 = vector.load %arg3[%c0_4, %c0_5] : memref<64x1xf32, #tpu.memory_space<vmem>>, vector<64x1xf32>
    %6 = arith.truncf %5 : vector<64x1xf32> to vector<64x1xbf16>
    %7 = vector.broadcast %6 : vector<64x1xbf16> to vector<64x256xbf16>
    %8 = arith.addf %4, %7 : vector<64x256xbf16>
    %cst_6 = arith.constant 0.000000e+00 : bf16
    %9 = vector.broadcast %cst_6 : bf16 to vector<64x256xbf16>
    %10 = arith.maximumf %8, %9 : vector<64x256xbf16>
    %c0_7 = arith.constant 0 : index
    %c0_8 = arith.constant 0 : index
    %11 = vector.load %arg4[%c0_7, %c0_8] : memref<128x64xbf16, #tpu.memory_space<vmem>>, vector<128x64xbf16>
    %cst_9 = arith.constant dense<0.000000e+00> : vector<128x256xf32>
    %12 = tpu.matmul %11, %10, %cst_9 {dimension_numbers = #tpu.dot_dimension_numbers<[1], [0], [0], [1], [0, 0, 1, 1], [], []>} : vector<128x64xbf16>, vector<64x256xbf16>, vector<128x256xf32> -> vector<128x256xf32>
    %13 = arith.truncf %12 : vector<128x256xf32> to vector<128x256xbf16>
    %c0_10 = arith.constant 0 : index
    %c0_11 = arith.constant 0 : index
    %14 = vector.load %arg5[%c0_10, %c0_11] : memref<128x1xf32, #tpu.memory_space<vmem>>, vector<128x1xf32>
    %15 = arith.truncf %14 : vector<128x1xf32> to vector<128x1xbf16>
    %16 = vector.broadcast %15 : vector<128x1xbf16> to vector<128x256xbf16>
    %17 = arith.addf %13, %16 : vector<128x256xbf16>
    %cst_12 = arith.constant 0.000000e+00 : bf16
    %18 = vector.broadcast %cst_12 : bf16 to vector<128x256xbf16>
    %19 = arith.maximumf %17, %18 : vector<128x256xbf16>
    %c0_13 = arith.constant 0 : index
    %c0_14 = arith.constant 0 : index
    %20 = vector.load %arg6[%c0_13, %c0_14] : memref<1024x128xbf16, #tpu.memory_space<vmem>>, vector<1024x128xbf16>
    %cst_15 = arith.constant dense<0.000000e+00> : vector<1024x256xf32>
    %21 = tpu.matmul %20, %19, %cst_15 {dimension_numbers = #tpu.dot_dimension_numbers<[1], [0], [0], [1], [0, 0, 1, 1], [], []>} : vector<1024x128xbf16>, vector<128x256xbf16>, vector<1024x256xf32> -> vector<1024x256xf32>
    %22 = arith.truncf %21 : vector<1024x256xf32> to vector<1024x256xbf16>
    %c0_16 = arith.constant 0 : index
    %c0_17 = arith.constant 0 : index
    %23 = vector.load %arg7[%c0_16, %c0_17] : memref<1024x1xf32, #tpu.memory_space<vmem>>, vector<1024x1xf32>
    %24 = arith.truncf %23 : vector<1024x1xf32> to vector<1024x1xbf16>
    %25 = vector.broadcast %24 : vector<1024x1xbf16> to vector<1024x256xbf16>
    %26 = arith.addf %22, %25 : vector<1024x256xbf16>
    %cst_18 = arith.constant 0.000000e+00 : bf16
    %27 = vector.broadcast %cst_18 : bf16 to vector<1024x256xbf16>
    %28 = arith.maximumf %26, %27 : vector<1024x256xbf16>
    %cst_19 = arith.constant dense<0xFF80> : vector<1024xbf16>
    %29 = vector.multi_reduction <maximumf>, %28, %cst_19 [1] : vector<1024x256xbf16> to vector<1024xbf16>
    %30 = vector.shape_cast %29 : vector<1024xbf16> to vector<1024x1xbf16>
    %c0_20 = arith.constant 0 : index
    %c0_21 = arith.constant 0 : index
    %31 = vector.load %arg8[%c0_20, %c0_21] : memref<512x1024xbf16, #tpu.memory_space<vmem>>, vector<512x1024xbf16>
    %cst_22 = arith.constant dense<0.000000e+00> : vector<512x1xf32>
    %32 = tpu.matmul %31, %30, %cst_22 {dimension_numbers = #tpu.dot_dimension_numbers<[1], [0], [0], [1], [0, 0, 1, 1], [], []>} : vector<512x1024xbf16>, vector<1024x1xbf16>, vector<512x1xf32> -> vector<512x1xf32>
    %33 = arith.truncf %32 : vector<512x1xf32> to vector<512x1xbf16>
    %c0_23 = arith.constant 0 : index
    %c0_24 = arith.constant 0 : index
    %34 = vector.load %arg9[%c0_23, %c0_24] : memref<512x1xf32, #tpu.memory_space<vmem>>, vector<512x1xf32>
    %35 = arith.truncf %34 : vector<512x1xf32> to vector<512x1xbf16>
    %36 = arith.addf %33, %35 : vector<512x1xbf16>
    %cst_25 = arith.constant 0.000000e+00 : bf16
    %37 = vector.broadcast %cst_25 : bf16 to vector<512x1xbf16>
    %38 = arith.maximumf %36, %37 : vector<512x1xbf16>
    %c0_26 = arith.constant 0 : index
    %c0_27 = arith.constant 0 : index
    %39 = vector.load %arg10[%c0_26, %c0_27] : memref<256x512xbf16, #tpu.memory_space<vmem>>, vector<256x512xbf16>
    %cst_28 = arith.constant dense<0.000000e+00> : vector<256x1xf32>
    %40 = tpu.matmul %39, %38, %cst_28 {dimension_numbers = #tpu.dot_dimension_numbers<[1], [0], [0], [1], [0, 0, 1, 1], [], []>} : vector<256x512xbf16>, vector<512x1xbf16>, vector<256x1xf32> -> vector<256x1xf32>
    %41 = arith.truncf %40 : vector<256x1xf32> to vector<256x1xbf16>
    %c0_29 = arith.constant 0 : index
    %c0_30 = arith.constant 0 : index
    %42 = vector.load %arg11[%c0_29, %c0_30] : memref<256x1xf32, #tpu.memory_space<vmem>>, vector<256x1xf32>
    %43 = arith.truncf %42 : vector<256x1xf32> to vector<256x1xbf16>
    %44 = arith.addf %41, %43 : vector<256x1xbf16>
    %cst_31 = arith.constant 0.000000e+00 : bf16
    %45 = vector.broadcast %cst_31 : bf16 to vector<256x1xbf16>
    %46 = arith.maximumf %44, %45 : vector<256x1xbf16>
    %c0_32 = arith.constant 0 : index
    %c0_33 = arith.constant 0 : index
    %47 = vector.load %arg12[%c0_32, %c0_33] : memref<128x256xbf16, #tpu.memory_space<vmem>>, vector<128x256xbf16>
    %cst_34 = arith.constant dense<0.000000e+00> : vector<128x1xf32>
    %48 = tpu.matmul %47, %46, %cst_34 {dimension_numbers = #tpu.dot_dimension_numbers<[1], [0], [0], [1], [0, 0, 1, 1], [], []>} : vector<128x256xbf16>, vector<256x1xbf16>, vector<128x1xf32> -> vector<128x1xf32>
    %49 = arith.truncf %48 : vector<128x1xf32> to vector<128x1xbf16>
    %c0_35 = arith.constant 0 : index
    %c0_36 = arith.constant 0 : index
    %50 = vector.load %arg13[%c0_35, %c0_36] : memref<128x1xf32, #tpu.memory_space<vmem>>, vector<128x1xf32>
    %51 = arith.truncf %50 : vector<128x1xf32> to vector<128x1xbf16>
    %52 = arith.addf %49, %51 : vector<128x1xbf16>
    %cst_37 = arith.constant 0.000000e+00 : bf16
    %53 = vector.broadcast %cst_37 : bf16 to vector<128x1xbf16>
    %54 = arith.maximumf %52, %53 : vector<128x1xbf16>
    %c0_38 = arith.constant 0 : index
    %c0_39 = arith.constant 0 : index
    %55 = vector.load %arg14[%c0_38, %c0_39] : memref<512x1024xbf16, #tpu.memory_space<vmem>>, vector<512x1024xbf16>
    %cst_40 = arith.constant dense<0.000000e+00> : vector<512x256xf32>
    %56 = tpu.matmul %55, %28, %cst_40 {dimension_numbers = #tpu.dot_dimension_numbers<[1], [0], [0], [1], [0, 0, 1, 1], [], []>} : vector<512x1024xbf16>, vector<1024x256xbf16>, vector<512x256xf32> -> vector<512x256xf32>
    %c0_41 = arith.constant 0 : index
    %c0_42 = arith.constant 0 : index
    %57 = vector.load %arg15[%c0_41, %c0_42] : memref<512x128xbf16, #tpu.memory_space<vmem>>, vector<512x128xbf16>
    %cst_43 = arith.constant dense<0.000000e+00> : vector<512x1xf32>
    %58 = tpu.matmul %57, %54, %cst_43 {dimension_numbers = #tpu.dot_dimension_numbers<[1], [0], [0], [1], [0, 0, 1, 1], [], []>} : vector<512x128xbf16>, vector<128x1xbf16>, vector<512x1xf32> -> vector<512x1xf32>
    %59 = vector.broadcast %58 : vector<512x1xf32> to vector<512x256xf32>
    %60 = arith.addf %56, %59 : vector<512x256xf32>
    %61 = arith.truncf %60 : vector<512x256xf32> to vector<512x256xbf16>
    %c0_44 = arith.constant 0 : index
    %c0_45 = arith.constant 0 : index
    %62 = vector.load %arg16[%c0_44, %c0_45] : memref<512x1xf32, #tpu.memory_space<vmem>>, vector<512x1xf32>
    %63 = arith.truncf %62 : vector<512x1xf32> to vector<512x1xbf16>
    %64 = vector.broadcast %63 : vector<512x1xbf16> to vector<512x256xbf16>
    %65 = arith.addf %61, %64 : vector<512x256xbf16>
    %cst_46 = arith.constant 0.000000e+00 : bf16
    %66 = vector.broadcast %cst_46 : bf16 to vector<512x256xbf16>
    %67 = arith.maximumf %65, %66 : vector<512x256xbf16>
    %c0_47 = arith.constant 0 : index
    %c0_48 = arith.constant 0 : index
    %68 = vector.load %arg17[%c0_47, %c0_48] : memref<256x512xbf16, #tpu.memory_space<vmem>>, vector<256x512xbf16>
    %cst_49 = arith.constant dense<0.000000e+00> : vector<256x256xf32>
    %69 = tpu.matmul %68, %67, %cst_49 {dimension_numbers = #tpu.dot_dimension_numbers<[1], [0], [0], [1], [0, 0, 1, 1], [], []>} : vector<256x512xbf16>, vector<512x256xbf16>, vector<256x256xf32> -> vector<256x256xf32>
    %70 = arith.truncf %69 : vector<256x256xf32> to vector<256x256xbf16>
    %c0_50 = arith.constant 0 : index
    %c0_51 = arith.constant 0 : index
    %71 = vector.load %arg18[%c0_50, %c0_51] : memref<256x1xf32, #tpu.memory_space<vmem>>, vector<256x1xf32>
    %72 = arith.truncf %71 : vector<256x1xf32> to vector<256x1xbf16>
    %73 = vector.broadcast %72 : vector<256x1xbf16> to vector<256x256xbf16>
    %74 = arith.addf %70, %73 : vector<256x256xbf16>
    %cst_52 = arith.constant 0.000000e+00 : bf16
    %75 = vector.broadcast %cst_52 : bf16 to vector<256x256xbf16>
    %76 = arith.maximumf %74, %75 : vector<256x256xbf16>
    %c0_53 = arith.constant 0 : index
    %c0_54 = arith.constant 0 : index
    %77 = vector.load %arg19[%c0_53, %c0_54] : memref<128x256xbf16, #tpu.memory_space<vmem>>, vector<128x256xbf16>
    %cst_55 = arith.constant dense<0.000000e+00> : vector<128x256xf32>
    %78 = tpu.matmul %77, %76, %cst_55 {dimension_numbers = #tpu.dot_dimension_numbers<[1], [0], [0], [1], [0, 0, 1, 1], [], []>} : vector<128x256xbf16>, vector<256x256xbf16>, vector<128x256xf32> -> vector<128x256xf32>
    %79 = arith.truncf %78 : vector<128x256xf32> to vector<128x256xbf16>
    %c0_56 = arith.constant 0 : index
    %c0_57 = arith.constant 0 : index
    %80 = vector.load %arg20[%c0_56, %c0_57] : memref<128x1xf32, #tpu.memory_space<vmem>>, vector<128x1xf32>
    %81 = arith.truncf %80 : vector<128x1xf32> to vector<128x1xbf16>
    %82 = vector.broadcast %81 : vector<128x1xbf16> to vector<128x256xbf16>
    %83 = arith.addf %79, %82 : vector<128x256xbf16>
    %cst_58 = arith.constant 0.000000e+00 : bf16
    %84 = vector.broadcast %cst_58 : bf16 to vector<128x256xbf16>
    %85 = arith.maximumf %83, %84 : vector<128x256xbf16>
    %c0_59 = arith.constant 0 : index
    %c0_60 = arith.constant 0 : index
    %86 = vector.load %arg21[%c0_59, %c0_60] : memref<8x128xbf16, #tpu.memory_space<vmem>>, vector<8x128xbf16>
    %cst_61 = arith.constant dense<0.000000e+00> : vector<8x256xf32>
    %87 = tpu.matmul %86, %85, %cst_61 {dimension_numbers = #tpu.dot_dimension_numbers<[1], [0], [0], [1], [0, 0, 1, 1], [], []>} : vector<8x128xbf16>, vector<128x256xbf16>, vector<8x256xf32> -> vector<8x256xf32>
    %c0_62 = arith.constant 0 : index
    %c0_63 = arith.constant 0 : index
    %88 = vector.load %arg22[%c0_62, %c0_63] : memref<8x1xf32, #tpu.memory_space<vmem>>, vector<8x1xf32>
    %89 = vector.broadcast %88 : vector<8x1xf32> to vector<8x256xf32>
    %90 = arith.addf %87, %89 : vector<8x256xf32>
    %c0_64 = arith.constant 0 : index
    %c0_65 = arith.constant 0 : index
    %c0_66 = arith.constant 0 : index
    %91 = vector.load %arg23[%c0_64, %c0_65, %c0_66] : memref<1x8x256xf32, #tpu.memory_space<vmem>>, vector<1x8x256xf32>
    %92 = vector.shape_cast %91 : vector<1x8x256xf32> to vector<8x256xf32>
    %93 = vector.shape_cast %90 : vector<8x256xf32> to vector<1x8x256xf32>
    tpu.vector_store %arg23[%c0_64, %c0_65, %c0_66], %93 {strides = array<i32>} : memref<1x8x256xf32, #tpu.memory_space<vmem>>, vector<1x8x256xf32>,
    return
  }
  func.func @transform_0(%arg0: i32) -> (i32, i32, i32) {
    %c0_i32 = arith.constant 0 : i32
    %c0_i32_0 = arith.constant 0 : i32
    %c0_i32_1 = arith.constant 0 : i32
    return %arg0, %c0_i32, %c0_i32_0 : i32, i32, i32
  }
  func.func @transform_1(%arg0: i32) -> (i32, i32) {
    %c0_i32 = arith.constant 0 : i32
    %c0_i32_0 = arith.constant 0 : i32
    %c0_i32_1 = arith.constant 0 : i32
    return %c0_i32, %c0_i32_0 : i32, i32
  }
  func.func @transform_2(%arg0: i32) -> (i32, i32) {
    %c0_i32 = arith.constant 0 : i32
    %c0_i32_0 = arith.constant 0 : i32
    %c0_i32_1 = arith.constant 0 : i32
    return %c0_i32, %c0_i32_0 : i32, i32
  }
  func.func @transform_3(%arg0: i32) -> (i32, i32) {
    %c0_i32 = arith.constant 0 : i32
    %c0_i32_0 = arith.constant 0 : i32
    %c0_i32_1 = arith.constant 0 : i32
    return %c0_i32, %c0_i32_0 : i32, i32
  }
  func.func @transform_4(%arg0: i32) -> (i32, i32) {
    %c0_i32 = arith.constant 0 : i32
    %c0_i32_0 = arith.constant 0 : i32
    %c0_i32_1 = arith.constant 0 : i32
    return %c0_i32, %c0_i32_0 : i32, i32
  }
  func.func @transform_5(%arg0: i32) -> (i32, i32) {
    %c0_i32 = arith.constant 0 : i32
    %c0_i32_0 = arith.constant 0 : i32
    %c0_i32_1 = arith.constant 0 : i32
    return %c0_i32, %c0_i32_0 : i32, i32
  }
  func.func @transform_6(%arg0: i32) -> (i32, i32) {
    %c0_i32 = arith.constant 0 : i32
    %c0_i32_0 = arith.constant 0 : i32
    %c0_i32_1 = arith.constant 0 : i32
    return %c0_i32, %c0_i32_0 : i32, i32
  }
  func.func @transform_7(%arg0: i32) -> (i32, i32) {
    %c0_i32 = arith.constant 0 : i32
    %c0_i32_0 = arith.constant 0 : i32
    %c0_i32_1 = arith.constant 0 : i32
    return %c0_i32, %c0_i32_0 : i32, i32
  }
  func.func @transform_8(%arg0: i32) -> (i32, i32) {
    %c0_i32 = arith.constant 0 : i32
    %c0_i32_0 = arith.constant 0 : i32
    %c0_i32_1 = arith.constant 0 : i32
    return %c0_i32, %c0_i32_0 : i32, i32
  }
  func.func @transform_9(%arg0: i32) -> (i32, i32) {
    %c0_i32 = arith.constant 0 : i32
    %c0_i32_0 = arith.constant 0 : i32
    %c0_i32_1 = arith.constant 0 : i32
    return %c0_i32, %c0_i32_0 : i32, i32
  }
  func.func @transform_10(%arg0: i32) -> (i32, i32) {
    %c0_i32 = arith.constant 0 : i32
    %c0_i32_0 = arith.constant 0 : i32
    %c0_i32_1 = arith.constant 0 : i32
    return %c0_i32, %c0_i32_0 : i32, i32
  }
  func.func @transform_11(%arg0: i32) -> (i32, i32) {
    %c0_i32 = arith.constant 0 : i32
    %c0_i32_0 = arith.constant 0 : i32
    %c0_i32_1 = arith.constant 0 : i32
    return %c0_i32, %c0_i32_0 : i32, i32
  }
  func.func @transform_12(%arg0: i32) -> (i32, i32) {
    %c0_i32 = arith.constant 0 : i32
    %c0_i32_0 = arith.constant 0 : i32
    %c0_i32_1 = arith.constant 0 : i32
    return %c0_i32, %c0_i32_0 : i32, i32
  }
  func.func @transform_13(%arg0: i32) -> (i32, i32) {
    %c0_i32 = arith.constant 0 : i32
    %c0_i32_0 = arith.constant 0 : i32
    %c0_i32_1 = arith.constant 0 : i32
    return %c0_i32, %c0_i32_0 : i32, i32
  }
  func.func @transform_14(%arg0: i32) -> (i32, i32) {
    %c0_i32 = arith.constant 0 : i32
    %c0_i32_0 = arith.constant 0 : i32
    %c0_i32_1 = arith.constant 0 : i32
    return %c0_i32, %c0_i32_0 : i32, i32
  }
  func.func @transform_15(%arg0: i32) -> (i32, i32) {
    %c0_i32 = arith.constant 0 : i32
    %c0_i32_0 = arith.constant 0 : i32
    %c0_i32_1 = arith.constant 0 : i32
    return %c0_i32, %c0_i32_0 : i32, i32
  }
  func.func @transform_16(%arg0: i32) -> (i32, i32) {
    %c0_i32 = arith.constant 0 : i32
    %c0_i32_0 = arith.constant 0 : i32
    %c0_i32_1 = arith.constant 0 : i32
    return %c0_i32, %c0_i32_0 : i32, i32
  }
  func.func @transform_17(%arg0: i32) -> (i32, i32) {
    %c0_i32 = arith.constant 0 : i32
    %c0_i32_0 = arith.constant 0 : i32
    %c0_i32_1 = arith.constant 0 : i32
    return %c0_i32, %c0_i32_0 : i32, i32
  }
  func.func @transform_18(%arg0: i32) -> (i32, i32) {
    %c0_i32 = arith.constant 0 : i32
    %c0_i32_0 = arith.constant 0 : i32
    %c0_i32_1 = arith.constant 0 : i32
    return %c0_i32, %c0_i32_0 : i32, i32
  }
  func.func @transform_19(%arg0: i32) -> (i32, i32) {
    %c0_i32 = arith.constant 0 : i32
    %c0_i32_0 = arith.constant 0 : i32
    %c0_i32_1 = arith.constant 0 : i32
    return %c0_i32, %c0_i32_0 : i32, i32
  }
  func.func @transform_20(%arg0: i32) -> (i32, i32) {
    %c0_i32 = arith.constant 0 : i32
    %c0_i32_0 = arith.constant 0 : i32
    %c0_i32_1 = arith.constant 0 : i32
    return %c0_i32, %c0_i32_0 : i32, i32
  }
  func.func @transform_21(%arg0: i32) -> (i32, i32) {
    %c0_i32 = arith.constant 0 : i32
    %c0_i32_0 = arith.constant 0 : i32
    %c0_i32_1 = arith.constant 0 : i32
    return %c0_i32, %c0_i32_0 : i32, i32
  }
  func.func @transform_22(%arg0: i32) -> (i32, i32, i32) {
    %c0_i32 = arith.constant 0 : i32
    %c0_i32_0 = arith.constant 0 : i32
    %c0_i32_1 = arith.constant 0 : i32
    return %arg0, %c0_i32, %c0_i32_0 : i32, i32, i32
  }
}

</mosaic_0001>

<bundles_post_ra>
// kernel: tpu_custom_call.1
= control target key start
LH: loop header
LB: loop body
LE: loop exit
PB: predicated region body
PF: predicated region fallthrough
CT: control target
= control target key end

     0   :  { %s21183_s0 = inlined_call_operand.vmem [shape: bf16[2,8,256], index: 0, kind: input, shape index: {}]   ;;  %s21184_s1 = inlined_call_operand.vmem [shape: bf16[64,8], index: 1, kind: input, shape index: {}]   ;;  %s21185_s2 = inlined_call_operand.vmem [shape: f32[64,1], index: 2, kind: input, shape index: {}]   ;;  %s21186_s3 = inlined_call_operand.vmem [shape: bf16[128,64], index: 3, kind: input, shape index: {}]   ;;  %s21187_s4 = inlined_call_operand.vmem [shape: f32[128,1], index: 4, kind: input, shape index: {}]   ;;  %s21188_s5 = inlined_call_operand.vmem [shape: bf16[1024,128], index: 5, kind: input, shape index: {}]   ;;  %s21189_s6 = inlined_call_operand.vmem [shape: f32[1024,1], index: 6, kind: input, shape index: {}]   ;;  %s21190_s7 = inlined_call_operand.vmem [shape: bf16[512,1024], index: 7, kind: input, shape index: {}]   ;;  %s21191_s8 = inlined_call_operand.vmem [shape: f32[512,1], index: 8, kind: input, shape index: {}]   ;;  %s21192_s9 = inlined_call_operand.vmem [shape: bf16[256,512], index: 9, kind: input, shape index: {}]   ;;  %s21193_s10 = inlined_call_operand.vmem [shape: f32[256,1], index: 10, kind: input, shape index: {}]   ;;  %s21194_s11 = inlined_call_operand.hbm [shape: bf16[128,256], index: 11, kind: input, shape index: {}]   ;;  %s21195_s12 = inlined_call_operand.vmem [shape: f32[128,1], index: 12, kind: input, shape index: {}]   ;;  %s21196_s13 = inlined_call_operand.hbm [shape: bf16[512,1024], index: 13, kind: input, shape index: {}]   ;;  %s21197_s14 = inlined_call_operand.hbm [shape: bf16[512,128], index: 14, kind: input, shape index: {}]   ;;  %s21198_s15 = inlined_call_operand.vmem [shape: f32[512,1], index: 15, kind: input, shape index: {}]   ;;  %s21199_s16 = inlined_call_operand.hbm [shape: bf16[256,512], index: 16, kind: input, shape index: {}]   ;;  %s21200_s17 = inlined_call_operand.vmem [shape: f32[256,1], index: 17, kind: input, shape index: {}]   ;;  %s21201_s18 = inlined_call_operand.vmem [shape: bf16[128,256], index: 18, kind: input, shape index: {}]   ;;  %s21202_s19 = inlined_call_operand.vmem [shape: f32[128,1], index: 19, kind: input, shape index: {}]   ;;  %s21203_s20 = inlined_call_operand.vmem [shape: bf16[8,128], index: 20, kind: input, shape index: {}]   ;;  %s21204_s21 = inlined_call_operand.vmem [shape: f32[8,1], index: 21, kind: input, shape index: {}]   ;;  %s21205_s22 = inlined_call_operand.hbm [shape: f32[2,8,256], index: 22, kind: output, shape index: {}]  }
   0x1   :  { %21457 = sst [smem:[#allocation180_spill]] %s21183_s0 }
   0x2   :  { %21458 = sst [smem:[#allocation181_spill]] %s21184_s1 }
   0x3   :  { %21459 = sst [smem:[#allocation182_spill]] %s21185_s2 }
   0x4   :  { %21460 = sst [smem:[#allocation183_spill]] %s21186_s3 }
   0x5   :  { %21461 = sst [smem:[#allocation184_spill]] %s21187_s4 }
   0x6   :  { %21462 = sst [smem:[#allocation185_spill]] %s21188_s5 }
   0x7   :  { %21463 = sst [smem:[#allocation186_spill]] %s21189_s6 }
   0x8   :  { %21464 = sst [smem:[#allocation187_spill]] %s21196_s13 }
   0x9   :  { %21465 = sst [smem:[#allocation188_spill]] %s21203_s20 }
   0xa   :  { %21466 = sst [smem:[#allocation189_spill]] %s21205_s22 }
   0xb   :  { %27 = vsyncpa [#allocation3], 0 }
   0xc   :  { %28 = vsyncpa [#allocation6], 0 }
   0xd   :  { %29 = vsyncpa [#allocation9], 0 }
   0xe   :  { %30 = vsyncpa [#allocation4], 0 }
   0xf   :  { %32 = vsyncpa [#allocation4 + $0x1], 0  ;;  %s16131_s3 = smov 0   ;;  %s16133_s28 = smov 0  }
  0x10   :  { %s16135_s29 = smov 0   ;;  %s16137_s30 = smov 0  }
  0x11 LB: > { %21467 = sst [smem:[#allocation15_spill]] %s15988_s3  ;;  %s16152_s4 = sadd.s32 4294967295, %s16000_s30   ;;  %s16000_s30 = sphi %s16137_s30, %s22078_s30   ;;  %s15996_s29 = sphi %s16135_s29, %s22081_s29   ;;  %s15992_s28 = sphi %s16133_s28, %s22080_s28   ;;  %s15988_s3 = sphi %s16131_s3, %s22079_s3  }
  0x12   : > { %21468 = sst [smem:[#allocation16_spill]] %s15992_s28  ;;  %s13172_s0 = sadd.s32 4294967294, %s16000_s30  }
  0x13   : > { %21469 = sst [smem:[#allocation17_spill]] %s15996_s29  ;;  %s16156_s23 = sadd.s32 1, %s16000_s30  }
  0x14   : > { %21470 = sst [smem:[#allocation18_spill]] %s16000_s30  ;;  %s512_s1 = sadd.s32 1, %s15996_s29 }
  0x15   : > { %21471 = sst [smem:[#allocation19_spill]] %s16156_s23  ;;  %s509_s5 = ssub.s32 %s16000_s30, %s16156_s23 }
  0x16   : > { %p522_p0 = scmp.ne.s32.totalorder %s15996_s29, %s15992_s28  ;;  %p510_p1 = scmp.eq.s32.totalorder %s509_s5, 0 }
  0x17   : > { %p523_p2 = scmp.eq.s32.totalorder %s16152_s4, 1  ;;  %p528_p3 = scmp.ne.s32.totalorder %s15992_s28, %s15988_s3 }
  0x18   : > { %p529_p4 = scmp.eq.s32.totalorder %s13172_s0, 1  ;;  %p13173_p7 = scmp.ge.s32.totalorder %s16000_s30, 1 }
  0x19   : > { %s16167_s24 = scalar_select %p510_p1, %s15996_s29, %s512_s1  }
  0x1a   : > { %p16169_p5 = por %p523_p2, %p522_p0  ;;  %p16173_p6 = por %p529_p4, %p528_p3 }
  0x1b   : > { %21472 = sst [smem:[#allocation20_spill]] %s16167_s24  ;;  %p536_p8 = scmp.lt.s32.totalorder %s16000_s30, 3 }
  0x1c   : > { %s21473_s6 = scalar_select %p16169_p5, 1, 0 }
  0x1d   : > { %s21475_s25 = scalar_select %p16173_p6, 1, 0 }
  0x1e   : > { %21474 = sst [smem:[#allocation21_spill]] %s21473_s6  ;;  %p21218_p9 = scmp.eq.s32.totalorder %s16152_s4, 0 }
  0x1f   : > { %21476 = sst [smem:[#allocation22_spill]] %s21475_s25  ;;  %p16180_p10 = pnand %p13173_p7, %p536_p8 }
  0x20   : > { %s16002_s2 = smov [#allocation5]   ;;  %s16003_s1 = smov [#allocation2]  }
  0x21   : > { %s21477_s26 = scalar_select %p16180_p10, 1, 0 }
  0x22   : > { %s594_s27 = sshll.u32 %s16002_s2, 4  ;;  %p15391_p11 = pneg %p16180_p10  ;;  %s595_s27 = int_to_ptr.vmem [resolvable:$true] %s594_s27 }
  0x23   : > { %s578_s5 = sshll.u32 %s16003_s1, 4  ;;  %s21479_s13 = sld [smem:[#allocation187_spill]]  ;;  %s16192_s5 = int_to_ptr.vmem [resolvable:$true] %s578_s5 }
  0x24   : > { %p16188_p12 = pnand %p21218_p9, %p15391_p11 }
  0x26   : > { %p16202_p0 = pneg %p16188_p12 }
  0x29   : > { %s15814_s23 = scalar_lea.hbm %s21479_s13, 32768 }
  0x2a   : > { %p15815_p13 = scmp.ne.s32.totalorder %s21479_s13, %s15814_s23  ;;  %p15821_p3 = scmp.lt.u32.totalorder %s15814_s23, %s21479_s13 }
  0x2c   : > { %p15817_p1 = pnand %p16202_p0, %p15815_p13 }
  0x2e   : > { %p15818_p2 = pneg %p15817_p1 }
  0x30   : > { %p15823_p4 = pnand %p15821_p3, %p15818_p2 }
  0x32   : > { %15826 = shalt.err (!%p15823_p4)
}
  0x33   : > { %s15827_s29 = scalar_lea.vmem %s595_s27, 32768  ;;  %p15835_p9 = scmp.lt.s32.totalorder %s595_s27, %s595_s27 }
  0x34   : > { %p15828_p7 = scmp.ne.s32.totalorder %s595_s27, %s15827_s29  ;;  %p15836_p6 = scmp.lt.s32.totalorder %s15827_s29, %s15827_s29 }
  0x36   : > { %p15830_p8 = pnand %p15828_p7, %p16202_p0  ;;  %p15837_p5 = por %p15836_p6, %p15835_p9 }
  0x38   : > { %p15831_p11 = pneg %p15830_p8 }
  0x3a   : > { %p15838_p10 = pnand %p15837_p5, %p15831_p11 }
  0x3c   : > { %15841 = shalt.err (!%p15838_p10)
}
  0x3d   : > { %s16004_s3 = smov 512   ;;  %s16005_s24 = smov 32  }
  0x3e   : > { %15397 = dma.hbm_to_vmem [thread:$0]  (!%p16188_p12), %s21479_s13, 32768, %s595_s27, [#allocation6], %s16004_s3, %s16004_s3, %s16005_s24  }
  0x3f   : > { %s15842_s22 = scalar_lea.hbm %s21194_s11, 2048 }
  0x40   : > { %p15843_p13 = scmp.ne.s32.totalorder %s21194_s11, %s15842_s22  ;;  %p15849_p9 = scmp.lt.u32.totalorder %s15842_s22, %s21194_s11 }
  0x42   : > { %p15845_p5 = pnand %p15843_p13, %p16202_p0 }
  0x44   : > { %p15846_p6 = pneg %p15845_p5 }
  0x46   : > { %p15851_p10 = pnand %p15849_p9, %p15846_p6 }
  0x48   : > { %15854 = shalt.err (!%p15851_p10)
}
  0x49   : > { %s15855_s27 = scalar_lea.vmem %s16192_s5, 2048  ;;  %p15863_p4 = scmp.lt.s32.totalorder %s16192_s5, %s16192_s5 }
  0x4a   : > { %p15856_p1 = scmp.ne.s32.totalorder %s16192_s5, %s15855_s27  ;;  %p15864_p7 = scmp.lt.s32.totalorder %s15855_s27, %s15855_s27 }
  0x4c   : > { %p15858_p2 = pnand %p15856_p1, %p16202_p0  ;;  %p15865_p8 = por %p15864_p7, %p15863_p4 }
  0x4e   : > { %p15859_p3 = pneg %p15858_p2 }
  0x50   : > { %p15866_p11 = pnand %p15865_p8, %p15859_p3 }
  0x52   : > { %15869 = shalt.err (!%p15866_p11)
}
  0x53   : > { %s16006_s20 = smov 128   ;;  %s16007_s22 = smov 8  }
  0x54   : > { %15394 = dma.hbm_to_vmem [thread:$0]  (!%p16188_p12), %s21194_s11, 2048, %s16192_s5, [#allocation3], %s16006_s20, %s16006_s20, %s16007_s22  }
  0x55   : > { %s16008_s3 = smov [#allocation7]   ;;  %s15870_s25 = scalar_lea.hbm %s21197_s14, 4096 }
  0x56   : > { %s607_s24 = sshll.u32 %s16008_s3, 4  ;;  %p15871_p13 = scmp.ne.s32.totalorder %s21197_s14, %s15870_s25  ;;  %s608_s24 = int_to_ptr.vmem [resolvable:$true] %s607_s24 }
  0x57   : > { %p15877_p9 = scmp.lt.u32.totalorder %s15870_s25, %s21197_s14 }
  0x58   : > { %p15873_p5 = pnand %p15871_p13, %p16202_p0 }
  0x5a   : > { %p15874_p6 = pneg %p15873_p5 }
  0x5c   : > { %p15879_p10 = pnand %p15877_p9, %p15874_p6 }
  0x5e   : > { %15882 = shalt.err (!%p15879_p10)
}
  0x5f   : > { %s15883_s5 = scalar_lea.vmem %s608_s24, 4096  ;;  %p15891_p4 = scmp.lt.s32.totalorder %s608_s24, %s608_s24 }
  0x60   : > { %p15884_p1 = scmp.ne.s32.totalorder %s608_s24, %s15883_s5  ;;  %p15892_p7 = scmp.lt.s32.totalorder %s15883_s5, %s15883_s5 }
  0x62   : > { %p15886_p2 = pnand %p15884_p1, %p16202_p0  ;;  %p15893_p8 = por %p15892_p7, %p15891_p4 }
  0x64   : > { %p15887_p3 = pneg %p15886_p2 }
  0x66   : > { %p15894_p11 = pnand %p15893_p8, %p15887_p3 }
  0x68   : > { %15897 = shalt.err (!%p15894_p11)
}
  0x69   : > { %s16009_s20 = smov 64   ;;  %s16010_s22 = smov 4  }
  0x6a   : > { %15400 = dma.hbm_to_vmem [thread:$0]  (!%p16188_p12), %s21197_s14, 4096, %s608_s24, [#allocation6], %s16009_s20, %s16009_s20, %s16010_s22  }
  0x6b   : > { %s16011_s6 = smov [#allocation8]   ;;  %s15898_s25 = scalar_lea.hbm %s21199_s16, 8192 }
  0x6c   : > { %s623_s3 = sshll.u32 %s16011_s6, 4  ;;  %p15899_p13 = scmp.ne.s32.totalorder %s21199_s16, %s15898_s25  ;;  %s624_s3 = int_to_ptr.vmem [resolvable:$true] %s623_s3 }
  0x6d   : > { %p15905_p9 = scmp.lt.u32.totalorder %s15898_s25, %s21199_s16 }
  0x6e   : > { %p15901_p5 = pnand %p15899_p13, %p16202_p0 }
  0x70   : > { %p15902_p6 = pneg %p15901_p5 }
  0x72   : > { %p15907_p10 = pnand %p15905_p9, %p15902_p6 }
  0x74   : > { %15910 = shalt.err (!%p15907_p10)
}
  0x75   : > { %s15911_s24 = scalar_lea.vmem %s624_s3, 8192  ;;  %p15919_p4 = scmp.lt.s32.totalorder %s624_s3, %s624_s3 }
  0x76   : > { %p15912_p1 = scmp.ne.s32.totalorder %s624_s3, %s15911_s24  ;;  %p15920_p7 = scmp.lt.s32.totalorder %s15911_s24, %s15911_s24 }
  0x78   : > { %p15914_p2 = pnand %p15912_p1, %p16202_p0  ;;  %p15921_p8 = por %p15920_p7, %p15919_p4 }
  0x7a   : > { %p15915_p3 = pneg %p15914_p2 }
  0x7c   : > { %p15922_p11 = pnand %p15921_p8, %p15915_p3 }
  0x7e   : > { %15925 = shalt.err (!%p15922_p11)
}
  0x7f   : > { %s16012_s20 = smov 256   ;;  %s16013_s22 = smov 16  }
  0x80   : > { %15403 = dma.hbm_to_vmem [thread:$0]  (!%p16188_p12), %s21199_s16, 8192, %s624_s3, [#allocation9], %s16012_s20, %s16012_s20, %s16013_s22  }
  0x81   : > { %p21481_p13 = scmp.ne.s32.totalorder %s21477_s26, 0 }
  0x83   : > { %662 = sbr.rel (%p21481_p13) target bundleno = 5282 (0x14a2), region = 108 }
  0x8a   : > { %p21482_p5 = scmp.eq.s32.totalorder %s16152_s4, 0 }
  0x8c   : > { %15971 = dma.done.wait (%p21482_p5), [#allocation3], 2048   ;;  %p21483_p0 = pmov %p21482_p5 }
  0x8e   : > { %15973 = vsyncadd (%p21483_p0), [#allocation3], 4294965248  ;;  %p21484_p6 = pmov %p21483_p0 }
  0x8f   : > { %p21485_p9 = pmov %p21483_p0 }
  0x90   : > { %15975 = dma.done.wait (%p21484_p6), [#allocation6], 36864  }
  0x91   : > { %15977 = vsyncadd (%p21485_p9), [#allocation6], 4294930432  ;;  %p21486_p10 = pmov %p21483_p0 }
  0x92   : > { %p21487_p12 = pmov %p21483_p0 }
  0x93   : > { %15979 = dma.done.wait (%p21486_p10), [#allocation9], 8192  }
  0x94   : > { %15981 = vsyncadd (%p21487_p12), [#allocation9], 4294959104  ;;  %p736_p1 = scmp.lt.s32.totalorder %s16152_s4, 1  ;;  %v21225_v0 = vmov 0   ;;  %s21488_s3 = sld [smem:[#allocation180_spill]]  ;;  %vm789_vm0 = vcmask 1043456  }
  0x95   : > { %828 = vmatprep.mubr.bf16.mxu0 %v21225_v0  ;;  %15462 = vset.pattern.permute.xlu0 %v21225_v0  ;;  %s21489_s1 = sld [smem:[#allocation181_spill]]  ;;  %vm776_vm1 = vcmask 64512   ;;  %s21490_s5 = sld [smem:[#allocation182_spill]]  ;;  %vm981_vm2 = vcmask 523264  }
  0x96   : > { %s737_s26 = scalar_select %p736_p1, %s16152_s4, 1  ;;  %15463 = vset.pattern.permute.xlu1 %v21225_v0  ;;  %1038 = vmatprep.mubr.bf16.mxu1 %v21225_v0 }
  0x97   : > { %s21491_s20 = sld [smem:[#allocation184_spill]]  ;;  %s21493_s25 = sld [smem:[#allocation183_spill]] }
  0x98   : > { %s13987_s0 = sshll.u32 %s737_s26, 3  ;;  %s21494_s13 = sld [smem:[#allocation185_spill]] }
  0x99   : > { %s22069_s22 = sld [smem:[#allocation16_spill]]  ;;  %s22070_s2 = sld [smem:[#allocation188_spill]] }
  0x9a   : > { %s740_s30 = scalar_lea.vmem %s21488_s3, %s13987_s0  ;;  %s21492_s0 = sld [smem:[#allocation186_spill]] }
  0x9b   : > { %v742_v1 = vld [vmem:[%s740_s30] sm:$0xff]  ;;  %v878_v7 = vld [vmem:[%s21490_s5 + $0x8] sm:$0xff]  ;;  %v879_v9 = vld [vmem:[%s21490_s5 + $0x10] sm:$0xff]  ;;  %s13988_s30 = sshll.u32 %s16152_s4, 8  ;;  %s22071_s29 = sld [smem:[#allocation21_spill]] }
  0x9c   : > { %v13192_v2 = vcombine.high %v742_v1, %v742_v1  ;;  %v13191_v3 = vcombine.low %v742_v1, %v742_v1  ;;  %v15466_v5 = vld [vmem:[%s21489_s1] sm:$0xff]   ;;  %v880_v10 = vld [vmem:[%s21490_s5 + $0x18] sm:$0xff]  ;;  %v882_v12 = vld [vmem:[%s21490_s5 + $0x28] sm:$0xff]  ;;  %s16015_s28 = smov [#allocation10]  }
  0x9d   : > { %v877_v6 = vld [vmem:[%s21490_s5] sm:$0xff]  ;;  %v886_v13 = vpack.c.bf16 %v880_v10, %v879_v9  ;;  %v883_v15 = vld [vmem:[%s21490_s5 + $0x30] sm:$0xff]  ;;  %v884_v16 = vld [vmem:[%s21490_s5 + $0x38] sm:$0xff]  ;;  %s15930_s26 = sshll.u32 %s16015_s28, 4  ;;  %s15931_s26 = int_to_ptr.vmem [resolvable:$false] %s15930_s26 }
  0x9e   : > { %13193 = vmatprep.subr.msk.bf16.mxu0 %vm789_vm0, %v13192_v2  ;;  %v791_v4 = vsel %vm789_vm0, %v13191_v3, 0  ;;  %v885_v8 = vpack.c.bf16 %v878_v7, %v877_v6  ;;  %v881_v11 = vld [vmem:[%s21490_s5 + $0x20] sm:$0xff]  ;;  %v1136_v18 = vld [vmem:[%s21491_s20 + $0x8] sm:$0xff]  ;;  %v888_v19 = vpack.c.bf16 %v884_v16, %v883_v15  ;;  %v1137_v20 = vld [vmem:[%s21491_s20 + $0x10] sm:$0xff] }
  0x9f   : > { %797 = vmatpush1.bf16.msra.mxu0 %v791_v4  ;;  %v887_v14 = vpack.c.bf16 %v882_v12, %v881_v11  ;;  %v1135_v17 = vld [vmem:[%s21491_s20] sm:$0xff]  ;;  %v1138_v21 = vld [vmem:[%s21491_s20 + $0x18] sm:$0xff]  ;;  %v15467_v22 = vld [vmem:[%s21489_s1 + $0x8] sm:$0xff]   ;;  %s733_s6 = sand.u32 1, %s22069_s22  }
  0xa0   : > { %891 = vperm.xlu0 %15462, %v885_v8   ;;  %v1151_v23 = vpack.c.bf16 %v1136_v18, %v1135_v17  ;;  %v1139_v24 = vld [vmem:[%s21491_s20 + $0x20] sm:$0xff]  ;;  %v1140_v25 = vld [vmem:[%s21491_s20 + $0x28] sm:$0xff]  ;;  %v1152_v26 = vpack.c.bf16 %v1138_v21, %v1137_v20  ;;  %v1141_v27 = vld [vmem:[%s21491_s20 + $0x30] sm:$0xff]  ;;  %s13184_s3 = sshll.u32 %s733_s6, 4  ;;  %s13058_s4 = scalar_lea.sflag [#allocation4], %s733_s6 }
  0xa1   : > { %901 = vperm.xlu1 %15463, %v887_v14   ;;  %v1142_v28 = vld [vmem:[%s21491_s20 + $0x38] sm:$0xff]  ;;  %v1153_v29 = vpack.c.bf16 %v1140_v25, %v1139_v24  ;;  %v1143_v30 = vld [vmem:[%s21491_s20 + $0x40] sm:$0xff]  ;;  %v1144_v31 = vld [vmem:[%s21491_s20 + $0x48] sm:$0xff]  ;;  %s735_s23 = scalar_lea.vmem [#allocation10], %s13184_s3  ;;  %p22073_p3 = scmp.ne.s32.totalorder %s22071_s29, 0 }
  0xa2   : > { %13194 = vmatmul.mubr.msk.bf16.vlgmr.msra.gmra.mrb[0].mxu0 %vm776_vm1, %v15466_v5  ;;  %v1154_v32 = vpack.c.bf16 %v1142_v28, %v1141_v27  ;;  %v1145_v33 = vld [vmem:[%s21491_s20 + $0x50] sm:$0xff]  ;;  %v1146_v34 = vld [vmem:[%s21491_s20 + $0x58] sm:$0xff]  ;;  %v1155_v36 = vpack.c.bf16 %v1144_v31, %v1143_v30  ;;  %v1147_v37 = vld [vmem:[%s21491_s20 + $0x60] sm:$0xff]  ;;  %s13072_s27 = sshll.u32 %s735_s23, 4  ;;  %s21143_s27 = int_to_ptr.vmem [resolvable:$true] %s13072_s27 }
  0xa3   : > { %838 = vmatprep.mubr.bf16.mxu0 %v21225_v0  ;;  %v15468_v35 = vld [vmem:[%s21489_s1 + $0x10] sm:$0xff]   ;;  %v1148_v38 = vld [vmem:[%s21491_s20 + $0x68] sm:$0xff]  ;;  %v1156_v39 = vpack.c.bf16 %v1146_v34, %v1145_v33  ;;  %v2544_v40 = vld [vmem:[%s21492_s0] sm:$0xff]  ;;  %s15926_s22 = scalar_lea.vmem %s21143_s27, 256  ;;  %p15933_p8 = scmp.lt.s32.totalorder %s21143_s27, %s15931_s26 }
  0xa4   : > { %896 = vperm.xlu0 %15462, %v886_v13   ;;  %v2545_v41 = vld [vmem:[%s21492_s0 + $0x8] sm:$0xff]  ;;  %v1149_v42 = vld [vmem:[%s21491_s20 + $0x70] sm:$0xff]  ;;  %v1150_v43 = vld [vmem:[%s21491_s20 + $0x78] sm:$0xff]  ;;  %v1157_v44 = vpack.c.bf16 %v1148_v38, %v1147_v37  ;;  %p15927_p2 = scmp.ne.s32.totalorder %s21143_s27, %s15926_s22 }
  0xa5   : > { %906 = vperm.xlu1 %15463, %v888_v19   ;;  %v2546_v45 = vld [vmem:[%s21492_s0 + $0x10] sm:$0xff]  ;;  %v2547_v46 = vld [vmem:[%s21492_s0 + $0x18] sm:$0xff]  ;;  %v1158_v48 = vpack.c.bf16 %v1150_v43, %v1149_v42  ;;  %v2548_v49 = vld [vmem:[%s21492_s0 + $0x20] sm:$0xff]  ;;  %v2672_v51 = vpack.c.bf16 %v2545_v41, %v2544_v40 }
  0xa6   : > { %v15469_v47 = vld [vmem:[%s21489_s1 + $0x18] sm:$0xff]   ;;  %v2549_v50 = vld [vmem:[%s21492_s0 + $0x28] sm:$0xff]  ;;  %v2550_v52 = vld [vmem:[%s21492_s0 + $0x30] sm:$0xff]  ;;  %v2673_v54 = vpack.c.bf16 %v2547_v46, %v2546_v45  ;;  %s22072_s1 = sld [smem:[#allocation189_spill]]  ;;  %p15928_p4 = pnand %p15927_p2, %p22073_p3 }
  0xa7   : > { %v2551_v53 = vld [vmem:[%s21492_s0 + $0x38] sm:$0xff]  ;;  %v2552_v55 = vld [vmem:[%s21492_s0 + $0x40] sm:$0xff]  ;;  %v2553_v56 = vld [vmem:[%s21492_s0 + $0x48] sm:$0xff]  ;;  %v2674_v57 = vpack.c.bf16 %v2549_v50, %v2548_v49 }
  0xa8   : > { %1161 = vperm.xlu0 %15462, %v1151_v23   ;;  %v2554_v58 = vld [vmem:[%s21492_s0 + $0x50] sm:$0xff]  ;;  %v2555_v59 = vld [vmem:[%s21492_s0 + $0x58] sm:$0xff]  ;;  %v2675_v60 = vpack.c.bf16 %v2551_v53, %v2550_v52  ;;  %v2556_v61 = vld [vmem:[%s21492_s0 + $0x60] sm:$0xff]  ;;  %v2676_v63 = vpack.c.bf16 %v2553_v56, %v2552_v55  ;;  %p15929_p7 = pneg %p15928_p4 }
  0xa9   : > { %1166 = vperm.xlu1 %15463, %v1152_v26   ;;  %v2557_v62 = vld [vmem:[%s21492_s0 + $0x68] sm:$0xff]  ;;  %v2558_v1 = vld [vmem:[%s21492_s0 + $0x70] sm:$0xff]  ;;  %v2559_v2 = vld [vmem:[%s21492_s0 + $0x78] sm:$0xff]  ;;  %v2677_v3 = vpack.c.bf16 %v2555_v59, %v2554_v58 }
  0xaa   : > { %13195 = vmatmul.mubr.msk.bf16.gmra.mrb[4].mxu0 %vm776_vm1, %v15467_v22  ;;  %v2560_v4 = vld [vmem:[%s21492_s0 + $0x80] sm:$0xff]  ;;  %v2561_v5 = vld [vmem:[%s21492_s0 + $0x88] sm:$0xff]  ;;  %v2678_v6 = vpack.c.bf16 %v2557_v62, %v2556_v61  ;;  %v2562_v7 = vld [vmem:[%s21492_s0 + $0x90] sm:$0xff]  ;;  %v2679_v9 = vpack.c.bf16 %v2559_v2, %v2558_v1 }
  0xab   : > { %848 = vmatprep.mubr.bf16.mxu0 %v21225_v0  ;;  %v2563_v8 = vld [vmem:[%s21492_s0 + $0x98] sm:$0xff]  ;;  %v2564_v10 = vld [vmem:[%s21492_s0 + $0xa0] sm:$0xff]  ;;  %v2565_v11 = vld [vmem:[%s21492_s0 + $0xa8] sm:$0xff]  ;;  %v2680_v12 = vpack.c.bf16 %v2561_v5, %v2560_v4 }
  0xac   : > { %1171 = vperm.xlu0 %15462, %v1153_v29   ;;  %v2566_v13 = vld [vmem:[%s21492_s0 + $0xb0] sm:$0xff]  ;;  %v2567_v14 = vld [vmem:[%s21492_s0 + $0xb8] sm:$0xff]  ;;  %v2681_v15 = vpack.c.bf16 %v2563_v8, %v2562_v7  ;;  %v2568_v16 = vld [vmem:[%s21492_s0 + $0xc0] sm:$0xff]  ;;  %v2682_v18 = vpack.c.bf16 %v2565_v11, %v2564_v10  ;;  %s21141_s5 = scalar_lea.hbm %s22072_s1, %s13988_s30 }
  0xad   : > { %1176 = vperm.xlu1 %15463, %v1154_v32   ;;  %v2569_v17 = vld [vmem:[%s21492_s0 + $0xc8] sm:$0xff]  ;;  %v2570_v19 = vld [vmem:[%s21492_s0 + $0xd0] sm:$0xff]  ;;  %v2571_v20 = vld [vmem:[%s21492_s0 + $0xd8] sm:$0xff]  ;;  %v2683_v21 = vpack.c.bf16 %v2567_v14, %v2566_v13 }
  0xae   : > { %v2572_v22 = vld [vmem:[%s21492_s0 + $0xe0] sm:$0xff]  ;;  %v2573_v23 = vld [vmem:[%s21492_s0 + $0xe8] sm:$0xff]  ;;  %v2684_v24 = vpack.c.bf16 %v2569_v17, %v2568_v16  ;;  %v2574_v25 = vld [vmem:[%s21492_s0 + $0xf0] sm:$0xff]  ;;  %v2685_v27 = vpack.c.bf16 %v2571_v20, %v2570_v19 }
  0xaf   : > { %v2575_v26 = vld [vmem:[%s21492_s0 + $0xf8] sm:$0xff]  ;;  %v2686_v28 = vpack.c.bf16 %v2573_v23, %v2572_v22  ;;  %v15470_v11 = vld [vmem:[%s21493_s25] sm:$0xff]   ;;  %v15472_v13 = vld [vmem:[%s21493_s25 + $0x10] sm:$0xff]  }
  0xb0   : > { %1181 = vperm.xlu0 %15462, %v1155_v36   ;;  %v2687_v29 = vpack.c.bf16 %v2575_v26, %v2574_v25  ;;  %v15473_v14 = vld [vmem:[%s21493_s25 + $0x18] sm:$0xff]   ;;  %v15475_v16 = vld [vmem:[%s21493_s25 + $0x28] sm:$0xff]   ;;  %v15476_v17 = vld [vmem:[%s21493_s25 + $0x30] sm:$0xff]  }
  0xb1   : > { %1186 = vperm.xlu1 %15463, %v1156_v39  }
  0xb2   : > { %13196 = vmatmul.mubr.msk.bf16.gmra.mrb[8].mxu0 %vm776_vm1, %v15468_v35 }
  0xb3   : > { %858 = vmatprep.mubr.bf16.mxu0 %v21225_v0 }
  0xb4   : > { %1191 = vperm.xlu0 %15462, %v1157_v44  }
  0xb5   : > { %1196 = vperm.xlu1 %15463, %v1158_v48  }
  0xb8   : > { %2738 = vperm.xlu0 %15462, %v2672_v51  }
  0xb9   : > { %2743 = vperm.xlu1 %15463, %v2673_v54  }
  0xba   : > { %13197 = vmatmul.mubr.msk.bf16.gmra.mrb[12].mxu0 %vm776_vm1, %v15469_v47 }
  0xbb   : > { %1775 = vmatprep.mubr.bf16.mxu0 %v21225_v0 }
  0xbc   : > { %2748 = vperm.xlu0 %15462, %v2674_v57  }
  0xbd   : > { %2753 = vperm.xlu1 %15463, %v2675_v60  }
  0xc0   : > { %2758 = vperm.xlu0 %15462, %v2676_v63  }
  0xc1   : > { %2763 = vperm.xlu1 %15463, %v2677_v3  }
  0xc4   : > { %2768 = vperm.xlu0 %15462, %v2678_v6  }
  0xc5   : > { %2773 = vperm.xlu1 %15463, %v2679_v9  }
  0xc8   : > { %2778 = vperm.xlu0 %15462, %v2680_v12   ;;  %v15471_v12 = vld [vmem:[%s21493_s25 + $0x8] sm:$0xff]  }
  0xc9   : > { %2783 = vperm.xlu1 %15463, %v2681_v15   ;;  %v15474_v15 = vld [vmem:[%s21493_s25 + $0x20] sm:$0xff]  }
  0xcc   : > { %2788 = vperm.xlu0 %15462, %v2682_v18   ;;  %v15477_v18 = vld [vmem:[%s21493_s25 + $0x38] sm:$0xff]  }
  0xcd   : > { %2793 = vperm.xlu1 %15463, %v2683_v21  }
  0xd0   : > { %2798 = vperm.xlu0 %15462, %v2684_v24  }
  0xd1   : > { %2803 = vperm.xlu1 %15463, %v2685_v27  }
  0xd4   : > { %2808 = vperm.xlu0 %15462, %v2686_v28  }
  0xd5   : > { %2813 = vperm.xlu1 %15463, %v2687_v29  }
 0x11f   : > { %v892_v35 = vpop.permute.xlu0 %891 }
 0x120   : > { %v902_v57 = vpop.permute.xlu1 %901 }
 0x123   : > { %v897_v46 = vpop.permute.xlu0 %896 }
 0x124   : > { %v907_v5 = vpop.permute.xlu1 %906 }
 0x127   : > { %v1162_v24 = vpop.permute.xlu0 %1161 }
 0x175   : > { %v830_v30 = vpop.f32.mrb[0].mxu0 }
 0x176   : > { %v832_v31 = vpop.f32.mrb[1].mxu0 }
 0x177   : > { %v834_v32 = vpop.f32.mrb[2].mxu0 }
 0x178   : > { %v869_v33 = vpack.c.bf16 %v834_v32, %v830_v30  ;;  %v836_v34 = vpop.f32.mrb[3].mxu0 }
 0x179   : > { %v870_v36 = vpack.c.bf16 %v836_v34, %v832_v31 }
 0x17a   : > { %v909_v37 = vadd.bf16 %v892_v35, %v869_v33 }
 0x17b   : > { %v910_v38 = vadd.bf16 %v892_v35, %v870_v36  ;;  %v1167_v35 = vpop.permute.xlu1 %1166 }
 0x17c   : > { %v917_v42 = vmax.bf16 %v21225_v0, %v909_v37 }
 0x17d   : > { %v840_v39 = vpop.f32.mrb[4].mxu0  ;;  %v918_v40 = vmax.bf16 %v21225_v0, %v910_v38 }
 0x17e   : > { %v842_v41 = vpop.f32.mrb[5].mxu0 }
 0x17f   : > { %v844_v43 = vpop.f32.mrb[6].mxu0  ;;  %1006 = vmatprep.subr.bf16.mxu1 %v918_v40 }
 0x180   : > { %v871_v44 = vpack.c.bf16 %v844_v43, %v840_v39  ;;  %v846_v45 = vpop.f32.mrb[7].mxu0  ;;  %1007 = vmatpush1.bf16.msra.mxu1 %v917_v42 }
 0x181   : > { %v872_v47 = vpack.c.bf16 %v846_v45, %v842_v41 }
 0x182   : > { %v911_v48 = vadd.bf16 %v897_v46, %v871_v44 }
 0x183   : > { %v912_v49 = vadd.bf16 %v897_v46, %v872_v47  ;;  %v1172_v46 = vpop.permute.xlu0 %1171 }
 0x184   : > { %v919_v53 = vmax.bf16 %v21225_v0, %v911_v48 }
 0x185   : > { %v850_v50 = vpop.f32.mrb[8].mxu0  ;;  %v920_v51 = vmax.bf16 %v21225_v0, %v912_v49 }
 0x186   : > { %v852_v52 = vpop.f32.mrb[9].mxu0 }
 0x187   : > { %v854_v54 = vpop.f32.mrb[10].mxu0  ;;  %1008 = vmatprep.subr.bf16.mxu1 %v920_v51 }
 0x188   : > { %v873_v55 = vpack.c.bf16 %v854_v54, %v850_v50  ;;  %v856_v56 = vpop.f32.mrb[11].mxu0  ;;  %1009 = vmatpush1.bf16.msra.mxu1 %v919_v53 }
 0x189   : > { %v874_v58 = vpack.c.bf16 %v856_v56, %v852_v52 }
 0x18a   : > { %v913_v59 = vadd.bf16 %v902_v57, %v873_v55 }
 0x18b   : > { %v914_v60 = vadd.bf16 %v902_v57, %v874_v58  ;;  %v1177_v57 = vpop.permute.xlu1 %1176 }
 0x18c   : > { %v921_v1 = vmax.bf16 %v21225_v0, %v913_v59 }
 0x18d   : > { %v860_v61 = vpop.f32.mrb[12].mxu0  ;;  %v922_v62 = vmax.bf16 %v21225_v0, %v914_v60 }
 0x18e   : > { %v862_v63 = vpop.f32.mrb[13].mxu0 }
 0x18f   : > { %v864_v2 = vpop.f32.mrb[14].mxu0  ;;  %1010 = vmatprep.subr.bf16.mxu1 %v922_v62 }
 0x190   : > { %v875_v3 = vpack.c.bf16 %v864_v2, %v860_v61  ;;  %v866_v4 = vpop.f32.mrb[15].mxu0  ;;  %1011 = vmatpush1.bf16.msra.mxu1 %v921_v1 }
 0x191   : > { %v876_v6 = vpack.c.bf16 %v866_v4, %v862_v63 }
 0x192   : > { %v915_v7 = vadd.bf16 %v907_v5, %v875_v3 }
 0x193   : > { %v916_v8 = vadd.bf16 %v907_v5, %v876_v6  ;;  %v1182_v5 = vpop.permute.xlu0 %1181 }
 0x194   : > { %v923_v10 = vmax.bf16 %v21225_v0, %v915_v7 }
 0x195   : > { %v924_v9 = vmax.bf16 %v21225_v0, %v916_v8 }
 0x197   : > { %1012 = vmatprep.subr.bf16.mxu1 %v924_v9 }
 0x198   : > { %1013 = vmatpush1.bf16.msra.mxu1 %v923_v10 }
 0x19b   : > { %13206 = vmatmul.mubr.msk.bf16.vlgmr.msra.gmra.mrb[0].mxu1 %vm981_vm2, %v15470_v11 }
 0x19c   : > { %1048 = vmatprep.mubr.bf16.mxu1 %v21225_v0 }
 0x1a3   : > { %13207 = vmatmul.mubr.msk.bf16.gmra.mrb[4].mxu1 %vm981_vm2, %v15471_v12 }
 0x1a4   : > { %1058 = vmatprep.mubr.bf16.mxu1 %v21225_v0 }
 0x1ab   : > { %13208 = vmatmul.mubr.msk.bf16.gmra.mrb[8].mxu1 %vm981_vm2, %v15472_v13 }
 0x1ac   : > { %1068 = vmatprep.mubr.bf16.mxu1 %v21225_v0 }
 0x1b3   : > { %13209 = vmatmul.mubr.msk.bf16.gmra.mrb[12].mxu1 %vm981_vm2, %v15473_v14 }
 0x1b4   : > { %1078 = vmatprep.mubr.bf16.mxu1 %v21225_v0 }
 0x1bb   : > { %13210 = vmatmul.mubr.msk.bf16.gmra.mrb[16].mxu1 %vm981_vm2, %v15474_v15 }
 0x1bc   : > { %1088 = vmatprep.mubr.bf16.mxu1 %v21225_v0 }
 0x1c3   : > { %13211 = vmatmul.mubr.msk.bf16.gmra.mrb[20].mxu1 %vm981_vm2, %v15475_v16  ;;  %v1187_v16 = vpop.permute.xlu1 %1186 }
 0x1c4   : > { %1098 = vmatprep.mubr.bf16.mxu1 %v21225_v0 }
 0x1cb   : > { %13212 = vmatmul.mubr.msk.bf16.gmra.mrb[24].mxu1 %vm981_vm2, %v15476_v17 }
 0x1cc   : > { %1108 = vmatprep.mubr.bf16.mxu1 %v21225_v0 }
 0x1d3   : > { %13213 = vmatmul.mubr.msk.bf16.gmra.mrb[28].mxu1 %vm981_vm2, %v15477_v18 }
 0x1d4   : > { %2055 = vmatprep.mubr.bf16.mxu1 %v21225_v0 }
 0x26e   : > { %v1040_v19 = vpop.f32.mrb[0].mxu1 }
 0x26f   : > { %v1042_v20 = vpop.f32.mrb[1].mxu1 }
 0x270   : > { %v1044_v21 = vpop.f32.mrb[2].mxu1 }
 0x271   : > { %v1046_v22 = vpop.f32.mrb[3].mxu1  ;;  %v1119_v23 = vpack.c.bf16 %v1044_v21, %v1040_v19 }
 0x272   : > { %v1120_v25 = vpack.c.bf16 %v1046_v22, %v1042_v20 }
 0x273   : > { %v1199_v26 = vadd.bf16 %v1162_v24, %v1119_v23 }
 0x274   : > { %v1200_v27 = vadd.bf16 %v1162_v24, %v1120_v25 }
 0x275   : > { %v1215_v31 = vmax.bf16 %v21225_v0, %v1199_v26 }
 0x276   : > { %v1050_v28 = vpop.f32.mrb[4].mxu1  ;;  %v1216_v29 = vmax.bf16 %v21225_v0, %v1200_v27  ;;  %v1192_v27 = vpop.permute.xlu0 %1191 }
 0x277   : > { %v1052_v30 = vpop.f32.mrb[5].mxu1 }
 0x278   : > { %v1054_v32 = vpop.f32.mrb[6].mxu1  ;;  %1743 = vmatprep.subr.bf16.mxu0 %v1216_v29  ;;  %14397 = vmatprep.subr.bf16.mxu1 %v1216_v29 }
 0x279   : > { %v1056_v33 = vpop.f32.mrb[7].mxu1  ;;  %1744 = vmatpush1.bf16.msra.mxu0 %v1215_v31  ;;  %14405 = vmatpush1.bf16.msra.mxu1 %v1215_v31  ;;  %v1121_v34 = vpack.c.bf16 %v1054_v32, %v1050_v28 }
 0x27a   : > { %v1122_v36 = vpack.c.bf16 %v1056_v33, %v1052_v30 }
 0x27b   : > { %v1201_v37 = vadd.bf16 %v1167_v35, %v1121_v34 }
 0x27c   : > { %v1202_v38 = vadd.bf16 %v1167_v35, %v1122_v36 }
 0x27d   : > { %v1217_v42 = vmax.bf16 %v21225_v0, %v1201_v37 }
 0x27e   : > { %v1060_v39 = vpop.f32.mrb[8].mxu1  ;;  %v1218_v40 = vmax.bf16 %v21225_v0, %v1202_v38  ;;  %v1197_v38 = vpop.permute.xlu1 %1196 }
 0x27f   : > { %v1062_v41 = vpop.f32.mrb[9].mxu1 }
 0x280   : > { %v1064_v43 = vpop.f32.mrb[10].mxu1  ;;  %1745 = vmatprep.subr.bf16.mxu0 %v1218_v40  ;;  %14398 = vmatprep.subr.bf16.mxu1 %v1218_v40 }
 0x281   : > { %v1066_v44 = vpop.f32.mrb[11].mxu1  ;;  %1746 = vmatpush1.bf16.msra.mxu0 %v1217_v42  ;;  %14406 = vmatpush1.bf16.msra.mxu1 %v1217_v42  ;;  %v1123_v45 = vpack.c.bf16 %v1064_v43, %v1060_v39 }
 0x282   : > { %v1124_v47 = vpack.c.bf16 %v1066_v44, %v1062_v41  ;;  %v15478_v44 = vld [vmem:[%s21494_s13] sm:$0xff]  }
 0x283   : > { %v1203_v48 = vadd.bf16 %v1172_v46, %v1123_v45  ;;  %v15494_v45 = vld [vmem:[%s21494_s13 + $0xe0] sm:$0xff]  }
 0x284   : > { %v1204_v49 = vadd.bf16 %v1172_v46, %v1124_v47  ;;  %v15479_v46 = vld [vmem:[%s21494_s13 + $0x8] sm:$0xff]  }
 0x285   : > { %v1219_v53 = vmax.bf16 %v21225_v0, %v1203_v48  ;;  %v15496_v47 = vld [vmem:[%s21494_s13 + $0xe8] sm:$0xff]   ;;  %v15480_v48 = vld [vmem:[%s21494_s13 + $0x10] sm:$0xff]  }
 0x286   : > { %v1070_v50 = vpop.f32.mrb[12].mxu1  ;;  %v1220_v51 = vmax.bf16 %v21225_v0, %v1204_v49  ;;  %v15481_v49 = vld [vmem:[%s21494_s13 + $0x18] sm:$0xff]  }
 0x287   : > { %v1072_v52 = vpop.f32.mrb[13].mxu1 }
 0x288   : > { %v1074_v54 = vpop.f32.mrb[14].mxu1  ;;  %1747 = vmatprep.subr.bf16.mxu0 %v1220_v51  ;;  %14399 = vmatprep.subr.bf16.mxu1 %v1220_v51  ;;  %v15483_v51 = vld [vmem:[%s21494_s13 + $0x28] sm:$0xff]  }
 0x289   : > { %v1076_v55 = vpop.f32.mrb[15].mxu1  ;;  %1748 = vmatpush1.bf16.msra.mxu0 %v1219_v53  ;;  %14407 = vmatpush1.bf16.msra.mxu1 %v1219_v53  ;;  %v1125_v56 = vpack.c.bf16 %v1074_v54, %v1070_v50  ;;  %v15482_v50 = vld [vmem:[%s21494_s13 + $0x20] sm:$0xff]   ;;  %v15485_v53 = vld [vmem:[%s21494_s13 + $0x38] sm:$0xff]  }
 0x28a   : > { %v1126_v58 = vpack.c.bf16 %v1076_v55, %v1072_v52  ;;  %v15484_v52 = vld [vmem:[%s21494_s13 + $0x30] sm:$0xff]   ;;  %v15486_v54 = vld [vmem:[%s21494_s13 + $0x40] sm:$0xff]   ;;  %v15487_v55 = vld [vmem:[%s21494_s13 + $0x48] sm:$0xff]  }
 0x28b   : > { %v1205_v59 = vadd.bf16 %v1177_v57, %v1125_v56  ;;  %v15488_v56 = vld [vmem:[%s21494_s13 + $0x50] sm:$0xff]  }
 0x28c   : > { %v1206_v60 = vadd.bf16 %v1177_v57, %v1126_v58  ;;  %v15489_v57 = vld [vmem:[%s21494_s13 + $0x58] sm:$0xff]   ;;  %v15498_v58 = vld [vmem:[%s21494_s13 + $0xf0] sm:$0xff]  }
 0x28d   : > { %v1221_v1 = vmax.bf16 %v21225_v0, %v1205_v59  ;;  %v15490_v59 = vld [vmem:[%s21494_s13 + $0x60] sm:$0xff]  }
 0x28e   : > { %v1080_v61 = vpop.f32.mrb[16].mxu1  ;;  %v1222_v62 = vmax.bf16 %v21225_v0, %v1206_v60  ;;  %v15500_v60 = vld [vmem:[%s21494_s13 + $0xf8] sm:$0xff]  }
 0x28f   : > { %v1082_v63 = vpop.f32.mrb[17].mxu1 }
 0x290   : > { %v1084_v2 = vpop.f32.mrb[18].mxu1  ;;  %1749 = vmatprep.subr.bf16.mxu0 %v1222_v62  ;;  %14400 = vmatprep.subr.bf16.mxu1 %v1222_v62  ;;  %v15502_v62 = vld [vmem:[%s21494_s13 + $0x100] sm:$0xff]  }
 0x291   : > { %v1086_v3 = vpop.f32.mrb[19].mxu1  ;;  %1750 = vmatpush1.bf16.msra.mxu0 %v1221_v1  ;;  %14408 = vmatpush1.bf16.msra.mxu1 %v1221_v1  ;;  %v1127_v4 = vpack.c.bf16 %v1084_v2, %v1080_v61  ;;  %v15491_v61 = vld [vmem:[%s21494_s13 + $0x68] sm:$0xff]   ;;  %v15493_v2 = vld [vmem:[%s21494_s13 + $0x78] sm:$0xff]  }
 0x292   : > { %v1128_v6 = vpack.c.bf16 %v1086_v3, %v1082_v63  ;;  %v15492_v63 = vld [vmem:[%s21494_s13 + $0x70] sm:$0xff]   ;;  %v15504_v1 = vld [vmem:[%s21494_s13 + $0x108] sm:$0xff]  }
 0x293   : > { %v1207_v7 = vadd.bf16 %v1182_v5, %v1127_v4  ;;  %v15506_v3 = vld [vmem:[%s21494_s13 + $0x110] sm:$0xff]   ;;  %v15495_v4 = vld [vmem:[%s21494_s13 + $0x80] sm:$0xff]  }
 0x294   : > { %v1208_v8 = vadd.bf16 %v1182_v5, %v1128_v6  ;;  %v15508_v5 = vld [vmem:[%s21494_s13 + $0x118] sm:$0xff]   ;;  %v15497_v6 = vld [vmem:[%s21494_s13 + $0x88] sm:$0xff]  }
 0x295   : > { %v1223_v12 = vmax.bf16 %v21225_v0, %v1207_v7  ;;  %v15510_v7 = vld [vmem:[%s21494_s13 + $0x120] sm:$0xff]  }
 0x296   : > { %v1090_v9 = vpop.f32.mrb[20].mxu1  ;;  %v1224_v10 = vmax.bf16 %v21225_v0, %v1208_v8  ;;  %v15499_v8 = vld [vmem:[%s21494_s13 + $0x90] sm:$0xff]  }
 0x297   : > { %v1092_v11 = vpop.f32.mrb[21].mxu1 }
 0x298   : > { %v1094_v13 = vpop.f32.mrb[22].mxu1  ;;  %1751 = vmatprep.subr.bf16.mxu0 %v1224_v10  ;;  %14401 = vmatprep.subr.bf16.mxu1 %v1224_v10  ;;  %v15501_v10 = vld [vmem:[%s21494_s13 + $0x98] sm:$0xff]  }
 0x299   : > { %v1096_v14 = vpop.f32.mrb[23].mxu1  ;;  %1752 = vmatpush1.bf16.msra.mxu0 %v1223_v12  ;;  %14409 = vmatpush1.bf16.msra.mxu1 %v1223_v12  ;;  %v1129_v15 = vpack.c.bf16 %v1094_v13, %v1090_v9  ;;  %v15512_v9 = vld [vmem:[%s21494_s13 + $0x128] sm:$0xff]   ;;  %v15503_v12 = vld [vmem:[%s21494_s13 + $0xa0] sm:$0xff]   ;;  %v15516_v13 = vld [vmem:[%s21494_s13 + $0x138] sm:$0xff]  }
 0x29a   : > { %v1130_v17 = vpack.c.bf16 %v1096_v14, %v1092_v11  ;;  %v15514_v11 = vld [vmem:[%s21494_s13 + $0x130] sm:$0xff]   ;;  %v15505_v14 = vld [vmem:[%s21494_s13 + $0xa8] sm:$0xff]  }
 0x29b   : > { %v1209_v18 = vadd.bf16 %v1187_v16, %v1129_v15  ;;  %v15518_v15 = vld [vmem:[%s21494_s13 + $0x140] sm:$0xff]  }
 0x29c   : > { %v1210_v19 = vadd.bf16 %v1187_v16, %v1130_v17  ;;  %v15507_v16 = vld [vmem:[%s21494_s13 + $0xb0] sm:$0xff]   ;;  %v15519_v17 = vld [vmem:[%s21494_s13 + $0x148] sm:$0xff]  }
 0x29d   : > { %v1225_v23 = vmax.bf16 %v21225_v0, %v1209_v18  ;;  %v15509_v18 = vld [vmem:[%s21494_s13 + $0xb8] sm:$0xff]  }
 0x29e   : > { %v1100_v20 = vpop.f32.mrb[24].mxu1  ;;  %v1226_v21 = vmax.bf16 %v21225_v0, %v1210_v19  ;;  %v15520_v19 = vld [vmem:[%s21494_s13 + $0x150] sm:$0xff]  }
 0x29f   : > { %v1102_v22 = vpop.f32.mrb[25].mxu1 }
 0x2a0   : > { %v1104_v24 = vpop.f32.mrb[26].mxu1  ;;  %1753 = vmatprep.subr.bf16.mxu0 %v1226_v21  ;;  %14402 = vmatprep.subr.bf16.mxu1 %v1226_v21  ;;  %v15521_v21 = vld [vmem:[%s21494_s13 + $0x158] sm:$0xff]  }
 0x2a1   : > { %v1106_v25 = vpop.f32.mrb[27].mxu1  ;;  %1754 = vmatpush1.bf16.msra.mxu0 %v1225_v23  ;;  %14410 = vmatpush1.bf16.msra.mxu1 %v1225_v23  ;;  %v1131_v26 = vpack.c.bf16 %v1104_v24, %v1100_v20  ;;  %v15511_v20 = vld [vmem:[%s21494_s13 + $0xc0] sm:$0xff]   ;;  %v15515_v24 = vld [vmem:[%s21494_s13 + $0xd0] sm:$0xff]  }
 0x2a2   : > { %v1132_v28 = vpack.c.bf16 %v1106_v25, %v1102_v22  ;;  %v15513_v22 = vld [vmem:[%s21494_s13 + $0xc8] sm:$0xff]   ;;  %v15522_v23 = vld [vmem:[%s21494_s13 + $0x160] sm:$0xff]  }
 0x2a3   : > { %v1211_v29 = vadd.bf16 %v1192_v27, %v1131_v26  ;;  %v15523_v25 = vld [vmem:[%s21494_s13 + $0x168] sm:$0xff]  }
 0x2a4   : > { %v1212_v30 = vadd.bf16 %v1192_v27, %v1132_v28  ;;  %v15517_v28 = vld [vmem:[%s21494_s13 + $0xd8] sm:$0xff]  }
 0x2a5   : > { %v1227_v34 = vmax.bf16 %v21225_v0, %v1211_v29 }
 0x2a6   : > { %v1110_v31 = vpop.f32.mrb[28].mxu1  ;;  %v1228_v32 = vmax.bf16 %v21225_v0, %v1212_v30 }
 0x2a7   : > { %v1112_v33 = vpop.f32.mrb[29].mxu1 }
 0x2a8   : > { %v1114_v35 = vpop.f32.mrb[30].mxu1  ;;  %1755 = vmatprep.subr.bf16.mxu0 %v1228_v32  ;;  %14403 = vmatprep.subr.bf16.mxu1 %v1228_v32  ;;  %v2739_v32 = vpop.permute.xlu0 %2738 }
 0x2a9   : > { %v1116_v36 = vpop.f32.mrb[31].mxu1  ;;  %1756 = vmatpush1.bf16.msra.mxu0 %v1227_v34  ;;  %14411 = vmatpush1.bf16.msra.mxu1 %v1227_v34  ;;  %v1133_v37 = vpack.c.bf16 %v1114_v35, %v1110_v31  ;;  %v15524_v34 = vld [vmem:[%s21494_s13 + $0x170] sm:$0xff]  }
 0x2aa   : > { %v1134_v39 = vpack.c.bf16 %v1116_v36, %v1112_v33 }
 0x2ab   : > { %v1213_v40 = vadd.bf16 %v1197_v38, %v1133_v37 }
 0x2ac   : > { %v1214_v41 = vadd.bf16 %v1197_v38, %v1134_v39 }
 0x2ad   : > { %v1229_v43 = vmax.bf16 %v21225_v0, %v1213_v40 }
 0x2ae   : > { %v1230_v42 = vmax.bf16 %v21225_v0, %v1214_v41 }
 0x2b0   : > { %1757 = vmatprep.subr.bf16.mxu0 %v1230_v42  ;;  %14404 = vmatprep.subr.bf16.mxu1 %v1230_v42 }
 0x2b1   : > { %1758 = vmatpush1.bf16.msra.mxu0 %v1229_v43  ;;  %14412 = vmatpush1.bf16.msra.mxu1 %v1229_v43  ;;  %v15525_v43 = vld [vmem:[%s21494_s13 + $0x178] sm:$0xff]  }
 0x2b2   : > { %5040 = vmatprep.subr.bf16.mxu1 %v21225_v0 }
 0x2b4   : > { %1776 = vmatmul.mubr.bf16.vlgmr.msra.gmra.mrb[16].mxu0 %v15478_v44  ;;  %2056 = vmatmul.mubr.bf16.vlgmr.msra.gmra.mrb[32].mxu1 %v15494_v45 }
 0x2b5   : > { %1785 = vmatprep.mubr.bf16.mxu0 %v21225_v0  ;;  %2065 = vmatprep.mubr.bf16.mxu1 %v21225_v0 }
 0x2bc   : > { %1786 = vmatmul.mubr.bf16.gmra.mrb[20].mxu0 %v15479_v46  ;;  %2066 = vmatmul.mubr.bf16.gmra.mrb[36].mxu1 %v15496_v47  ;;  %v2744_v46 = vpop.permute.xlu1 %2743 }
 0x2bd   : > { %1795 = vmatprep.mubr.bf16.mxu0 %v21225_v0  ;;  %2075 = vmatprep.mubr.bf16.mxu1 %v21225_v0 }
 0x2c4   : > { %1796 = vmatmul.mubr.bf16.gmra.mrb[24].mxu0 %v15480_v48  ;;  %2076 = vmatmul.mubr.bf16.gmra.mrb[40].mxu1 %v15498_v58 }
 0x2c5   : > { %1805 = vmatprep.mubr.bf16.mxu0 %v21225_v0  ;;  %2085 = vmatprep.mubr.bf16.mxu1 %v21225_v0 }
 0x2cc   : > { %1806 = vmatmul.mubr.bf16.gmra.mrb[28].mxu0 %v15481_v49  ;;  %2086 = vmatmul.mubr.bf16.gmra.mrb[44].mxu1 %v15500_v60 }
 0x2cd   : > { %1815 = vmatprep.mubr.bf16.mxu0 %v21225_v0  ;;  %2095 = vmatprep.mubr.bf16.mxu1 %v21225_v0 }
 0x2d4   : > { %1816 = vmatmul.mubr.bf16.gmra.mrb[32].mxu0 %v15482_v50  ;;  %2096 = vmatmul.mubr.bf16.gmra.mrb[48].mxu1 %v15502_v62 }
 0x2d5   : > { %1825 = vmatprep.mubr.bf16.mxu0 %v21225_v0  ;;  %2105 = vmatprep.mubr.bf16.mxu1 %v21225_v0 }
 0x2dc   : > { %1826 = vmatmul.mubr.bf16.gmra.mrb[36].mxu0 %v15483_v51  ;;  %2106 = vmatmul.mubr.bf16.gmra.mrb[52].mxu1 %v15504_v1 }
 0x2dd   : > { %1835 = vmatprep.mubr.bf16.mxu0 %v21225_v0  ;;  %2115 = vmatprep.mubr.bf16.mxu1 %v21225_v0 }
 0x2e4   : > { %1836 = vmatmul.mubr.bf16.gmra.mrb[40].mxu0 %v15484_v52  ;;  %2116 = vmatmul.mubr.bf16.gmra.mrb[56].mxu1 %v15506_v3 }
 0x2e5   : > { %1845 = vmatprep.mubr.bf16.mxu0 %v21225_v0  ;;  %2125 = vmatprep.mubr.bf16.mxu1 %v21225_v0 }
 0x2ec   : > { %1846 = vmatmul.mubr.bf16.gmra.mrb[44].mxu0 %v15485_v53  ;;  %2126 = vmatmul.mubr.bf16.gmra.mrb[60].mxu1 %v15508_v5 }
 0x2ed   : > { %1855 = vmatprep.mubr.bf16.mxu0 %v21225_v0  ;;  %2135 = vmatprep.mubr.bf16.mxu1 %v21225_v0 }
 0x2f4   : > { %1856 = vmatmul.mubr.bf16.gmra.mrb[48].mxu0 %v15486_v54  ;;  %2136 = vmatmul.mubr.bf16.gmra.mrb[64].mxu1 %v15510_v7 }
 0x2f5   : > { %1865 = vmatprep.mubr.bf16.mxu0 %v21225_v0  ;;  %2145 = vmatprep.mubr.bf16.mxu1 %v21225_v0 }
 0x2fc   : > { %1866 = vmatmul.mubr.bf16.gmra.mrb[52].mxu0 %v15487_v55  ;;  %2146 = vmatmul.mubr.bf16.gmra.mrb[68].mxu1 %v15512_v9 }
 0x2fd   : > { %1875 = vmatprep.mubr.bf16.mxu0 %v21225_v0  ;;  %2155 = vmatprep.mubr.bf16.mxu1 %v21225_v0 }
 0x304   : > { %1876 = vmatmul.mubr.bf16.gmra.mrb[56].mxu0 %v15488_v56  ;;  %2156 = vmatmul.mubr.bf16.gmra.mrb[72].mxu1 %v15514_v11  ;;  %v15526_v56 = vld [vmem:[%s21494_s13 + $0x180] sm:$0xff]  }
 0x305   : > { %1885 = vmatprep.mubr.bf16.mxu0 %v21225_v0  ;;  %2165 = vmatprep.mubr.bf16.mxu1 %v21225_v0 }
 0x30c   : > { %1886 = vmatmul.mubr.bf16.gmra.mrb[60].mxu0 %v15489_v57  ;;  %2166 = vmatmul.mubr.bf16.gmra.mrb[76].mxu1 %v15516_v13 }
 0x30d   : > { %1895 = vmatprep.mubr.bf16.mxu0 %v21225_v0  ;;  %2175 = vmatprep.mubr.bf16.mxu1 %v21225_v0 }
 0x314   : > { %1896 = vmatmul.mubr.bf16.gmra.mrb[64].mxu0 %v15490_v59  ;;  %2176 = vmatmul.mubr.bf16.gmra.mrb[80].mxu1 %v15518_v15  ;;  %v2749_v59 = vpop.permute.xlu0 %2748 }
 0x315   : > { %1905 = vmatprep.mubr.bf16.mxu0 %v21225_v0  ;;  %2185 = vmatprep.mubr.bf16.mxu1 %v21225_v0 }
 0x31c   : > { %1906 = vmatmul.mubr.bf16.gmra.mrb[68].mxu0 %v15491_v61  ;;  %2186 = vmatmul.mubr.bf16.gmra.mrb[84].mxu1 %v15519_v17 }
 0x31d   : > { %1915 = vmatprep.mubr.bf16.mxu0 %v21225_v0  ;;  %2195 = vmatprep.mubr.bf16.mxu1 %v21225_v0 }
 0x324   : > { %1916 = vmatmul.mubr.bf16.gmra.mrb[72].mxu0 %v15492_v63  ;;  %2196 = vmatmul.mubr.bf16.gmra.mrb[88].mxu1 %v15520_v19 }
 0x325   : > { %1925 = vmatprep.mubr.bf16.mxu0 %v21225_v0  ;;  %2205 = vmatprep.mubr.bf16.mxu1 %v21225_v0 }
 0x32c   : > { %1926 = vmatmul.mubr.bf16.gmra.mrb[76].mxu0 %v15493_v2  ;;  %2206 = vmatmul.mubr.bf16.gmra.mrb[92].mxu1 %v15521_v21  ;;  %v2759_v21 = vpop.permute.xlu0 %2758 }
 0x32d   : > { %1935 = vmatprep.mubr.bf16.mxu0 %v21225_v0  ;;  %2215 = vmatprep.mubr.bf16.mxu1 %v21225_v0 }
 0x334   : > { %1936 = vmatmul.mubr.bf16.gmra.mrb[80].mxu0 %v15495_v4  ;;  %2216 = vmatmul.mubr.bf16.gmra.mrb[96].mxu1 %v15522_v23  ;;  %v15528_v23 = vld [vmem:[%s21494_s13 + $0x190] sm:$0xff]  }
 0x335   : > { %1945 = vmatprep.mubr.bf16.mxu0 %v21225_v0  ;;  %2225 = vmatprep.mubr.bf16.mxu1 %v21225_v0 }
 0x33c   : > { %1946 = vmatmul.mubr.bf16.gmra.mrb[84].mxu0 %v15497_v6  ;;  %2226 = vmatmul.mubr.bf16.gmra.mrb[100].mxu1 %v15523_v25 }
 0x33d   : > { %1955 = vmatprep.mubr.bf16.mxu0 %v21225_v0  ;;  %2235 = vmatprep.mubr.bf16.mxu1 %v21225_v0 }
 0x344   : > { %1956 = vmatmul.mubr.bf16.gmra.mrb[88].mxu0 %v15499_v8  ;;  %2236 = vmatmul.mubr.bf16.gmra.mrb[104].mxu1 %v15524_v34  ;;  %v2754_v8 = vpop.permute.xlu1 %2753 }
 0x345   : > { %1965 = vmatprep.mubr.bf16.mxu0 %v21225_v0  ;;  %2245 = vmatprep.mubr.bf16.mxu1 %v21225_v0 }
 0x348   : > { %v2764_v34 = vpop.permute.xlu1 %2763 }
 0x34c   : > { %1966 = vmatmul.mubr.bf16.gmra.mrb[92].mxu0 %v15501_v10  ;;  %2246 = vmatmul.mubr.bf16.gmra.mrb[108].mxu1 %v15525_v43  ;;  %v15527_v10 = vld [vmem:[%s21494_s13 + $0x188] sm:$0xff]  }
 0x34d   : > { %1975 = vmatprep.mubr.bf16.mxu0 %v21225_v0  ;;  %2255 = vmatprep.mubr.bf16.mxu1 %v21225_v0 }
 0x354   : > { %1976 = vmatmul.mubr.bf16.gmra.mrb[96].mxu0 %v15503_v12  ;;  %2256 = vmatmul.mubr.bf16.gmra.mrb[112].mxu1 %v15526_v56 }
 0x355   : > { %1985 = vmatprep.mubr.bf16.mxu0 %v21225_v0  ;;  %2265 = vmatprep.mubr.bf16.mxu1 %v21225_v0 }
 0x35c   : > { %1986 = vmatmul.mubr.bf16.gmra.mrb[100].mxu0 %v15505_v14  ;;  %2266 = vmatmul.mubr.bf16.gmra.mrb[116].mxu1 %v15527_v10 }
 0x35d   : > { %1995 = vmatprep.mubr.bf16.mxu0 %v21225_v0  ;;  %2275 = vmatprep.mubr.bf16.mxu1 %v21225_v0 }
 0x364   : > { %1996 = vmatmul.mubr.bf16.gmra.mrb[104].mxu0 %v15507_v16  ;;  %2276 = vmatmul.mubr.bf16.gmra.mrb[120].mxu1 %v15528_v23 }
 0x365   : > { %2005 = vmatprep.mubr.bf16.mxu0 %v21225_v0  ;;  %2285 = vmatprep.mubr.bf16.mxu1 %v21225_v0 }
 0x36c   : > { %2006 = vmatmul.mubr.bf16.gmra.mrb[108].mxu0 %v15509_v18 }
 0x36d   : > { %2015 = vmatprep.mubr.bf16.mxu0 %v21225_v0 }
 0x374   : > { %2016 = vmatmul.mubr.bf16.gmra.mrb[112].mxu0 %v15511_v20 }
 0x375   : > { %2025 = vmatprep.mubr.bf16.mxu0 %v21225_v0 }
 0x37c   : > { %2026 = vmatmul.mubr.bf16.gmra.mrb[116].mxu0 %v15513_v22 }
 0x37d   : > { %2035 = vmatprep.mubr.bf16.mxu0 %v21225_v0 }
 0x384   : > { %2036 = vmatmul.mubr.bf16.gmra.mrb[120].mxu0 %v15515_v24 }
 0x385   : > { %2045 = vmatprep.mubr.bf16.mxu0 %v21225_v0 }
 0x387   : > { %v1777_v26 = vpop.f32.mrb[16].mxu0  ;;  %v16835_v23 = vpop.f32.mrb[32].mxu1 }
 0x388   : > { %v1779_v27 = vpop.f32.mrb[17].mxu0  ;;  %21511 = vst [vmem:[#allocation39_spill] sm:$0xff] %v16835_v23 }
 0x389   : > { %v1781_v29 = vpop.f32.mrb[18].mxu0 }
 0x38a   : > { %v2416_v30 = vpack.c.bf16 %v1781_v29, %v1777_v26  ;;  %v1783_v31 = vpop.f32.mrb[19].mxu0 }
 0x38b   : > { %v2417_v33 = vpack.c.bf16 %v1783_v31, %v1779_v27 }
 0x38c   : > { %v3056_v35 = vadd.bf16 %v2739_v32, %v2416_v30  ;;  %2046 = vmatmul.mubr.bf16.gmra.mrb[124].mxu0 %v15517_v28 }
 0x38d   : > { %v3057_v36 = vadd.bf16 %v2739_v32, %v2417_v33 }
 0x38e   : > { %v16740_v37 = vmax.bf16 %v21225_v0, %v3056_v35 }
 0x38f   : > { %v1787_v38 = vpop.f32.mrb[20].mxu0  ;;  %v16744_v39 = vmax.bf16 %v21225_v0, %v3057_v36  ;;  %v15529_v36 = vld [vmem:[%s21494_s13 + $0x198] sm:$0xff]  }
 0x390   : > { %21495 = vst [vmem:[#allocation23_spill] sm:$0xff] %v16740_v37  ;;  %v1789_v40 = vpop.f32.mrb[21].mxu0  ;;  %2286 = vmatmul.mubr.bf16.gmra.mrb[124].mxu1 %v15529_v36 }
 0x391   : > { %21496 = vst [vmem:[#allocation24_spill] sm:$0xff] %v16744_v39  ;;  %v1791_v41 = vpop.f32.mrb[22].mxu0  ;;  %v3312_v42 = vmax.bf16 %v16744_v39, %v16740_v37  ;;  %2295 = vmatprep.mubr.bf16.mxu1 %v21225_v0  ;;  %v17113_v37 = vld [vmem:[%s21190_s7 + $0x20] sm:$0xff]  ;;  %v2582_v39 = vld [vmem:[%s21492_s0 + $0x130] sm:$0xff] }
 0x392   : > { %v2418_v44 = vpack.c.bf16 %v1791_v41, %v1787_v38  ;;  %v1793_v45 = vpop.f32.mrb[23].mxu0 }
 0x393   : > { %v2419_v47 = vpack.c.bf16 %v1793_v45, %v1789_v40  ;;  %3313 = vmax.xlane.bf16.xlu0 %v3312_v42 }
 0x394   : > { %v3058_v48 = vadd.bf16 %v2744_v46, %v2418_v44 }
 0x395   : > { %v3059_v49 = vadd.bf16 %v2744_v46, %v2419_v47 }
 0x396   : > { %v16752_v50 = vmax.bf16 %v21225_v0, %v3058_v48 }
 0x397   : > { %v1797_v51 = vpop.f32.mrb[24].mxu0  ;;  %v16756_v52 = vmax.bf16 %v21225_v0, %v3059_v49  ;;  %v2769_v49 = vpop.permute.xlu0 %2768 }
 0x398   : > { %21497 = vst [vmem:[#allocation25_spill] sm:$0xff] %v16752_v50  ;;  %v1799_v53 = vpop.f32.mrb[25].mxu0 }
 0x399   : > { %21498 = vst [vmem:[#allocation26_spill] sm:$0xff] %v16756_v52  ;;  %v1801_v54 = vpop.f32.mrb[26].mxu0  ;;  %v3315_v55 = vmax.bf16 %v16756_v52, %v16752_v50  ;;  %v17108_v52 = vld [vmem:[%s21190_s7] sm:$0xff] }
 0x39a   : > { %v2420_v57 = vpack.c.bf16 %v1801_v54, %v1797_v51  ;;  %v1803_v58 = vpop.f32.mrb[27].mxu0 }
 0x39b   : > { %v2421_v60 = vpack.c.bf16 %v1803_v58, %v1799_v53  ;;  %3316 = vmax.xlane.bf16.xlu1 %v3315_v55  ;;  %v15530_v53 = vld [vmem:[%s21494_s13 + $0x1a0] sm:$0xff]  }
 0x39c   : > { %v3060_v61 = vadd.bf16 %v2749_v59, %v2420_v57  ;;  %2296 = vmatmul.mubr.bf16.gmra.mrb[128].mxu1 %v15530_v53 }
 0x39d   : > { %v3061_v62 = vadd.bf16 %v2749_v59, %v2421_v60  ;;  %2305 = vmatprep.mubr.bf16.mxu1 %v21225_v0 }
 0x39e   : > { %v16764_v63 = vmax.bf16 %v21225_v0, %v3060_v61 }
 0x39f   : > { %v1807_v1 = vpop.f32.mrb[28].mxu0  ;;  %v16768_v2 = vmax.bf16 %v21225_v0, %v3061_v62 }
 0x3a0   : > { %21499 = vst [vmem:[#allocation27_spill] sm:$0xff] %v16764_v63  ;;  %v1809_v3 = vpop.f32.mrb[29].mxu0 }
 0x3a1   : > { %21500 = vst [vmem:[#allocation28_spill] sm:$0xff] %v16768_v2  ;;  %v1811_v4 = vpop.f32.mrb[30].mxu0  ;;  %v3318_v5 = vmax.bf16 %v16768_v2, %v16764_v63  ;;  %v13279_v63 = vcombine.high %v17108_v52, %v17113_v37 }
 0x3a2   : > { %v2422_v6 = vpack.c.bf16 %v1811_v4, %v1807_v1  ;;  %v1813_v7 = vpop.f32.mrb[31].mxu0 }
 0x3a3   : > { %v2423_v9 = vpack.c.bf16 %v1813_v7, %v1809_v3  ;;  %3319 = vmax.xlane.bf16.xlu0 %v3318_v5  ;;  %v2774_v3 = vpop.permute.xlu1 %2773  ;;  %v15531_v5 = vld [vmem:[%s21494_s13 + $0x1a8] sm:$0xff]  }
 0x3a4   : > { %v3062_v11 = vadd.bf16 %v2754_v8, %v2422_v6  ;;  %2306 = vmatmul.mubr.bf16.gmra.mrb[132].mxu1 %v15531_v5  ;;  %v15534_v5 = vld [vmem:[%s21494_s13 + $0x1c0] sm:$0xff]  }
 0x3a5   : > { %v3063_v12 = vadd.bf16 %v2754_v8, %v2423_v9  ;;  %2315 = vmatprep.mubr.bf16.mxu1 %v21225_v0 }
 0x3a6   : > { %v16776_v13 = vmax.bf16 %v21225_v0, %v3062_v11 }
 0x3a7   : > { %v1817_v14 = vpop.f32.mrb[32].mxu0  ;;  %v16780_v15 = vmax.bf16 %v21225_v0, %v3063_v12 }
 0x3a8   : > { %21501 = vst [vmem:[#allocation29_spill] sm:$0xff] %v16776_v13  ;;  %v1819_v16 = vpop.f32.mrb[33].mxu0 }
 0x3a9   : > { %21502 = vst [vmem:[#allocation30_spill] sm:$0xff] %v16780_v15  ;;  %v1821_v17 = vpop.f32.mrb[34].mxu0  ;;  %v3321_v18 = vmax.bf16 %v16780_v15, %v16776_v13 }
 0x3aa   : > { %v2424_v19 = vpack.c.bf16 %v1821_v17, %v1817_v14  ;;  %v1823_v20 = vpop.f32.mrb[35].mxu0 }
 0x3ab   : > { %v2425_v22 = vpack.c.bf16 %v1823_v20, %v1819_v16  ;;  %3322 = vmax.xlane.bf16.xlu1 %v3321_v18  ;;  %v2779_v18 = vpop.permute.xlu0 %2778  ;;  %v15532_v20 = vld [vmem:[%s21494_s13 + $0x1b0] sm:$0xff]  }
 0x3ac   : > { %v3064_v24 = vadd.bf16 %v2759_v21, %v2424_v19  ;;  %2316 = vmatmul.mubr.bf16.gmra.mrb[136].mxu1 %v15532_v20 }
 0x3ad   : > { %v3065_v25 = vadd.bf16 %v2759_v21, %v2425_v22  ;;  %2325 = vmatprep.mubr.bf16.mxu1 %v21225_v0 }
 0x3ae   : > { %v16788_v26 = vmax.bf16 %v21225_v0, %v3064_v24 }
 0x3af   : > { %v1827_v27 = vpop.f32.mrb[36].mxu0  ;;  %v16792_v28 = vmax.bf16 %v21225_v0, %v3065_v25  ;;  %v16840_v25 = vpop.f32.mrb[33].mxu1 }
 0x3b0   : > { %21503 = vst [vmem:[#allocation31_spill] sm:$0xff] %v16788_v26  ;;  %v1829_v29 = vpop.f32.mrb[37].mxu0  ;;  %21513 = vst [vmem:[#allocation41_spill] sm:$0xff] %v16840_v25 }
 0x3b1   : > { %21504 = vst [vmem:[#allocation32_spill] sm:$0xff] %v16792_v28  ;;  %v1831_v30 = vpop.f32.mrb[38].mxu0  ;;  %v3324_v31 = vmax.bf16 %v16792_v28, %v16788_v26  ;;  %v2579_v26 = vld [vmem:[%s21492_s0 + $0x118] sm:$0xff] }
 0x3b2   : > { %v2426_v32 = vpack.c.bf16 %v1831_v30, %v1827_v27  ;;  %v1833_v33 = vpop.f32.mrb[39].mxu0  ;;  %v16846_v30 = vpop.f32.mrb[34].mxu1 }
 0x3b3   : > { %v2427_v35 = vpack.c.bf16 %v1833_v33, %v1829_v29  ;;  %3325 = vmax.xlane.bf16.xlu0 %v3324_v31  ;;  %21515 = vst [vmem:[#allocation43_spill] sm:$0xff] %v16846_v30 }
 0x3b4   : > { %v3066_v38 = vadd.bf16 %v2764_v34, %v2426_v32  ;;  %v16848_v32 = vpop.f32.mrb[35].mxu1 }
 0x3b5   : > { %v3067_v40 = vadd.bf16 %v2764_v34, %v2427_v35  ;;  %21516 = vst [vmem:[#allocation44_spill] sm:$0xff] %v16848_v32 }
 0x3b6   : > { %v16800_v41 = vmax.bf16 %v21225_v0, %v3066_v38  ;;  %v2784_v38 = vpop.permute.xlu1 %2783 }
 0x3b7   : > { %v1837_v42 = vpop.f32.mrb[40].mxu0  ;;  %v16804_v43 = vmax.bf16 %v21225_v0, %v3067_v40 }
 0x3b8   : > { %21505 = vst [vmem:[#allocation33_spill] sm:$0xff] %v16800_v41  ;;  %v1839_v44 = vpop.f32.mrb[41].mxu0 }
 0x3b9   : > { %21506 = vst [vmem:[#allocation34_spill] sm:$0xff] %v16804_v43  ;;  %v1841_v45 = vpop.f32.mrb[42].mxu0  ;;  %v3327_v46 = vmax.bf16 %v16804_v43, %v16800_v41  ;;  %v2578_v43 = vld [vmem:[%s21492_s0 + $0x110] sm:$0xff] }
 0x3ba   : > { %v2428_v47 = vpack.c.bf16 %v1841_v45, %v1837_v42  ;;  %v1843_v48 = vpop.f32.mrb[43].mxu0  ;;  %v15533_v42 = vld [vmem:[%s21494_s13 + $0x1b8] sm:$0xff]   ;;  %v2689_v50 = vpack.c.bf16 %v2579_v26, %v2578_v43 }
 0x3bb   : > { %v2429_v51 = vpack.c.bf16 %v1843_v48, %v1839_v44  ;;  %3328 = vmax.xlane.bf16.xlu1 %v3327_v46  ;;  %2326 = vmatmul.mubr.bf16.gmra.mrb[140].mxu1 %v15533_v42  ;;  %v16855_v46 = vpop.f32.mrb[36].mxu1  ;;  %v2583_v26 = vld [vmem:[%s21492_s0 + $0x138] sm:$0xff] }
 0x3bc   : > { %v3068_v54 = vadd.bf16 %v2769_v49, %v2428_v47  ;;  %21517 = vst [vmem:[#allocation45_spill] sm:$0xff] %v16855_v46  ;;  %2335 = vmatprep.mubr.bf16.mxu1 %v21225_v0  ;;  %v2691_v43 = vpack.c.bf16 %v2583_v26, %v2582_v39  ;;  %v2588_v39 = vld [vmem:[%s21492_s0 + $0x160] sm:$0xff] }
 0x3bd   : > { %v3069_v55 = vadd.bf16 %v2769_v49, %v2429_v51  ;;  %v16864_v51 = vpop.f32.mrb[37].mxu1  ;;  %v2592_v26 = vld [vmem:[%s21492_s0 + $0x180] sm:$0xff] }
 0x3be   : > { %v16812_v56 = vmax.bf16 %v21225_v0, %v3068_v54  ;;  %21519 = vst [vmem:[#allocation47_spill] sm:$0xff] %v16864_v51 }
 0x3bf   : > { %v1847_v57 = vpop.f32.mrb[44].mxu0  ;;  %v16816_v58 = vmax.bf16 %v21225_v0, %v3069_v55  ;;  %v16870_v55 = vpop.f32.mrb[38].mxu1 }
 0x3c0   : > { %21507 = vst [vmem:[#allocation35_spill] sm:$0xff] %v16812_v56  ;;  %v1849_v59 = vpop.f32.mrb[45].mxu0  ;;  %21521 = vst [vmem:[#allocation49_spill] sm:$0xff] %v16870_v55 }
 0x3c1   : > { %21508 = vst [vmem:[#allocation36_spill] sm:$0xff] %v16816_v58  ;;  %v1851_v60 = vpop.f32.mrb[46].mxu0  ;;  %v3330_v61 = vmax.bf16 %v16816_v58, %v16812_v56 }
 0x3c2   : > { %v2430_v62 = vpack.c.bf16 %v1851_v60, %v1847_v57  ;;  %v1853_v1 = vpop.f32.mrb[47].mxu0 }
 0x3c3   : > { %v2431_v4 = vpack.c.bf16 %v1853_v1, %v1849_v59  ;;  %3331 = vmax.xlane.bf16.xlu0 %v3330_v61  ;;  %v16872_v59 = vpop.f32.mrb[39].mxu1  ;;  %2336 = vmatmul.mubr.bf16.gmra.mrb[144].mxu1 %v15534_v5 }
 0x3c4   : > { %v3070_v6 = vadd.bf16 %v2774_v3, %v2430_v62  ;;  %21522 = vst [vmem:[#allocation50_spill] sm:$0xff] %v16872_v59  ;;  %2345 = vmatprep.mubr.bf16.mxu1 %v21225_v0 }
 0x3c5   : > { %v3071_v7 = vadd.bf16 %v2774_v3, %v2431_v4  ;;  %v2789_v3 = vpop.permute.xlu0 %2788 }
 0x3c6   : > { %v16824_v8 = vmax.bf16 %v21225_v0, %v3070_v6 }
 0x3c7   : > { %v1857_v9 = vpop.f32.mrb[48].mxu0  ;;  %v16828_v10 = vmax.bf16 %v21225_v0, %v3071_v7 }
 0x3c8   : > { %21509 = vst [vmem:[#allocation37_spill] sm:$0xff] %v16824_v8  ;;  %v1859_v11 = vpop.f32.mrb[49].mxu0 }
 0x3c9   : > { %21510 = vst [vmem:[#allocation38_spill] sm:$0xff] %v16828_v10  ;;  %v1861_v12 = vpop.f32.mrb[50].mxu0  ;;  %v3333_v14 = vmax.bf16 %v16828_v10, %v16824_v8  ;;  %v2576_v8 = vld [vmem:[%s21492_s0 + $0x100] sm:$0xff] }
 0x3ca   : > { %v2432_v16 = vpack.c.bf16 %v1861_v12, %v1857_v9  ;;  %v1863_v17 = vpop.f32.mrb[51].mxu0 }
 0x3cb   : > { %v2433_v19 = vpack.c.bf16 %v1863_v17, %v1859_v11  ;;  %3334 = vmax.xlane.bf16.xlu1 %v3333_v14 }
 0x3cc   : > { %v3072_v21 = vadd.bf16 %v2779_v18, %v2432_v16 }
 0x3cd   : > { %v3073_v22 = vadd.bf16 %v2779_v18, %v2433_v19  ;;  %v16890_v18 = vpop.f32.mrb[40].mxu1 }
 0x3ce   : > { %v16838_v24 = vmax.bf16 %v21225_v0, %v3072_v21  ;;  %21525 = vst [vmem:[#allocation53_spill] sm:$0xff] %v16890_v18  ;;  %v16894_v21 = vpop.f32.mrb[41].mxu1 }
 0x3cf   : > { %v1867_v27 = vpop.f32.mrb[52].mxu0  ;;  %v16844_v29 = vmax.bf16 %v21225_v0, %v3073_v22  ;;  %21526 = vst [vmem:[#allocation54_spill] sm:$0xff] %v16894_v21 }
 0x3d0   : > { %21512 = vst [vmem:[#allocation40_spill] sm:$0xff] %v16838_v24  ;;  %v1869_v31 = vpop.f32.mrb[53].mxu0 }
 0x3d1   : > { %21514 = vst [vmem:[#allocation42_spill] sm:$0xff] %v16844_v29  ;;  %v1871_v33 = vpop.f32.mrb[54].mxu0  ;;  %v3336_v34 = vmax.bf16 %v16844_v29, %v16838_v24  ;;  %v15541_v29 = vld [vmem:[%s21494_s13 + $0x1f8] sm:$0xff]  }
 0x3d2   : > { %v2434_v35 = vpack.c.bf16 %v1871_v33, %v1867_v27  ;;  %v1873_v36 = vpop.f32.mrb[55].mxu0  ;;  %v2794_v33 = vpop.permute.xlu1 %2793 }
 0x3d3   : > { %v2435_v40 = vpack.c.bf16 %v1873_v36, %v1869_v31  ;;  %3337 = vmax.xlane.bf16.xlu0 %v3336_v34  ;;  %v16896_v31 = vpop.f32.mrb[42].mxu1  ;;  %v15535_v36 = vld [vmem:[%s21494_s13 + $0x1c8] sm:$0xff]  }
 0x3d4   : > { %v3074_v44 = vadd.bf16 %v2784_v38, %v2434_v35  ;;  %21527 = vst [vmem:[#allocation55_spill] sm:$0xff] %v16896_v31  ;;  %v16898_v35 = vpop.f32.mrb[43].mxu1  ;;  %2346 = vmatmul.mubr.bf16.gmra.mrb[148].mxu1 %v15535_v36 }
 0x3d5   : > { %v3075_v45 = vadd.bf16 %v2784_v38, %v2435_v40  ;;  %21528 = vst [vmem:[#allocation56_spill] sm:$0xff] %v16898_v35  ;;  %2355 = vmatprep.mubr.bf16.mxu1 %v21225_v0 }
 0x3d6   : > { %v16862_v49 = vmax.bf16 %v21225_v0, %v3074_v44 }
 0x3d7   : > { %v1877_v53 = vpop.f32.mrb[56].mxu0  ;;  %v16868_v54 = vmax.bf16 %v21225_v0, %v3075_v45 }
 0x3d8   : > { %21518 = vst [vmem:[#allocation46_spill] sm:$0xff] %v16862_v49  ;;  %v1879_v57 = vpop.f32.mrb[57].mxu0 }
 0x3d9   : > { %21520 = vst [vmem:[#allocation48_spill] sm:$0xff] %v16868_v54  ;;  %v1881_v60 = vpop.f32.mrb[58].mxu0  ;;  %v3339_v61 = vmax.bf16 %v16868_v54, %v16862_v49 }
 0x3da   : > { %v2436_v62 = vpack.c.bf16 %v1881_v60, %v1877_v53  ;;  %v1883_v1 = vpop.f32.mrb[59].mxu0 }
 0x3db   : > { %v2437_v4 = vpack.c.bf16 %v1883_v1, %v1879_v57  ;;  %3340 = vmax.xlane.bf16.xlu1 %v3339_v61  ;;  %v16914_v61 = vpop.f32.mrb[44].mxu1 }
 0x3dc   : > { %v3076_v6 = vadd.bf16 %v2789_v3, %v2436_v62  ;;  %21531 = vst [vmem:[#allocation59_spill] sm:$0xff] %v16914_v61 }
 0x3dd   : > { %v3077_v7 = vadd.bf16 %v2789_v3, %v2437_v4  ;;  %v16918_v3 = vpop.f32.mrb[45].mxu1 }
 0x3de   : > { %v16884_v12 = vmax.bf16 %v21225_v0, %v3076_v6  ;;  %21532 = vst [vmem:[#allocation60_spill] sm:$0xff] %v16918_v3  ;;  %v16920_v6 = vpop.f32.mrb[46].mxu1 }
 0x3df   : > { %v1887_v14 = vpop.f32.mrb[60].mxu0  ;;  %v16888_v16 = vmax.bf16 %v21225_v0, %v3077_v7  ;;  %21533 = vst [vmem:[#allocation61_spill] sm:$0xff] %v16920_v6  ;;  %v2799_v7 = vpop.permute.xlu0 %2798 }
 0x3e0   : > { %21523 = vst [vmem:[#allocation51_spill] sm:$0xff] %v16884_v12  ;;  %v1889_v17 = vpop.f32.mrb[61].mxu0 }
 0x3e1   : > { %21524 = vst [vmem:[#allocation52_spill] sm:$0xff] %v16888_v16  ;;  %v1891_v19 = vpop.f32.mrb[62].mxu0  ;;  %v3342_v20 = vmax.bf16 %v16888_v16, %v16884_v12 }
 0x3e2   : > { %v2438_v22 = vpack.c.bf16 %v1891_v19, %v1887_v14  ;;  %v1893_v27 = vpop.f32.mrb[63].mxu0  ;;  %v15536_v19 = vld [vmem:[%s21494_s13 + $0x1d0] sm:$0xff]  }
 0x3e3   : > { %v2439_v34 = vpack.c.bf16 %v1893_v27, %v1889_v17  ;;  %3343 = vmax.xlane.bf16.xlu0 %v3342_v20  ;;  %v16922_v17 = vpop.f32.mrb[47].mxu1  ;;  %2356 = vmatmul.mubr.bf16.gmra.mrb[152].mxu1 %v15536_v19 }
 0x3e4   : > { %v3078_v38 = vadd.bf16 %v2794_v33, %v2438_v22  ;;  %21534 = vst [vmem:[#allocation62_spill] sm:$0xff] %v16922_v17  ;;  %2365 = vmatprep.mubr.bf16.mxu1 %v21225_v0 }
 0x3e5   : > { %v3079_v40 = vadd.bf16 %v2794_v33, %v2439_v34 }
 0x3e6   : > { %v16908_v45 = vmax.bf16 %v21225_v0, %v3078_v38 }
 0x3e7   : > { %v1897_v53 = vpop.f32.mrb[64].mxu0  ;;  %v16912_v57 = vmax.bf16 %v21225_v0, %v3079_v40 }
 0x3e8   : > { %21529 = vst [vmem:[#allocation57_spill] sm:$0xff] %v16908_v45  ;;  %v1899_v60 = vpop.f32.mrb[65].mxu0 }
 0x3e9   : > { %21530 = vst [vmem:[#allocation58_spill] sm:$0xff] %v16912_v57  ;;  %v1901_v62 = vpop.f32.mrb[66].mxu0  ;;  %v3345_v1 = vmax.bf16 %v16912_v57, %v16908_v45 }
 0x3ea   : > { %v2440_v4 = vpack.c.bf16 %v1901_v62, %v1897_v53  ;;  %v1903_v5 = vpop.f32.mrb[67].mxu0  ;;  %v16938_v53 = vpop.f32.mrb[48].mxu1 }
 0x3eb   : > { %v2441_v14 = vpack.c.bf16 %v1903_v5, %v1899_v60  ;;  %3346 = vmax.xlane.bf16.xlu1 %v3345_v1  ;;  %21537 = vst [vmem:[#allocation65_spill] sm:$0xff] %v16938_v53  ;;  %v16942_v1 = vpop.f32.mrb[49].mxu1 }
 0x3ec   : > { %v3080_v20 = vadd.bf16 %v2799_v7, %v2440_v4  ;;  %21538 = vst [vmem:[#allocation66_spill] sm:$0xff] %v16942_v1 }
 0x3ed   : > { %v3081_v22 = vadd.bf16 %v2799_v7, %v2441_v14  ;;  %v16944_v7 = vpop.f32.mrb[50].mxu1  ;;  %v2804_v14 = vpop.permute.xlu1 %2803 }
 0x3ee   : > { %v16932_v34 = vmax.bf16 %v21225_v0, %v3080_v20  ;;  %21539 = vst [vmem:[#allocation67_spill] sm:$0xff] %v16944_v7  ;;  %v16946_v20 = vpop.f32.mrb[51].mxu1 }
 0x3ef   : > { %v1907_v36 = vpop.f32.mrb[68].mxu0  ;;  %v16936_v38 = vmax.bf16 %v21225_v0, %v3081_v22  ;;  %21540 = vst [vmem:[#allocation68_spill] sm:$0xff] %v16946_v20  ;;  %v15537_v22 = vld [vmem:[%s21494_s13 + $0x1d8] sm:$0xff]   ;;  %v16962_v42 = vpop.f32.mrb[52].mxu1 }
 0x3f0   : > { %21535 = vst [vmem:[#allocation63_spill] sm:$0xff] %v16932_v34  ;;  %v1909_v40 = vpop.f32.mrb[69].mxu0  ;;  %2366 = vmatmul.mubr.bf16.gmra.mrb[156].mxu1 %v15537_v22  ;;  %21543 = vst [vmem:[#allocation71_spill] sm:$0xff] %v16962_v42  ;;  %v2606_v42 = vld [vmem:[%s21492_s0 + $0x1f0] sm:$0xff] }
 0x3f1   : > { %21536 = vst [vmem:[#allocation64_spill] sm:$0xff] %v16936_v38  ;;  %v1911_v60 = vpop.f32.mrb[70].mxu0  ;;  %v3348_v62 = vmax.bf16 %v16936_v38, %v16932_v34  ;;  %2375 = vmatprep.mubr.bf16.mxu1 %v21225_v0 }
 0x3f2   : > { %v2442_v4 = vpack.c.bf16 %v1911_v60, %v1907_v36  ;;  %v1913_v5 = vpop.f32.mrb[71].mxu0 }
 0x3f3   : > { %v2443_v19 = vpack.c.bf16 %v1913_v5, %v1909_v40  ;;  %3349 = vmax.xlane.bf16.xlu0 %v3348_v62 }
 0x3f4   : > { %v3082_v33 = vadd.bf16 %v2804_v14, %v2442_v4 }
 0x3f5   : > { %v3083_v27 = vadd.bf16 %v2804_v14, %v2443_v19  ;;  %v16966_v19 = vpop.f32.mrb[53].mxu1 }
 0x3f6   : > { %v16956_v60 = vmax.bf16 %v21225_v0, %v3082_v33  ;;  %21544 = vst [vmem:[#allocation72_spill] sm:$0xff] %v16966_v19  ;;  %v16968_v44 = vpop.f32.mrb[54].mxu1  ;;  %v2809_v33 = vpop.permute.xlu0 %2808  ;;  %v2602_v19 = vld [vmem:[%s21492_s0 + $0x1d0] sm:$0xff] }
 0x3f7   : > { %v1917_v40 = vpop.f32.mrb[72].mxu0  ;;  %v16960_v62 = vmax.bf16 %v21225_v0, %v3083_v27  ;;  %21545 = vst [vmem:[#allocation73_spill] sm:$0xff] %v16968_v44  ;;  %v16970_v9 = vpop.f32.mrb[55].mxu1  ;;  %v15538_v27 = vld [vmem:[%s21494_s13 + $0x1e0] sm:$0xff]  }
 0x3f8   : > { %21541 = vst [vmem:[#allocation69_spill] sm:$0xff] %v16956_v60  ;;  %v1919_v5 = vpop.f32.mrb[73].mxu0  ;;  %21546 = vst [vmem:[#allocation74_spill] sm:$0xff] %v16970_v9  ;;  %2376 = vmatmul.mubr.bf16.gmra.mrb[160].mxu1 %v15538_v27 }
 0x3f9   : > { %21542 = vst [vmem:[#allocation70_spill] sm:$0xff] %v16960_v62  ;;  %v1921_v4 = vpop.f32.mrb[74].mxu0  ;;  %v3351_v14 = vmax.bf16 %v16960_v62, %v16956_v60  ;;  %v16986_v62 = vpop.f32.mrb[56].mxu1 }
 0x3fa   : > { %v2444_v22 = vpack.c.bf16 %v1921_v4, %v1917_v40  ;;  %v1923_v36 = vpop.f32.mrb[75].mxu0  ;;  %v21547_v4 = vmov 0   ;;  %21550 = vst [vmem:[#allocation77_spill] sm:$0xff] %v16986_v62  ;;  %v2598_v62 = vld [vmem:[%s21492_s0 + $0x1b0] sm:$0xff] }
 0x3fb   : > { %v2445_v11 = vpack.c.bf16 %v1923_v36, %v1919_v5  ;;  %3352 = vmax.xlane.bf16.xlu1 %v3351_v14  ;;  %2385 = vmatprep.mubr.bf16.mxu1 %v21547_v4 }
 0x3fc   : > { %v3084_v48 = vadd.bf16 %v2809_v33, %v2444_v22 }
 0x3fd   : > { %v3085_v47 = vadd.bf16 %v2809_v33, %v2445_v11  ;;  %v16990_v33 = vpop.f32.mrb[57].mxu1 }
 0x3fe   : > { %v16980_v60 = vmax.bf16 %v21547_v4, %v3084_v48  ;;  %21551 = vst [vmem:[#allocation78_spill] sm:$0xff] %v16990_v33  ;;  %v16992_v0 = vpop.f32.mrb[58].mxu1  ;;  %v2814_v48 = vpop.permute.xlu1 %2813  ;;  %v2594_v33 = vld [vmem:[%s21492_s0 + $0x190] sm:$0xff] }
 0x3ff   : > { %v1927_v36 = vpop.f32.mrb[76].mxu0  ;;  %v16984_v5 = vmax.bf16 %v21547_v4, %v3085_v47  ;;  %21552 = vst [vmem:[#allocation79_spill] sm:$0xff] %v16992_v0  ;;  %v16994_v38 = vpop.f32.mrb[59].mxu1  ;;  %v15539_v47 = vld [vmem:[%s21494_s13 + $0x1e8] sm:$0xff]  }
 0x400   : > { %21548 = vst [vmem:[#allocation75_spill] sm:$0xff] %v16980_v60  ;;  %v1929_v14 = vpop.f32.mrb[77].mxu0  ;;  %21553 = vst [vmem:[#allocation80_spill] sm:$0xff] %v16994_v38  ;;  %2386 = vmatmul.mubr.bf16.gmra.mrb[164].mxu1 %v15539_v47 }
 0x401   : > { %21549 = vst [vmem:[#allocation76_spill] sm:$0xff] %v16984_v5  ;;  %v1931_v11 = vpop.f32.mrb[78].mxu0  ;;  %v3354_v22 = vmax.bf16 %v16984_v5, %v16980_v60  ;;  %2395 = vmatprep.mubr.bf16.mxu1 %v21547_v4 }
 0x402   : > { %v2446_v27 = vpack.c.bf16 %v1931_v11, %v1927_v36  ;;  %v1933_v40 = vpop.f32.mrb[79].mxu0 }
 0x403   : > { %v2447_v34 = vpack.c.bf16 %v1933_v40, %v1929_v14  ;;  %3355 = vmax.xlane.bf16.xlu0 %v3354_v22 }
 0x404   : > { %v3086_v45 = vadd.bf16 %v2814_v48, %v2446_v27 }
 0x405   : > { %v3087_v57 = vadd.bf16 %v2814_v48, %v2447_v34  ;;  %v17014_v34 = vpop.f32.mrb[60].mxu1 }
 0x406   : > { %v17004_v11 = vmax.bf16 %v21547_v4, %v3086_v45  ;;  %21556 = vst [vmem:[#allocation83_spill] sm:$0xff] %v17014_v34  ;;  %v17020_v47 = vpop.f32.mrb[61].mxu1  ;;  %v2580_v45 = vld [vmem:[%s21492_s0 + $0x120] sm:$0xff]  ;;  %v2590_v34 = vld [vmem:[%s21492_s0 + $0x170] sm:$0xff] }
 0x407   : > { %v17008_v40 = vmax.bf16 %v21547_v4, %v3087_v57  ;;  %v17010_v14 = vpop.f32.mrb[80].mxu0  ;;  %21557 = vst [vmem:[#allocation84_spill] sm:$0xff] %v17020_v47  ;;  %v17026_v57 = vpop.f32.mrb[62].mxu1 }
 0x408   : > { %21554 = vst [vmem:[#allocation81_spill] sm:$0xff] %v17004_v11  ;;  %v17012_v22 = vpop.f32.mrb[81].mxu0  ;;  %21558 = vst [vmem:[#allocation85_spill] sm:$0xff] %v17026_v57  ;;  %v17030_v5 = vpop.f32.mrb[63].mxu1 }
 0x409   : > { %21555 = vst [vmem:[#allocation82_spill] sm:$0xff] %v17008_v40  ;;  %v3357_v27 = vmax.bf16 %v17008_v40, %v17004_v11  ;;  %v17018_v48 = vpop.f32.mrb[82].mxu0  ;;  %21559 = vst [vmem:[#allocation86_spill] sm:$0xff] %v17030_v5  ;;  %v15540_v11 = vld [vmem:[%s21494_s13 + $0x1f0] sm:$0xff]   ;;  %v17044_v60 = vpop.f32.mrb[64].mxu1 }
 0x40a   : > { %v17024_v36 = vpop.f32.mrb[83].mxu0  ;;  %2396 = vmatmul.mubr.bf16.gmra.mrb[168].mxu1 %v15540_v11  ;;  %21560 = vst [vmem:[#allocation87_spill] sm:$0xff] %v17044_v60  ;;  %v17048_v49 = vpop.f32.mrb[65].mxu1  ;;  %v2577_v11 = vld [vmem:[%s21492_s0 + $0x108] sm:$0xff]  ;;  %v2586_v5 = vld [vmem:[%s21492_s0 + $0x150] sm:$0xff] }
 0x40b   : > { %3358 = vmax.xlane.bf16.xlu1 %v3357_v27  ;;  %2405 = vmatprep.mubr.bf16.mxu1 %v21547_v4  ;;  %21561 = vst [vmem:[#allocation88_spill] sm:$0xff] %v17048_v49  ;;  %v17054_v40 = vpop.f32.mrb[66].mxu1  ;;  %v2584_v49 = vld [vmem:[%s21492_s0 + $0x140] sm:$0xff] }
 0x40c   : > { %21562 = vst [vmem:[#allocation89_spill] sm:$0xff] %v17054_v40  ;;  %v17058_v24 = vpop.f32.mrb[67].mxu1 }
 0x40d   : > { %21563 = vst [vmem:[#allocation90_spill] sm:$0xff] %v17058_v24  ;;  %v17077_v41 = vpop.f32.mrb[68].mxu1 }
 0x40e   : > { %21564 = vst [vmem:[#allocation91_spill] sm:$0xff] %v17077_v41  ;;  %v17087_v10 = vpop.f32.mrb[69].mxu1 }
 0x40f   : > { %v17040_v12 = vpop.f32.mrb[84].mxu0  ;;  %21565 = vst [vmem:[#allocation92_spill] sm:$0xff] %v17087_v10  ;;  %v17099_v15 = vpop.f32.mrb[70].mxu1 }
 0x410   : > { %v17042_v27 = vpop.f32.mrb[85].mxu0  ;;  %21566 = vst [vmem:[#allocation93_spill] sm:$0xff] %v17099_v15  ;;  %v17103_v2 = vpop.f32.mrb[71].mxu1 }
 0x411   : > { %v17046_v16 = vpop.f32.mrb[86].mxu0  ;;  %21567 = vst [vmem:[#allocation94_spill] sm:$0xff] %v17103_v2  ;;  %v17139_v40 = vpop.f32.mrb[72].mxu1 }
 0x412   : > { %v17052_v54 = vpop.f32.mrb[87].mxu0  ;;  %2406 = vmatmul.mubr.bf16.gmra.mrb[172].mxu1 %v15541_v29  ;;  %v2688_v29 = vpack.c.bf16 %v2577_v11, %v2576_v8  ;;  %v2581_v8 = vld [vmem:[%s21492_s0 + $0x128] sm:$0xff]  ;;  %21568 = vst [vmem:[#allocation95_spill] sm:$0xff] %v17139_v40  ;;  %v17149_v10 = vpop.f32.mrb[73].mxu1 }
 0x413   : > { %v2690_v11 = vpack.c.bf16 %v2581_v8, %v2580_v45  ;;  %v2585_v45 = vld [vmem:[%s21492_s0 + $0x148] sm:$0xff]  ;;  %5072 = vmatprep.mubr.bf16.mxu1 %v13279_v63  ;;  %21569 = vst [vmem:[#allocation96_spill] sm:$0xff] %v17149_v10  ;;  %v2591_v63 = vld [vmem:[%s21492_s0 + $0x178] sm:$0xff] }
 0x414   : > { %v2692_v47 = vpack.c.bf16 %v2585_v45, %v2584_v49 }
 0x417   : > { %v17073_v56 = vpop.f32.mrb[88].mxu0 }
 0x418   : > { %v17075_v58 = vpop.f32.mrb[89].mxu0 }
 0x419   : > { %v17085_v28 = vpop.f32.mrb[90].mxu0 }
 0x41a   : > { %v17097_v13 = vpop.f32.mrb[91].mxu0 }
 0x41d   : > { %2818 = vperm.xlu0 %15462, %v2688_v29   ;;  %v2587_v29 = vld [vmem:[%s21492_s0 + $0x158] sm:$0xff] }
 0x41e   : > { %v2693_v41 = vpack.c.bf16 %v2587_v29, %v2586_v5  ;;  %v2695_v29 = vpack.c.bf16 %v2591_v63, %v2590_v34  ;;  %v2595_v5 = vld [vmem:[%s21492_s0 + $0x198] sm:$0xff] }
 0x41f   : > { %v17135_v24 = vpop.f32.mrb[92].mxu0  ;;  %v2599_v63 = vld [vmem:[%s21492_s0 + $0x1b8] sm:$0xff] }
 0x420   : > { %2823 = vperm.xlu1 %15463, %v2689_v50   ;;  %v17137_v60 = vpop.f32.mrb[93].mxu0  ;;  %v2589_v50 = vld [vmem:[%s21492_s0 + $0x168] sm:$0xff] }
 0x421   : > { %2828 = vperm.xlu0 %15462, %v2690_v11   ;;  %v17147_v8 = vpop.f32.mrb[94].mxu0  ;;  %v17161_v11 = vpop.f32.mrb[74].mxu1  ;;  %v2694_v15 = vpack.c.bf16 %v2589_v50, %v2588_v39 }
 0x422   : > { %v17159_v49 = vpop.f32.mrb[95].mxu0  ;;  %21570 = vst [vmem:[#allocation97_spill] sm:$0xff] %v17161_v11  ;;  %v17165_v45 = vpop.f32.mrb[75].mxu1  ;;  %v2697_v11 = vpack.c.bf16 %v2595_v5, %v2594_v33  ;;  %v2601_v33 = vld [vmem:[%s21492_s0 + $0x1c8] sm:$0xff] }
 0x423   : > { %21571 = vst [vmem:[#allocation98_spill] sm:$0xff] %v17165_v45  ;;  %v17188_v50 = vpop.f32.mrb[76].mxu1 }
 0x424   : > { %v3314_v2 = vpop.xlane.xlu0 %3313  ;;  %2833 = vperm.xlu1 %15463, %v2691_v43   ;;  %21572 = vst [vmem:[#allocation99_spill] sm:$0xff] %v17188_v50 }
 0x425   : > { %5041 = vmatpush1.bf16.msra.mxu1 %v3314_v2  ;;  %2838 = vperm.xlu0 %15462, %v2692_v47   ;;  %v2593_v2 = vld [vmem:[%s21492_s0 + $0x188] sm:$0xff]  ;;  %v17198_v47 = vpop.f32.mrb[77].mxu1 }
 0x426   : > { %5042 = vmatprep.subr.bf16.mxu1 %v21547_v4  ;;  %v2696_v57 = vpack.c.bf16 %v2593_v2, %v2592_v26  ;;  %21573 = vst [vmem:[#allocation100_spill] sm:$0xff] %v17198_v47  ;;  %v17210_v26 = vpop.f32.mrb[78].mxu1  ;;  %v2600_v2 = vld [vmem:[%s21492_s0 + $0x1c0] sm:$0xff] }
 0x427   : > { %v17184_v43 = vpop.f32.mrb[96].mxu0  ;;  %21574 = vst [vmem:[#allocation101_spill] sm:$0xff] %v17210_v26  ;;  %v17214_v10 = vpop.f32.mrb[79].mxu1  ;;  %v2700_v0 = vpack.c.bf16 %v2601_v33, %v2600_v2 }
 0x428   : > { %2843 = vperm.xlu1 %15463, %v2693_v41   ;;  %v17186_v39 = vpop.f32.mrb[97].mxu0  ;;  %v2596_v41 = vld [vmem:[%s21492_s0 + $0x1a0] sm:$0xff]  ;;  %21575 = vst [vmem:[#allocation102_spill] sm:$0xff] %v17214_v10 }
 0x429   : > { %2848 = vperm.xlu0 %15462, %v2694_v15   ;;  %v17196_v40 = vpop.f32.mrb[98].mxu0  ;;  %v2597_v15 = vld [vmem:[%s21492_s0 + $0x1a8] sm:$0xff] }
 0x42a   : > { %v17206_v34 = vpop.f32.mrb[99].mxu0  ;;  %v2698_v38 = vpack.c.bf16 %v2597_v15, %v2596_v41  ;;  %v17237_v15 = vpop.f32.mrb[80].mxu1 }
 0x42b   : > { %21576 = vst [vmem:[#allocation103_spill] sm:$0xff] %v17237_v15 }
 0x42c   : > { %v3317_v45 = vpop.xlane.xlu1 %3316  ;;  %2853 = vperm.xlu1 %15463, %v2695_v29   ;;  %v2699_v29 = vpack.c.bf16 %v2599_v63, %v2598_v62  ;;  %v2604_v62 = vld [vmem:[%s21492_s0 + $0x1e0] sm:$0xff]  ;;  %v2607_v63 = vld [vmem:[%s21492_s0 + $0x1f8] sm:$0xff] }
 0x42d   : > { %5043 = vmatpush1.bf16.msra.mxu1 %v3317_v45  ;;  %2858 = vperm.xlu0 %15462, %v2696_v57   ;;  %v2603_v57 = vld [vmem:[%s21492_s0 + $0x1d8] sm:$0xff]  ;;  %v17247_v45 = vpop.f32.mrb[81].mxu1 }
 0x42e   : > { %5044 = vmatprep.subr.bf16.mxu1 %v21547_v4  ;;  %21577 = vst [vmem:[#allocation104_spill] sm:$0xff] %v17247_v45  ;;  %v17259_v2 = vpop.f32.mrb[82].mxu1  ;;  %v2701_v26 = vpack.c.bf16 %v2603_v57, %v2602_v19 }
 0x42f   : > { %v17233_v5 = vpop.f32.mrb[100].mxu0  ;;  %21578 = vst [vmem:[#allocation105_spill] sm:$0xff] %v17259_v2  ;;  %v17263_v47 = vpop.f32.mrb[83].mxu1 }
 0x430   : > { %2863 = vperm.xlu1 %15463, %v2697_v11   ;;  %v17235_v41 = vpop.f32.mrb[101].mxu0  ;;  %21579 = vst [vmem:[#allocation106_spill] sm:$0xff] %v17263_v47  ;;  %v17280_v57 = vpop.f32.mrb[84].mxu1 }
 0x431   : > { %2868 = vperm.xlu0 %15462, %v2698_v38   ;;  %v17245_v50 = vpop.f32.mrb[102].mxu0  ;;  %v2605_v38 = vld [vmem:[%s21492_s0 + $0x1e8] sm:$0xff]  ;;  %21580 = vst [vmem:[#allocation107_spill] sm:$0xff] %v17280_v57 }
 0x432   : > { %v17255_v11 = vpop.f32.mrb[103].mxu0  ;;  %v2702_v9 = vpack.c.bf16 %v2605_v38, %v2604_v62  ;;  %v17284_v38 = vpop.f32.mrb[85].mxu1 }
 0x433   : > { %21581 = vst [vmem:[#allocation108_spill] sm:$0xff] %v17284_v38  ;;  %v17290_v15 = vpop.f32.mrb[86].mxu1 }
 0x434   : > { %v3320_v10 = vpop.xlane.xlu0 %3319  ;;  %2873 = vperm.xlu1 %15463, %v2699_v29   ;;  %21582 = vst [vmem:[#allocation109_spill] sm:$0xff] %v17290_v15 }
 0x435   : > { %5045 = vmatpush1.bf16.msra.mxu1 %v3320_v10  ;;  %2878 = vperm.xlu0 %15462, %v2700_v0   ;;  %v2703_v0 = vpack.c.bf16 %v2607_v63, %v2606_v42  ;;  %v17294_v42 = vpop.f32.mrb[87].mxu1 }
 0x436   : > { %5046 = vmatprep.subr.bf16.mxu1 %v21547_v4  ;;  %21583 = vst [vmem:[#allocation110_spill] sm:$0xff] %v17294_v42  ;;  %v17305_v47 = vpop.f32.mrb[88].mxu1 }
 0x437   : > { %v17276_v19 = vpop.f32.mrb[104].mxu0  ;;  %21584 = vst [vmem:[#allocation111_spill] sm:$0xff] %v17305_v47  ;;  %v17309_v2 = vpop.f32.mrb[89].mxu1 }
 0x438   : > { %2883 = vperm.xlu1 %15463, %v2701_v26   ;;  %v17278_v10 = vpop.f32.mrb[105].mxu0  ;;  %21585 = vst [vmem:[#allocation112_spill] sm:$0xff] %v17309_v2  ;;  %v17315_v1 = vpop.f32.mrb[90].mxu1 }
 0x439   : > { %2888 = vperm.xlu0 %15462, %v2702_v9   ;;  %v17282_v62 = vpop.f32.mrb[106].mxu0  ;;  %21586 = vst [vmem:[#allocation113_spill] sm:$0xff] %v17315_v1  ;;  %v17319_v9 = vpop.f32.mrb[91].mxu1 }
 0x43a   : > { %v17286_v44 = vpop.f32.mrb[107].mxu0  ;;  %21587 = vst [vmem:[#allocation114_spill] sm:$0xff] %v17319_v9  ;;  %v17330_v20 = vpop.f32.mrb[92].mxu1 }
 0x43b   : > { %21588 = vst [vmem:[#allocation115_spill] sm:$0xff] %v17330_v20  ;;  %v17334_v29 = vpop.f32.mrb[93].mxu1 }
 0x43c   : > { %v3323_v63 = vpop.xlane.xlu1 %3322  ;;  %2893 = vperm.xlu1 %15463, %v2703_v0   ;;  %21589 = vst [vmem:[#allocation116_spill] sm:$0xff] %v17334_v29  ;;  %v17340_v3 = vpop.f32.mrb[94].mxu1 }
 0x43d   : > { %5047 = vmatpush1.bf16.msra.mxu1 %v3323_v63  ;;  %21590 = vst [vmem:[#allocation117_spill] sm:$0xff] %v17340_v3  ;;  %v17344_v42 = vpop.f32.mrb[95].mxu1 }
 0x43e   : > { %5048 = vmatprep.subr.bf16.mxu1 %v21547_v4  ;;  %21591 = vst [vmem:[#allocation118_spill] sm:$0xff] %v17344_v42  ;;  %v17355_v17 = vpop.f32.mrb[96].mxu1 }
 0x43f   : > { %v17301_v45 = vpop.f32.mrb[108].mxu0  ;;  %21592 = vst [vmem:[#allocation119_spill] sm:$0xff] %v17355_v17  ;;  %v17359_v57 = vpop.f32.mrb[97].mxu1 }
 0x440   : > { %v17303_v33 = vpop.f32.mrb[109].mxu0  ;;  %21593 = vst [vmem:[#allocation120_spill] sm:$0xff] %v17359_v57  ;;  %v17365_v21 = vpop.f32.mrb[98].mxu1 }
 0x441   : > { %v17307_v26 = vpop.f32.mrb[110].mxu0  ;;  %21594 = vst [vmem:[#allocation121_spill] sm:$0xff] %v17365_v21  ;;  %v17369_v9 = vpop.f32.mrb[99].mxu1 }
 0x442   : > { %v17311_v0 = vpop.f32.mrb[111].mxu0  ;;  %21595 = vst [vmem:[#allocation122_spill] sm:$0xff] %v17369_v9  ;;  %v17380_v35 = vpop.f32.mrb[100].mxu1 }
 0x443   : > { %21596 = vst [vmem:[#allocation123_spill] sm:$0xff] %v17380_v35  ;;  %v17384_v47 = vpop.f32.mrb[101].mxu1 }
 0x444   : > { %v3326_v38 = vpop.xlane.xlu0 %3325  ;;  %21597 = vst [vmem:[#allocation124_spill] sm:$0xff] %v17384_v47  ;;  %v17390_v51 = vpop.f32.mrb[102].mxu1 }
 0x445   : > { %5049 = vmatpush1.bf16.msra.mxu1 %v3326_v38  ;;  %21598 = vst [vmem:[#allocation125_spill] sm:$0xff] %v17390_v51  ;;  %v17394_v42 = vpop.f32.mrb[103].mxu1 }
 0x446   : > { %5050 = vmatprep.subr.bf16.mxu1 %v21547_v4  ;;  %21599 = vst [vmem:[#allocation126_spill] sm:$0xff] %v17394_v42  ;;  %v17405_v59 = vpop.f32.mrb[104].mxu1 }
 0x447   : > { %v17326_v15 = vpop.f32.mrb[112].mxu0  ;;  %21601 = vst [vmem:[#allocation128_spill] sm:$0xff] %v17405_v59  ;;  %v17409_v20 = vpop.f32.mrb[105].mxu1 }
 0x448   : > { %v17328_v63 = vpop.f32.mrb[113].mxu0  ;;  %21602 = vst [vmem:[#allocation129_spill] sm:$0xff] %v17409_v20  ;;  %v17415_v25 = vpop.f32.mrb[106].mxu1 }
 0x449   : > { %v17332_v53 = vpop.f32.mrb[114].mxu0  ;;  %21604 = vst [vmem:[#allocation131_spill] sm:$0xff] %v17415_v25  ;;  %v17419_v9 = vpop.f32.mrb[107].mxu1 }
 0x44a   : > { %v17336_v7 = vpop.f32.mrb[115].mxu0  ;;  %21605 = vst [vmem:[#allocation132_spill] sm:$0xff] %v17419_v9  ;;  %v17426_v51 = vpop.f32.mrb[108].mxu1 }
 0x44b   : > { %21606 = vst [vmem:[#allocation133_spill] sm:$0xff] %v17426_v51 }
 0x44c   : > { %v3329_v2 = vpop.xlane.xlu1 %3328 }
 0x44d   : > { %5051 = vmatpush1.bf16.msra.mxu1 %v3329_v2 }
 0x44e   : > { %5052 = vmatprep.subr.bf16.mxu1 %v21547_v4 }
 0x44f   : > { %v17351_v1 = vpop.f32.mrb[116].mxu0 }
 0x450   : > { %v17353_v38 = vpop.f32.mrb[117].mxu0 }
 0x451   : > { %v17357_v61 = vpop.f32.mrb[118].mxu0 }
 0x452   : > { %v17361_v6 = vpop.f32.mrb[119].mxu0 }
 0x454   : > { %v3332_v29 = vpop.xlane.xlu0 %3331 }
 0x455   : > { %5053 = vmatpush1.bf16.msra.mxu1 %v3332_v29 }
 0x456   : > { %5054 = vmatprep.subr.bf16.mxu1 %v21547_v4 }
 0x457   : > { %v17376_v3 = vpop.f32.mrb[120].mxu0 }
 0x458   : > { %v17378_v2 = vpop.f32.mrb[121].mxu0 }
 0x459   : > { %v17382_v18 = vpop.f32.mrb[122].mxu0 }
 0x45a   : > { %v17386_v31 = vpop.f32.mrb[123].mxu0 }
 0x45c   : > { %v3335_v57 = vpop.xlane.xlu1 %3334 }
 0x45d   : > { %5055 = vmatpush1.bf16.msra.mxu1 %v3335_v57  ;;  %v17428_v57 = vpop.f32.mrb[109].mxu1 }
 0x45e   : > { %5056 = vmatprep.subr.bf16.mxu1 %v21547_v4  ;;  %21607 = vst [vmem:[#allocation134_spill] sm:$0xff] %v17428_v57  ;;  %v17430_v32 = vpop.f32.mrb[110].mxu1 }
 0x45f   : > { %v17401_v21 = vpop.f32.mrb[124].mxu0  ;;  %21608 = vst [vmem:[#allocation135_spill] sm:$0xff] %v17430_v32  ;;  %v17432_v23 = vpop.f32.mrb[111].mxu1  ;;  %v21633_v32 = vpack.c.bf16 %v17024_v36, %v17012_v22  ;;  %v21637_v36 = vpack.c.bf16 %v17085_v28, %v17073_v56  ;;  %v3520_v28 = vld [vmem:[%s21190_s7 + $0x80] sm:$0xff] }
 0x460   : > { %v17403_v29 = vpop.f32.mrb[125].mxu0  ;;  %21609 = vst [vmem:[#allocation136_spill] sm:$0xff] %v17432_v23  ;;  %v17439_v59 = vpop.f32.mrb[112].mxu1 }
 0x461   : > { %21600 = vst [vmem:[#allocation127_spill] sm:$0xff] %v17403_v29  ;;  %v17407_v46 = vpop.f32.mrb[126].mxu0  ;;  %21610 = vst [vmem:[#allocation137_spill] sm:$0xff] %v17439_v59  ;;  %v17441_v35 = vpop.f32.mrb[113].mxu1 }
 0x462   : > { %v17411_v55 = vpop.f32.mrb[127].mxu0  ;;  %21611 = vst [vmem:[#allocation138_spill] sm:$0xff] %v17441_v35  ;;  %v17443_v20 = vpop.f32.mrb[114].mxu1 }
 0x463   : > { %21603 = vst [vmem:[#allocation130_spill] sm:$0xff] %v17411_v55  ;;  %21612 = vst [vmem:[#allocation139_spill] sm:$0xff] %v17443_v20  ;;  %v17447_v25 = vpop.f32.mrb[115].mxu1 }
 0x464   : > { %v3338_v47 = vpop.xlane.xlu0 %3337  ;;  %21613 = vst [vmem:[#allocation140_spill] sm:$0xff] %v17447_v25 }
 0x465   : > { %5057 = vmatpush1.bf16.msra.mxu1 %v3338_v47  ;;  %v17452_v47 = vpop.f32.mrb[116].mxu1 }
 0x466   : > { %5058 = vmatprep.subr.bf16.mxu1 %v21547_v4  ;;  %21614 = vst [vmem:[#allocation141_spill] sm:$0xff] %v17452_v47  ;;  %v17454_v42 = vpop.f32.mrb[117].mxu1 }
 0x467   : > { %21615 = vst [vmem:[#allocation142_spill] sm:$0xff] %v17454_v42  ;;  %v17456_v57 = vpop.f32.mrb[118].mxu1 }
 0x468   : > { %21616 = vst [vmem:[#allocation143_spill] sm:$0xff] %v17456_v57  ;;  %v17460_v51 = vpop.f32.mrb[119].mxu1 }
 0x469   : > { %21617 = vst [vmem:[#allocation144_spill] sm:$0xff] %v17460_v51 }
 0x46c   : > { %v3341_v17 = vpop.xlane.xlu1 %3340 }
 0x46d   : > { %5059 = vmatpush1.bf16.msra.mxu1 %v3341_v17 }
 0x46e   : > { %5060 = vmatprep.subr.bf16.mxu1 %v21547_v4 }
 0x474   : > { %v3344_v17 = vpop.xlane.xlu0 %3343 }
 0x475   : > { %5061 = vmatpush1.bf16.msra.mxu1 %v3344_v17  ;;  %v17465_v17 = vpop.f32.mrb[120].mxu1 }
 0x476   : > { %5062 = vmatprep.subr.bf16.mxu1 %v21547_v4  ;;  %21618 = vst [vmem:[#allocation145_spill] sm:$0xff] %v17465_v17  ;;  %v17467_v30 = vpop.f32.mrb[121].mxu1 }
 0x477   : > { %21619 = vst [vmem:[#allocation146_spill] sm:$0xff] %v17467_v30  ;;  %v17469_v35 = vpop.f32.mrb[122].mxu1 }
 0x478   : > { %21620 = vst [vmem:[#allocation147_spill] sm:$0xff] %v17469_v35  ;;  %v17473_v20 = vpop.f32.mrb[123].mxu1 }
 0x479   : > { %21621 = vst [vmem:[#allocation148_spill] sm:$0xff] %v17473_v20  ;;  %v3516_v20 = vld [vmem:[%s21190_s7 + $0x60] sm:$0xff] }
 0x47c   : > { %v3347_v9 = vpop.xlane.xlu1 %3346 }
 0x47d   : > { %5063 = vmatpush1.bf16.msra.mxu1 %v3347_v9  ;;  %v17478_v9 = vpop.f32.mrb[124].mxu1 }
 0x47e   : > { %5064 = vmatprep.subr.bf16.mxu1 %v21547_v4  ;;  %21622 = vst [vmem:[#allocation149_spill] sm:$0xff] %v17478_v9  ;;  %v17480_v59 = vpop.f32.mrb[125].mxu1 }
 0x47f   : > { %21623 = vst [vmem:[#allocation150_spill] sm:$0xff] %v17480_v59  ;;  %v17482_v42 = vpop.f32.mrb[126].mxu1  ;;  %v3512_v59 = vld [vmem:[%s21190_s7 + $0x40] sm:$0xff] }
 0x480   : > { %21624 = vst [vmem:[#allocation151_spill] sm:$0xff] %v17482_v42  ;;  %v17486_v57 = vpop.f32.mrb[127].mxu1  ;;  %v13287_v55 = vcombine.high %v3512_v59, %v3516_v20 }
 0x481   : > { %21625 = vst [vmem:[#allocation152_spill] sm:$0xff] %v17486_v57  ;;  %v21632_v57 = vpack.c.bf16 %v17018_v48, %v17010_v14  ;;  %v21639_v48 = vpack.c.bf16 %v17046_v16, %v17040_v12  ;;  %v13286_v12 = vcombine.low %v3512_v59, %v3516_v20  ;;  %v21646_v59 = vpack.c.bf16 %v17159_v49, %v17137_v60 }
 0x484   : > { %v3350_v23 = vpop.xlane.xlu0 %3349 }
 0x485   : > { %5065 = vmatpush1.bf16.msra.mxu1 %v3350_v23  ;;  %v17491_v23 = vpop.f32.mrb[128].mxu1 }
 0x486   : > { %5066 = vmatprep.subr.bf16.mxu1 %v21547_v4  ;;  %21626 = vst [vmem:[#allocation153_spill] sm:$0xff] %v17491_v23  ;;  %v17493_v47 = vpop.f32.mrb[129].mxu1 }
 0x487   : > { %21627 = vst [vmem:[#allocation154_spill] sm:$0xff] %v17493_v47  ;;  %v17495_v30 = vpop.f32.mrb[130].mxu1 }
 0x488   : > { %21628 = vst [vmem:[#allocation155_spill] sm:$0xff] %v17495_v30  ;;  %v17499_v35 = vpop.f32.mrb[131].mxu1  ;;  %v21636_v30 = vcombine.low %v17108_v52, %v17113_v37 }
 0x489   : > { %21629 = vst [vmem:[#allocation156_spill] sm:$0xff] %v17499_v35 }
 0x48c   : > { %v3353_v25 = vpop.xlane.xlu1 %3352 }
 0x48d   : > { %5067 = vmatpush1.bf16.msra.mxu1 %v3353_v25  ;;  %v17504_v25 = vpop.f32.mrb[132].mxu1 }
 0x48e   : > { %5068 = vmatprep.subr.bf16.mxu1 %v21547_v4  ;;  %21630 = vst [vmem:[#allocation157_spill] sm:$0xff] %v17504_v25  ;;  %v17506_v17 = vpop.f32.mrb[133].mxu1 }
 0x48f   : > { %v17514_v23 = vpop.f32.mrb[134].mxu1 }
 0x490   : > { %21631 = vst [vmem:[#allocation158_spill] sm:$0xff] %v17514_v23 }
 0x494   : > { %v3356_v51 = vpop.xlane.xlu0 %3355 }
 0x495   : > { %5069 = vmatpush1.bf16.msra.mxu1 %v3356_v51  ;;  %v17518_v51 = vpop.f32.mrb[135].mxu1 }
 0x496   : > { %5070 = vmatprep.subr.bf16.mxu1 %v21547_v4  ;;  %v17550_v37 = vpop.f32.mrb[136].mxu1 }
 0x497   : > { %v17560_v56 = vpop.f32.mrb[137].mxu1 }
 0x49c   : > { %v2819_v47 = vpop.permute.xlu0 %2818  ;;  %v3359_v35 = vpop.xlane.xlu1 %3358 }
 0x49d   : > { %v3088_v42 = vadd.bf16 %v2819_v47, %v21632_v57  ;;  %v3089_v29 = vadd.bf16 %v2819_v47, %v21633_v32  ;;  %5071 = vmatpush1.bf16.msra.mxu1 %v3359_v35  ;;  %v21638_v35 = vpack.c.bf16 %v17097_v13, %v17075_v58  ;;  %v3524_v13 = vld [vmem:[%s21190_s7 + $0xa0] sm:$0xff] }
 0x49e   : > { %5329 = vmatprep.subr.bf16.mxu1 %v21547_v4 }
 0x49f   : > { %v17530_v9 = vmax.bf16 %v21547_v4, %v3088_v42  ;;  %v17533_v25 = vmax.bf16 %v21547_v4, %v3089_v29  ;;  %v21640_v29 = vpack.c.bf16 %v17052_v54, %v17042_v27  ;;  %v17568_v54 = vpop.f32.mrb[138].mxu1 }
 0x4a0   : > { %v2829_v23 = vpop.permute.xlu0 %2828  ;;  %5073 = vmatmul.mubr.bf16.vlgmr.msra.gmra.mrb[176].mxu1 %v21636_v30  ;;  %v2824_v14 = vpop.permute.xlu1 %2823 }
 0x4a1   : > { %21634 = vst [vmem:[#allocation159_spill] sm:$0xff] %v17530_v9  ;;  %21635 = vst [vmem:[#allocation160_spill] sm:$0xff] %v17533_v25  ;;  %v3092_v32 = vadd.bf16 %v2829_v23, %v21637_v36  ;;  %v3093_v22 = vadd.bf16 %v2829_v23, %v21638_v35  ;;  %v3090_v42 = vadd.bf16 %v2824_v14, %v21639_v48  ;;  %5080 = vmatprep.mubr.bf16.mxu1 %v13287_v55 }
 0x4a2   : > { %v3091_v57 = vadd.bf16 %v2824_v14, %v21640_v29  ;;  %v3360_v52 = vmax.bf16 %v17533_v25, %v17530_v9  ;;  %v13295_v23 = vcombine.high %v3520_v28, %v3524_v13  ;;  %v17578_v14 = vpop.f32.mrb[139].mxu1  ;;  %v21645_v35 = vpack.c.bf16 %v17147_v8, %v17135_v24  ;;  %v21729_v25 = vld [vmem:[#allocation74_spill] sm:$0xff] }
 0x4a3   : > { %v17563_v58 = vmax.bf16 %v21547_v4, %v3090_v42  ;;  %v17573_v27 = vmax.bf16 %v21547_v4, %v3092_v32  ;;  %v17576_v47 = vmax.bf16 %v21547_v4, %v3093_v22  ;;  %v21647_v22 = vpack.c.bf16 %v17196_v40, %v17184_v43  ;;  %v3528_v40 = vld [vmem:[%s21190_s7 + $0xc0] sm:$0xff] }
 0x4a4   : > { %v17566_v30 = vmax.bf16 %v21547_v4, %v3091_v57  ;;  %3361 = vmax.xlane.bf16.xlu0 %v3360_v52  ;;  %v2834_v55 = vpop.permute.xlu1 %2833  ;;  %v2839_v36 = vpop.permute.xlu0 %2838  ;;  %v21648_v24 = vpack.c.bf16 %v17206_v34, %v17186_v39  ;;  %v3532_v43 = vld [vmem:[%s21190_s7 + $0xe0] sm:$0xff] }
 0x4a5   : > { %21641 = vst [vmem:[#allocation161_spill] sm:$0xff] %v17563_v58  ;;  %21643 = vst [vmem:[#allocation163_spill] sm:$0xff] %v17573_v27  ;;  %v3094_v48 = vadd.bf16 %v2834_v55, %v21645_v35  ;;  %v3095_v20 = vadd.bf16 %v2834_v55, %v21646_v59  ;;  %v3096_v29 = vadd.bf16 %v2839_v36, %v21647_v22  ;;  %v17596_v57 = vpop.f32.mrb[140].mxu1 }
 0x4a6   : > { %21642 = vst [vmem:[#allocation162_spill] sm:$0xff] %v17566_v30  ;;  %21644 = vst [vmem:[#allocation164_spill] sm:$0xff] %v17576_v47  ;;  %v3363_v42 = vmax.bf16 %v17566_v30, %v17563_v58  ;;  %v3097_v8 = vadd.bf16 %v2839_v36, %v21648_v24  ;;  %v3366_v60 = vmax.bf16 %v17576_v47, %v17573_v27  ;;  %v17612_v39 = vpop.f32.mrb[141].mxu1  ;;  %v2619_v27 = vld [vmem:[%s21492_s0 + $0x258] sm:$0xff]  ;;  %v2616_v47 = vld [vmem:[%s21492_s0 + $0x240] sm:$0xff] }
 0x4a7   : > { %v17601_v49 = vmax.bf16 %v21547_v4, %v3094_v48  ;;  %v17604_v52 = vmax.bf16 %v21547_v4, %v3095_v20  ;;  %v17614_v55 = vpop.f32.mrb[142].mxu1  ;;  %v17619_v36 = vmax.bf16 %v21547_v4, %v3096_v29  ;;  %v13303_v48 = vcombine.high %v3528_v40, %v3532_v43  ;;  %v21678_v29 = vld [vmem:[#allocation127_spill] sm:$0xff] }
 0x4a8   : > { %3364 = vmax.xlane.bf16.xlu1 %v3363_v42  ;;  %5081 = vmatmul.mubr.bf16.gmra.mrb[180].mxu1 %v13286_v12  ;;  %v2844_v34 = vpop.permute.xlu1 %2843  ;;  %v13294_v12 = vcombine.low %v3520_v28, %v3524_v13  ;;  %v17622_v35 = vmax.bf16 %v21547_v4, %v3097_v8  ;;  %v17624_v59 = vpop.f32.mrb[143].mxu1  ;;  %v21653_v42 = vpack.c.bf16 %v17245_v50, %v17233_v5 }
 0x4a9   : > { %5088 = vmatprep.mubr.bf16.mxu1 %v13295_v23  ;;  %21649 = vst [vmem:[#allocation165_spill] sm:$0xff] %v17601_v49  ;;  %21650 = vst [vmem:[#allocation166_spill] sm:$0xff] %v17604_v52  ;;  %v2849_v20 = vpop.permute.xlu0 %2848  ;;  %v21654_v28 = vpack.c.bf16 %v17255_v11, %v17235_v41  ;;  %v3369_v24 = vmax.bf16 %v17604_v52, %v17601_v49  ;;  %v21655_v8 = vpack.c.bf16 %v17282_v62, %v17276_v19  ;;  %v3536_v19 = vld [vmem:[%s21190_s7 + $0x100] sm:$0xff]  ;;  %v2618_v52 = vld [vmem:[%s21492_s0 + $0x250] sm:$0xff] }
 0x4aa   : > { %21651 = vst [vmem:[#allocation167_spill] sm:$0xff] %v17619_v36  ;;  %21652 = vst [vmem:[#allocation168_spill] sm:$0xff] %v17622_v35  ;;  %v3098_v22 = vadd.bf16 %v2844_v34, %v21653_v42  ;;  %v21656_v50 = vpack.c.bf16 %v17286_v44, %v17278_v10  ;;  %v17642_v42 = vpop.f32.mrb[144].mxu1  ;;  %v3372_v41 = vmax.bf16 %v17622_v35, %v17619_v36  ;;  %v3540_v44 = vld [vmem:[%s21190_s7 + $0x120] sm:$0xff]  ;;  %v2615_v36 = vld [vmem:[%s21492_s0 + $0x238] sm:$0xff] }
 0x4ab   : > { %v3099_v13 = vadd.bf16 %v2844_v34, %v21654_v28  ;;  %v17658_v10 = vpop.f32.mrb[145].mxu1  ;;  %v3600_v35 = vld [vmem:[%s21190_s7 + $0x300] sm:$0xff] }
 0x4ac   : > { %3367 = vmax.xlane.bf16.xlu0 %v3366_v60  ;;  %v3100_v60 = vadd.bf16 %v2849_v20, %v21655_v8  ;;  %v3101_v5 = vadd.bf16 %v2849_v20, %v21656_v50  ;;  %v17647_v11 = vmax.bf16 %v21547_v4, %v3098_v22  ;;  %v2854_v62 = vpop.permute.xlu1 %2853  ;;  %v21661_v50 = vpack.c.bf16 %v17307_v26, %v17301_v45  ;;  %v3604_v49 = vld [vmem:[%s21190_s7 + $0x320] sm:$0xff] }
 0x4ad   : > { %v17650_v34 = vmax.bf16 %v21547_v4, %v3099_v13  ;;  %v13311_v13 = vcombine.high %v3536_v19, %v3540_v44  ;;  %v2859_v8 = vpop.permute.xlu0 %2858  ;;  %v21664_v45 = vpack.c.bf16 %v17336_v7, %v17328_v63  ;;  %v3548_v7 = vld [vmem:[%s21190_s7 + $0x160] sm:$0xff] }
 0x4ae   : > { %21657 = vst [vmem:[#allocation169_spill] sm:$0xff] %v17647_v11  ;;  %v17665_v22 = vmax.bf16 %v21547_v4, %v3100_v60  ;;  %v17668_v28 = vmax.bf16 %v21547_v4, %v3101_v5  ;;  %v3102_v32 = vadd.bf16 %v2854_v62, %v21661_v50  ;;  %v21663_v5 = vpack.c.bf16 %v17332_v53, %v17326_v15  ;;  %v3544_v53 = vld [vmem:[%s21190_s7 + $0x140] sm:$0xff] }
 0x4af   : > { %21658 = vst [vmem:[#allocation170_spill] sm:$0xff] %v17650_v34  ;;  %v3105_v26 = vadd.bf16 %v2859_v8, %v21664_v45  ;;  %v21669_v45 = vpack.c.bf16 %v17357_v61, %v17351_v1 }
 0x4b0   : > { %3370 = vmax.xlane.bf16.xlu1 %v3369_v24  ;;  %5089 = vmatmul.mubr.bf16.gmra.mrb[184].mxu1 %v13294_v12  ;;  %v17660_v12 = vpop.f32.mrb[146].mxu1  ;;  %21659 = vst [vmem:[#allocation171_spill] sm:$0xff] %v17665_v22  ;;  %21660 = vst [vmem:[#allocation172_spill] sm:$0xff] %v17668_v28  ;;  %v3104_v20 = vadd.bf16 %v2859_v8, %v21663_v5  ;;  %v2864_v63 = vpop.permute.xlu1 %2863 }
 0x4b1   : > { %5096 = vmatprep.mubr.bf16.mxu1 %v13303_v48  ;;  %v13302_v48 = vcombine.low %v3528_v40, %v3532_v43  ;;  %v17670_v24 = vpop.f32.mrb[147].mxu1  ;;  %v21662_v40 = vpack.c.bf16 %v17311_v0, %v17303_v33  ;;  %v3378_v33 = vmax.bf16 %v17668_v28, %v17665_v22  ;;  %v17693_v0 = vmax.bf16 %v21547_v4, %v3102_v32  ;;  %v2869_v5 = vpop.permute.xlu0 %2868 }
 0x4b2   : > { %v17688_v50 = vpop.f32.mrb[148].mxu1  ;;  %v3106_v60 = vadd.bf16 %v2864_v63, %v21669_v45  ;;  %v21671_v32 = vpack.c.bf16 %v17382_v18, %v17376_v3  ;;  %v3552_v18 = vld [vmem:[%s21190_s7 + $0x180] sm:$0xff] }
 0x4b3   : > { %v3103_v43 = vadd.bf16 %v2854_v62, %v21662_v40  ;;  %21665 = vst [vmem:[#allocation173_spill] sm:$0xff] %v17693_v0  ;;  %v17704_v15 = vpop.f32.mrb[149].mxu1  ;;  %v17713_v40 = vmax.bf16 %v21547_v4, %v3104_v20  ;;  %v3556_v3 = vld [vmem:[%s21190_s7 + $0x1a0] sm:$0xff]  ;;  %v21677_v20 = vld [vmem:[#allocation130_spill] sm:$0xff] }
 0x4b4   : > { %3373 = vmax.xlane.bf16.xlu0 %v3372_v41  ;;  %v3375_v41 = vmax.bf16 %v17650_v34, %v17647_v11  ;;  %v3108_v16 = vadd.bf16 %v2869_v5, %v21671_v32  ;;  %v21679_v23 = vpack.c.bf16 %v21677_v20, %v21678_v29  ;;  %v21685_v29 = vld [vmem:[#allocation41_spill] sm:$0xff] }
 0x4b5   : > { %v17696_v62 = vmax.bf16 %v21547_v4, %v3103_v43  ;;  %21667 = vst [vmem:[#allocation175_spill] sm:$0xff] %v17713_v40  ;;  %v17716_v43 = vmax.bf16 %v21547_v4, %v3105_v26 }
 0x4b6   : > { %v17761_v45 = vmax.bf16 %v21547_v4, %v3108_v16 }
 0x4b7   : > { %21666 = vst [vmem:[#allocation174_spill] sm:$0xff] %v17696_v62  ;;  %21668 = vst [vmem:[#allocation176_spill] sm:$0xff] %v17716_v43 }
 0x4b8   : > { %3376 = vmax.xlane.bf16.xlu1 %v3375_v41  ;;  %5097 = vmatmul.mubr.bf16.gmra.mrb[188].mxu1 %v13302_v48  ;;  %v17706_v48 = vpop.f32.mrb[150].mxu1  ;;  %v13319_v41 = vcombine.high %v3544_v53, %v3548_v7  ;;  %21675 = vst [vmem:[#allocation179_spill] sm:$0xff] %v17761_v45 }
 0x4b9   : > { %5104 = vmatprep.mubr.bf16.mxu1 %v13311_v13  ;;  %v13310_v13 = vcombine.low %v3536_v19, %v3540_v44  ;;  %v17710_v8 = vpop.f32.mrb[151].mxu1  ;;  %v21670_v19 = vpack.c.bf16 %v17361_v6, %v17353_v38  ;;  %v21672_v6 = vpack.c.bf16 %v17386_v31, %v17378_v2  ;;  %v3384_v38 = vmax.bf16 %v17716_v43, %v17713_v40  ;;  %v2874_v31 = vpop.permute.xlu1 %2873 }
 0x4ba   : > { %v17728_v26 = vpop.f32.mrb[152].mxu1  ;;  %v3111_v2 = vadd.bf16 %v2874_v31, %v21679_v23 }
 0x4bb   : > { %v3107_v44 = vadd.bf16 %v2864_v63, %v21670_v19  ;;  %v17733_v61 = vpop.f32.mrb[153].mxu1  ;;  %v3109_v1 = vadd.bf16 %v2869_v5, %v21672_v6  ;;  %v17741_v63 = vmax.bf16 %v21547_v4, %v3106_v60  ;;  %v13318_v60 = vcombine.low %v3544_v53, %v3548_v7  ;;  %v21681_v7 = vld [vmem:[#allocation43_spill] sm:$0xff] }
 0x4bc   : > { %3379 = vmax.xlane.bf16.xlu0 %v3378_v33  ;;  %v3381_v33 = vmax.bf16 %v17696_v62, %v17693_v0  ;;  %v17752_v32 = vpop.f32.mrb[154].mxu1  ;;  %v13327_v19 = vcombine.high %v3552_v18, %v3556_v3  ;;  %v21682_v5 = vld [vmem:[#allocation39_spill] sm:$0xff] }
 0x4bd   : > { %21673 = vst [vmem:[#allocation177_spill] sm:$0xff] %v17741_v63  ;;  %v17772_v53 = vmax.bf16 %v21547_v4, %v3109_v1  ;;  %v21683_v40 = vpack.c.bf16 %v21681_v7, %v21682_v5  ;;  %v3564_v5 = vld [vmem:[%s21190_s7 + $0x1e0] sm:$0xff] }
 0x4be   : > { %v21694_v0 = vld [vmem:[#allocation47_spill] sm:$0xff] }
 0x4bf   : > { %21680 = vst [vmem:[#allocation130_spill] sm:$0xff] %v17772_v53 }
 0x4c0   : > { %3382 = vmax.xlane.bf16.xlu1 %v3381_v33  ;;  %5105 = vmatmul.mubr.bf16.gmra.mrb[192].mxu1 %v13310_v13  ;;  %v17744_v13 = vmax.bf16 %v21547_v4, %v3107_v44  ;;  %v2879_v44 = vpop.permute.xlu0 %2878  ;;  %v21676_v33 = vpack.c.bf16 %v17407_v46, %v17401_v21  ;;  %v21684_v21 = vld [vmem:[#allocation44_spill] sm:$0xff] }
 0x4c1   : > { %5112 = vmatprep.mubr.bf16.mxu1 %v13319_v41  ;;  %v17756_v41 = vpop.f32.mrb[155].mxu1  ;;  %v3112_v43 = vadd.bf16 %v2879_v44, %v21683_v40  ;;  %v21686_v23 = vpack.c.bf16 %v21684_v21, %v21685_v29  ;;  %v3560_v40 = vld [vmem:[%s21190_s7 + $0x1c0] sm:$0xff] }
 0x4c2   : > { %21674 = vst [vmem:[#allocation178_spill] sm:$0xff] %v17744_v13  ;;  %v3110_v6 = vadd.bf16 %v2874_v31, %v21676_v33  ;;  %v3390_v31 = vmax.bf16 %v17772_v53, %v17761_v45  ;;  %v13335_v21 = vcombine.high %v3560_v40, %v3564_v5  ;;  %v21691_v45 = vld [vmem:[#allocation45_spill] sm:$0xff] }
 0x4c3   : > { %v17774_v16 = vpop.f32.mrb[156].mxu1  ;;  %v3113_v20 = vadd.bf16 %v2879_v44, %v21686_v23  ;;  %v2884_v44 = vpop.permute.xlu1 %2883  ;;  %v17807_v7 = vmax.bf16 %v21547_v4, %v3112_v43  ;;  %v21690_v23 = vld [vmem:[#allocation49_spill] sm:$0xff] }
 0x4c4   : > { %3385 = vmax.xlane.bf16.xlu0 %v3384_v38  ;;  %v3387_v38 = vmax.bf16 %v17744_v13, %v17741_v63  ;;  %v17779_v46 = vpop.f32.mrb[157].mxu1  ;;  %v17787_v1 = vmax.bf16 %v21547_v4, %v3110_v6  ;;  %v13326_v6 = vcombine.low %v3552_v18, %v3556_v3  ;;  %v2889_v29 = vpop.permute.xlu0 %2888  ;;  %v21692_v53 = vpack.c.bf16 %v21690_v23, %v21691_v45  ;;  %v21693_v13 = vld [vmem:[#allocation50_spill] sm:$0xff]  ;;  %v21697_v3 = vld [vmem:[#allocation55_spill] sm:$0xff] }
 0x4c5   : > { %21689 = vst [vmem:[#allocation39_spill] sm:$0xff] %v17807_v7  ;;  %v21695_v62 = vpack.c.bf16 %v21693_v13, %v21694_v0  ;;  %v17818_v18 = vmax.bf16 %v21547_v4, %v3113_v20  ;;  %v21701_v0 = vld [vmem:[#allocation54_spill] sm:$0xff] }
 0x4c6   : > { %21687 = vst [vmem:[#allocation127_spill] sm:$0xff] %v17787_v1  ;;  %v3114_v63 = vadd.bf16 %v2884_v44, %v21692_v53  ;;  %v21700_v53 = vld [vmem:[#allocation56_spill] sm:$0xff] }
 0x4c7   : > { %v3115_v33 = vadd.bf16 %v2884_v44, %v21695_v62  ;;  %21696 = vst [vmem:[#allocation44_spill] sm:$0xff] %v17818_v18  ;;  %v21702_v62 = vpack.c.bf16 %v21700_v53, %v21701_v0  ;;  %v3396_v44 = vmax.bf16 %v17818_v18, %v17807_v7  ;;  %v21706_v0 = vld [vmem:[#allocation61_spill] sm:$0xff] }
 0x4c8   : > { %3388 = vmax.xlane.bf16.xlu1 %v3387_v38  ;;  %5113 = vmatmul.mubr.bf16.gmra.mrb[196].mxu1 %v13318_v60  ;;  %v17790_v60 = vmax.bf16 %v21547_v4, %v3111_v2  ;;  %v21698_v2 = vld [vmem:[#allocation53_spill] sm:$0xff]  ;;  %v17833_v20 = vmax.bf16 %v21547_v4, %v3114_v63  ;;  %v13334_v63 = vcombine.low %v3560_v40, %v3564_v5 }
 0x4c9   : > { %5120 = vmatprep.mubr.bf16.mxu1 %v13327_v19  ;;  %v17798_v19 = vpop.f32.mrb[158].mxu1  ;;  %v21699_v22 = vpack.c.bf16 %v21697_v3, %v21698_v2  ;;  %v3117_v13 = vadd.bf16 %v2889_v29, %v21702_v62  ;;  %v3572_v2 = vld [vmem:[%s21190_s7 + $0x220] sm:$0xff] }
 0x4ca   : > { %21688 = vst [vmem:[#allocation43_spill] sm:$0xff] %v17790_v60  ;;  %v17802_v38 = vpop.f32.mrb[159].mxu1  ;;  %21703 = vst [vmem:[#allocation41_spill] sm:$0xff] %v17833_v20  ;;  %v21707_v62 = vld [vmem:[#allocation59_spill] sm:$0xff] }
 0x4cb   : > { %v17820_v43 = vpop.f32.mrb[160].mxu1  ;;  %v3116_v28 = vadd.bf16 %v2889_v29, %v21699_v22  ;;  %v3568_v22 = vld [vmem:[%s21190_s7 + $0x200] sm:$0xff]  ;;  %v2894_v29 = vpop.permute.xlu1 %2893  ;;  %v21708_v7 = vpack.c.bf16 %v21706_v0, %v21707_v62  ;;  %v17864_v40 = vmax.bf16 %v21547_v4, %v3117_v13 }
 0x4cc   : > { %3391 = vmax.xlane.bf16.xlu0 %v3390_v31  ;;  %v3393_v31 = vmax.bf16 %v17790_v60, %v17787_v1  ;;  %v17825_v45 = vpop.f32.mrb[161].mxu1  ;;  %v13343_v53 = vcombine.high %v3568_v22, %v3572_v2  ;;  %v21709_v1 = vld [vmem:[#allocation62_spill] sm:$0xff]  ;;  %v21710_v60 = vld [vmem:[#allocation60_spill] sm:$0xff] }
 0x4cd   : > { %v17853_v3 = vmax.bf16 %v21547_v4, %v3116_v28  ;;  %v3118_v18 = vadd.bf16 %v2894_v29, %v21708_v7  ;;  %v21711_v11 = vpack.c.bf16 %v21709_v1, %v21710_v60  ;;  %21712 = vst [vmem:[#allocation50_spill] sm:$0xff] %v17864_v40  ;;  %v3576_v1 = vld [vmem:[%s21190_s7 + $0x240] sm:$0xff] }
 0x4ce   : > { %v3580_v60 = vld [vmem:[%s21190_s7 + $0x260] sm:$0xff] }
 0x4cf   : > { %21705 = vst [vmem:[#allocation45_spill] sm:$0xff] %v17853_v3  ;;  %v3119_v34 = vadd.bf16 %v2894_v29, %v21711_v11  ;;  %v3402_v7 = vmax.bf16 %v17864_v40, %v17853_v3  ;;  %v2610_v40 = vld [vmem:[%s21492_s0 + $0x210] sm:$0xff] }
 0x4d0   : > { %3394 = vmax.xlane.bf16.xlu1 %v3393_v31  ;;  %5121 = vmatmul.mubr.bf16.gmra.mrb[200].mxu1 %v13326_v6  ;;  %v17836_v6 = vmax.bf16 %v21547_v4, %v3115_v33  ;;  %v3584_v33 = vld [vmem:[%s21190_s7 + $0x280] sm:$0xff] }
 0x4d1   : > { %5128 = vmatprep.mubr.bf16.mxu1 %v13335_v21  ;;  %v17844_v21 = vpop.f32.mrb[162].mxu1  ;;  %v17876_v11 = vmax.bf16 %v21547_v4, %v3119_v34 }
 0x4d2   : > { %21704 = vst [vmem:[#allocation49_spill] sm:$0xff] %v17836_v6  ;;  %v17848_v31 = vpop.f32.mrb[163].mxu1  ;;  %v3399_v23 = vmax.bf16 %v17836_v6, %v17833_v20  ;;  %v2611_v20 = vld [vmem:[%s21492_s0 + $0x218] sm:$0xff]  ;;  %v2608_v6 = vld [vmem:[%s21492_s0 + $0x200] sm:$0xff] }
 0x4d3   : > { %v17866_v5 = vpop.f32.mrb[164].mxu1  ;;  %21714 = vst [vmem:[#allocation55_spill] sm:$0xff] %v17876_v11 }
 0x4d4   : > { %3397 = vmax.xlane.bf16.xlu0 %v3396_v44  ;;  %v17868_v28 = vpop.f32.mrb[165].mxu1  ;;  %v17873_v44 = vmax.bf16 %v21547_v4, %v3118_v18  ;;  %v13342_v18 = vcombine.low %v3568_v22, %v3572_v2  ;;  %v3588_v22 = vld [vmem:[%s21190_s7 + $0x2a0] sm:$0xff] }
 0x4d5   : > { %v17884_v13 = vpop.f32.mrb[166].mxu1  ;;  %v13359_v34 = vcombine.high %v3584_v33, %v3588_v22 }
 0x4d6   : > { %21713 = vst [vmem:[#allocation47_spill] sm:$0xff] %v17873_v44 }
 0x4d8   : > { %3400 = vmax.xlane.bf16.xlu1 %v3399_v23  ;;  %5129 = vmatmul.mubr.bf16.gmra.mrb[204].mxu1 %v13334_v63  ;;  %v17888_v23 = vpop.f32.mrb[167].mxu1  ;;  %v13351_v63 = vcombine.high %v3576_v1, %v3580_v60 }
 0x4d9   : > { %5136 = vmatprep.mubr.bf16.mxu1 %v13343_v53  ;;  %v3405_v53 = vmax.bf16 %v17876_v11, %v17873_v44  ;;  %v3592_v11 = vld [vmem:[%s21190_s7 + $0x2c0] sm:$0xff] }
 0x4dc   : > { %3403 = vmax.xlane.bf16.xlu0 %v3402_v7  ;;  %v3596_v7 = vld [vmem:[%s21190_s7 + $0x2e0] sm:$0xff] }
 0x4dd   : > { %v17894_v0 = vpop.f32.mrb[168].mxu1 }
 0x4de   : > { %21715 = vst [vmem:[#allocation53_spill] sm:$0xff] %v17894_v0  ;;  %v17896_v62 = vpop.f32.mrb[169].mxu1 }
 0x4df   : > { %21716 = vst [vmem:[#allocation56_spill] sm:$0xff] %v17896_v62  ;;  %v17904_v2 = vpop.f32.mrb[170].mxu1  ;;  %v21730_v62 = vld [vmem:[#allocation72_spill] sm:$0xff] }
 0x4e0   : > { %3406 = vmax.xlane.bf16.xlu1 %v3405_v53  ;;  %5137 = vmatmul.mubr.bf16.gmra.mrb[208].mxu1 %v13342_v18  ;;  %21717 = vst [vmem:[#allocation54_spill] sm:$0xff] %v17904_v2  ;;  %v17908_v53 = vpop.f32.mrb[171].mxu1  ;;  %v13350_v18 = vcombine.low %v3576_v1, %v3580_v60 }
 0x4e1   : > { %5144 = vmatprep.mubr.bf16.mxu1 %v13351_v63  ;;  %21718 = vst [vmem:[#allocation61_spill] sm:$0xff] %v17908_v53  ;;  %v13367_v63 = vcombine.high %v3592_v11, %v3596_v7  ;;  %v21731_v53 = vpack.c.bf16 %v21729_v25, %v21730_v62 }
 0x4e5   : > { %v17912_v29 = vpop.f32.mrb[172].mxu1 }
 0x4e6   : > { %v17914_v44 = vpop.f32.mrb[173].mxu1 }
 0x4e7   : > { %21719 = vst [vmem:[#allocation59_spill] sm:$0xff] %v17914_v44  ;;  %v17922_v3 = vpop.f32.mrb[174].mxu1 }
 0x4e8   : > { %5145 = vmatmul.mubr.bf16.gmra.mrb[212].mxu1 %v13350_v18  ;;  %v17926_v60 = vpop.f32.mrb[175].mxu1  ;;  %v13358_v18 = vcombine.low %v3584_v33, %v3588_v22  ;;  %v2609_v33 = vld [vmem:[%s21492_s0 + $0x208] sm:$0xff]  ;;  %v2705_v22 = vpack.c.bf16 %v2611_v20, %v2610_v40  ;;  %v2612_v20 = vld [vmem:[%s21492_s0 + $0x220] sm:$0xff]  ;;  %v13366_v40 = vcombine.low %v3592_v11, %v3596_v7  ;;  %v2622_v7 = vld [vmem:[%s21492_s0 + $0x270] sm:$0xff] }
 0x4e9   : > { %5152 = vmatprep.mubr.bf16.mxu1 %v13359_v34  ;;  %v2614_v34 = vld [vmem:[%s21492_s0 + $0x230] sm:$0xff]  ;;  %v2704_v1 = vpack.c.bf16 %v2609_v33, %v2608_v6  ;;  %v2613_v6 = vld [vmem:[%s21492_s0 + $0x228] sm:$0xff] }
 0x4ea   : > { %v2706_v33 = vpack.c.bf16 %v2613_v6, %v2612_v20  ;;  %v2617_v11 = vld [vmem:[%s21492_s0 + $0x248] sm:$0xff]  ;;  %v3612_v20 = vld [vmem:[%s21190_s7 + $0x360] sm:$0xff] }
 0x4f0   : > { %5153 = vmatmul.mubr.bf16.gmra.mrb[216].mxu1 %v13358_v18  ;;  %v13375_v18 = vcombine.high %v3600_v35, %v3604_v49 }
 0x4f1   : > { %5160 = vmatprep.mubr.bf16.mxu1 %v13367_v63  ;;  %v2707_v63 = vpack.c.bf16 %v2615_v36, %v2614_v34  ;;  %v2709_v36 = vpack.c.bf16 %v2619_v27, %v2618_v52  ;;  %v2623_v34 = vld [vmem:[%s21492_s0 + $0x278] sm:$0xff]  ;;  %v2620_v27 = vld [vmem:[%s21492_s0 + $0x260] sm:$0xff]  ;;  %v13374_v52 = vcombine.low %v3600_v35, %v3604_v49  ;;  %v2625_v49 = vld [vmem:[%s21492_s0 + $0x288] sm:$0xff] }
 0x4f2   : > { %v2711_v6 = vpack.c.bf16 %v2623_v34, %v2622_v7  ;;  %v3616_v34 = vld [vmem:[%s21190_s7 + $0x380] sm:$0xff] }
 0x4f5   : > { %2903 = vperm.xlu1 %15463, %v2705_v22   ;;  %v3608_v22 = vld [vmem:[%s21190_s7 + $0x340] sm:$0xff] }
 0x4f6   : > { %2898 = vperm.xlu0 %15462, %v2704_v1   ;;  %v2708_v1 = vpack.c.bf16 %v2617_v11, %v2616_v47  ;;  %v2621_v47 = vld [vmem:[%s21492_s0 + $0x268] sm:$0xff]  ;;  %v2624_v11 = vld [vmem:[%s21492_s0 + $0x280] sm:$0xff] }
 0x4f7   : > { %v2712_v7 = vpack.c.bf16 %v2625_v49, %v2624_v11  ;;  %v2635_v11 = vld [vmem:[%s21492_s0 + $0x2d8] sm:$0xff]  ;;  %v2632_v49 = vld [vmem:[%s21492_s0 + $0x2c0] sm:$0xff] }
 0x4f8   : > { %5161 = vmatmul.mubr.bf16.gmra.mrb[220].mxu1 %v13366_v40  ;;  %v13383_v40 = vcombine.high %v3608_v22, %v3612_v20 }
 0x4f9   : > { %2913 = vperm.xlu1 %15463, %v2707_v63   ;;  %5168 = vmatprep.mubr.bf16.mxu1 %v13375_v18  ;;  %v2710_v63 = vpack.c.bf16 %v2621_v47, %v2620_v27  ;;  %v2626_v18 = vld [vmem:[%s21492_s0 + $0x290] sm:$0xff]  ;;  %v3620_v27 = vld [vmem:[%s21190_s7 + $0x3a0] sm:$0xff] }
 0x4fa   : > { %2908 = vperm.xlu0 %15462, %v2706_v33   ;;  %v2627_v33 = vld [vmem:[%s21492_s0 + $0x298] sm:$0xff]  ;;  %v2628_v47 = vld [vmem:[%s21492_s0 + $0x2a0] sm:$0xff] }
 0x4fb   : > { %v2713_v35 = vpack.c.bf16 %v2627_v33, %v2626_v18  ;;  %v2634_v33 = vld [vmem:[%s21492_s0 + $0x2d0] sm:$0xff] }
 0x4fd   : > { %2923 = vperm.xlu1 %15463, %v2709_v36   ;;  %v2630_v36 = vld [vmem:[%s21492_s0 + $0x2b0] sm:$0xff] }
 0x4fe   : > { %2918 = vperm.xlu0 %15462, %v2708_v1   ;;  %v2631_v1 = vld [vmem:[%s21492_s0 + $0x2b8] sm:$0xff] }
 0x500   : > { %5169 = vmatmul.mubr.bf16.gmra.mrb[224].mxu1 %v13374_v52  ;;  %v2629_v52 = vld [vmem:[%s21492_s0 + $0x2a8] sm:$0xff] }
 0x501   : > { %2933 = vperm.xlu1 %15463, %v2711_v6   ;;  %5176 = vmatprep.mubr.bf16.mxu1 %v13383_v40  ;;  %v13382_v6 = vcombine.low %v3608_v22, %v3612_v20  ;;  %v2715_v40 = vpack.c.bf16 %v2631_v1, %v2630_v36  ;;  %v2714_v18 = vpack.c.bf16 %v2629_v52, %v2628_v47  ;;  %v2633_v22 = vld [vmem:[%s21492_s0 + $0x2c8] sm:$0xff]  ;;  %v3624_v1 = vld [vmem:[%s21190_s7 + $0x3c0] sm:$0xff] }
 0x502   : > { %2928 = vperm.xlu0 %15462, %v2710_v63   ;;  %v13391_v63 = vcombine.high %v3616_v34, %v3620_v27  ;;  %v2717_v20 = vpack.c.bf16 %v2635_v11, %v2634_v33  ;;  %v2716_v36 = vpack.c.bf16 %v2633_v22, %v2632_v49  ;;  %v3628_v47 = vld [vmem:[%s21190_s7 + $0x3e0] sm:$0xff] }
 0x503   : > { %v2636_v52 = vld [vmem:[%s21492_s0 + $0x2e0] sm:$0xff]  ;;  %v13398_v22 = vcombine.low %v3624_v1, %v3628_v47 }
 0x504   : > { %v3632_v11 = vld [vmem:[%s21190_s7 + $0x400] sm:$0xff] }
 0x505   : > { %2943 = vperm.xlu1 %15463, %v2713_v35   ;;  %v2638_v35 = vld [vmem:[%s21492_s0 + $0x2f0] sm:$0xff]  ;;  %v3636_v49 = vld [vmem:[%s21190_s7 + $0x420] sm:$0xff] }
 0x506   : > { %2938 = vperm.xlu0 %15462, %v2712_v7   ;;  %v2639_v7 = vld [vmem:[%s21492_s0 + $0x2f8] sm:$0xff]  ;;  %v13407_v58 = vcombine.high %v3632_v11, %v3636_v49 }
 0x508   : > { %5177 = vmatmul.mubr.bf16.gmra.mrb[228].mxu1 %v13382_v6  ;;  %v2637_v6 = vld [vmem:[%s21492_s0 + $0x2e8] sm:$0xff] }
 0x509   : > { %2953 = vperm.xlu1 %15463, %v2715_v40   ;;  %5184 = vmatprep.mubr.bf16.mxu1 %v13391_v63  ;;  %v13390_v40 = vcombine.low %v3616_v34, %v3620_v27  ;;  %v2719_v63 = vpack.c.bf16 %v2639_v7, %v2638_v35  ;;  %v2718_v33 = vpack.c.bf16 %v2637_v6, %v2636_v52  ;;  %v3640_v34 = vld [vmem:[%s21190_s7 + $0x440] sm:$0xff] }
 0x50a   : > { %2948 = vperm.xlu0 %15462, %v2714_v18   ;;  %v13399_v18 = vcombine.high %v3624_v1, %v3628_v47  ;;  %v3644_v27 = vld [vmem:[%s21190_s7 + $0x460] sm:$0xff] }
 0x50b   : > { %v13415_v35 = vcombine.high %v3640_v34, %v3644_v27  ;;  %v13414_v7 = vcombine.low %v3640_v34, %v3644_v27  ;;  %v3656_v47 = vld [vmem:[%s21190_s7 + $0x4c0] sm:$0xff] }
 0x50c   : > { %v3660_v52 = vld [vmem:[%s21190_s7 + $0x4e0] sm:$0xff] }
 0x50d   : > { %2963 = vperm.xlu1 %15463, %v2717_v20   ;;  %v13406_v20 = vcombine.low %v3632_v11, %v3636_v49  ;;  %v3672_v34 = vld [vmem:[%s21190_s7 + $0x540] sm:$0xff] }
 0x50e   : > { %2958 = vperm.xlu0 %15462, %v2716_v36   ;;  %v3648_v36 = vld [vmem:[%s21190_s7 + $0x480] sm:$0xff] }
 0x50f   : > { %v3676_v27 = vld [vmem:[%s21190_s7 + $0x560] sm:$0xff] }
 0x510   : > { %5185 = vmatmul.mubr.bf16.gmra.mrb[232].mxu1 %v13390_v40  ;;  %v13431_v40 = vcombine.high %v3656_v47, %v3660_v52 }
 0x511   : > { %2973 = vperm.xlu1 %15463, %v2719_v63   ;;  %5192 = vmatprep.mubr.bf16.mxu1 %v13399_v18  ;;  %v3664_v63 = vld [vmem:[%s21190_s7 + $0x500] sm:$0xff] }
 0x512   : > { %2968 = vperm.xlu0 %15462, %v2718_v33   ;;  %v3668_v18 = vld [vmem:[%s21190_s7 + $0x520] sm:$0xff]  ;;  %v13430_v33 = vcombine.low %v3656_v47, %v3660_v52  ;;  %v13446_v47 = vcombine.low %v3672_v34, %v3676_v27 }
 0x513   : > { %v13439_v49 = vcombine.high %v3664_v63, %v3668_v18 }
 0x518   : > { %5193 = vmatmul.mubr.bf16.gmra.mrb[236].mxu1 %v13398_v22 }
 0x519   : > { %5200 = vmatprep.mubr.bf16.mxu1 %v13407_v58  ;;  %v3652_v58 = vld [vmem:[%s21190_s7 + $0x4a0] sm:$0xff] }
 0x51a   : > { %v13423_v1 = vcombine.high %v3648_v36, %v3652_v58  ;;  %v13422_v6 = vcombine.low %v3648_v36, %v3652_v58  ;;  %v13447_v36 = vcombine.high %v3672_v34, %v3676_v27  ;;  %v3696_v34 = vld [vmem:[%s21190_s7 + $0x600] sm:$0xff] }
 0x51b   : > { %v3700_v27 = vld [vmem:[%s21190_s7 + $0x620] sm:$0xff] }
 0x520   : > { %5201 = vmatmul.mubr.bf16.gmra.mrb[240].mxu1 %v13406_v20  ;;  %v13438_v20 = vcombine.low %v3664_v63, %v3668_v18  ;;  %v3688_v63 = vld [vmem:[%s21190_s7 + $0x5c0] sm:$0xff] }
 0x521   : > { %5208 = vmatprep.mubr.bf16.mxu1 %v13415_v35  ;;  %v3692_v18 = vld [vmem:[%s21190_s7 + $0x5e0] sm:$0xff] }
 0x528   : > { %5209 = vmatmul.mubr.bf16.gmra.mrb[244].mxu1 %v13414_v7  ;;  %v3680_v7 = vld [vmem:[%s21190_s7 + $0x580] sm:$0xff] }
 0x529   : > { %5216 = vmatprep.mubr.bf16.mxu1 %v13423_v1  ;;  %v3684_v1 = vld [vmem:[%s21190_s7 + $0x5a0] sm:$0xff] }
 0x530   : > { %5217 = vmatmul.mubr.bf16.gmra.mrb[248].mxu1 %v13422_v6  ;;  %v13455_v6 = vcombine.high %v3680_v7, %v3684_v1 }
 0x531   : > { %5224 = vmatprep.mubr.bf16.mxu1 %v13431_v40 }
 0x535   : > { %v3362_v11 = vpop.xlane.xlu0 %3361 }
 0x536   : > { %5330 = vmatpush1.bf16.msra.mxu1 %v3362_v11 }
 0x537   : > { %5331 = vmatprep.subr.bf16.mxu1 %v21547_v4 }
 0x538   : > { %5225 = vmatmul.mubr.bf16.gmra.mrb[252].mxu1 %v13430_v33  ;;  %v13454_v33 = vcombine.low %v3680_v7, %v3684_v1  ;;  %v3704_v7 = vld [vmem:[%s21190_s7 + $0x640] sm:$0xff] }
 0x539   : > { %v3365_v22 = vpop.xlane.xlu1 %3364  ;;  %5232 = vmatprep.mubr.bf16.mxu1 %v13439_v49  ;;  %v13463_v49 = vcombine.high %v3688_v63, %v3692_v18  ;;  %v3708_v1 = vld [vmem:[%s21190_s7 + $0x660] sm:$0xff] }
 0x53a   : > { %5332 = vmatpush1.bf16.msra.mxu1 %v3365_v22 }
 0x53b   : > { %5333 = vmatprep.subr.bf16.mxu1 %v21547_v4 }
 0x53d   : > { %v3368_v35 = vpop.xlane.xlu0 %3367 }
 0x53e   : > { %5334 = vmatpush1.bf16.msra.mxu1 %v3368_v35 }
 0x53f   : > { %5335 = vmatprep.subr.bf16.mxu1 %v21547_v4 }
 0x540   : > { %5233 = vmatmul.mubr.bf16.gmra.mrb[0].mxu1 %v13438_v20  ;;  %v13462_v20 = vcombine.low %v3688_v63, %v3692_v18  ;;  %v3712_v63 = vld [vmem:[%s21190_s7 + $0x680] sm:$0xff] }
 0x541   : > { %v3371_v58 = vpop.xlane.xlu1 %3370  ;;  %5240 = vmatprep.mubr.bf16.mxu1 %v13447_v36  ;;  %v13471_v36 = vcombine.high %v3696_v34, %v3700_v27  ;;  %v3716_v18 = vld [vmem:[%s21190_s7 + $0x6a0] sm:$0xff] }
 0x542   : > { %5336 = vmatpush1.bf16.msra.mxu1 %v3371_v58 }
 0x543   : > { %5337 = vmatprep.subr.bf16.mxu1 %v21547_v4 }
 0x545   : > { %v3374_v52 = vpop.xlane.xlu0 %3373 }
 0x546   : > { %5338 = vmatpush1.bf16.msra.mxu1 %v3374_v52 }
 0x547   : > { %5339 = vmatprep.subr.bf16.mxu1 %v21547_v4 }
 0x548   : > { %5241 = vmatmul.mubr.bf16.gmra.mrb[4].mxu1 %v13446_v47  ;;  %v13470_v47 = vcombine.low %v3696_v34, %v3700_v27  ;;  %v3720_v34 = vld [vmem:[%s21190_s7 + $0x6c0] sm:$0xff] }
 0x549   : > { %v3377_v40 = vpop.xlane.xlu1 %3376  ;;  %5248 = vmatprep.mubr.bf16.mxu1 %v13455_v6  ;;  %v13479_v6 = vcombine.high %v3704_v7, %v3708_v1  ;;  %v3724_v27 = vld [vmem:[%s21190_s7 + $0x6e0] sm:$0xff] }
 0x54a   : > { %5340 = vmatpush1.bf16.msra.mxu1 %v3377_v40 }
 0x54b   : > { %5341 = vmatprep.subr.bf16.mxu1 %v21547_v4 }
 0x54d   : > { %v3380_v11 = vpop.xlane.xlu0 %3379 }
 0x54e   : > { %5342 = vmatpush1.bf16.msra.mxu1 %v3380_v11 }
 0x54f   : > { %5343 = vmatprep.subr.bf16.mxu1 %v21547_v4 }
 0x550   : > { %5249 = vmatmul.mubr.bf16.gmra.mrb[8].mxu1 %v13454_v33  ;;  %v13478_v33 = vcombine.low %v3704_v7, %v3708_v1  ;;  %v3728_v7 = vld [vmem:[%s21190_s7 + $0x700] sm:$0xff] }
 0x551   : > { %v3383_v22 = vpop.xlane.xlu1 %3382  ;;  %5256 = vmatprep.mubr.bf16.mxu1 %v13463_v49  ;;  %v13487_v49 = vcombine.high %v3712_v63, %v3716_v18  ;;  %v3732_v1 = vld [vmem:[%s21190_s7 + $0x720] sm:$0xff] }
 0x552   : > { %5344 = vmatpush1.bf16.msra.mxu1 %v3383_v22 }
 0x553   : > { %5345 = vmatprep.subr.bf16.mxu1 %v21547_v4 }
 0x555   : > { %v3386_v35 = vpop.xlane.xlu0 %3385 }
 0x556   : > { %5346 = vmatpush1.bf16.msra.mxu1 %v3386_v35 }
 0x557   : > { %5347 = vmatprep.subr.bf16.mxu1 %v21547_v4 }
 0x558   : > { %5257 = vmatmul.mubr.bf16.gmra.mrb[12].mxu1 %v13462_v20  ;;  %v13486_v20 = vcombine.low %v3712_v63, %v3716_v18  ;;  %v21720_v63 = vld [vmem:[#allocation67_spill] sm:$0xff]  ;;  %v21721_v18 = vld [vmem:[#allocation65_spill] sm:$0xff] }
 0x559   : > { %v3389_v58 = vpop.xlane.xlu1 %3388  ;;  %5264 = vmatprep.mubr.bf16.mxu1 %v13471_v36  ;;  %v13495_v36 = vcombine.high %v3720_v34, %v3724_v27 }
 0x55a   : > { %5348 = vmatpush1.bf16.msra.mxu1 %v3389_v58 }
 0x55b   : > { %5349 = vmatprep.subr.bf16.mxu1 %v21547_v4 }
 0x55d   : > { %v3392_v52 = vpop.xlane.xlu0 %3391 }
 0x55e   : > { %5350 = vmatpush1.bf16.msra.mxu1 %v3392_v52 }
 0x55f   : > { %5351 = vmatprep.subr.bf16.mxu1 %v21547_v4 }
 0x560   : > { %5265 = vmatmul.mubr.bf16.gmra.mrb[16].mxu1 %v13470_v47  ;;  %v13494_v47 = vcombine.low %v3720_v34, %v3724_v27 }
 0x561   : > { %v3395_v40 = vpop.xlane.xlu1 %3394  ;;  %5272 = vmatprep.mubr.bf16.mxu1 %v13479_v6 }
 0x562   : > { %5352 = vmatpush1.bf16.msra.mxu1 %v3395_v40  ;;  %v13503_v40 = vcombine.high %v3728_v7, %v3732_v1 }
 0x563   : > { %5353 = vmatprep.subr.bf16.mxu1 %v21547_v4 }
 0x565   : > { %v3398_v11 = vpop.xlane.xlu0 %3397 }
 0x566   : > { %5354 = vmatpush1.bf16.msra.mxu1 %v3398_v11 }
 0x567   : > { %5355 = vmatprep.subr.bf16.mxu1 %v21547_v4 }
 0x568   : > { %5273 = vmatmul.mubr.bf16.gmra.mrb[20].mxu1 %v13478_v33  ;;  %v21722_v33 = vpack.c.bf16 %v21720_v63, %v21721_v18 }
 0x569   : > { %v3401_v22 = vpop.xlane.xlu1 %3400  ;;  %5280 = vmatprep.mubr.bf16.mxu1 %v13487_v49  ;;  %v21723_v49 = vld [vmem:[#allocation68_spill] sm:$0xff] }
 0x56a   : > { %5356 = vmatpush1.bf16.msra.mxu1 %v3401_v22  ;;  %v21724_v22 = vld [vmem:[#allocation66_spill] sm:$0xff] }
 0x56b   : > { %5357 = vmatprep.subr.bf16.mxu1 %v21547_v4 }
 0x56d   : > { %v3404_v35 = vpop.xlane.xlu0 %3403 }
 0x56e   : > { %5358 = vmatpush1.bf16.msra.mxu1 %v3404_v35 }
 0x56f   : > { %5359 = vmatprep.subr.bf16.mxu1 %v21547_v4 }
 0x570   : > { %5281 = vmatmul.mubr.bf16.gmra.mrb[24].mxu1 %v13486_v20  ;;  %v21725_v20 = vpack.c.bf16 %v21723_v49, %v21724_v22  ;;  %v21737_v49 = vld [vmem:[#allocation77_spill] sm:$0xff]  ;;  %v3736_v22 = vld [vmem:[%s21190_s7 + $0x740] sm:$0xff] }
 0x571   : > { %v3407_v58 = vpop.xlane.xlu1 %3406  ;;  %5288 = vmatprep.mubr.bf16.mxu1 %v13495_v36  ;;  %v21726_v36 = vld [vmem:[#allocation73_spill] sm:$0xff] }
 0x572   : > { %5360 = vmatpush1.bf16.msra.mxu1 %v3407_v58  ;;  %v21727_v58 = vld [vmem:[#allocation71_spill] sm:$0xff] }
 0x573   : > { %5618 = vmatprep.subr.bf16.mxu1 %v21547_v4  ;;  %v21728_v30 = vpack.c.bf16 %v21726_v36, %v21727_v58  ;;  %v21745_v36 = vld [vmem:[#allocation86_spill] sm:$0xff]  ;;  %v21746_v58 = vld [vmem:[#allocation84_spill] sm:$0xff] }
 0x575   : > { %v2899_v52 = vpop.permute.xlu0 %2898  ;;  %v2904_v6 = vpop.permute.xlu1 %2903 }
 0x576   : > { %v3120_v11 = vadd.bf16 %v2899_v52, %v21722_v33  ;;  %v3121_v35 = vadd.bf16 %v2899_v52, %v21725_v20  ;;  %v3122_v9 = vadd.bf16 %v2904_v6, %v21728_v30  ;;  %v3123_v0 = vadd.bf16 %v2904_v6, %v21731_v53  ;;  %v21736_v30 = vld [vmem:[#allocation79_spill] sm:$0xff]  ;;  %v21739_v53 = vld [vmem:[#allocation80_spill] sm:$0xff] }
 0x577   : > { %v21738_v25 = vpack.c.bf16 %v21736_v30, %v21737_v49  ;;  %v21743_v20 = vld [vmem:[#allocation83_spill] sm:$0xff]  ;;  %v21747_v30 = vpack.c.bf16 %v21745_v36, %v21746_v58 }
 0x578   : > { %5289 = vmatmul.mubr.bf16.gmra.mrb[28].mxu1 %v13494_v47  ;;  %v18157_v34 = vmax.bf16 %v21547_v4, %v3120_v11  ;;  %v18160_v27 = vmax.bf16 %v21547_v4, %v3121_v35  ;;  %v18163_v63 = vmax.bf16 %v21547_v4, %v3122_v9  ;;  %v18166_v52 = vmax.bf16 %v21547_v4, %v3123_v0  ;;  %v21740_v47 = vld [vmem:[#allocation78_spill] sm:$0xff]  ;;  %v3740_v9 = vld [vmem:[%s21190_s7 + $0x760] sm:$0xff]  ;;  %v21742_v0 = vld [vmem:[#allocation85_spill] sm:$0xff] }
 0x579   : > { %v2909_v18 = vpop.permute.xlu0 %2908  ;;  %v2914_v33 = vpop.permute.xlu1 %2913  ;;  %5296 = vmatprep.mubr.bf16.mxu1 %v13503_v40  ;;  %v21741_v6 = vpack.c.bf16 %v21739_v53, %v21740_v47  ;;  %v21744_v35 = vpack.c.bf16 %v21742_v0, %v21743_v20  ;;  %v13502_v53 = vcombine.low %v3728_v7, %v3732_v1  ;;  %v13511_v47 = vcombine.high %v3736_v22, %v3740_v9  ;;  %v21752_v7 = vld [vmem:[#allocation89_spill] sm:$0xff]  ;;  %v21753_v1 = vld [vmem:[#allocation87_spill] sm:$0xff] }
 0x57a   : > { %21732 = vst [vmem:[#allocation62_spill] sm:$0xff] %v18157_v34  ;;  %21733 = vst [vmem:[#allocation60_spill] sm:$0xff] %v18160_v27  ;;  %v3124_v62 = vadd.bf16 %v2909_v18, %v21738_v25  ;;  %v3127_v49 = vadd.bf16 %v2914_v33, %v21747_v30  ;;  %v3408_v25 = vmax.bf16 %v18160_v27, %v18157_v34  ;;  %v21755_v30 = vld [vmem:[#allocation90_spill] sm:$0xff]  ;;  %v21762_v34 = vld [vmem:[#allocation92_spill] sm:$0xff] }
 0x57b   : > { %21734 = vst [vmem:[#allocation67_spill] sm:$0xff] %v18163_v63  ;;  %21735 = vst [vmem:[#allocation65_spill] sm:$0xff] %v18166_v52  ;;  %v3125_v11 = vadd.bf16 %v2909_v18, %v21741_v6  ;;  %v3126_v40 = vadd.bf16 %v2914_v33, %v21744_v35  ;;  %v3411_v18 = vmax.bf16 %v18166_v52, %v18163_v63  ;;  %v21759_v63 = vld [vmem:[#allocation91_spill] sm:$0xff]  ;;  %v21761_v52 = vld [vmem:[#allocation94_spill] sm:$0xff] }
 0x57c   : > { %3409 = vmax.xlane.bf16.xlu0 %v3408_v25  ;;  %v18191_v2 = vmax.bf16 %v21547_v4, %v3124_v62  ;;  %v18200_v33 = vmax.bf16 %v21547_v4, %v3127_v49  ;;  %v21754_v36 = vpack.c.bf16 %v21752_v7, %v21753_v1  ;;  %v21756_v25 = vld [vmem:[#allocation88_spill] sm:$0xff]  ;;  %v21758_v49 = vld [vmem:[#allocation93_spill] sm:$0xff]  ;;  %v21763_v7 = vpack.c.bf16 %v21761_v52, %v21762_v34 }
 0x57d   : > { %3412 = vmax.xlane.bf16.xlu1 %v3411_v18  ;;  %v2919_v6 = vpop.permute.xlu0 %2918  ;;  %v18194_v0 = vmax.bf16 %v21547_v4, %v3125_v11  ;;  %v18197_v20 = vmax.bf16 %v21547_v4, %v3126_v40  ;;  %v2924_v35 = vpop.permute.xlu1 %2923  ;;  %v21757_v62 = vpack.c.bf16 %v21755_v30, %v21756_v25  ;;  %v3744_v11 = vld [vmem:[%s21190_s7 + $0x780] sm:$0xff]  ;;  %v13510_v30 = vcombine.low %v3736_v22, %v3740_v9  ;;  %v21768_v22 = vld [vmem:[#allocation97_spill] sm:$0xff] }
 0x57e   : > { %21748 = vst [vmem:[#allocation68_spill] sm:$0xff] %v18191_v2  ;;  %21751 = vst [vmem:[#allocation71_spill] sm:$0xff] %v18200_v33  ;;  %v3128_v58 = vadd.bf16 %v2919_v6, %v21754_v36  ;;  %v3748_v40 = vld [vmem:[%s21190_s7 + $0x7a0] sm:$0xff]  ;;  %v3131_v1 = vadd.bf16 %v2924_v35, %v21763_v7  ;;  %v21771_v7 = vld [vmem:[#allocation98_spill] sm:$0xff] }
 0x57f   : > { %21749 = vst [vmem:[#allocation66_spill] sm:$0xff] %v18194_v0  ;;  %21750 = vst [vmem:[#allocation73_spill] sm:$0xff] %v18197_v20  ;;  %v3129_v18 = vadd.bf16 %v2919_v6, %v21757_v62  ;;  %v3414_v36 = vmax.bf16 %v18194_v0, %v18191_v2  ;;  %v3417_v6 = vmax.bf16 %v18200_v33, %v18197_v20  ;;  %v21769_v9 = vld [vmem:[#allocation95_spill] sm:$0xff]  ;;  %v21777_v33 = vld [vmem:[#allocation102_spill] sm:$0xff] }
 0x580   : > { %5297 = vmatmul.mubr.bf16.gmra.mrb[32].mxu1 %v13502_v53  ;;  %v21760_v53 = vpack.c.bf16 %v21758_v49, %v21759_v63  ;;  %v13519_v25 = vcombine.high %v3744_v11, %v3748_v40  ;;  %v18225_v27 = vmax.bf16 %v21547_v4, %v3128_v58  ;;  %v18234_v52 = vmax.bf16 %v21547_v4, %v3131_v1  ;;  %v21774_v1 = vld [vmem:[#allocation101_spill] sm:$0xff]  ;;  %v21775_v20 = vld [vmem:[#allocation99_spill] sm:$0xff]  ;;  %v21778_v2 = vld [vmem:[#allocation100_spill] sm:$0xff] }
 0x581   : > { %5304 = vmatprep.mubr.bf16.mxu1 %v13511_v47  ;;  %v2929_v62 = vpop.permute.xlu0 %2928  ;;  %v18228_v63 = vmax.bf16 %v21547_v4, %v3129_v18  ;;  %v21770_v49 = vpack.c.bf16 %v21768_v22, %v21769_v9  ;;  %v3752_v18 = vld [vmem:[%s21190_s7 + $0x7c0] sm:$0xff]  ;;  %v21779_v22 = vpack.c.bf16 %v21777_v33, %v21778_v2 }
 0x582   : > { %v3130_v47 = vadd.bf16 %v2924_v35, %v21760_v53  ;;  %21764 = vst [vmem:[#allocation74_spill] sm:$0xff] %v18225_v27  ;;  %21767 = vst [vmem:[#allocation77_spill] sm:$0xff] %v18234_v52  ;;  %v2934_v35 = vpop.permute.xlu1 %2933 }
 0x583   : > { %21765 = vst [vmem:[#allocation72_spill] sm:$0xff] %v18228_v63  ;;  %v3132_v53 = vadd.bf16 %v2929_v62, %v21770_v49  ;;  %v3135_v9 = vadd.bf16 %v2934_v35, %v21779_v22  ;;  %v3420_v49 = vmax.bf16 %v18228_v63, %v18225_v27  ;;  %v21793_v27 = vld [vmem:[#allocation110_spill] sm:$0xff]  ;;  %v21794_v63 = vld [vmem:[#allocation108_spill] sm:$0xff] }
 0x584   : > { %3415 = vmax.xlane.bf16.xlu0 %v3414_v36  ;;  %v18231_v34 = vmax.bf16 %v21547_v4, %v3130_v47  ;;  %v21772_v36 = vld [vmem:[#allocation96_spill] sm:$0xff]  ;;  %v3756_v47 = vld [vmem:[%s21190_s7 + $0x7e0] sm:$0xff] }
 0x585   : > { %3418 = vmax.xlane.bf16.xlu1 %v3417_v6  ;;  %v21773_v58 = vpack.c.bf16 %v21771_v7, %v21772_v36  ;;  %v13518_v7 = vcombine.low %v3744_v11, %v3748_v40  ;;  %v13527_v36 = vcombine.high %v3752_v18, %v3756_v47  ;;  %v18268_v2 = vmax.bf16 %v21547_v4, %v3135_v9  ;;  %v2939_v33 = vpop.permute.xlu0 %2938  ;;  %v21784_v11 = vld [vmem:[#allocation105_spill] sm:$0xff]  ;;  %v21785_v40 = vld [vmem:[#allocation103_spill] sm:$0xff] }
 0x586   : > { %21766 = vst [vmem:[#allocation79_spill] sm:$0xff] %v18231_v34  ;;  %v21790_v9 = vld [vmem:[#allocation109_spill] sm:$0xff] }
 0x587   : > { %v3133_v6 = vadd.bf16 %v2929_v62, %v21773_v58  ;;  %v3423_v62 = vmax.bf16 %v18234_v52, %v18231_v34  ;;  %v18259_v58 = vmax.bf16 %v21547_v4, %v3132_v53  ;;  %21783 = vst [vmem:[#allocation83_spill] sm:$0xff] %v18268_v2  ;;  %v21788_v53 = vld [vmem:[#allocation104_spill] sm:$0xff]  ;;  %v21791_v52 = vld [vmem:[#allocation107_spill] sm:$0xff] }
 0x588   : > { %5305 = vmatmul.mubr.bf16.gmra.mrb[36].mxu1 %v13510_v30  ;;  %v21776_v30 = vpack.c.bf16 %v21774_v1, %v21775_v20 }
 0x589   : > { %5312 = vmatprep.mubr.bf16.mxu1 %v13519_v25  ;;  %21780 = vst [vmem:[#allocation80_spill] sm:$0xff] %v18259_v58  ;;  %v18262_v20 = vmax.bf16 %v21547_v4, %v3133_v6  ;;  %v3505_v6 = vld [vmem:[%s21190_s7 + $0x8] sm:$0xff] }
 0x58a   : > { %v3134_v25 = vadd.bf16 %v2934_v35, %v21776_v30  ;;  %v2944_v35 = vpop.permute.xlu1 %2943  ;;  %v21786_v30 = vpack.c.bf16 %v21784_v11, %v21785_v40  ;;  %v21795_v11 = vpack.c.bf16 %v21793_v27, %v21794_v63  ;;  %v2949_v63 = vpop.permute.xlu0 %2948 }
 0x58b   : > { %21781 = vst [vmem:[#allocation78_spill] sm:$0xff] %v18262_v20 }
 0x58c   : > { %3421 = vmax.xlane.bf16.xlu0 %v3420_v49  ;;  %v18265_v1 = vmax.bf16 %v21547_v4, %v3134_v25  ;;  %v3136_v22 = vadd.bf16 %v2939_v33, %v21786_v30  ;;  %v21787_v49 = vld [vmem:[#allocation106_spill] sm:$0xff]  ;;  %v3509_v25 = vld [vmem:[%s21190_s7 + $0x28] sm:$0xff]  ;;  %v3139_v40 = vadd.bf16 %v2944_v35, %v21795_v11  ;;  %v3426_v30 = vmax.bf16 %v18262_v20, %v18259_v58 }
 0x58d   : > { %3424 = vmax.xlane.bf16.xlu1 %v3423_v62  ;;  %v21789_v62 = vpack.c.bf16 %v21787_v49, %v21788_v53  ;;  %v13526_v49 = vcombine.low %v3752_v18, %v3756_v47  ;;  %v13281_v53 = vcombine.high %v3505_v6, %v3509_v25  ;;  %v21800_v18 = vld [vmem:[#allocation113_spill] sm:$0xff]  ;;  %v21801_v47 = vld [vmem:[#allocation111_spill] sm:$0xff]  ;;  %v21809_v58 = vld [vmem:[#allocation118_spill] sm:$0xff] }
 0x58e   : > { %21782 = vst [vmem:[#allocation85_spill] sm:$0xff] %v18265_v1  ;;  %v18302_v27 = vmax.bf16 %v21547_v4, %v3139_v40  ;;  %v21806_v40 = vld [vmem:[#allocation117_spill] sm:$0xff]  ;;  %v21810_v20 = vld [vmem:[#allocation116_spill] sm:$0xff] }
 0x58f   : > { %v3137_v34 = vadd.bf16 %v2939_v33, %v21789_v62  ;;  %v3429_v33 = vmax.bf16 %v18268_v2, %v18265_v1  ;;  %v18293_v62 = vmax.bf16 %v21547_v4, %v3136_v22  ;;  %v21804_v22 = vld [vmem:[#allocation112_spill] sm:$0xff]  ;;  %v21807_v2 = vld [vmem:[#allocation115_spill] sm:$0xff] }
 0x590   : > { %5313 = vmatmul.mubr.bf16.gmra.mrb[40].mxu1 %v13518_v7  ;;  %v21792_v7 = vpack.c.bf16 %v21790_v9, %v21791_v52  ;;  %21799 = vst [vmem:[#allocation87_spill] sm:$0xff] %v18302_v27 }
 0x591   : > { %5320 = vmatprep.mubr.bf16.mxu1 %v13527_v36  ;;  %21796 = vst [vmem:[#allocation86_spill] sm:$0xff] %v18293_v62  ;;  %v18296_v52 = vmax.bf16 %v21547_v4, %v3137_v34  ;;  %v3513_v34 = vld [vmem:[%s21190_s7 + $0x48] sm:$0xff] }
 0x592   : > { %v3138_v36 = vadd.bf16 %v2944_v35, %v21792_v7  ;;  %v2954_v35 = vpop.permute.xlu1 %2953  ;;  %v21802_v7 = vpack.c.bf16 %v21800_v18, %v21801_v47  ;;  %v21811_v18 = vpack.c.bf16 %v21809_v58, %v21810_v20  ;;  %v2959_v20 = vpop.permute.xlu0 %2958 }
 0x593   : > { %21797 = vst [vmem:[#allocation84_spill] sm:$0xff] %v18296_v52 }
 0x594   : > { %3427 = vmax.xlane.bf16.xlu0 %v3426_v30  ;;  %v18299_v9 = vmax.bf16 %v21547_v4, %v3138_v36  ;;  %v3140_v11 = vadd.bf16 %v2949_v63, %v21802_v7  ;;  %v21803_v30 = vld [vmem:[#allocation114_spill] sm:$0xff]  ;;  %v3517_v36 = vld [vmem:[%s21190_s7 + $0x68] sm:$0xff]  ;;  %v3143_v47 = vadd.bf16 %v2954_v35, %v21811_v18  ;;  %v3432_v7 = vmax.bf16 %v18296_v52, %v18293_v62 }
 0x595   : > { %3430 = vmax.xlane.bf16.xlu1 %v3429_v33  ;;  %v21805_v33 = vpack.c.bf16 %v21803_v30, %v21804_v22  ;;  %v13280_v30 = vcombine.low %v3505_v6, %v3509_v25  ;;  %v13289_v22 = vcombine.high %v3513_v34, %v3517_v36  ;;  %v21816_v6 = vld [vmem:[#allocation121_spill] sm:$0xff]  ;;  %v21817_v25 = vld [vmem:[#allocation119_spill] sm:$0xff]  ;;  %v21825_v62 = vld [vmem:[#allocation126_spill] sm:$0xff] }
 0x596   : > { %21798 = vst [vmem:[#allocation89_spill] sm:$0xff] %v18299_v9  ;;  %v18336_v58 = vmax.bf16 %v21547_v4, %v3143_v47  ;;  %v21822_v47 = vld [vmem:[#allocation125_spill] sm:$0xff]  ;;  %v21826_v52 = vld [vmem:[#allocation124_spill] sm:$0xff] }
 0x597   : > { %v3141_v1 = vadd.bf16 %v2949_v63, %v21805_v33  ;;  %v3435_v63 = vmax.bf16 %v18302_v27, %v18299_v9  ;;  %v18327_v33 = vmax.bf16 %v21547_v4, %v3140_v11  ;;  %v21820_v11 = vld [vmem:[#allocation120_spill] sm:$0xff]  ;;  %v21823_v27 = vld [vmem:[#allocation123_spill] sm:$0xff] }
 0x598   : > { %5321 = vmatmul.mubr.bf16.gmra.mrb[44].mxu1 %v13526_v49  ;;  %v21808_v49 = vpack.c.bf16 %v21806_v40, %v21807_v2  ;;  %21815 = vst [vmem:[#allocation91_spill] sm:$0xff] %v18336_v58 }
 0x599   : > { %5361 = vmatprep.mubr.bf16.mxu1 %v13281_v53  ;;  %21812 = vst [vmem:[#allocation90_spill] sm:$0xff] %v18327_v33  ;;  %v18330_v2 = vmax.bf16 %v21547_v4, %v3141_v1  ;;  %v3521_v1 = vld [vmem:[%s21190_s7 + $0x88] sm:$0xff] }
 0x59a   : > { %v3142_v53 = vadd.bf16 %v2954_v35, %v21808_v49  ;;  %v2964_v35 = vpop.permute.xlu1 %2963  ;;  %v21818_v49 = vpack.c.bf16 %v21816_v6, %v21817_v25  ;;  %v21827_v6 = vpack.c.bf16 %v21825_v62, %v21826_v52  ;;  %v2969_v52 = vpop.permute.xlu0 %2968 }
 0x59b   : > { %21813 = vst [vmem:[#allocation88_spill] sm:$0xff] %v18330_v2 }
 0x59c   : > { %3433 = vmax.xlane.bf16.xlu0 %v3432_v7  ;;  %v18333_v40 = vmax.bf16 %v21547_v4, %v3142_v53  ;;  %v3144_v18 = vadd.bf16 %v2959_v20, %v21818_v49  ;;  %v21819_v7 = vld [vmem:[#allocation122_spill] sm:$0xff]  ;;  %v3525_v53 = vld [vmem:[%s21190_s7 + $0xa8] sm:$0xff]  ;;  %v3147_v25 = vadd.bf16 %v2964_v35, %v21827_v6  ;;  %v3438_v49 = vmax.bf16 %v18330_v2, %v18327_v33 }
 0x59d   : > { %3436 = vmax.xlane.bf16.xlu1 %v3435_v63  ;;  %v21821_v63 = vpack.c.bf16 %v21819_v7, %v21820_v11  ;;  %v13288_v7 = vcombine.low %v3513_v34, %v3517_v36  ;;  %v13297_v11 = vcombine.high %v3521_v1, %v3525_v53  ;;  %v21832_v34 = vld [vmem:[#allocation131_spill] sm:$0xff]  ;;  %v21833_v36 = vld [vmem:[#allocation128_spill] sm:$0xff]  ;;  %v21842_v2 = vld [vmem:[#allocation134_spill] sm:$0xff] }
 0x59e   : > { %21814 = vst [vmem:[#allocation93_spill] sm:$0xff] %v18333_v40  ;;  %v18370_v62 = vmax.bf16 %v21547_v4, %v3147_v25  ;;  %v21838_v25 = vld [vmem:[#allocation135_spill] sm:$0xff]  ;;  %v21841_v33 = vld [vmem:[#allocation136_spill] sm:$0xff] }
 0x59f   : > { %v3145_v9 = vadd.bf16 %v2959_v20, %v21821_v63  ;;  %v3441_v20 = vmax.bf16 %v18336_v58, %v18333_v40  ;;  %v18361_v63 = vmax.bf16 %v21547_v4, %v3144_v18  ;;  %v21836_v18 = vld [vmem:[#allocation129_spill] sm:$0xff] }
 0x5a0   : > { %5362 = vmatmul.mubr.bf16.vlgmr.msra.gmra.mrb[176].mxu1 %v13280_v30  ;;  %v21824_v30 = vpack.c.bf16 %v21822_v47, %v21823_v27  ;;  %21831 = vst [vmem:[#allocation95_spill] sm:$0xff] %v18370_v62  ;;  %v21839_v58 = vld [vmem:[#allocation133_spill] sm:$0xff] }
 0x5a1   : > { %5369 = vmatprep.mubr.bf16.mxu1 %v13289_v22  ;;  %21828 = vst [vmem:[#allocation94_spill] sm:$0xff] %v18361_v63  ;;  %v18364_v27 = vmax.bf16 %v21547_v4, %v3145_v9  ;;  %v3529_v9 = vld [vmem:[%s21190_s7 + $0xc8] sm:$0xff] }
 0x5a2   : > { %v3146_v22 = vadd.bf16 %v2964_v35, %v21824_v30  ;;  %v2974_v35 = vpop.permute.xlu1 %2973  ;;  %v21834_v30 = vpack.c.bf16 %v21832_v34, %v21833_v36  ;;  %v21843_v34 = vpack.c.bf16 %v21841_v33, %v21842_v2  ;;  %v3537_v2 = vld [vmem:[%s21190_s7 + $0x108] sm:$0xff] }
 0x5a3   : > { %21829 = vst [vmem:[#allocation92_spill] sm:$0xff] %v18364_v27 }
 0x5a4   : > { %3439 = vmax.xlane.bf16.xlu0 %v3438_v49  ;;  %v18367_v47 = vmax.bf16 %v21547_v4, %v3146_v22  ;;  %v3148_v6 = vadd.bf16 %v2969_v52, %v21834_v30  ;;  %v21835_v49 = vld [vmem:[#allocation132_spill] sm:$0xff]  ;;  %v3151_v36 = vadd.bf16 %v2974_v35, %v21843_v34  ;;  %v3444_v30 = vmax.bf16 %v18364_v27, %v18361_v63  ;;  %v21864_v63 = vld [vmem:[#allocation150_spill] sm:$0xff] }
 0x5a5   : > { %3442 = vmax.xlane.bf16.xlu1 %v3441_v20  ;;  %v21837_v20 = vpack.c.bf16 %v21835_v49, %v21836_v18  ;;  %v3533_v22 = vld [vmem:[%s21190_s7 + $0xe8] sm:$0xff]  ;;  %v13296_v49 = vcombine.low %v3521_v1, %v3525_v53 }
 0x5a6   : > { %21830 = vst [vmem:[#allocation97_spill] sm:$0xff] %v18367_v47  ;;  %v13305_v18 = vcombine.high %v3529_v9, %v3533_v22  ;;  %v18404_v33 = vmax.bf16 %v21547_v4, %v3151_v36  ;;  %v3541_v1 = vld [vmem:[%s21190_s7 + $0x128] sm:$0xff] }
 0x5a7   : > { %v3149_v40 = vadd.bf16 %v2969_v52, %v21837_v20  ;;  %v3447_v52 = vmax.bf16 %v18370_v62, %v18367_v47  ;;  %v18395_v20 = vmax.bf16 %v21547_v4, %v3148_v6  ;;  %v13313_v6 = vcombine.high %v3537_v2, %v3541_v1  ;;  %v21854_v47 = vld [vmem:[#allocation139_spill] sm:$0xff]  ;;  %v21857_v62 = vld [vmem:[#allocation140_spill] sm:$0xff] }
 0x5a8   : > { %5370 = vmatmul.mubr.bf16.gmra.mrb[180].mxu1 %v13288_v7  ;;  %v21840_v7 = vpack.c.bf16 %v21838_v25, %v21839_v58  ;;  %21847 = vst [vmem:[#allocation99_spill] sm:$0xff] %v18404_v33  ;;  %v13312_v34 = vcombine.low %v3537_v2, %v3541_v1  ;;  %v2646_v1 = vld [vmem:[%s21492_s0 + $0x330] sm:$0xff] }
 0x5a9   : > { %5377 = vmatprep.mubr.bf16.mxu1 %v13297_v11  ;;  %21844 = vst [vmem:[#allocation98_spill] sm:$0xff] %v18395_v20  ;;  %v18398_v58 = vmax.bf16 %v21547_v4, %v3149_v40 }
 0x5aa   : > { %v3150_v11 = vadd.bf16 %v2974_v35, %v21840_v7  ;;  %v13304_v35 = vcombine.low %v3529_v9, %v3533_v22  ;;  %v3545_v7 = vld [vmem:[%s21190_s7 + $0x148] sm:$0xff] }
 0x5ab   : > { %21845 = vst [vmem:[#allocation96_spill] sm:$0xff] %v18398_v58  ;;  %v3450_v40 = vmax.bf16 %v18398_v58, %v18395_v20  ;;  %v3553_v9 = vld [vmem:[%s21190_s7 + $0x188] sm:$0xff] }
 0x5ac   : > { %3445 = vmax.xlane.bf16.xlu0 %v3444_v30  ;;  %v18401_v25 = vmax.bf16 %v21547_v4, %v3150_v11  ;;  %v3549_v11 = vld [vmem:[%s21190_s7 + $0x168] sm:$0xff]  ;;  %v2642_v30 = vld [vmem:[%s21492_s0 + $0x310] sm:$0xff] }
 0x5ad   : > { %3448 = vmax.xlane.bf16.xlu1 %v3447_v52  ;;  %v13321_v36 = vcombine.high %v3545_v7, %v3549_v11  ;;  %v3557_v22 = vld [vmem:[%s21190_s7 + $0x1a8] sm:$0xff]  ;;  %v2643_v52 = vld [vmem:[%s21492_s0 + $0x318] sm:$0xff] }
 0x5ae   : > { %21846 = vst [vmem:[#allocation101_spill] sm:$0xff] %v18401_v25  ;;  %v3453_v53 = vmax.bf16 %v18404_v33, %v18401_v25  ;;  %v2721_v2 = vpack.c.bf16 %v2643_v52, %v2642_v30  ;;  %v2651_v30 = vld [vmem:[%s21492_s0 + $0x358] sm:$0xff]  ;;  %v13328_v52 = vcombine.low %v3553_v9, %v3557_v22 }
 0x5b0   : > { %5378 = vmatmul.mubr.bf16.gmra.mrb[184].mxu1 %v13296_v49  ;;  %v13320_v49 = vcombine.low %v3545_v7, %v3549_v11  ;;  %v3561_v7 = vld [vmem:[%s21190_s7 + $0x1c8] sm:$0xff] }
 0x5b1   : > { %5385 = vmatprep.mubr.bf16.mxu1 %v13305_v18  ;;  %v13329_v18 = vcombine.high %v3553_v9, %v3557_v22  ;;  %v3565_v11 = vld [vmem:[%s21190_s7 + $0x1e8] sm:$0xff]  ;;  %v2655_v9 = vld [vmem:[%s21492_s0 + $0x378] sm:$0xff]  ;;  %v2648_v22 = vld [vmem:[%s21492_s0 + $0x340] sm:$0xff] }
 0x5b4   : > { %3451 = vmax.xlane.bf16.xlu0 %v3450_v40  ;;  %v2647_v40 = vld [vmem:[%s21492_s0 + $0x338] sm:$0xff] }
 0x5b5   : > { %3454 = vmax.xlane.bf16.xlu1 %v3453_v53  ;;  %v2640_v53 = vld [vmem:[%s21492_s0 + $0x300] sm:$0xff] }
 0x5b8   : > { %5386 = vmatmul.mubr.bf16.gmra.mrb[188].mxu1 %v13304_v35  ;;  %v2641_v35 = vld [vmem:[%s21492_s0 + $0x308] sm:$0xff] }
 0x5b9   : > { %5393 = vmatprep.mubr.bf16.mxu1 %v13313_v6  ;;  %v2723_v6 = vpack.c.bf16 %v2647_v40, %v2646_v1 }
 0x5c0   : > { %5394 = vmatmul.mubr.bf16.gmra.mrb[192].mxu1 %v13312_v34  ;;  %v2720_v34 = vpack.c.bf16 %v2641_v35, %v2640_v53  ;;  %v2654_v53 = vld [vmem:[%s21492_s0 + $0x370] sm:$0xff]  ;;  %v2649_v35 = vld [vmem:[%s21492_s0 + $0x348] sm:$0xff] }
 0x5c1   : > { %5401 = vmatprep.mubr.bf16.mxu1 %v13321_v36  ;;  %v2650_v36 = vld [vmem:[%s21492_s0 + $0x350] sm:$0xff] }
 0x5c2   : > { %v2725_v1 = vpack.c.bf16 %v2651_v30, %v2650_v36  ;;  %v3573_v36 = vld [vmem:[%s21190_s7 + $0x228] sm:$0xff]  ;;  %v2724_v30 = vpack.c.bf16 %v2649_v35, %v2648_v22  ;;  %v2662_v22 = vld [vmem:[%s21492_s0 + $0x3b0] sm:$0xff] }
 0x5c3   : > { %v2657_v35 = vld [vmem:[%s21492_s0 + $0x388] sm:$0xff] }
 0x5c8   : > { %5402 = vmatmul.mubr.bf16.gmra.mrb[196].mxu1 %v13320_v49  ;;  %v2644_v49 = vld [vmem:[%s21492_s0 + $0x320] sm:$0xff] }
 0x5c9   : > { %5409 = vmatprep.mubr.bf16.mxu1 %v13329_v18  ;;  %v2645_v18 = vld [vmem:[%s21492_s0 + $0x328] sm:$0xff] }
 0x5ca   : > { %2983 = vperm.xlu1 %15463, %v2721_v2   ;;  %v13337_v2 = vcombine.high %v3561_v7, %v3565_v11  ;;  %v2722_v40 = vpack.c.bf16 %v2645_v18, %v2644_v49  ;;  %v2659_v49 = vld [vmem:[%s21492_s0 + $0x398] sm:$0xff]  ;;  %v13336_v18 = vcombine.low %v3561_v7, %v3565_v11  ;;  %v2656_v11 = vld [vmem:[%s21492_s0 + $0x380] sm:$0xff] }
 0x5cb   : > { %v2663_v7 = vld [vmem:[%s21492_s0 + $0x3b8] sm:$0xff] }
 0x5ce   : > { %2993 = vperm.xlu1 %15463, %v2723_v6   ;;  %2978 = vperm.xlu0 %15462, %v2720_v34   ;;  %v2727_v6 = vpack.c.bf16 %v2655_v9, %v2654_v53  ;;  %v3569_v34 = vld [vmem:[%s21190_s7 + $0x208] sm:$0xff] }
 0x5cf   : > { %v13345_v53 = vcombine.high %v3569_v34, %v3573_v36 }
 0x5d0   : > { %5410 = vmatmul.mubr.bf16.gmra.mrb[200].mxu1 %v13328_v52  ;;  %v2658_v52 = vld [vmem:[%s21492_s0 + $0x390] sm:$0xff] }
 0x5d1   : > { %5417 = vmatprep.mubr.bf16.mxu1 %v13337_v2  ;;  %v2652_v2 = vld [vmem:[%s21492_s0 + $0x360] sm:$0xff] }
 0x5d2   : > { %3003 = vperm.xlu1 %15463, %v2725_v1   ;;  %2988 = vperm.xlu0 %15462, %v2722_v40   ;;  %v2653_v1 = vld [vmem:[%s21492_s0 + $0x368] sm:$0xff]  ;;  %v2729_v40 = vpack.c.bf16 %v2659_v49, %v2658_v52  ;;  %v2728_v49 = vpack.c.bf16 %v2657_v35, %v2656_v11  ;;  %v2670_v11 = vld [vmem:[%s21492_s0 + $0x3f0] sm:$0xff] }
 0x5d3   : > { %v2726_v9 = vpack.c.bf16 %v2653_v1, %v2652_v2  ;;  %v3581_v52 = vld [vmem:[%s21190_s7 + $0x268] sm:$0xff]  ;;  %v2667_v2 = vld [vmem:[%s21492_s0 + $0x3d8] sm:$0xff]  ;;  %v13344_v1 = vcombine.low %v3569_v34, %v3573_v36  ;;  %v2664_v36 = vld [vmem:[%s21492_s0 + $0x3c0] sm:$0xff] }
 0x5d4   : > { %v2671_v34 = vld [vmem:[%s21492_s0 + $0x3f8] sm:$0xff]  ;;  %v2665_v35 = vld [vmem:[%s21492_s0 + $0x3c8] sm:$0xff] }
 0x5d6   : > { %3013 = vperm.xlu1 %15463, %v2727_v6   ;;  %2998 = vperm.xlu0 %15462, %v2724_v30   ;;  %v2731_v6 = vpack.c.bf16 %v2663_v7, %v2662_v22  ;;  %v3577_v30 = vld [vmem:[%s21190_s7 + $0x248] sm:$0xff] }
 0x5d7   : > { %v13353_v22 = vcombine.high %v3577_v30, %v3581_v52 }
 0x5d8   : > { %5418 = vmatmul.mubr.bf16.gmra.mrb[204].mxu1 %v13336_v18  ;;  %v2666_v18 = vld [vmem:[%s21492_s0 + $0x3d0] sm:$0xff] }
 0x5d9   : > { %5425 = vmatprep.mubr.bf16.mxu1 %v13345_v53  ;;  %v2660_v53 = vld [vmem:[%s21492_s0 + $0x3a0] sm:$0xff] }
 0x5da   : > { %3023 = vperm.xlu1 %15463, %v2729_v40   ;;  %3008 = vperm.xlu0 %15462, %v2726_v9   ;;  %v2661_v40 = vld [vmem:[%s21492_s0 + $0x3a8] sm:$0xff]  ;;  %v2733_v9 = vpack.c.bf16 %v2667_v2, %v2666_v18  ;;  %v2732_v2 = vpack.c.bf16 %v2665_v35, %v2664_v36 }
 0x5db   : > { %v2730_v7 = vpack.c.bf16 %v2661_v40, %v2660_v53  ;;  %v3589_v18 = vld [vmem:[%s21190_s7 + $0x2a8] sm:$0xff]  ;;  %v2668_v53 = vld [vmem:[%s21492_s0 + $0x3e0] sm:$0xff] }
 0x5dc   : > { %v2669_v40 = vld [vmem:[%s21492_s0 + $0x3e8] sm:$0xff]  ;;  %s15932_s0 = scalar_lea.vmem %s15931_s26, 512 }
 0x5dd   : > { %v3605_v36 = vld [vmem:[%s21190_s7 + $0x328] sm:$0xff]  ;;  %p15934_p11 = scmp.lt.s32.totalorder %s15932_s0, %s15926_s22 }
 0x5de   : > { %3033 = vperm.xlu1 %15463, %v2731_v6   ;;  %3018 = vperm.xlu0 %15462, %v2728_v49   ;;  %v2735_v6 = vpack.c.bf16 %v2671_v34, %v2670_v11  ;;  %v3585_v49 = vld [vmem:[%s21190_s7 + $0x288] sm:$0xff] }
 0x5df   : > { %v3601_v34 = vld [vmem:[%s21190_s7 + $0x308] sm:$0xff]  ;;  %p15935_p13 = por %p15934_p11, %p15933_p8 }
 0x5e0   : > { %5426 = vmatmul.mubr.bf16.gmra.mrb[208].mxu1 %v13344_v1  ;;  %v13352_v1 = vcombine.low %v3577_v30, %v3581_v52  ;;  %v3597_v30 = vld [vmem:[%s21190_s7 + $0x2e8] sm:$0xff]  ;;  %v13360_v52 = vcombine.low %v3585_v49, %v3589_v18 }
 0x5e1   : > { %5433 = vmatprep.mubr.bf16.mxu1 %v13353_v22  ;;  %v13361_v22 = vcombine.high %v3585_v49, %v3589_v18  ;;  %v3613_v49 = vld [vmem:[%s21190_s7 + $0x368] sm:$0xff]  ;;  %v13376_v18 = vcombine.low %v3601_v34, %v3605_v36  ;;  %p15936_p5 = pnand %p15935_p13, %p15929_p7 }
 0x5e2   : > { %3043 = vperm.xlu1 %15463, %v2733_v9   ;;  %3028 = vperm.xlu0 %15462, %v2730_v7   ;;  %v2734_v9 = vpack.c.bf16 %v2669_v40, %v2668_v53  ;;  %v3593_v7 = vld [vmem:[%s21190_s7 + $0x2c8] sm:$0xff] }
 0x5e3   : > { %v13369_v11 = vcombine.high %v3593_v7, %v3597_v30  ;;  %v13368_v35 = vcombine.low %v3593_v7, %v3597_v30  ;;  %v3617_v53 = vld [vmem:[%s21190_s7 + $0x388] sm:$0xff] }
 0x5e4   : > { %v3621_v40 = vld [vmem:[%s21190_s7 + $0x3a8] sm:$0xff] }
 0x5e5   : > { %v3625_v7 = vld [vmem:[%s21190_s7 + $0x3c8] sm:$0xff] }
 0x5e6   : > { %3053 = vperm.xlu1 %15463, %v2735_v6   ;;  %3038 = vperm.xlu0 %15462, %v2732_v2   ;;  %v13377_v6 = vcombine.high %v3601_v34, %v3605_v36  ;;  %v3609_v2 = vld [vmem:[%s21190_s7 + $0x348] sm:$0xff] }
 0x5e7   : > { %v3629_v30 = vld [vmem:[%s21190_s7 + $0x3e8] sm:$0xff] }
 0x5e8   : > { %5434 = vmatmul.mubr.bf16.gmra.mrb[212].mxu1 %v13352_v1  ;;  %v13385_v1 = vcombine.high %v3609_v2, %v3613_v49 }
 0x5e9   : > { %5441 = vmatprep.mubr.bf16.mxu1 %v13361_v22  ;;  %v13384_v22 = vcombine.low %v3609_v2, %v3613_v49  ;;  %v13400_v2 = vcombine.low %v3625_v7, %v3629_v30 }
 0x5ea   : > { %3048 = vperm.xlu0 %15462, %v2734_v9   ;;  %v13393_v9 = vcombine.high %v3617_v53, %v3621_v40 }
 0x5f0   : > { %5442 = vmatmul.mubr.bf16.gmra.mrb[216].mxu1 %v13360_v52  ;;  %v13392_v52 = vcombine.low %v3617_v53, %v3621_v40  ;;  %v3641_v53 = vld [vmem:[%s21190_s7 + $0x448] sm:$0xff] }
 0x5f1   : > { %5449 = vmatprep.mubr.bf16.mxu1 %v13369_v11  ;;  %v13401_v11 = vcombine.high %v3625_v7, %v3629_v30  ;;  %v3645_v40 = vld [vmem:[%s21190_s7 + $0x468] sm:$0xff] }
 0x5f8   : > { %5450 = vmatmul.mubr.bf16.gmra.mrb[220].mxu1 %v13368_v35  ;;  %v3633_v35 = vld [vmem:[%s21190_s7 + $0x408] sm:$0xff] }
 0x5f9   : > { %5457 = vmatprep.mubr.bf16.mxu1 %v13377_v6  ;;  %v3637_v6 = vld [vmem:[%s21190_s7 + $0x428] sm:$0xff] }
 0x5fa   : > { %v13409_v49 = vcombine.high %v3633_v35, %v3637_v6 }
 0x600   : > { %5458 = vmatmul.mubr.bf16.gmra.mrb[224].mxu1 %v13376_v18 }
 0x601   : > { %5465 = vmatprep.mubr.bf16.mxu1 %v13385_v1 }
 0x608   : > { %5466 = vmatmul.mubr.bf16.gmra.mrb[228].mxu1 %v13384_v22  ;;  %v13408_v22 = vcombine.low %v3633_v35, %v3637_v6 }
 0x609   : > { %5473 = vmatprep.mubr.bf16.mxu1 %v13393_v9  ;;  %v13417_v9 = vcombine.high %v3641_v53, %v3645_v40 }
 0x60d   : > { %v3410_v34 = vpop.xlane.xlu0 %3409 }
 0x60e   : > { %5619 = vmatpush1.bf16.msra.mxu1 %v3410_v34  ;;  %v3413_v36 = vpop.xlane.xlu1 %3412  ;;  %v13416_v34 = vcombine.low %v3641_v53, %v3645_v40 }
 0x60f   : > { %5620 = vmatprep.subr.bf16.mxu1 %v21547_v4 }
 0x610   : > { %5474 = vmatmul.mubr.bf16.gmra.mrb[232].mxu1 %v13392_v52  ;;  %v3649_v52 = vld [vmem:[%s21190_s7 + $0x488] sm:$0xff] }
 0x611   : > { %5481 = vmatprep.mubr.bf16.mxu1 %v13401_v11  ;;  %v3653_v11 = vld [vmem:[%s21190_s7 + $0x4a8] sm:$0xff] }
 0x612   : > { %5621 = vmatpush1.bf16.msra.mxu1 %v3413_v36  ;;  %v13425_v36 = vcombine.high %v3649_v52, %v3653_v11 }
 0x613   : > { %5622 = vmatprep.subr.bf16.mxu1 %v21547_v4 }
 0x615   : > { %v3416_v18 = vpop.xlane.xlu0 %3415 }
 0x616   : > { %5623 = vmatpush1.bf16.msra.mxu1 %v3416_v18  ;;  %v3419_v1 = vpop.xlane.xlu1 %3418  ;;  %v13424_v18 = vcombine.low %v3649_v52, %v3653_v11 }
 0x617   : > { %5624 = vmatprep.subr.bf16.mxu1 %v21547_v4 }
 0x618   : > { %5482 = vmatmul.mubr.bf16.gmra.mrb[236].mxu1 %v13400_v2  ;;  %v3657_v2 = vld [vmem:[%s21190_s7 + $0x4c8] sm:$0xff] }
 0x619   : > { %5489 = vmatprep.mubr.bf16.mxu1 %v13409_v49  ;;  %v3661_v49 = vld [vmem:[%s21190_s7 + $0x4e8] sm:$0xff] }
 0x61a   : > { %5625 = vmatpush1.bf16.msra.mxu1 %v3419_v1  ;;  %v13433_v1 = vcombine.high %v3657_v2, %v3661_v49 }
 0x61b   : > { %5626 = vmatprep.subr.bf16.mxu1 %v21547_v4 }
 0x61d   : > { %v3422_v7 = vpop.xlane.xlu0 %3421 }
 0x61e   : > { %5627 = vmatpush1.bf16.msra.mxu1 %v3422_v7  ;;  %v3425_v30 = vpop.xlane.xlu1 %3424  ;;  %v13432_v7 = vcombine.low %v3657_v2, %v3661_v49 }
 0x61f   : > { %5628 = vmatprep.subr.bf16.mxu1 %v21547_v4 }
 0x620   : > { %5490 = vmatmul.mubr.bf16.gmra.mrb[240].mxu1 %v13408_v22  ;;  %v3665_v22 = vld [vmem:[%s21190_s7 + $0x508] sm:$0xff] }
 0x621   : > { %5497 = vmatprep.mubr.bf16.mxu1 %v13417_v9  ;;  %v3669_v9 = vld [vmem:[%s21190_s7 + $0x528] sm:$0xff] }
 0x622   : > { %5629 = vmatpush1.bf16.msra.mxu1 %v3425_v30  ;;  %v13441_v30 = vcombine.high %v3665_v22, %v3669_v9 }
 0x623   : > { %5630 = vmatprep.subr.bf16.mxu1 %v21547_v4 }
 0x625   : > { %v3428_v35 = vpop.xlane.xlu0 %3427 }
 0x626   : > { %5631 = vmatpush1.bf16.msra.mxu1 %v3428_v35  ;;  %v3431_v6 = vpop.xlane.xlu1 %3430  ;;  %v13440_v35 = vcombine.low %v3665_v22, %v3669_v9 }
 0x627   : > { %5632 = vmatprep.subr.bf16.mxu1 %v21547_v4 }
 0x628   : > { %5498 = vmatmul.mubr.bf16.gmra.mrb[244].mxu1 %v13416_v34  ;;  %v3673_v34 = vld [vmem:[%s21190_s7 + $0x548] sm:$0xff] }
 0x629   : > { %5505 = vmatprep.mubr.bf16.mxu1 %v13425_v36  ;;  %v3677_v36 = vld [vmem:[%s21190_s7 + $0x568] sm:$0xff] }
 0x62a   : > { %5633 = vmatpush1.bf16.msra.mxu1 %v3431_v6  ;;  %v13449_v6 = vcombine.high %v3673_v34, %v3677_v36 }
 0x62b   : > { %5634 = vmatprep.subr.bf16.mxu1 %v21547_v4 }
 0x62d   : > { %v3434_v53 = vpop.xlane.xlu0 %3433 }
 0x62e   : > { %5635 = vmatpush1.bf16.msra.mxu1 %v3434_v53  ;;  %v3437_v40 = vpop.xlane.xlu1 %3436  ;;  %v13448_v53 = vcombine.low %v3673_v34, %v3677_v36 }
 0x62f   : > { %5636 = vmatprep.subr.bf16.mxu1 %v21547_v4 }
 0x630   : > { %5506 = vmatmul.mubr.bf16.gmra.mrb[248].mxu1 %v13424_v18  ;;  %v3681_v18 = vld [vmem:[%s21190_s7 + $0x588] sm:$0xff] }
 0x631   : > { %5513 = vmatprep.mubr.bf16.mxu1 %v13433_v1  ;;  %v3685_v1 = vld [vmem:[%s21190_s7 + $0x5a8] sm:$0xff] }
 0x632   : > { %5637 = vmatpush1.bf16.msra.mxu1 %v3437_v40  ;;  %v13457_v40 = vcombine.high %v3681_v18, %v3685_v1 }
 0x633   : > { %5638 = vmatprep.subr.bf16.mxu1 %v21547_v4 }
 0x635   : > { %v3440_v52 = vpop.xlane.xlu0 %3439 }
 0x636   : > { %5639 = vmatpush1.bf16.msra.mxu1 %v3440_v52  ;;  %v3443_v11 = vpop.xlane.xlu1 %3442  ;;  %v3693_v52 = vld [vmem:[%s21190_s7 + $0x5e8] sm:$0xff] }
 0x637   : > { %5640 = vmatprep.subr.bf16.mxu1 %v21547_v4 }
 0x638   : > { %5514 = vmatmul.mubr.bf16.gmra.mrb[252].mxu1 %v13432_v7 }
 0x639   : > { %5521 = vmatprep.mubr.bf16.mxu1 %v13441_v30  ;;  %v3689_v30 = vld [vmem:[%s21190_s7 + $0x5c8] sm:$0xff] }
 0x63a   : > { %5641 = vmatpush1.bf16.msra.mxu1 %v3443_v11  ;;  %v21848_v11 = vld [vmem:[#allocation143_spill] sm:$0xff]  ;;  %v13465_v33 = vcombine.high %v3689_v30, %v3693_v52 }
 0x63b   : > { %5642 = vmatprep.subr.bf16.mxu1 %v21547_v4 }
 0x63d   : > { %v3446_v2 = vpop.xlane.xlu0 %3445 }
 0x63e   : > { %5643 = vmatpush1.bf16.msra.mxu1 %v3446_v2  ;;  %v3449_v49 = vpop.xlane.xlu1 %3448  ;;  %v21852_v2 = vld [vmem:[#allocation142_spill] sm:$0xff] }
 0x63f   : > { %5644 = vmatprep.subr.bf16.mxu1 %v21547_v4 }
 0x640   : > { %5522 = vmatmul.mubr.bf16.gmra.mrb[0].mxu1 %v13440_v35  ;;  %v21849_v35 = vld [vmem:[#allocation141_spill] sm:$0xff] }
 0x641   : > { %5529 = vmatprep.mubr.bf16.mxu1 %v13449_v6  ;;  %v21850_v34 = vpack.c.bf16 %v21848_v11, %v21849_v35  ;;  %v21851_v6 = vld [vmem:[#allocation144_spill] sm:$0xff]  ;;  %v21855_v11 = vld [vmem:[#allocation137_spill] sm:$0xff] }
 0x642   : > { %5645 = vmatpush1.bf16.msra.mxu1 %v3449_v49  ;;  %v21853_v49 = vpack.c.bf16 %v21851_v6, %v21852_v2  ;;  %v21856_v35 = vpack.c.bf16 %v21854_v47, %v21855_v11  ;;  %v21858_v6 = vld [vmem:[#allocation138_spill] sm:$0xff]  ;;  %v21867_v11 = vld [vmem:[#allocation147_spill] sm:$0xff] }
 0x643   : > { %5646 = vmatprep.subr.bf16.mxu1 %v21547_v4 }
 0x645   : > { %v3452_v22 = vpop.xlane.xlu0 %3451 }
 0x646   : > { %v3455_v9 = vpop.xlane.xlu1 %3454  ;;  %5647 = vmatpush1.bf16.msra.mxu1 %v3452_v22  ;;  %v13456_v22 = vcombine.low %v3681_v18, %v3685_v1  ;;  %v21860_v18 = vld [vmem:[#allocation151_spill] sm:$0xff]  ;;  %v21861_v1 = vld [vmem:[#allocation149_spill] sm:$0xff] }
 0x647   : > { %5648 = vmatprep.subr.bf16.mxu1 %v21547_v4  ;;  %v21862_v2 = vpack.c.bf16 %v21860_v18, %v21861_v1 }
 0x648   : > { %5530 = vmatmul.mubr.bf16.gmra.mrb[4].mxu1 %v13448_v53 }
 0x649   : > { %5537 = vmatprep.mubr.bf16.mxu1 %v13457_v40 }
 0x64a   : > { %v2984_v7 = vpop.permute.xlu1 %2983  ;;  %5649 = vmatpush1.bf16.msra.mxu1 %v3455_v9 }
 0x64b   : > { %v3154_v36 = vadd.bf16 %v2984_v7, %v21850_v34  ;;  %v3155_v53 = vadd.bf16 %v2984_v7, %v21853_v49  ;;  %5907 = vmatprep.subr.bf16.mxu1 %v21547_v4  ;;  %v21859_v7 = vpack.c.bf16 %v21857_v62, %v21858_v6  ;;  %v21871_v6 = vld [vmem:[#allocation146_spill] sm:$0xff] }
 0x64d   : > { %v18649_v40 = vmax.bf16 %v21547_v4, %v3154_v36  ;;  %v18652_v25 = vmax.bf16 %v21547_v4, %v3155_v53  ;;  %v2979_v20 = vpop.permute.xlu0 %2978  ;;  %v21863_v36 = vld [vmem:[#allocation152_spill] sm:$0xff] }
 0x64e   : > { %v2994_v58 = vpop.permute.xlu1 %2993  ;;  %v3152_v34 = vadd.bf16 %v2979_v20, %v21856_v35  ;;  %v3153_v9 = vadd.bf16 %v2979_v20, %v21859_v7  ;;  %v21865_v27 = vpack.c.bf16 %v21863_v36, %v21864_v63  ;;  %v3697_v20 = vld [vmem:[%s21190_s7 + $0x608] sm:$0xff]  ;;  %v21868_v35 = vld [vmem:[#allocation145_spill] sm:$0xff] }
 0x64f   : > { %v3158_v49 = vadd.bf16 %v2994_v58, %v21862_v2  ;;  %v3459_v0 = vmax.bf16 %v18652_v25, %v18649_v40  ;;  %v3701_v63 = vld [vmem:[%s21190_s7 + $0x628] sm:$0xff]  ;;  %v21874_v36 = vld [vmem:[#allocation157_spill] sm:$0xff] }
 0x650   : > { %v3159_v53 = vadd.bf16 %v2994_v58, %v21865_v27  ;;  %5538 = vmatmul.mubr.bf16.gmra.mrb[8].mxu1 %v13456_v22  ;;  %v18669_v44 = vmax.bf16 %v21547_v4, %v3152_v34  ;;  %v18672_v47 = vmax.bf16 %v21547_v4, %v3153_v9  ;;  %v13464_v58 = vcombine.low %v3689_v30, %v3693_v52  ;;  %v21870_v34 = vld [vmem:[#allocation148_spill] sm:$0xff] }
 0x651   : > { %5545 = vmatprep.mubr.bf16.mxu1 %v13465_v33  ;;  %3460 = vmax.xlane.bf16.xlu1 %v3459_v0  ;;  %v2989_v62 = vpop.permute.xlu0 %2988  ;;  %v18681_v27 = vmax.bf16 %v21547_v4, %v3158_v49  ;;  %v21869_v33 = vpack.c.bf16 %v21867_v11, %v21868_v35  ;;  %v21872_v7 = vpack.c.bf16 %v21870_v34, %v21871_v6  ;;  %v21873_v49 = vld [vmem:[#allocation158_spill] sm:$0xff]  ;;  %v3705_v6 = vld [vmem:[%s21190_s7 + $0x648] sm:$0xff] }
 0x652   : > { %v18684_v22 = vmax.bf16 %v21547_v4, %v3159_v53  ;;  %v3004_v18 = vpop.permute.xlu1 %3003  ;;  %v3456_v1 = vmax.bf16 %v18672_v47, %v18669_v44  ;;  %v13473_v2 = vcombine.high %v3697_v20, %v3701_v63  ;;  %v21875_v30 = vpack.c.bf16 %v21873_v49, %v21874_v36  ;;  %v21882_v49 = vld [vmem:[#allocation154_spill] sm:$0xff] }
 0x653   : > { %21866 = vst [vmem:[#allocation102_spill] sm:$0xff] %v18681_v27  ;;  %v3156_v0 = vadd.bf16 %v2989_v62, %v21869_v33  ;;  %v3157_v9 = vadd.bf16 %v2989_v62, %v21872_v7  ;;  %v21876_v35 = vpack.c.bf16 %v17518_v51, %v17506_v17  ;;  %v13472_v17 = vcombine.low %v3697_v20, %v3701_v63 }
 0x654   : > { %3457 = vmax.xlane.bf16.xlu0 %v3456_v1  ;;  %v3162_v52 = vadd.bf16 %v3004_v18, %v21875_v30  ;;  %v3465_v33 = vmax.bf16 %v18684_v22, %v18681_v27  ;;  %v21884_v20 = vpack.c.bf16 %v17614_v55, %v17596_v57  ;;  %v3713_v57 = vld [vmem:[%s21190_s7 + $0x688] sm:$0xff] }
 0x655   : > { %v18698_v53 = vmax.bf16 %v21547_v4, %v3156_v0  ;;  %v18701_v11 = vmax.bf16 %v21547_v4, %v3157_v9  ;;  %v3163_v62 = vadd.bf16 %v3004_v18, %v21876_v35  ;;  %v2999_v34 = vpop.permute.xlu0 %2998  ;;  %v3709_v0 = vld [vmem:[%s21190_s7 + $0x668] sm:$0xff]  ;;  %v21878_v9 = vld [vmem:[#allocation155_spill] sm:$0xff] }
 0x656   : > { %v18715_v7 = vmax.bf16 %v21547_v4, %v3162_v52  ;;  %v3014_v35 = vpop.permute.xlu1 %3013  ;;  %v13481_v27 = vcombine.high %v3705_v6, %v3709_v0  ;;  %v3717_v55 = vld [vmem:[%s21190_s7 + $0x6a8] sm:$0xff] }
 0x657   : > { %v18718_v51 = vmax.bf16 %v21547_v4, %v3163_v62  ;;  %v3166_v63 = vadd.bf16 %v3014_v35, %v21884_v20 }
 0x658   : > { %5546 = vmatmul.mubr.bf16.gmra.mrb[12].mxu1 %v13464_v58  ;;  %21877 = vst [vmem:[#allocation100_spill] sm:$0xff] %v18715_v7  ;;  %v21879_v58 = vld [vmem:[#allocation153_spill] sm:$0xff] }
 0x659   : > { %5553 = vmatprep.mubr.bf16.mxu1 %v13473_v2  ;;  %3466 = vmax.xlane.bf16.xlu1 %v3465_v33  ;;  %v21880_v18 = vpack.c.bf16 %v21878_v9, %v21879_v58  ;;  %v21881_v2 = vld [vmem:[#allocation156_spill] sm:$0xff]  ;;  %v3462_v33 = vmax.bf16 %v18701_v11, %v18698_v53  ;;  %v21885_v9 = vpack.c.bf16 %v17624_v59, %v17612_v39 }
 0x65a   : > { %v21883_v36 = vpack.c.bf16 %v21881_v2, %v21882_v49  ;;  %v3471_v58 = vmax.bf16 %v18718_v51, %v18715_v7  ;;  %v13480_v39 = vcombine.low %v3705_v6, %v3709_v0  ;;  %v21889_v2 = vpack.c.bf16 %v17578_v14, %v17560_v56  ;;  %v7112_v7 = vld [vmem:[%s21193_s10 + $0x10] sm:$0xff] }
 0x65b   : > { %v3160_v1 = vadd.bf16 %v2999_v34, %v21880_v18  ;;  %v3009_v18 = vpop.permute.xlu0 %3008  ;;  %v21890_v6 = vpack.c.bf16 %v17706_v48, %v17688_v50  ;;  %v21893_v56 = vpack.c.bf16 %v17710_v8, %v17704_v15  ;;  %v3721_v50 = vld [vmem:[%s21190_s7 + $0x6c8] sm:$0xff]  ;;  %v13488_v15 = vcombine.low %v3713_v57, %v3717_v55 }
 0x65c   : > { %v3161_v30 = vadd.bf16 %v2999_v34, %v21883_v36  ;;  %3463 = vmax.xlane.bf16.xlu0 %v3462_v33  ;;  %v3167_v34 = vadd.bf16 %v3014_v35, %v21885_v9  ;;  %v3165_v49 = vadd.bf16 %v3009_v18, %v21889_v2  ;;  %v3024_v36 = vpop.permute.xlu1 %3023  ;;  %v13489_v35 = vcombine.high %v3713_v57, %v3717_v55  ;;  %v3725_v48 = vld [vmem:[%s21190_s7 + $0x6e8] sm:$0xff] }
 0x65d   : > { %v18732_v52 = vmax.bf16 %v21547_v4, %v3160_v1  ;;  %v18749_v1 = vmax.bf16 %v21547_v4, %v3166_v63  ;;  %v3170_v0 = vadd.bf16 %v3024_v36, %v21890_v6  ;;  %v21896_v9 = vpack.c.bf16 %v17660_v12, %v17642_v42 }
 0x65e   : > { %v18735_v62 = vmax.bf16 %v21547_v4, %v3161_v30  ;;  %v18752_v59 = vmax.bf16 %v21547_v4, %v3167_v34  ;;  %v21898_v57 = vpack.c.bf16 %v17798_v19, %v17774_v16  ;;  %v3729_v16 = vld [vmem:[%s21190_s7 + $0x708] sm:$0xff]  ;;  %v21905_v6 = vpack.c.bf16 %v17756_v41, %v17733_v61 }
 0x65f   : > { %21886 = vst [vmem:[#allocation105_spill] sm:$0xff] %v18749_v1  ;;  %v3019_v20 = vpop.permute.xlu0 %3018  ;;  %v18783_v63 = vmax.bf16 %v21547_v4, %v3170_v0  ;;  %v3733_v19 = vld [vmem:[%s21190_s7 + $0x728] sm:$0xff]  ;;  %v21909_v61 = vpack.c.bf16 %v17888_v23, %v17868_v28 }
 0x660   : > { %5554 = vmatmul.mubr.bf16.gmra.mrb[16].mxu1 %v13472_v17  ;;  %21887 = vst [vmem:[#allocation103_spill] sm:$0xff] %v18752_v59  ;;  %v21888_v17 = vpack.c.bf16 %v17568_v54, %v17550_v37  ;;  %v3468_v30 = vmax.bf16 %v18735_v62, %v18732_v52  ;;  %v18769_v37 = vmax.bf16 %v21547_v4, %v3165_v49 }
 0x661   : > { %5561 = vmatprep.mubr.bf16.mxu1 %v13481_v27  ;;  %3472 = vmax.xlane.bf16.xlu1 %v3471_v58  ;;  %v3171_v54 = vadd.bf16 %v3024_v36, %v21893_v56  ;;  %v3477_v14 = vmax.bf16 %v18752_v59, %v18749_v1  ;;  %21894 = vst [vmem:[#allocation109_spill] sm:$0xff] %v18783_v63 }
 0x662   : > { %v3164_v27 = vadd.bf16 %v3009_v18, %v21888_v17  ;;  %21892 = vst [vmem:[#allocation104_spill] sm:$0xff] %v18769_v37  ;;  %v3168_v34 = vadd.bf16 %v3019_v20, %v21896_v9  ;;  %v21897_v58 = vpack.c.bf16 %v17670_v24, %v17658_v10  ;;  %v21901_v10 = vpack.c.bf16 %v17802_v38, %v17779_v46 }
 0x663   : > { %v18786_v8 = vmax.bf16 %v21547_v4, %v3171_v54  ;;  %v3029_v49 = vpop.permute.xlu0 %3028  ;;  %v13496_v46 = vcombine.low %v3721_v50, %v3725_v48  ;;  %v13504_v28 = vcombine.low %v3729_v16, %v3733_v19 }
 0x664   : > { %3469 = vmax.xlane.bf16.xlu0 %v3468_v30  ;;  %v18766_v33 = vmax.bf16 %v21547_v4, %v3164_v27  ;;  %v3169_v18 = vadd.bf16 %v3019_v20, %v21897_v58  ;;  %v13497_v27 = vcombine.high %v3721_v50, %v3725_v48  ;;  %v18800_v2 = vmax.bf16 %v21547_v4, %v3168_v34 }
 0x665   : > { %21895 = vst [vmem:[#allocation107_spill] sm:$0xff] %v18786_v8  ;;  %v3483_v24 = vmax.bf16 %v18786_v8, %v18783_v63  ;;  %v21904_v30 = vpack.c.bf16 %v17752_v32, %v17728_v26  ;;  %v3173_v0 = vadd.bf16 %v3029_v49, %v21905_v6  ;;  %v21906_v20 = vpack.c.bf16 %v17884_v13, %v17866_v5  ;;  %v3737_v5 = vld [vmem:[%s21190_s7 + $0x748] sm:$0xff] }
 0x666   : > { %21891 = vst [vmem:[#allocation106_spill] sm:$0xff] %v18766_v33  ;;  %v3474_v17 = vmax.bf16 %v18769_v37, %v18766_v33  ;;  %21899 = vst [vmem:[#allocation110_spill] sm:$0xff] %v18800_v2  ;;  %v18803_v42 = vmax.bf16 %v21547_v4, %v3169_v18  ;;  %v3741_v13 = vld [vmem:[%s21190_s7 + $0x768] sm:$0xff]  ;;  %v21912_v34 = vpack.c.bf16 %v17844_v21, %v17820_v43  ;;  %v21917_v21 = vld [vmem:[#allocation59_spill] sm:$0xff] }
 0x667   : > { %v18837_v26 = vmax.bf16 %v21547_v4, %v3173_v0  ;;  %v21913_v18 = vpack.c.bf16 %v17848_v31, %v17825_v45  ;;  %v21918_v45 = vpack.c.bf16 %v17926_v60, %v21917_v21  ;;  %v13512_v60 = vcombine.low %v3737_v5, %v3741_v13  ;;  %v21924_v0 = vld [vmem:[#allocation61_spill] sm:$0xff] }
 0x668   : > { %5562 = vmatmul.mubr.bf16.gmra.mrb[20].mxu1 %v13480_v39  ;;  %v3034_v39 = vpop.permute.xlu1 %3033  ;;  %21900 = vst [vmem:[#allocation108_spill] sm:$0xff] %v18803_v42  ;;  %v3480_v54 = vmax.bf16 %v18803_v42, %v18800_v2 }
 0x669   : > { %5569 = vmatprep.mubr.bf16.mxu1 %v13489_v35  ;;  %3478 = vmax.xlane.bf16.xlu1 %v3477_v14  ;;  %v3174_v55 = vadd.bf16 %v3034_v39, %v21898_v57  ;;  %v3175_v12 = vadd.bf16 %v3034_v39, %v21901_v10  ;;  %v3172_v35 = vadd.bf16 %v3029_v49, %v21904_v30  ;;  %v21922_v30 = vld [vmem:[#allocation53_spill] sm:$0xff] }
 0x66a   : > { %v13505_v14 = vcombine.high %v3729_v16, %v3733_v19  ;;  %21908 = vst [vmem:[#allocation112_spill] sm:$0xff] %v18837_v26  ;;  %v13513_v57 = vcombine.high %v3737_v5, %v3741_v13  ;;  %v3757_v5 = vld [vmem:[%s21190_s7 + $0x7e8] sm:$0xff] }
 0x66b   : > { %v18817_v36 = vmax.bf16 %v21547_v4, %v3174_v55  ;;  %v18820_v38 = vmax.bf16 %v21547_v4, %v3175_v12  ;;  %v18834_v48 = vmax.bf16 %v21547_v4, %v3172_v35  ;;  %v21914_v55 = vpack.c.bf16 %v17922_v3, %v17912_v29  ;;  %v3745_v3 = vld [vmem:[%s21190_s7 + $0x788] sm:$0xff] }
 0x66c   : > { %3475 = vmax.xlane.bf16.xlu0 %v3474_v17  ;;  %v3044_v56 = vpop.permute.xlu1 %3043  ;;  %v3749_v29 = vld [vmem:[%s21190_s7 + $0x7a8] sm:$0xff] }
 0x66d   : > { %21902 = vst [vmem:[#allocation113_spill] sm:$0xff] %v18817_v36  ;;  %21903 = vst [vmem:[#allocation111_spill] sm:$0xff] %v18820_v38  ;;  %v3178_v50 = vadd.bf16 %v3044_v56, %v21906_v20  ;;  %v3179_v32 = vadd.bf16 %v3044_v56, %v21909_v61  ;;  %v3489_v41 = vmax.bf16 %v18820_v38, %v18817_v36  ;;  %v21925_v56 = vld [vmem:[#allocation56_spill] sm:$0xff] }
 0x66e   : > { %21907 = vst [vmem:[#allocation114_spill] sm:$0xff] %v18834_v48 }
 0x66f   : > { %v18851_v9 = vmax.bf16 %v21547_v4, %v3178_v50  ;;  %v18854_v23 = vmax.bf16 %v21547_v4, %v3179_v32  ;;  %v13521_v50 = vcombine.high %v3745_v3, %v3749_v29 }
 0x670   : > { %5570 = vmatmul.mubr.bf16.gmra.mrb[24].mxu1 %v13488_v15  ;;  %v3039_v15 = vpop.permute.xlu0 %3038  ;;  %v3054_v17 = vpop.permute.xlu1 %3053 }
 0x671   : > { %5577 = vmatprep.mubr.bf16.mxu1 %v13497_v27  ;;  %3484 = vmax.xlane.bf16.xlu1 %v3483_v24  ;;  %21910 = vst [vmem:[#allocation117_spill] sm:$0xff] %v18851_v9  ;;  %21911 = vst [vmem:[#allocation115_spill] sm:$0xff] %v18854_v23  ;;  %v3176_v58 = vadd.bf16 %v3039_v15, %v21912_v34  ;;  %v3177_v39 = vadd.bf16 %v3039_v15, %v21913_v18  ;;  %v3753_v15 = vld [vmem:[%s21190_s7 + $0x7c8] sm:$0xff]  ;;  %v3510_v18 = vld [vmem:[%s21190_s7 + $0x30] sm:$0xff] }
 0x672   : > { %v3486_v27 = vmax.bf16 %v18837_v26, %v18834_v48  ;;  %v3182_v10 = vadd.bf16 %v3054_v17, %v21914_v55  ;;  %v3183_v31 = vadd.bf16 %v3054_v17, %v21918_v45  ;;  %v3495_v24 = vmax.bf16 %v18854_v23, %v18851_v9  ;;  %v3514_v55 = vld [vmem:[%s21190_s7 + $0x50] sm:$0xff] }
 0x673   : > { %v18868_v12 = vmax.bf16 %v21547_v4, %v3176_v58  ;;  %v18871_v43 = vmax.bf16 %v21547_v4, %v3177_v39  ;;  %v13529_v34 = vcombine.high %v3753_v15, %v3757_v5  ;;  %v3506_v58 = vld [vmem:[%s21190_s7 + $0x10] sm:$0xff]  ;;  %v13528_v39 = vcombine.low %v3753_v15, %v3757_v5 }
 0x674   : > { %3481 = vmax.xlane.bf16.xlu0 %v3480_v54  ;;  %v3049_v49 = vpop.permute.xlu0 %3048  ;;  %v18885_v16 = vmax.bf16 %v21547_v4, %v3182_v10  ;;  %v18888_v19 = vmax.bf16 %v21547_v4, %v3183_v31  ;;  %v21926_v54 = vpack.c.bf16 %v21924_v0, %v21925_v56  ;;  %v13283_v17 = vcombine.high %v3506_v58, %v3510_v18  ;;  %v3518_v10 = vld [vmem:[%s21190_s7 + $0x70] sm:$0xff] }
 0x675   : > { %21915 = vst [vmem:[#allocation118_spill] sm:$0xff] %v18868_v12  ;;  %21916 = vst [vmem:[#allocation116_spill] sm:$0xff] %v18871_v43  ;;  %v3492_v20 = vmax.bf16 %v18871_v43, %v18868_v12  ;;  %v13282_v45 = vcombine.low %v3506_v58, %v3510_v18  ;;  %v11314_v31 = vld [vmem:[%s21198_s15 + $0x30] sm:$0xff]  ;;  %v11316_v58 = vld [vmem:[%s21198_s15 + $0x40] sm:$0xff] }
 0x676   : > { %21919 = vst [vmem:[#allocation121_spill] sm:$0xff] %v18885_v16  ;;  %21920 = vst [vmem:[#allocation119_spill] sm:$0xff] %v18888_v19  ;;  %v11317_v18 = vld [vmem:[%s21198_s15 + $0x48] sm:$0xff] }
 0x678   : > { %5578 = vmatmul.mubr.bf16.gmra.mrb[28].mxu1 %v13496_v46  ;;  %v21921_v46 = vld [vmem:[#allocation54_spill] sm:$0xff] }
 0x679   : > { %5585 = vmatprep.mubr.bf16.mxu1 %v13505_v14  ;;  %3490 = vmax.xlane.bf16.xlu1 %v3489_v41  ;;  %v21923_v35 = vpack.c.bf16 %v21921_v46, %v21922_v30  ;;  %v3181_v14 = vadd.bf16 %v3049_v49, %v21926_v54  ;;  %v3501_v41 = vmax.bf16 %v18888_v19, %v18885_v16  ;;  %v11308_v46 = vld [vmem:[%s21198_s15] sm:$0xff]  ;;  %v11309_v30 = vld [vmem:[%s21198_s15 + $0x8] sm:$0xff] }
 0x67a   : > { %v11372_v56 = vpack.c.bf16 %v11309_v30, %v11308_v46  ;;  %v13290_v54 = vcombine.low %v3514_v55, %v3518_v10  ;;  %v3538_v46 = vld [vmem:[%s21190_s7 + $0x110] sm:$0xff] }
 0x67b   : > { %v3180_v6 = vadd.bf16 %v3049_v49, %v21923_v35  ;;  %v18902_v32 = vmax.bf16 %v21547_v4, %v3181_v14  ;;  %v13291_v49 = vcombine.high %v3514_v55, %v3518_v10  ;;  %v3522_v35 = vld [vmem:[%s21190_s7 + $0x90] sm:$0xff] }
 0x67c   : > { %3487 = vmax.xlane.bf16.xlu0 %v3486_v27  ;;  %v11310_v27 = vld [vmem:[%s21198_s15 + $0x10] sm:$0xff] }
 0x67d   : > { %v18899_v61 = vmax.bf16 %v21547_v4, %v3180_v6  ;;  %21928 = vst [vmem:[#allocation120_spill] sm:$0xff] %v18902_v32  ;;  %v3526_v6 = vld [vmem:[%s21190_s7 + $0xb0] sm:$0xff] }
 0x67e   : > { %v11322_v14 = vld [vmem:[%s21198_s15 + $0x70] sm:$0xff]  ;;  %v13299_v15 = vcombine.high %v3522_v35, %v3526_v6  ;;  %v13298_v55 = vcombine.low %v3522_v35, %v3526_v6 }
 0x67f   : > { %21927 = vst [vmem:[#allocation122_spill] sm:$0xff] %v18899_v61  ;;  %v3498_v13 = vmax.bf16 %v18902_v32, %v18899_v61  ;;  %v11330_v10 = vld [vmem:[%s21198_s15 + $0xb0] sm:$0xff] }
 0x680   : > { %5586 = vmatmul.mubr.bf16.gmra.mrb[32].mxu1 %v13504_v28  ;;  %v13520_v28 = vcombine.low %v3745_v3, %v3749_v29  ;;  %v11318_v29 = vld [vmem:[%s21198_s15 + $0x50] sm:$0xff] }
 0x681   : > { %5593 = vmatprep.mubr.bf16.mxu1 %v13513_v57  ;;  %3496 = vmax.xlane.bf16.xlu1 %v3495_v24  ;;  %v11311_v57 = vld [vmem:[%s21198_s15 + $0x18] sm:$0xff]  ;;  %v3542_v30 = vld [vmem:[%s21190_s7 + $0x130] sm:$0xff] }
 0x682   : > { %v11373_v21 = vpack.c.bf16 %v11311_v57, %v11310_v27  ;;  %v11315_v24 = vld [vmem:[%s21198_s15 + $0x38] sm:$0xff]  ;;  %v11376_v57 = vpack.c.bf16 %v11317_v18, %v11316_v58  ;;  %v3558_v58 = vld [vmem:[%s21190_s7 + $0x1b0] sm:$0xff] }
 0x683   : > { %v11375_v3 = vpack.c.bf16 %v11315_v24, %v11314_v31  ;;  %v11321_v31 = vld [vmem:[%s21198_s15 + $0x68] sm:$0xff] }
 0x684   : > { %3493 = vmax.xlane.bf16.xlu0 %v3492_v20  ;;  %v11323_v20 = vld [vmem:[%s21198_s15 + $0x78] sm:$0xff] }
 0x685   : > { %v11379_v5 = vpack.c.bf16 %v11323_v20, %v11322_v14  ;;  %v11332_v20 = vld [vmem:[%s21198_s15 + $0xc0] sm:$0xff] }
 0x688   : > { %5594 = vmatmul.mubr.bf16.gmra.mrb[36].mxu1 %v13512_v60  ;;  %v11319_v60 = vld [vmem:[%s21198_s15 + $0x58] sm:$0xff] }
 0x689   : > { %5601 = vmatprep.mubr.bf16.mxu1 %v13521_v50  ;;  %3502 = vmax.xlane.bf16.xlu1 %v3501_v41  ;;  %v11377_v0 = vpack.c.bf16 %v11319_v60, %v11318_v29  ;;  %v11312_v50 = vld [vmem:[%s21198_s15 + $0x20] sm:$0xff]  ;;  %v11313_v41 = vld [vmem:[%s21198_s15 + $0x28] sm:$0xff] }
 0x68a   : > { %v11324_v29 = vld [vmem:[%s21198_s15 + $0x80] sm:$0xff]  ;;  %v11325_v60 = vld [vmem:[%s21198_s15 + $0x88] sm:$0xff] }
 0x68b   : > { %v11380_v35 = vpack.c.bf16 %v11325_v60, %v11324_v29  ;;  %v3586_v60 = vld [vmem:[%s21190_s7 + $0x290] sm:$0xff] }
 0x68c   : > { %3499 = vmax.xlane.bf16.xlu0 %v3498_v13  ;;  %v11374_v13 = vpack.c.bf16 %v11313_v41, %v11312_v50  ;;  %v11333_v50 = vld [vmem:[%s21198_s15 + $0xc8] sm:$0xff]  ;;  %v3546_v41 = vld [vmem:[%s21190_s7 + $0x150] sm:$0xff] }
 0x690   : > { %5602 = vmatmul.mubr.bf16.gmra.mrb[40].mxu1 %v13520_v28  ;;  %v11326_v28 = vld [vmem:[%s21198_s15 + $0x90] sm:$0xff] }
 0x691   : > { %5609 = vmatprep.mubr.bf16.mxu1 %v13529_v34  ;;  %v11327_v34 = vld [vmem:[%s21198_s15 + $0x98] sm:$0xff] }
 0x692   : > { %v11381_v27 = vpack.c.bf16 %v11327_v34, %v11326_v28  ;;  %v3554_v34 = vld [vmem:[%s21190_s7 + $0x190] sm:$0xff] }
 0x698   : > { %5610 = vmatmul.mubr.bf16.gmra.mrb[44].mxu1 %v13528_v39  ;;  %v3530_v39 = vld [vmem:[%s21190_s7 + $0xd0] sm:$0xff] }
 0x699   : > { %5650 = vmatprep.mubr.bf16.mxu1 %v13283_v17  ;;  %v3534_v17 = vld [vmem:[%s21190_s7 + $0xf0] sm:$0xff] }
 0x69a   : > { %v13307_v24 = vcombine.high %v3530_v39, %v3534_v17  ;;  %v13306_v6 = vcombine.low %v3530_v39, %v3534_v17  ;;  %v13331_v39 = vcombine.high %v3554_v34, %v3558_v58  ;;  %v3562_v17 = vld [vmem:[%s21190_s7 + $0x1d0] sm:$0xff] }
 0x69e   : > { %11411 = vperm.xlu1 %15463, %v11373_v21   ;;  %v11331_v21 = vld [vmem:[%s21198_s15 + $0xb8] sm:$0xff] }
 0x6a0   : > { %5651 = vmatmul.mubr.bf16.vlgmr.msra.gmra.mrb[176].mxu1 %v13282_v45  ;;  %v11320_v45 = vld [vmem:[%s21198_s15 + $0x60] sm:$0xff] }
 0x6a1   : > { %5658 = vmatprep.mubr.bf16.mxu1 %v13291_v49  ;;  %v11383_v49 = vpack.c.bf16 %v11331_v21, %v11330_v10  ;;  %v3570_v10 = vld [vmem:[%s21190_s7 + $0x210] sm:$0xff] }
 0x6a2   : > { %11421 = vperm.xlu1 %15463, %v11375_v3   ;;  %v11378_v3 = vpack.c.bf16 %v11321_v31, %v11320_v45  ;;  %v3574_v21 = vld [vmem:[%s21190_s7 + $0x230] sm:$0xff] }
 0x6a3   : > { %v13347_v31 = vcombine.high %v3570_v10, %v3574_v21 }
 0x6a6   : > { %11431 = vperm.xlu1 %15463, %v11377_v0   ;;  %11406 = vperm.xlu0 %15462, %v11372_v56   ;;  %v11328_v0 = vld [vmem:[%s21198_s15 + $0xa0] sm:$0xff]  ;;  %v11329_v56 = vld [vmem:[%s21198_s15 + $0xa8] sm:$0xff] }
 0x6a7   : > { %v11382_v14 = vpack.c.bf16 %v11329_v56, %v11328_v0  ;;  %v3594_v56 = vld [vmem:[%s21190_s7 + $0x2d0] sm:$0xff] }
 0x6a8   : > { %5659 = vmatmul.mubr.bf16.gmra.mrb[180].mxu1 %v13290_v54  ;;  %v13315_v54 = vcombine.high %v3538_v46, %v3542_v30 }
 0x6a9   : > { %5666 = vmatprep.mubr.bf16.mxu1 %v13299_v15  ;;  %v3550_v15 = vld [vmem:[%s21190_s7 + $0x170] sm:$0xff] }
 0x6aa   : > { %11441 = vperm.xlu1 %15463, %v11379_v5   ;;  %11416 = vperm.xlu0 %15462, %v11374_v13   ;;  %v11384_v5 = vpack.c.bf16 %v11333_v50, %v11332_v20  ;;  %v13314_v13 = vcombine.low %v3538_v46, %v3542_v30  ;;  %v13323_v28 = vcombine.high %v3546_v41, %v3550_v15  ;;  %v3590_v46 = vld [vmem:[%s21190_s7 + $0x2b0] sm:$0xff] }
 0x6ab   : > { %v13322_v18 = vcombine.low %v3546_v41, %v3550_v15  ;;  %v3602_v15 = vld [vmem:[%s21190_s7 + $0x310] sm:$0xff] }
 0x6ae   : > { %11451 = vperm.xlu1 %15463, %v11381_v27   ;;  %11426 = vperm.xlu0 %15462, %v11376_v57   ;;  %v3566_v27 = vld [vmem:[%s21190_s7 + $0x1f0] sm:$0xff]  ;;  %v13330_v57 = vcombine.low %v3554_v34, %v3558_v58 }
 0x6af   : > { %v13338_v45 = vcombine.low %v3562_v17, %v3566_v27 }
 0x6b0   : > { %5667 = vmatmul.mubr.bf16.gmra.mrb[184].mxu1 %v13298_v55  ;;  %v13339_v55 = vcombine.high %v3562_v17, %v3566_v27 }
 0x6b1   : > { %5674 = vmatprep.mubr.bf16.mxu1 %v13307_v24  ;;  %v3578_v24 = vld [vmem:[%s21190_s7 + $0x250] sm:$0xff] }
 0x6b2   : > { %11461 = vperm.xlu1 %15463, %v11383_v49   ;;  %11436 = vperm.xlu0 %15462, %v11378_v3   ;;  %v3582_v49 = vld [vmem:[%s21190_s7 + $0x270] sm:$0xff]  ;;  %v13346_v3 = vcombine.low %v3570_v10, %v3574_v21 }
 0x6b3   : > { %v13355_v29 = vcombine.high %v3578_v24, %v3582_v49  ;;  %v13354_v30 = vcombine.low %v3578_v24, %v3582_v49  ;;  %v3618_v10 = vld [vmem:[%s21190_s7 + $0x390] sm:$0xff] }
 0x6b4   : > { %v3622_v21 = vld [vmem:[%s21190_s7 + $0x3b0] sm:$0xff] }
 0x6b6   : > { %11446 = vperm.xlu0 %15462, %v11380_v35   ;;  %v13363_v35 = vcombine.high %v3586_v60, %v3590_v46 }
 0x6b8   : > { %5675 = vmatmul.mubr.bf16.gmra.mrb[188].mxu1 %v13306_v6 }
 0x6b9   : > { %5682 = vmatprep.mubr.bf16.mxu1 %v13315_v54  ;;  %v3598_v54 = vld [vmem:[%s21190_s7 + $0x2f0] sm:$0xff] }
 0x6ba   : > { %11456 = vperm.xlu0 %15462, %v11382_v14   ;;  %v13362_v14 = vcombine.low %v3586_v60, %v3590_v46  ;;  %v13371_v20 = vcombine.high %v3594_v56, %v3598_v54  ;;  %v13394_v60 = vcombine.low %v3618_v10, %v3622_v21 }
 0x6be   : > { %11466 = vperm.xlu0 %15462, %v11384_v5   ;;  %v3606_v5 = vld [vmem:[%s21190_s7 + $0x330] sm:$0xff] }
 0x6bf   : > { %v13378_v17 = vcombine.low %v3602_v15, %v3606_v5 }
 0x6c0   : > { %5683 = vmatmul.mubr.bf16.gmra.mrb[192].mxu1 %v13314_v13  ;;  %v13370_v13 = vcombine.low %v3594_v56, %v3598_v54 }
 0x6c1   : > { %5690 = vmatprep.mubr.bf16.mxu1 %v13323_v28  ;;  %v13379_v28 = vcombine.high %v3602_v15, %v3606_v5 }
 0x6c8   : > { %5691 = vmatmul.mubr.bf16.gmra.mrb[196].mxu1 %v13322_v18  ;;  %v3610_v18 = vld [vmem:[%s21190_s7 + $0x350] sm:$0xff] }
 0x6c9   : > { %5698 = vmatprep.mubr.bf16.mxu1 %v13331_v39  ;;  %v3614_v39 = vld [vmem:[%s21190_s7 + $0x370] sm:$0xff] }
 0x6ca   : > { %v13387_v27 = vcombine.high %v3610_v18, %v3614_v39 }
 0x6d0   : > { %5699 = vmatmul.mubr.bf16.gmra.mrb[200].mxu1 %v13330_v57 }
 0x6d1   : > { %5706 = vmatprep.mubr.bf16.mxu1 %v13339_v55 }
 0x6d8   : > { %5707 = vmatmul.mubr.bf16.gmra.mrb[204].mxu1 %v13338_v45  ;;  %v13386_v45 = vcombine.low %v3610_v18, %v3614_v39 }
 0x6d9   : > { %5714 = vmatprep.mubr.bf16.mxu1 %v13347_v31  ;;  %v13395_v31 = vcombine.high %v3618_v10, %v3622_v21  ;;  %v3666_v10 = vld [vmem:[%s21190_s7 + $0x510] sm:$0xff] }
 0x6da   : > { %v3670_v21 = vld [vmem:[%s21190_s7 + $0x530] sm:$0xff] }
 0x6e0   : > { %5715 = vmatmul.mubr.bf16.gmra.mrb[208].mxu1 %v13346_v3  ;;  %v3626_v3 = vld [vmem:[%s21190_s7 + $0x3d0] sm:$0xff] }
 0x6e1   : > { %5722 = vmatprep.mubr.bf16.mxu1 %v13355_v29  ;;  %v3630_v29 = vld [vmem:[%s21190_s7 + $0x3f0] sm:$0xff] }
 0x6e2   : > { %v3461_v0 = vpop.xlane.xlu1 %3460  ;;  %v13403_v46 = vcombine.high %v3626_v3, %v3630_v29  ;;  %v13402_v56 = vcombine.low %v3626_v3, %v3630_v29  ;;  %v13442_v3 = vcombine.low %v3666_v10, %v3670_v21 }
 0x6e5   : > { %v3458_v6 = vpop.xlane.xlu0 %3457 }
 0x6e6   : > { %5908 = vmatpush1.bf16.msra.mxu1 %v3458_v6  ;;  %v3634_v6 = vld [vmem:[%s21190_s7 + $0x410] sm:$0xff] }
 0x6e7   : > { %5909 = vmatprep.subr.bf16.mxu1 %v21547_v4 }
 0x6e8   : > { %5723 = vmatmul.mubr.bf16.gmra.mrb[212].mxu1 %v13354_v30 }
 0x6e9   : > { %5730 = vmatprep.mubr.bf16.mxu1 %v13363_v35 }
 0x6ea   : > { %5910 = vmatpush1.bf16.msra.mxu1 %v3461_v0  ;;  %v3467_v41 = vpop.xlane.xlu1 %3466  ;;  %v3638_v0 = vld [vmem:[%s21190_s7 + $0x430] sm:$0xff] }
 0x6eb   : > { %5911 = vmatprep.subr.bf16.mxu1 %v21547_v4  ;;  %v13411_v54 = vcombine.high %v3634_v6, %v3638_v0  ;;  %v13410_v15 = vcombine.low %v3634_v6, %v3638_v0  ;;  %v3690_v6 = vld [vmem:[%s21190_s7 + $0x5d0] sm:$0xff] }
 0x6ec   : > { %v3694_v0 = vld [vmem:[%s21190_s7 + $0x5f0] sm:$0xff] }
 0x6ed   : > { %v3464_v50 = vpop.xlane.xlu0 %3463 }
 0x6ee   : > { %5912 = vmatpush1.bf16.msra.mxu1 %v3464_v50  ;;  %v3642_v50 = vld [vmem:[%s21190_s7 + $0x450] sm:$0xff] }
 0x6ef   : > { %5913 = vmatprep.subr.bf16.mxu1 %v21547_v4 }
 0x6f0   : > { %5731 = vmatmul.mubr.bf16.gmra.mrb[216].mxu1 %v13362_v14 }
 0x6f1   : > { %5738 = vmatprep.mubr.bf16.mxu1 %v13371_v20 }
 0x6f2   : > { %5914 = vmatpush1.bf16.msra.mxu1 %v3467_v41  ;;  %v3473_v58 = vpop.xlane.xlu1 %3472  ;;  %v3646_v41 = vld [vmem:[%s21190_s7 + $0x470] sm:$0xff] }
 0x6f3   : > { %5915 = vmatprep.subr.bf16.mxu1 %v21547_v4  ;;  %v13419_v5 = vcombine.high %v3642_v50, %v3646_v41  ;;  %v13418_v18 = vcombine.low %v3642_v50, %v3646_v41  ;;  %v13466_v50 = vcombine.low %v3690_v6, %v3694_v0 }
 0x6f5   : > { %v3470_v34 = vpop.xlane.xlu0 %3469 }
 0x6f6   : > { %5916 = vmatpush1.bf16.msra.mxu1 %v3470_v34  ;;  %v3650_v34 = vld [vmem:[%s21190_s7 + $0x490] sm:$0xff] }
 0x6f7   : > { %5917 = vmatprep.subr.bf16.mxu1 %v21547_v4 }
 0x6f8   : > { %5739 = vmatmul.mubr.bf16.gmra.mrb[220].mxu1 %v13370_v13 }
 0x6f9   : > { %5746 = vmatprep.mubr.bf16.mxu1 %v13379_v28 }
 0x6fa   : > { %5918 = vmatpush1.bf16.msra.mxu1 %v3473_v58  ;;  %v3479_v55 = vpop.xlane.xlu1 %3478  ;;  %v3654_v58 = vld [vmem:[%s21190_s7 + $0x4b0] sm:$0xff] }
 0x6fb   : > { %5919 = vmatprep.subr.bf16.mxu1 %v21547_v4  ;;  %v13427_v39 = vcombine.high %v3650_v34, %v3654_v58 }
 0x6fd   : > { %v3476_v57 = vpop.xlane.xlu0 %3475 }
 0x6fe   : > { %5920 = vmatpush1.bf16.msra.mxu1 %v3476_v57  ;;  %v13426_v57 = vcombine.low %v3650_v34, %v3654_v58  ;;  %v3714_v34 = vld [vmem:[%s21190_s7 + $0x690] sm:$0xff] }
 0x6ff   : > { %5921 = vmatprep.subr.bf16.mxu1 %v21547_v4  ;;  %v3718_v58 = vld [vmem:[%s21190_s7 + $0x6b0] sm:$0xff] }
 0x700   : > { %5747 = vmatmul.mubr.bf16.gmra.mrb[224].mxu1 %v13378_v17  ;;  %v3658_v17 = vld [vmem:[%s21190_s7 + $0x4d0] sm:$0xff] }
 0x701   : > { %5754 = vmatprep.mubr.bf16.mxu1 %v13387_v27  ;;  %v3662_v27 = vld [vmem:[%s21190_s7 + $0x4f0] sm:$0xff] }
 0x702   : > { %5922 = vmatpush1.bf16.msra.mxu1 %v3479_v55  ;;  %v3485_v49 = vpop.xlane.xlu1 %3484  ;;  %v13435_v55 = vcombine.high %v3658_v17, %v3662_v27 }
 0x703   : > { %5923 = vmatprep.subr.bf16.mxu1 %v21547_v4 }
 0x705   : > { %v3482_v24 = vpop.xlane.xlu0 %3481 }
 0x706   : > { %5924 = vmatpush1.bf16.msra.mxu1 %v3482_v24  ;;  %v3674_v24 = vld [vmem:[%s21190_s7 + $0x550] sm:$0xff] }
 0x707   : > { %5925 = vmatprep.subr.bf16.mxu1 %v21547_v4 }
 0x708   : > { %5755 = vmatmul.mubr.bf16.gmra.mrb[228].mxu1 %v13386_v45  ;;  %v13434_v45 = vcombine.low %v3658_v17, %v3662_v27  ;;  %v3722_v17 = vld [vmem:[%s21190_s7 + $0x6d0] sm:$0xff] }
 0x709   : > { %5762 = vmatprep.mubr.bf16.mxu1 %v13395_v31  ;;  %v13443_v31 = vcombine.high %v3666_v10, %v3670_v21  ;;  %v3726_v27 = vld [vmem:[%s21190_s7 + $0x6f0] sm:$0xff] }
 0x70a   : > { %5926 = vmatpush1.bf16.msra.mxu1 %v3485_v49  ;;  %v3491_v35 = vpop.xlane.xlu1 %3490  ;;  %v3678_v49 = vld [vmem:[%s21190_s7 + $0x570] sm:$0xff] }
 0x70b   : > { %5927 = vmatprep.subr.bf16.mxu1 %v21547_v4  ;;  %v13451_v29 = vcombine.high %v3674_v24, %v3678_v49  ;;  %v3730_v10 = vld [vmem:[%s21190_s7 + $0x710] sm:$0xff] }
 0x70c   : > { %v3734_v21 = vld [vmem:[%s21190_s7 + $0x730] sm:$0xff] }
 0x70d   : > { %v3488_v30 = vpop.xlane.xlu0 %3487 }
 0x70e   : > { %5928 = vmatpush1.bf16.msra.mxu1 %v3488_v30  ;;  %v13450_v30 = vcombine.low %v3674_v24, %v3678_v49  ;;  %v3738_v24 = vld [vmem:[%s21190_s7 + $0x750] sm:$0xff] }
 0x70f   : > { %5929 = vmatprep.subr.bf16.mxu1 %v21547_v4  ;;  %v3742_v49 = vld [vmem:[%s21190_s7 + $0x770] sm:$0xff] }
 0x710   : > { %5763 = vmatmul.mubr.bf16.gmra.mrb[232].mxu1 %v13394_v60  ;;  %v3682_v60 = vld [vmem:[%s21190_s7 + $0x590] sm:$0xff] }
 0x711   : > { %5770 = vmatprep.mubr.bf16.mxu1 %v13403_v46  ;;  %v3686_v46 = vld [vmem:[%s21190_s7 + $0x5b0] sm:$0xff] }
 0x712   : > { %5930 = vmatpush1.bf16.msra.mxu1 %v3491_v35  ;;  %v3497_v20 = vpop.xlane.xlu1 %3496  ;;  %v13459_v35 = vcombine.high %v3682_v60, %v3686_v46 }
 0x713   : > { %5931 = vmatprep.subr.bf16.mxu1 %v21547_v4 }
 0x715   : > { %v3494_v14 = vpop.xlane.xlu0 %3493 }
 0x716   : > { %5932 = vmatpush1.bf16.msra.mxu1 %v3494_v14  ;;  %v3698_v14 = vld [vmem:[%s21190_s7 + $0x610] sm:$0xff] }
 0x717   : > { %5933 = vmatprep.subr.bf16.mxu1 %v21547_v4 }
 0x718   : > { %5771 = vmatmul.mubr.bf16.gmra.mrb[236].mxu1 %v13402_v56  ;;  %v13458_v56 = vcombine.low %v3682_v60, %v3686_v46  ;;  %v3746_v60 = vld [vmem:[%s21190_s7 + $0x790] sm:$0xff] }
 0x719   : > { %5778 = vmatprep.mubr.bf16.mxu1 %v13411_v54  ;;  %v13467_v54 = vcombine.high %v3690_v6, %v3694_v0  ;;  %v3750_v46 = vld [vmem:[%s21190_s7 + $0x7b0] sm:$0xff] }
 0x71a   : > { %5934 = vmatpush1.bf16.msra.mxu1 %v3497_v20  ;;  %v3503_v28 = vpop.xlane.xlu1 %3502  ;;  %v3702_v20 = vld [vmem:[%s21190_s7 + $0x630] sm:$0xff] }
 0x71b   : > { %5935 = vmatprep.subr.bf16.mxu1 %v21547_v4  ;;  %v13475_v41 = vcombine.high %v3698_v14, %v3702_v20  ;;  %v3754_v6 = vld [vmem:[%s21190_s7 + $0x7d0] sm:$0xff] }
 0x71c   : > { %v3758_v0 = vld [vmem:[%s21190_s7 + $0x7f0] sm:$0xff] }
 0x71d   : > { %v3500_v13 = vpop.xlane.xlu0 %3499 }
 0x71e   : > { %5936 = vmatpush1.bf16.msra.mxu1 %v3500_v13  ;;  %v13474_v13 = vcombine.low %v3698_v14, %v3702_v20  ;;  %v3507_v14 = vld [vmem:[%s21190_s7 + $0x18] sm:$0xff] }
 0x71f   : > { %5937 = vmatprep.subr.bf16.mxu1 %v21547_v4  ;;  %v3511_v20 = vld [vmem:[%s21190_s7 + $0x38] sm:$0xff] }
 0x720   : > { %5779 = vmatmul.mubr.bf16.gmra.mrb[240].mxu1 %v13410_v15  ;;  %v3706_v15 = vld [vmem:[%s21190_s7 + $0x650] sm:$0xff] }
 0x721   : > { %5786 = vmatprep.mubr.bf16.mxu1 %v13419_v5  ;;  %v3710_v5 = vld [vmem:[%s21190_s7 + $0x670] sm:$0xff] }
 0x722   : > { %5938 = vmatpush1.bf16.msra.mxu1 %v3503_v28  ;;  %v13483_v28 = vcombine.high %v3706_v15, %v3710_v5 }
 0x728   : > { %5787 = vmatmul.mubr.bf16.gmra.mrb[244].mxu1 %v13418_v18  ;;  %v13482_v18 = vcombine.low %v3706_v15, %v3710_v5  ;;  %v3515_v15 = vld [vmem:[%s21190_s7 + $0x58] sm:$0xff] }
 0x729   : > { %5794 = vmatprep.mubr.bf16.mxu1 %v13427_v39  ;;  %v13491_v39 = vcombine.high %v3714_v34, %v3718_v58  ;;  %v3519_v5 = vld [vmem:[%s21190_s7 + $0x78] sm:$0xff] }
 0x730   : > { %5795 = vmatmul.mubr.bf16.gmra.mrb[248].mxu1 %v13426_v57  ;;  %v13490_v57 = vcombine.low %v3714_v34, %v3718_v58  ;;  %v3523_v34 = vld [vmem:[%s21190_s7 + $0x98] sm:$0xff] }
 0x731   : > { %5802 = vmatprep.mubr.bf16.mxu1 %v13435_v55  ;;  %v13499_v55 = vcombine.high %v3722_v17, %v3726_v27  ;;  %v3527_v58 = vld [vmem:[%s21190_s7 + $0xb8] sm:$0xff] }
 0x738   : > { %5803 = vmatmul.mubr.bf16.gmra.mrb[252].mxu1 %v13434_v45  ;;  %v13498_v45 = vcombine.low %v3722_v17, %v3726_v27  ;;  %v3531_v17 = vld [vmem:[%s21190_s7 + $0xd8] sm:$0xff] }
 0x739   : > { %5810 = vmatprep.mubr.bf16.mxu1 %v13443_v31  ;;  %v13507_v31 = vcombine.high %v3730_v10, %v3734_v21  ;;  %v3535_v27 = vld [vmem:[%s21190_s7 + $0xf8] sm:$0xff] }
 0x740   : > { %5811 = vmatmul.mubr.bf16.gmra.mrb[0].mxu1 %v13442_v3  ;;  %v13506_v3 = vcombine.low %v3730_v10, %v3734_v21  ;;  %v3539_v10 = vld [vmem:[%s21190_s7 + $0x118] sm:$0xff] }
 0x741   : > { %5818 = vmatprep.mubr.bf16.mxu1 %v13451_v29  ;;  %v13515_v29 = vcombine.high %v3738_v24, %v3742_v49  ;;  %v3543_v21 = vld [vmem:[%s21190_s7 + $0x138] sm:$0xff] }
 0x748   : > { %5819 = vmatmul.mubr.bf16.gmra.mrb[4].mxu1 %v13450_v30  ;;  %v13514_v30 = vcombine.low %v3738_v24, %v3742_v49  ;;  %v3547_v24 = vld [vmem:[%s21190_s7 + $0x158] sm:$0xff] }
 0x749   : > { %5826 = vmatprep.mubr.bf16.mxu1 %v13459_v35  ;;  %v13523_v35 = vcombine.high %v3746_v60, %v3750_v46  ;;  %v3551_v49 = vld [vmem:[%s21190_s7 + $0x178] sm:$0xff] }
 0x750   : > { %5827 = vmatmul.mubr.bf16.gmra.mrb[8].mxu1 %v13458_v56  ;;  %v13522_v56 = vcombine.low %v3746_v60, %v3750_v46  ;;  %v3555_v60 = vld [vmem:[%s21190_s7 + $0x198] sm:$0xff] }
 0x751   : > { %5834 = vmatprep.mubr.bf16.mxu1 %v13467_v54  ;;  %v13531_v54 = vcombine.high %v3754_v6, %v3758_v0  ;;  %v3559_v46 = vld [vmem:[%s21190_s7 + $0x1b8] sm:$0xff] }
 0x758   : > { %5835 = vmatmul.mubr.bf16.gmra.mrb[12].mxu1 %v13466_v50  ;;  %v13530_v50 = vcombine.low %v3754_v6, %v3758_v0  ;;  %v3563_v6 = vld [vmem:[%s21190_s7 + $0x1d8] sm:$0xff] }
 0x759   : > { %5842 = vmatprep.mubr.bf16.mxu1 %v13475_v41  ;;  %v13285_v41 = vcombine.high %v3507_v14, %v3511_v20  ;;  %v3567_v0 = vld [vmem:[%s21190_s7 + $0x1f8] sm:$0xff] }
 0x760   : > { %5843 = vmatmul.mubr.bf16.gmra.mrb[16].mxu1 %v13474_v13  ;;  %v13284_v13 = vcombine.low %v3507_v14, %v3511_v20  ;;  %v3571_v14 = vld [vmem:[%s21190_s7 + $0x218] sm:$0xff] }
 0x761   : > { %5850 = vmatprep.mubr.bf16.mxu1 %v13483_v28  ;;  %v13293_v28 = vcombine.high %v3515_v15, %v3519_v5  ;;  %v3575_v20 = vld [vmem:[%s21190_s7 + $0x238] sm:$0xff] }
 0x768   : > { %5851 = vmatmul.mubr.bf16.gmra.mrb[20].mxu1 %v13482_v18  ;;  %v13292_v18 = vcombine.low %v3515_v15, %v3519_v5  ;;  %v3579_v15 = vld [vmem:[%s21190_s7 + $0x258] sm:$0xff] }
 0x769   : > { %5858 = vmatprep.mubr.bf16.mxu1 %v13491_v39  ;;  %v13301_v39 = vcombine.high %v3523_v34, %v3527_v58  ;;  %v3583_v5 = vld [vmem:[%s21190_s7 + $0x278] sm:$0xff] }
 0x770   : > { %5859 = vmatmul.mubr.bf16.gmra.mrb[24].mxu1 %v13490_v57  ;;  %v13300_v57 = vcombine.low %v3523_v34, %v3527_v58  ;;  %v3587_v34 = vld [vmem:[%s21190_s7 + $0x298] sm:$0xff] }
 0x771   : > { %5866 = vmatprep.mubr.bf16.mxu1 %v13499_v55  ;;  %v13309_v55 = vcombine.high %v3531_v17, %v3535_v27  ;;  %v3591_v58 = vld [vmem:[%s21190_s7 + $0x2b8] sm:$0xff] }
 0x778   : > { %5867 = vmatmul.mubr.bf16.gmra.mrb[28].mxu1 %v13498_v45  ;;  %v13308_v45 = vcombine.low %v3531_v17, %v3535_v27  ;;  %v3595_v17 = vld [vmem:[%s21190_s7 + $0x2d8] sm:$0xff] }
 0x779   : > { %5874 = vmatprep.mubr.bf16.mxu1 %v13507_v31  ;;  %v13317_v31 = vcombine.high %v3539_v10, %v3543_v21  ;;  %v3599_v27 = vld [vmem:[%s21190_s7 + $0x2f8] sm:$0xff] }
 0x780   : > { %5875 = vmatmul.mubr.bf16.gmra.mrb[32].mxu1 %v13506_v3  ;;  %v13316_v3 = vcombine.low %v3539_v10, %v3543_v21  ;;  %v3603_v10 = vld [vmem:[%s21190_s7 + $0x318] sm:$0xff] }
 0x781   : > { %5882 = vmatprep.mubr.bf16.mxu1 %v13515_v29  ;;  %v13325_v29 = vcombine.high %v3547_v24, %v3551_v49  ;;  %v3607_v21 = vld [vmem:[%s21190_s7 + $0x338] sm:$0xff] }
 0x788   : > { %5883 = vmatmul.mubr.bf16.gmra.mrb[36].mxu1 %v13514_v30  ;;  %v13324_v30 = vcombine.low %v3547_v24, %v3551_v49  ;;  %v3611_v24 = vld [vmem:[%s21190_s7 + $0x358] sm:$0xff] }
 0x789   : > { %5890 = vmatprep.mubr.bf16.mxu1 %v13523_v35  ;;  %v13333_v35 = vcombine.high %v3555_v60, %v3559_v46  ;;  %v3615_v49 = vld [vmem:[%s21190_s7 + $0x378] sm:$0xff] }
 0x790   : > { %5891 = vmatmul.mubr.bf16.gmra.mrb[40].mxu1 %v13522_v56  ;;  %v13332_v56 = vcombine.low %v3555_v60, %v3559_v46  ;;  %v3619_v60 = vld [vmem:[%s21190_s7 + $0x398] sm:$0xff] }
 0x791   : > { %5898 = vmatprep.mubr.bf16.mxu1 %v13531_v54  ;;  %v13341_v54 = vcombine.high %v3563_v6, %v3567_v0  ;;  %v3623_v46 = vld [vmem:[%s21190_s7 + $0x3b8] sm:$0xff] }
 0x798   : > { %5899 = vmatmul.mubr.bf16.gmra.mrb[44].mxu1 %v13530_v50  ;;  %v13340_v50 = vcombine.low %v3563_v6, %v3567_v0  ;;  %v3627_v6 = vld [vmem:[%s21190_s7 + $0x3d8] sm:$0xff] }
 0x799   : > { %5939 = vmatprep.mubr.bf16.mxu1 %v13285_v41  ;;  %v13349_v41 = vcombine.high %v3571_v14, %v3575_v20  ;;  %v3631_v0 = vld [vmem:[%s21190_s7 + $0x3f8] sm:$0xff] }
 0x7a0   : > { %5940 = vmatmul.mubr.bf16.vlgmr.msra.gmra.mrb[176].mxu1 %v13284_v13  ;;  %v13348_v13 = vcombine.low %v3571_v14, %v3575_v20  ;;  %v3635_v14 = vld [vmem:[%s21190_s7 + $0x418] sm:$0xff] }
 0x7a1   : > { %5947 = vmatprep.mubr.bf16.mxu1 %v13293_v28  ;;  %v13357_v28 = vcombine.high %v3579_v15, %v3583_v5  ;;  %v3639_v20 = vld [vmem:[%s21190_s7 + $0x438] sm:$0xff] }
 0x7a8   : > { %5948 = vmatmul.mubr.bf16.gmra.mrb[180].mxu1 %v13292_v18  ;;  %v13356_v18 = vcombine.low %v3579_v15, %v3583_v5  ;;  %v3643_v15 = vld [vmem:[%s21190_s7 + $0x458] sm:$0xff] }
 0x7a9   : > { %5955 = vmatprep.mubr.bf16.mxu1 %v13301_v39  ;;  %v13365_v39 = vcombine.high %v3587_v34, %v3591_v58  ;;  %v3647_v5 = vld [vmem:[%s21190_s7 + $0x478] sm:$0xff] }
 0x7b0   : > { %5956 = vmatmul.mubr.bf16.gmra.mrb[184].mxu1 %v13300_v57  ;;  %v13364_v57 = vcombine.low %v3587_v34, %v3591_v58  ;;  %v3651_v34 = vld [vmem:[%s21190_s7 + $0x498] sm:$0xff] }
 0x7b1   : > { %5963 = vmatprep.mubr.bf16.mxu1 %v13309_v55  ;;  %v13373_v55 = vcombine.high %v3595_v17, %v3599_v27  ;;  %v3655_v58 = vld [vmem:[%s21190_s7 + $0x4b8] sm:$0xff] }
 0x7b8   : > { %5964 = vmatmul.mubr.bf16.gmra.mrb[188].mxu1 %v13308_v45  ;;  %v13372_v45 = vcombine.low %v3595_v17, %v3599_v27  ;;  %v3659_v17 = vld [vmem:[%s21190_s7 + $0x4d8] sm:$0xff] }
 0x7b9   : > { %5971 = vmatprep.mubr.bf16.mxu1 %v13317_v31  ;;  %v13381_v31 = vcombine.high %v3603_v10, %v3607_v21  ;;  %v3663_v27 = vld [vmem:[%s21190_s7 + $0x4f8] sm:$0xff] }
 0x7c0   : > { %5972 = vmatmul.mubr.bf16.gmra.mrb[192].mxu1 %v13316_v3  ;;  %v13380_v3 = vcombine.low %v3603_v10, %v3607_v21  ;;  %v3667_v10 = vld [vmem:[%s21190_s7 + $0x518] sm:$0xff] }
 0x7c1   : > { %5979 = vmatprep.mubr.bf16.mxu1 %v13325_v29  ;;  %v13389_v29 = vcombine.high %v3611_v24, %v3615_v49  ;;  %v3671_v21 = vld [vmem:[%s21190_s7 + $0x538] sm:$0xff] }
 0x7c8   : > { %5980 = vmatmul.mubr.bf16.gmra.mrb[196].mxu1 %v13324_v30  ;;  %v13388_v30 = vcombine.low %v3611_v24, %v3615_v49  ;;  %v3675_v24 = vld [vmem:[%s21190_s7 + $0x558] sm:$0xff] }
 0x7c9   : > { %5987 = vmatprep.mubr.bf16.mxu1 %v13333_v35  ;;  %v13397_v35 = vcombine.high %v3619_v60, %v3623_v46  ;;  %v3679_v49 = vld [vmem:[%s21190_s7 + $0x578] sm:$0xff] }
 0x7d0   : > { %5988 = vmatmul.mubr.bf16.gmra.mrb[200].mxu1 %v13332_v56  ;;  %v13396_v56 = vcombine.low %v3619_v60, %v3623_v46  ;;  %v3683_v60 = vld [vmem:[%s21190_s7 + $0x598] sm:$0xff] }
 0x7d1   : > { %5995 = vmatprep.mubr.bf16.mxu1 %v13341_v54  ;;  %v13405_v54 = vcombine.high %v3627_v6, %v3631_v0  ;;  %v3687_v46 = vld [vmem:[%s21190_s7 + $0x5b8] sm:$0xff] }
 0x7d8   : > { %5996 = vmatmul.mubr.bf16.gmra.mrb[204].mxu1 %v13340_v50  ;;  %v13404_v50 = vcombine.low %v3627_v6, %v3631_v0  ;;  %v3691_v6 = vld [vmem:[%s21190_s7 + $0x5d8] sm:$0xff] }
 0x7d9   : > { %6003 = vmatprep.mubr.bf16.mxu1 %v13349_v41  ;;  %v13413_v41 = vcombine.high %v3635_v14, %v3639_v20  ;;  %v3695_v0 = vld [vmem:[%s21190_s7 + $0x5f8] sm:$0xff] }
 0x7e0   : > { %6004 = vmatmul.mubr.bf16.gmra.mrb[208].mxu1 %v13348_v13  ;;  %v13412_v13 = vcombine.low %v3635_v14, %v3639_v20  ;;  %v3699_v14 = vld [vmem:[%s21190_s7 + $0x618] sm:$0xff] }
 0x7e1   : > { %6011 = vmatprep.mubr.bf16.mxu1 %v13357_v28  ;;  %v13421_v28 = vcombine.high %v3643_v15, %v3647_v5  ;;  %v3703_v20 = vld [vmem:[%s21190_s7 + $0x638] sm:$0xff] }
 0x7e8   : > { %6012 = vmatmul.mubr.bf16.gmra.mrb[212].mxu1 %v13356_v18  ;;  %v13420_v18 = vcombine.low %v3643_v15, %v3647_v5  ;;  %v3707_v15 = vld [vmem:[%s21190_s7 + $0x658] sm:$0xff] }
 0x7e9   : > { %6019 = vmatprep.mubr.bf16.mxu1 %v13365_v39  ;;  %v13429_v39 = vcombine.high %v3651_v34, %v3655_v58  ;;  %v3711_v5 = vld [vmem:[%s21190_s7 + $0x678] sm:$0xff] }
 0x7f0   : > { %6020 = vmatmul.mubr.bf16.gmra.mrb[216].mxu1 %v13364_v57  ;;  %v13428_v57 = vcombine.low %v3651_v34, %v3655_v58  ;;  %v3715_v34 = vld [vmem:[%s21190_s7 + $0x698] sm:$0xff] }
 0x7f1   : > { %6027 = vmatprep.mubr.bf16.mxu1 %v13373_v55  ;;  %v13437_v55 = vcombine.high %v3659_v17, %v3663_v27  ;;  %v3719_v58 = vld [vmem:[%s21190_s7 + $0x6b8] sm:$0xff] }
 0x7f8   : > { %6028 = vmatmul.mubr.bf16.gmra.mrb[220].mxu1 %v13372_v45  ;;  %v13436_v45 = vcombine.low %v3659_v17, %v3663_v27  ;;  %v3723_v17 = vld [vmem:[%s21190_s7 + $0x6d8] sm:$0xff] }
 0x7f9   : > { %6035 = vmatprep.mubr.bf16.mxu1 %v13381_v31  ;;  %v13445_v31 = vcombine.high %v3667_v10, %v3671_v21  ;;  %v3727_v27 = vld [vmem:[%s21190_s7 + $0x6f8] sm:$0xff] }
 0x800   : > { %6036 = vmatmul.mubr.bf16.gmra.mrb[224].mxu1 %v13380_v3  ;;  %v13444_v3 = vcombine.low %v3667_v10, %v3671_v21  ;;  %v3731_v10 = vld [vmem:[%s21190_s7 + $0x718] sm:$0xff] }
 0x801   : > { %6043 = vmatprep.mubr.bf16.mxu1 %v13389_v29  ;;  %v13453_v29 = vcombine.high %v3675_v24, %v3679_v49  ;;  %v3735_v21 = vld [vmem:[%s21190_s7 + $0x738] sm:$0xff] }
 0x808   : > { %6044 = vmatmul.mubr.bf16.gmra.mrb[228].mxu1 %v13388_v30  ;;  %v13452_v30 = vcombine.low %v3675_v24, %v3679_v49  ;;  %v13500_v24 = vcombine.low %v3723_v17, %v3727_v27 }
 0x809   : > { %6051 = vmatprep.mubr.bf16.mxu1 %v13397_v35  ;;  %v13461_v35 = vcombine.high %v3683_v60, %v3687_v46 }
 0x810   : > { %6052 = vmatmul.mubr.bf16.gmra.mrb[232].mxu1 %v13396_v56  ;;  %v13460_v56 = vcombine.low %v3683_v60, %v3687_v46  ;;  %v15544_v46 = vld [vmem:[%s21192_s9 + $0x4] ss:$16 sps:$4 sm:$0xff]  }
 0x811   : > { %6059 = vmatprep.mubr.bf16.mxu1 %v13405_v54  ;;  %v13469_v54 = vcombine.high %v3691_v6, %v3695_v0  ;;  %6804 = vmatprep.mubr.bf16.mxu0 %v15544_v46 }
 0x818   : > { %6060 = vmatmul.mubr.bf16.gmra.mrb[236].mxu1 %v13404_v50  ;;  %v13468_v50 = vcombine.low %v3691_v6, %v3695_v0 }
 0x819   : > { %6067 = vmatprep.mubr.bf16.mxu1 %v13413_v41  ;;  %v13477_v41 = vcombine.high %v3699_v14, %v3703_v20 }
 0x820   : > { %6068 = vmatmul.mubr.bf16.gmra.mrb[240].mxu1 %v13412_v13  ;;  %v13476_v13 = vcombine.low %v3699_v14, %v3703_v20 }
 0x821   : > { %6075 = vmatprep.mubr.bf16.mxu1 %v13421_v28  ;;  %v13485_v28 = vcombine.high %v3707_v15, %v3711_v5 }
 0x828   : > { %6076 = vmatmul.mubr.bf16.gmra.mrb[244].mxu1 %v13420_v18  ;;  %v13484_v18 = vcombine.low %v3707_v15, %v3711_v5  ;;  %v3751_v15 = vld [vmem:[%s21190_s7 + $0x7b8] sm:$0xff] }
 0x829   : > { %6083 = vmatprep.mubr.bf16.mxu1 %v13429_v39  ;;  %v13493_v39 = vcombine.high %v3715_v34, %v3719_v58 }
 0x830   : > { %6084 = vmatmul.mubr.bf16.gmra.mrb[248].mxu1 %v13428_v57  ;;  %v13492_v57 = vcombine.low %v3715_v34, %v3719_v58 }
 0x831   : > { %6091 = vmatprep.mubr.bf16.mxu1 %v13437_v55  ;;  %v13501_v55 = vcombine.high %v3723_v17, %v3727_v27  ;;  %v3755_v17 = vld [vmem:[%s21190_s7 + $0x7d8] sm:$0xff] }
 0x832   : > { %v3759_v27 = vld [vmem:[%s21190_s7 + $0x7f8] sm:$0xff] }
 0x838   : > { %6092 = vmatmul.mubr.bf16.gmra.mrb[252].mxu1 %v13436_v45 }
 0x839   : > { %6099 = vmatprep.mubr.bf16.mxu1 %v13445_v31 }
 0x840   : > { %6100 = vmatmul.mubr.bf16.gmra.mrb[0].mxu1 %v13444_v3  ;;  %v13509_v3 = vcombine.high %v3731_v10, %v3735_v21 }
 0x841   : > { %6107 = vmatprep.mubr.bf16.mxu1 %v13453_v29 }
 0x848   : > { %6108 = vmatmul.mubr.bf16.gmra.mrb[4].mxu1 %v13452_v30  ;;  %v3739_v30 = vld [vmem:[%s21190_s7 + $0x758] sm:$0xff] }
 0x849   : > { %6115 = vmatprep.mubr.bf16.mxu1 %v13461_v35  ;;  %v3743_v35 = vld [vmem:[%s21190_s7 + $0x778] sm:$0xff] }
 0x84a   : > { %v13517_v14 = vcombine.high %v3739_v30, %v3743_v35 }
 0x850   : > { %6116 = vmatmul.mubr.bf16.gmra.mrb[8].mxu1 %v13460_v56  ;;  %v13508_v56 = vcombine.low %v3731_v10, %v3735_v21 }
 0x851   : > { %6123 = vmatprep.mubr.bf16.mxu1 %v13469_v54 }
 0x858   : > { %6124 = vmatmul.mubr.bf16.gmra.mrb[12].mxu1 %v13468_v50 }
 0x859   : > { %6131 = vmatprep.mubr.bf16.mxu1 %v13477_v41  ;;  %v3747_v41 = vld [vmem:[%s21190_s7 + $0x798] sm:$0xff] }
 0x85a   : > { %v13525_v58 = vcombine.high %v3747_v41, %v3751_v15  ;;  %v13524_v10 = vcombine.low %v3747_v41, %v3751_v15 }
 0x860   : > { %6132 = vmatmul.mubr.bf16.gmra.mrb[16].mxu1 %v13476_v13 }
 0x861   : > { %6139 = vmatprep.mubr.bf16.mxu1 %v13485_v28  ;;  %v13516_v28 = vcombine.low %v3739_v30, %v3743_v35  ;;  %v13532_v30 = vcombine.low %v3755_v17, %v3759_v27 }
 0x868   : > { %6140 = vmatmul.mubr.bf16.gmra.mrb[20].mxu1 %v13484_v18  ;;  %v6231_v18 = vld [vmem:[%s21191_s8 + $0x18] sm:$0xff] }
 0x869   : > { %6147 = vmatprep.mubr.bf16.mxu1 %v13493_v39 }
 0x870   : > { %6148 = vmatmul.mubr.bf16.gmra.mrb[24].mxu1 %v13492_v57 }
 0x871   : > { %6155 = vmatprep.mubr.bf16.mxu1 %v13501_v55 }
 0x873   : > { %v19373_v45 = vpop.f32.mrb[176].mxu1 }
 0x874   : > { %v5943_v31 = vpop.f32.mrb[177].mxu1 }
 0x875   : > { %v19375_v49 = vpop.f32.mrb[178].mxu1  ;;  %v13533_v31 = vcombine.high %v3755_v17, %v3759_v27 }
 0x876   : > { %v6196_v29 = vpack.c.bf16 %v19375_v49, %v19373_v45  ;;  %v5946_v60 = vpop.f32.mrb[179].mxu1 }
 0x878   : > { %6156 = vmatmul.mubr.bf16.gmra.mrb[28].mxu1 %v13500_v24  ;;  %v6230_v24 = vld [vmem:[%s21191_s8 + $0x10] sm:$0xff] }
 0x879   : > { %6163 = vmatprep.mubr.bf16.mxu1 %v13509_v3 }
 0x87b   : > { %v19388_v6 = vpop.f32.mrb[180].mxu1 }
 0x87c   : > { %v5951_v0 = vpop.f32.mrb[181].mxu1 }
 0x87d   : > { %v19390_v54 = vpop.f32.mrb[182].mxu1 }
 0x87e   : > { %v5954_v50 = vpop.f32.mrb[183].mxu1 }
 0x880   : > { %6164 = vmatmul.mubr.bf16.gmra.mrb[32].mxu1 %v13508_v56 }
 0x881   : > { %6171 = vmatprep.mubr.bf16.mxu1 %v13517_v14 }
 0x883   : > { %v19400_v5 = vpop.f32.mrb[184].mxu1 }
 0x884   : > { %v5959_v13 = vpop.f32.mrb[185].mxu1 }
 0x885   : > { %v19402_v34 = vpop.f32.mrb[186].mxu1 }
 0x886   : > { %v5962_v39 = vpop.f32.mrb[187].mxu1 }
 0x888   : > { %6172 = vmatmul.mubr.bf16.gmra.mrb[36].mxu1 %v13516_v28 }
 0x889   : > { %6179 = vmatprep.mubr.bf16.mxu1 %v13525_v58 }
 0x88b   : > { %v19412_v57 = vpop.f32.mrb[188].mxu1 }
 0x88c   : > { %v5967_v55 = vpop.f32.mrb[189].mxu1 }
 0x88d   : > { %v19414_v21 = vpop.f32.mrb[190].mxu1 }
 0x88e   : > { %v5970_v3 = vpop.f32.mrb[191].mxu1 }
 0x890   : > { %6180 = vmatmul.mubr.bf16.gmra.mrb[40].mxu1 %v13524_v10 }
 0x891   : > { %6187 = vmatprep.mubr.bf16.mxu1 %v13533_v31 }
 0x893   : > { %v19418_v60 = vpop.f32.mrb[192].mxu1 }
 0x894   : > { %v5975_v46 = vpop.f32.mrb[193].mxu1 }
 0x895   : > { %v19420_v35 = vpop.f32.mrb[194].mxu1 }
 0x896   : > { %v5978_v56 = vpop.f32.mrb[195].mxu1 }
 0x897   : > { %v6229_v56 = vld [vmem:[%s21191_s8 + $0x8] sm:$0xff] }
 0x898   : > { %6188 = vmatmul.mubr.bf16.gmra.mrb[44].mxu1 %v13532_v30  ;;  %v6228_v30 = vld [vmem:[%s21191_s8] sm:$0xff] }
 0x89b   : > { %v19424_v14 = vpop.f32.mrb[196].mxu1 }
 0x89c   : > { %v5983_v50 = vpop.f32.mrb[197].mxu1 }
 0x89d   : > { %v19426_v41 = vpop.f32.mrb[198].mxu1  ;;  %v6244_v50 = vld [vmem:[%s21191_s8 + $0x80] sm:$0xff] }
 0x89e   : > { %v5986_v13 = vpop.f32.mrb[199].mxu1 }
 0x89f   : > { %v6245_v13 = vld [vmem:[%s21191_s8 + $0x88] sm:$0xff] }
 0x8a3   : > { %v19430_v28 = vpop.f32.mrb[200].mxu1 }
 0x8a4   : > { %v5991_v58 = vpop.f32.mrb[201].mxu1 }
 0x8a5   : > { %v19432_v39 = vpop.f32.mrb[202].mxu1  ;;  %v6292_v58 = vpack.c.bf16 %v6229_v56, %v6228_v30  ;;  %v6246_v30 = vld [vmem:[%s21191_s8 + $0x90] sm:$0xff] }
 0x8a6   : > { %v5994_v27 = vpop.f32.mrb[203].mxu1 }
 0x8a7   : > { %v6324_v0 = vadd.bf16 %v6292_v58, %v6196_v29  ;;  %v6293_v29 = vpack.c.bf16 %v6231_v18, %v6230_v24  ;;  %v6248_v24 = vld [vmem:[%s21191_s8 + $0xa0] sm:$0xff] }
 0x8a9   : > { %v6356_v49 = vmax.bf16 %v21547_v4, %v6324_v0  ;;  %v6249_v0 = vld [vmem:[%s21191_s8 + $0xa8] sm:$0xff] }
 0x8ab   : > { %v19436_v55 = vpop.f32.mrb[204].mxu1 }
 0x8ac   : > { %v5999_v10 = vpop.f32.mrb[205].mxu1 }
 0x8ad   : > { %v19438_v31 = vpop.f32.mrb[206].mxu1 }
 0x8ae   : > { %v6002_v46 = vpop.f32.mrb[207].mxu1 }
 0x8af   : > { %v6300_v46 = vpack.c.bf16 %v6245_v13, %v6244_v50 }
 0x8b3   : > { %v6005_v27 = vpop.f32.mrb[208].mxu1 }
 0x8b4   : > { %v6007_v10 = vpop.f32.mrb[209].mxu1 }
 0x8b5   : > { %v6008_v3 = vpop.f32.mrb[210].mxu1 }
 0x8b6   : > { %v6204_v17 = vpack.c.bf16 %v6008_v3, %v6005_v27  ;;  %v6010_v15 = vpop.f32.mrb[211].mxu1  ;;  %v21929_v27 = vpack.c.bf16 %v19390_v54, %v19388_v6 }
 0x8b7   : > { %v6247_v15 = vld [vmem:[%s21191_s8 + $0x98] sm:$0xff] }
 0x8b8   : > { %v6332_v20 = vadd.bf16 %v6300_v46, %v6204_v17  ;;  %v6301_v50 = vpack.c.bf16 %v6247_v15, %v6246_v30  ;;  %v6325_v10 = vadd.bf16 %v6293_v29, %v21929_v27  ;;  %v6232_v46 = vld [vmem:[%s21191_s8 + $0x20] sm:$0xff] }
 0x8ba   : > { %v6364_v45 = vmax.bf16 %v21547_v4, %v6332_v20  ;;  %v6233_v20 = vld [vmem:[%s21191_s8 + $0x28] sm:$0xff]  ;;  %v6357_v54 = vmax.bf16 %v21547_v4, %v6325_v10  ;;  %v6250_v10 = vld [vmem:[%s21191_s8 + $0xb0] sm:$0xff] }
 0x8bb   : > { %v6013_v3 = vpop.f32.mrb[212].mxu1  ;;  %v6294_v30 = vpack.c.bf16 %v6233_v20, %v6232_v46  ;;  %v6251_v46 = vld [vmem:[%s21191_s8 + $0xb8] sm:$0xff] }
 0x8bc   : > { %v6015_v56 = vpop.f32.mrb[213].mxu1  ;;  %13989 = vmatprep.subr.bf16.mxu0 %v6364_v45 }
 0x8bd   : > { %v6016_v13 = vpop.f32.mrb[214].mxu1  ;;  %13990 = vmatpush3.bf16.msra.mxu0 %v6356_v49  ;;  %v6302_v49 = vpack.c.bf16 %v6249_v0, %v6248_v24  ;;  %v6303_v0 = vpack.c.bf16 %v6251_v46, %v6250_v10 }
 0x8be   : > { %v6205_v17 = vpack.c.bf16 %v6016_v13, %v6013_v3  ;;  %v6018_v58 = vpop.f32.mrb[215].mxu1 }
 0x8bf   : > { %v6235_v58 = vld [vmem:[%s21191_s8 + $0x38] sm:$0xff] }
 0x8c0   : > { %v6333_v18 = vadd.bf16 %v6301_v50, %v6205_v17  ;;  %v21930_v50 = vpack.c.bf16 %v19402_v34, %v19400_v5  ;;  %v6234_v17 = vld [vmem:[%s21191_s8 + $0x30] sm:$0xff] }
 0x8c1   : > { %v6295_v20 = vpack.c.bf16 %v6235_v58, %v6234_v17 }
 0x8c2   : > { %v6365_v6 = vmax.bf16 %v21547_v4, %v6333_v18  ;;  %v6326_v13 = vadd.bf16 %v6294_v30, %v21930_v50  ;;  %v6253_v50 = vld [vmem:[%s21191_s8 + $0xc8] sm:$0xff] }
 0x8c3   : > { %v6021_v15 = vpop.f32.mrb[216].mxu1 }
 0x8c4   : > { %v6023_v45 = vpop.f32.mrb[217].mxu1  ;;  %13991 = vmatprep.subr.bf16.mxu0 %v6365_v6  ;;  %v6358_v34 = vmax.bf16 %v21547_v4, %v6326_v13 }
 0x8c5   : > { %v6024_v29 = vpop.f32.mrb[218].mxu1  ;;  %13992 = vmatpush3.bf16.msra.mxu0 %v6357_v54 }
 0x8c6   : > { %v6206_v3 = vpack.c.bf16 %v6024_v29, %v6021_v15  ;;  %v6026_v56 = vpop.f32.mrb[219].mxu1  ;;  %v21931_v15 = vpack.c.bf16 %v19414_v21, %v19412_v57  ;;  %v6237_v29 = vld [vmem:[%s21191_s8 + $0x48] sm:$0xff] }
 0x8c7   : > { %v6252_v56 = vld [vmem:[%s21191_s8 + $0xc0] sm:$0xff] }
 0x8c8   : > { %v6334_v27 = vadd.bf16 %v6302_v49, %v6206_v3  ;;  %v6327_v45 = vadd.bf16 %v6295_v20, %v21931_v15  ;;  %v6236_v49 = vld [vmem:[%s21191_s8 + $0x40] sm:$0xff] }
 0x8c9   : > { %v6296_v13 = vpack.c.bf16 %v6237_v29, %v6236_v49 }
 0x8ca   : > { %v6366_v5 = vmax.bf16 %v21547_v4, %v6334_v27  ;;  %v6359_v21 = vmax.bf16 %v21547_v4, %v6327_v45  ;;  %v6304_v27 = vpack.c.bf16 %v6253_v50, %v6252_v56  ;;  %v21933_v50 = vpack.c.bf16 %v19426_v41, %v19424_v14 }
 0x8cb   : > { %v6029_v18 = vpop.f32.mrb[220].mxu1 }
 0x8cc   : > { %v6031_v24 = vpop.f32.mrb[221].mxu1  ;;  %13993 = vmatprep.subr.bf16.mxu0 %v6366_v5 }
 0x8cd   : > { %v6032_v6 = vpop.f32.mrb[222].mxu1  ;;  %13994 = vmatpush3.bf16.msra.mxu0 %v6358_v34  ;;  %v21932_v34 = vpack.c.bf16 %v19420_v35, %v19418_v60  ;;  %v6239_v24 = vld [vmem:[%s21191_s8 + $0x58] sm:$0xff] }
 0x8ce   : > { %v6207_v54 = vpack.c.bf16 %v6032_v6, %v6029_v18  ;;  %v6034_v30 = vpop.f32.mrb[223].mxu1  ;;  %v6238_v18 = vld [vmem:[%s21191_s8 + $0x50] sm:$0xff] }
 0x8cf   : > { %v6328_v20 = vadd.bf16 %v6296_v13, %v21932_v34  ;;  %v6254_v6 = vld [vmem:[%s21191_s8 + $0xd0] sm:$0xff]  ;;  %v6297_v30 = vpack.c.bf16 %v6239_v24, %v6238_v18  ;;  %v6241_v13 = vld [vmem:[%s21191_s8 + $0x68] sm:$0xff] }
 0x8d0   : > { %v6335_v3 = vadd.bf16 %v6303_v0, %v6207_v54  ;;  %v6255_v54 = vld [vmem:[%s21191_s8 + $0xd8] sm:$0xff] }
 0x8d1   : > { %v6360_v35 = vmax.bf16 %v21547_v4, %v6328_v20  ;;  %v6305_v49 = vpack.c.bf16 %v6255_v54, %v6254_v6  ;;  %v6242_v54 = vld [vmem:[%s21191_s8 + $0x70] sm:$0xff] }
 0x8d2   : > { %v6367_v57 = vmax.bf16 %v21547_v4, %v6335_v3 }
 0x8d3   : > { %v6037_v17 = vpop.f32.mrb[224].mxu1 }
 0x8d4   : > { %v6039_v58 = vpop.f32.mrb[225].mxu1  ;;  %13995 = vmatprep.subr.bf16.mxu0 %v6367_v57  ;;  %v6329_v57 = vadd.bf16 %v6297_v30, %v21933_v50  ;;  %v6258_v30 = vld [vmem:[%s21191_s8 + $0xf0] sm:$0xff] }
 0x8d5   : > { %v6040_v10 = vpop.f32.mrb[226].mxu1  ;;  %13996 = vmatpush3.bf16.msra.mxu0 %v6359_v21  ;;  %v6240_v21 = vld [vmem:[%s21191_s8 + $0x60] sm:$0xff] }
 0x8d6   : > { %v6208_v46 = vpack.c.bf16 %v6040_v10, %v6037_v17  ;;  %v6042_v5 = vpop.f32.mrb[227].mxu1  ;;  %v6256_v58 = vld [vmem:[%s21191_s8 + $0xe0] sm:$0xff]  ;;  %v6361_v41 = vmax.bf16 %v21547_v4, %v6329_v57  ;;  %v6298_v10 = vpack.c.bf16 %v6241_v13, %v6240_v21  ;;  %v21935_v21 = vpack.c.bf16 %v19438_v31, %v19436_v55 }
 0x8d7   : > { %v15545_v55 = vld [vmem:[%s21192_s9 + $0x24] ss:$16 sps:$4 sm:$0xff]  }
 0x8d8   : > { %v6336_v0 = vadd.bf16 %v6304_v27, %v6208_v46  ;;  %v6257_v27 = vld [vmem:[%s21191_s8 + $0xe8] sm:$0xff] }
 0x8d9   : > { %v6306_v34 = vpack.c.bf16 %v6257_v27, %v6256_v58 }
 0x8da   : > { %v6368_v60 = vmax.bf16 %v21547_v4, %v6336_v0  ;;  %v21934_v0 = vpack.c.bf16 %v19432_v39, %v19430_v28 }
 0x8db   : > { %v6045_v15 = vpop.f32.mrb[228].mxu1 }
 0x8dc   : > { %v6047_v45 = vpop.f32.mrb[229].mxu1  ;;  %13997 = vmatprep.subr.bf16.mxu0 %v6368_v60  ;;  %v6330_v6 = vadd.bf16 %v6298_v10, %v21934_v0  ;;  %v6243_v60 = vld [vmem:[%s21191_s8 + $0x78] sm:$0xff]  ;;  %v15542_v10 = vld [vmem:[%s21192_s9] ss:$16 sps:$4 sm:$0xff]   ;;  %v15548_v0 = vld [vmem:[%s21192_s9 + $0x44] ss:$16 sps:$4 sm:$0xff]  }
 0x8dd   : > { %v6048_v29 = vpop.f32.mrb[230].mxu1  ;;  %13998 = vmatpush3.bf16.msra.mxu0 %v6360_v35  ;;  %v6299_v45 = vpack.c.bf16 %v6243_v60, %v6242_v54 }
 0x8de   : > { %v6209_v3 = vpack.c.bf16 %v6048_v29, %v6045_v15  ;;  %v6050_v56 = vpop.f32.mrb[231].mxu1  ;;  %v6259_v15 = vld [vmem:[%s21191_s8 + $0xf8] sm:$0xff]  ;;  %v6362_v39 = vmax.bf16 %v21547_v4, %v6330_v6 }
 0x8df   : > { %v6331_v13 = vadd.bf16 %v6299_v45, %v21935_v21 }
 0x8e0   : > { %v6337_v17 = vadd.bf16 %v6305_v49, %v6209_v3  ;;  %v6307_v3 = vpack.c.bf16 %v6259_v15, %v6258_v30  ;;  %v15550_v30 = vld [vmem:[%s21192_s9 + $0x40] ss:$16 sps:$4 sm:$0xff]  }
 0x8e1   : > { %v6363_v27 = vmax.bf16 %v21547_v4, %v6331_v13 }
 0x8e2   : > { %v6369_v14 = vmax.bf16 %v21547_v4, %v6337_v17 }
 0x8e3   : > { %v6053_v46 = vpop.f32.mrb[232].mxu1 }
 0x8e4   : > { %v6055_v5 = vpop.f32.mrb[233].mxu1  ;;  %13999 = vmatprep.subr.bf16.mxu0 %v6369_v14 }
 0x8e5   : > { %v6056_v20 = vpop.f32.mrb[234].mxu1  ;;  %14000 = vmatpush3.bf16.msra.mxu0 %v6361_v41 }
 0x8e6   : > { %v6210_v18 = vpack.c.bf16 %v6056_v20, %v6053_v46  ;;  %v6058_v24 = vpop.f32.mrb[235].mxu1 }
 0x8e8   : > { %v6338_v35 = vadd.bf16 %v6306_v34, %v6210_v18  ;;  %v15547_v18 = vld [vmem:[%s21192_s9 + $0x20] ss:$16 sps:$4 sm:$0xff]  }
 0x8ea   : > { %v6370_v28 = vmax.bf16 %v21547_v4, %v6338_v35 }
 0x8eb   : > { %v6061_v49 = vpop.f32.mrb[236].mxu1 }
 0x8ec   : > { %v6063_v29 = vpop.f32.mrb[237].mxu1  ;;  %14001 = vmatprep.subr.bf16.mxu0 %v6370_v28  ;;  %v15551_v28 = vld [vmem:[%s21192_s9 + $0x64] ss:$16 sps:$4 sm:$0xff]  }
 0x8ed   : > { %v6064_v56 = vpop.f32.mrb[238].mxu1  ;;  %14002 = vmatpush3.bf16.msra.mxu0 %v6362_v39 }
 0x8ee   : > { %v6211_v50 = vpack.c.bf16 %v6064_v56, %v6061_v49  ;;  %v6066_v57 = vpop.f32.mrb[239].mxu1 }
 0x8f0   : > { %v6339_v17 = vadd.bf16 %v6307_v3, %v6211_v50  ;;  %v15553_v3 = vld [vmem:[%s21192_s9 + $0x60] ss:$16 sps:$4 sm:$0xff]   ;;  %v15554_v50 = vld [vmem:[%s21192_s9 + $0x84] ss:$16 sps:$4 sm:$0xff]  }
 0x8f2   : > { %v6371_v58 = vmax.bf16 %v21547_v4, %v6339_v17 }
 0x8f3   : > { %v19578_v14 = vpop.f32.mrb[240].mxu1 }
 0x8f4   : > { %v6071_v41 = vpop.f32.mrb[241].mxu1  ;;  %14003 = vmatprep.subr.bf16.mxu0 %v6371_v58  ;;  %v15556_v58 = vld [vmem:[%s21192_s9 + $0x80] ss:$16 sps:$4 sm:$0xff]  }
 0x8f5   : > { %v19583_v46 = vpop.f32.mrb[242].mxu1  ;;  %14004 = vmatpush3.bf16.msra.mxu0 %v6363_v27  ;;  %v15557_v41 = vld [vmem:[%s21192_s9 + $0xa4] ss:$16 sps:$4 sm:$0xff]  }
 0x8f6   : > { %v6212_v31 = vpack.c.bf16 %v19583_v46, %v19578_v14  ;;  %v6074_v5 = vpop.f32.mrb[243].mxu1 }
 0x8f8   : > { %6805 = vmatmul.mubr.bf16.vlgmr.msra.gmra.mrb[128].mxu0 %v15542_v10 }
 0x8f9   : > { %6812 = vmatprep.mubr.bf16.mxu0 %v15545_v55 }
 0x8fb   : > { %v19590_v34 = vpop.f32.mrb[244].mxu1 }
 0x8fc   : > { %v6079_v20 = vpop.f32.mrb[245].mxu1 }
 0x8fd   : > { %v19595_v24 = vpop.f32.mrb[246].mxu1 }
 0x8fe   : > { %v6082_v54 = vpop.f32.mrb[247].mxu1 }
 0x8ff   : > { %v15560_v54 = vld [vmem:[%s21192_s9 + $0xc4] ss:$16 sps:$4 sm:$0xff]  }
 0x900   : > { %6813 = vmatmul.mubr.bf16.gmra.mrb[132].mxu0 %v15547_v18  ;;  %v15559_v18 = vld [vmem:[%s21192_s9 + $0xa0] ss:$16 sps:$4 sm:$0xff]  }
 0x901   : > { %6820 = vmatprep.mubr.bf16.mxu0 %v15548_v0 }
 0x903   : > { %v19602_v60 = vpop.f32.mrb[248].mxu1 }
 0x904   : > { %v6087_v35 = vpop.f32.mrb[249].mxu1 }
 0x905   : > { %v19607_v15 = vpop.f32.mrb[250].mxu1  ;;  %v15568_v35 = vld [vmem:[%s21192_s9 + $0x100] ss:$16 sps:$4 sm:$0xff]  }
 0x906   : > { %v6090_v45 = vpop.f32.mrb[251].mxu1 }
 0x908   : > { %6821 = vmatmul.mubr.bf16.gmra.mrb[136].mxu0 %v15550_v30 }
 0x909   : > { %6828 = vmatprep.mubr.bf16.mxu0 %v15551_v28 }
 0x90b   : > { %v19614_v49 = vpop.f32.mrb[252].mxu1 }
 0x90c   : > { %v6095_v29 = vpop.f32.mrb[253].mxu1 }
 0x90d   : > { %v19619_v56 = vpop.f32.mrb[254].mxu1  ;;  %v15562_v29 = vld [vmem:[%s21192_s9 + $0xc0] ss:$16 sps:$4 sm:$0xff]  }
 0x90e   : > { %v6098_v21 = vpop.f32.mrb[255].mxu1 }
 0x910   : > { %6829 = vmatmul.mubr.bf16.gmra.mrb[140].mxu0 %v15553_v3 }
 0x911   : > { %6836 = vmatprep.mubr.bf16.mxu0 %v15554_v50  ;;  %v15563_v50 = vld [vmem:[%s21192_s9 + $0xe4] ss:$16 sps:$4 sm:$0xff]  }
 0x913   : > { %v19626_v13 = vpop.f32.mrb[0].mxu1 }
 0x914   : > { %v6103_v17 = vpop.f32.mrb[1].mxu1 }
 0x915   : > { %v19631_v27 = vpop.f32.mrb[2].mxu1 }
 0x916   : > { %v6106_v55 = vpop.f32.mrb[3].mxu1 }
 0x917   : > { %v15565_v55 = vld [vmem:[%s21192_s9 + $0xe0] ss:$16 sps:$4 sm:$0xff]  }
 0x918   : > { %6837 = vmatmul.mubr.bf16.gmra.mrb[144].mxu0 %v15556_v58 }
 0x919   : > { %6844 = vmatprep.mubr.bf16.mxu0 %v15557_v41 }
 0x91b   : > { %v19638_v5 = vpop.f32.mrb[4].mxu1 }
 0x91c   : > { %v6111_v20 = vpop.f32.mrb[5].mxu1 }
 0x91d   : > { %v19643_v0 = vpop.f32.mrb[6].mxu1 }
 0x91e   : > { %v6114_v30 = vpop.f32.mrb[7].mxu1 }
 0x920   : > { %6845 = vmatmul.mubr.bf16.gmra.mrb[148].mxu0 %v15559_v18  ;;  %v15566_v18 = vld [vmem:[%s21192_s9 + $0x104] ss:$16 sps:$4 sm:$0xff]  }
 0x921   : > { %6852 = vmatprep.mubr.bf16.mxu0 %v15560_v54 }
 0x923   : > { %v19650_v28 = vpop.f32.mrb[8].mxu1 }
 0x924   : > { %v6119_v45 = vpop.f32.mrb[9].mxu1 }
 0x925   : > { %v19655_v3 = vpop.f32.mrb[10].mxu1  ;;  %v6260_v45 = vld [vmem:[%s21191_s8 + $0x100] sm:$0xff] }
 0x926   : > { %v6122_v17 = vpop.f32.mrb[11].mxu1 }
 0x927   : > { %v6277_v17 = vld [vmem:[%s21191_s8 + $0x188] sm:$0xff] }
 0x928   : > { %6853 = vmatmul.mubr.bf16.gmra.mrb[152].mxu0 %v15562_v29  ;;  %v6261_v29 = vld [vmem:[%s21191_s8 + $0x108] sm:$0xff] }
 0x929   : > { %6860 = vmatprep.mubr.bf16.mxu0 %v15563_v50  ;;  %v6276_v50 = vld [vmem:[%s21191_s8 + $0x180] sm:$0xff] }
 0x92a   : > { %v6316_v21 = vpack.c.bf16 %v6277_v17, %v6276_v50 }
 0x92b   : > { %v19662_v58 = vpop.f32.mrb[12].mxu1 }
 0x92c   : > { %v6127_v41 = vpop.f32.mrb[13].mxu1 }
 0x92d   : > { %v19667_v20 = vpop.f32.mrb[14].mxu1  ;;  %v6308_v41 = vpack.c.bf16 %v6261_v29, %v6260_v45  ;;  %v6278_v29 = vld [vmem:[%s21191_s8 + $0x190] sm:$0xff] }
 0x92e   : > { %v6130_v30 = vpop.f32.mrb[15].mxu1 }
 0x92f   : > { %v6340_v6 = vadd.bf16 %v6308_v41, %v6212_v31 }
 0x930   : > { %6861 = vmatmul.mubr.bf16.gmra.mrb[156].mxu0 %v15565_v55  ;;  %v15569_v55 = vld [vmem:[%s21192_s9 + $0x124] ss:$16 sps:$4 sm:$0xff]  }
 0x931   : > { %6868 = vmatprep.mubr.bf16.mxu0 %v15566_v18  ;;  %v6262_v18 = vld [vmem:[%s21191_s8 + $0x110] sm:$0xff]  ;;  %v6372_v46 = vmax.bf16 %v21547_v4, %v6340_v6  ;;  %v21936_v6 = vpack.c.bf16 %v19595_v24, %v19590_v34 }
 0x933   : > { %v6133_v30 = vpop.f32.mrb[16].mxu1 }
 0x934   : > { %v6135_v54 = vpop.f32.mrb[17].mxu1 }
 0x935   : > { %v6136_v10 = vpop.f32.mrb[18].mxu1  ;;  %v6263_v54 = vld [vmem:[%s21191_s8 + $0x118] sm:$0xff] }
 0x936   : > { %v6220_v57 = vpack.c.bf16 %v6136_v10, %v6133_v30  ;;  %v6138_v39 = vpop.f32.mrb[19].mxu1  ;;  %v6309_v31 = vpack.c.bf16 %v6263_v54, %v6262_v18  ;;  %v6264_v18 = vld [vmem:[%s21191_s8 + $0x120] sm:$0xff]  ;;  %v6265_v54 = vld [vmem:[%s21191_s8 + $0x128] sm:$0xff] }
 0x937   : > { %v6279_v39 = vld [vmem:[%s21191_s8 + $0x198] sm:$0xff] }
 0x938   : > { %v6348_v45 = vadd.bf16 %v6316_v21, %v6220_v57  ;;  %6869 = vmatmul.mubr.bf16.gmra.mrb[160].mxu0 %v15568_v35  ;;  %v6317_v17 = vpack.c.bf16 %v6279_v39, %v6278_v29  ;;  %v15571_v57 = vld [vmem:[%s21192_s9 + $0x120] ss:$16 sps:$4 sm:$0xff]   ;;  %v15572_v21 = vld [vmem:[%s21192_s9 + $0x144] ss:$16 sps:$4 sm:$0xff]   ;;  %v6281_v39 = vld [vmem:[%s21191_s8 + $0x1a8] sm:$0xff] }
 0x939   : > { %6876 = vmatprep.mubr.bf16.mxu0 %v15569_v55  ;;  %v6341_v55 = vadd.bf16 %v6309_v31, %v21936_v6  ;;  %v6280_v29 = vld [vmem:[%s21191_s8 + $0x1a0] sm:$0xff]  ;;  %v6266_v6 = vld [vmem:[%s21191_s8 + $0x130] sm:$0xff] }
 0x93a   : > { %v6380_v14 = vmax.bf16 %v21547_v4, %v6348_v45 }
 0x93b   : > { %v6141_v10 = vpop.f32.mrb[20].mxu1  ;;  %v6373_v24 = vmax.bf16 %v21547_v4, %v6341_v55  ;;  %v6267_v55 = vld [vmem:[%s21191_s8 + $0x138] sm:$0xff] }
 0x93c   : > { %v6143_v50 = vpop.f32.mrb[21].mxu1  ;;  %14101 = vmatprep.subr.bf16.mxu0 %v6380_v14  ;;  %v6310_v14 = vpack.c.bf16 %v6265_v54, %v6264_v18  ;;  %v6282_v54 = vld [vmem:[%s21191_s8 + $0x1b0] sm:$0xff] }
 0x93d   : > { %v6144_v35 = vpop.f32.mrb[22].mxu1  ;;  %14102 = vmatpush3.bf16.msra.mxu0 %v6372_v46  ;;  %v15574_v50 = vld [vmem:[%s21192_s9 + $0x140] ss:$16 sps:$4 sm:$0xff]  }
 0x93e   : > { %v6221_v41 = vpack.c.bf16 %v6144_v35, %v6141_v10  ;;  %v6146_v30 = vpop.f32.mrb[23].mxu1  ;;  %v6318_v10 = vpack.c.bf16 %v6281_v39, %v6280_v29  ;;  %v6311_v29 = vpack.c.bf16 %v6267_v55, %v6266_v6  ;;  %v6285_v6 = vld [vmem:[%s21191_s8 + $0x1c8] sm:$0xff] }
 0x940   : > { %v6349_v45 = vadd.bf16 %v6317_v17, %v6221_v41  ;;  %6877 = vmatmul.mubr.bf16.gmra.mrb[164].mxu0 %v15571_v57  ;;  %v15575_v57 = vld [vmem:[%s21192_s9 + $0x164] ss:$16 sps:$4 sm:$0xff]   ;;  %v21937_v41 = vpack.c.bf16 %v19607_v15, %v19602_v60 }
 0x941   : > { %6884 = vmatprep.mubr.bf16.mxu0 %v15572_v21 }
 0x942   : > { %v6381_v34 = vmax.bf16 %v21547_v4, %v6349_v45  ;;  %v6342_v30 = vadd.bf16 %v6310_v14, %v21937_v41  ;;  %v6283_v45 = vld [vmem:[%s21191_s8 + $0x1b8] sm:$0xff]  ;;  %v15577_v14 = vld [vmem:[%s21192_s9 + $0x160] ss:$16 sps:$4 sm:$0xff]  }
 0x943   : > { %v6149_v46 = vpop.f32.mrb[24].mxu1 }
 0x944   : > { %v6151_v31 = vpop.f32.mrb[25].mxu1  ;;  %14103 = vmatprep.subr.bf16.mxu0 %v6381_v34  ;;  %v6374_v15 = vmax.bf16 %v21547_v4, %v6342_v30  ;;  %v6284_v30 = vld [vmem:[%s21191_s8 + $0x1c0] sm:$0xff] }
 0x945   : > { %v6152_v17 = vpop.f32.mrb[26].mxu1  ;;  %14104 = vmatpush3.bf16.msra.mxu0 %v6373_v24  ;;  %v6319_v24 = vpack.c.bf16 %v6283_v45, %v6282_v54  ;;  %v15578_v31 = vld [vmem:[%s21192_s9 + $0x184] ss:$16 sps:$4 sm:$0xff]   ;;  %v6320_v45 = vpack.c.bf16 %v6285_v6, %v6284_v30  ;;  %v15583_v30 = vld [vmem:[%s21192_s9 + $0x1a0] ss:$16 sps:$4 sm:$0xff]  }
 0x946   : > { %v6222_v35 = vpack.c.bf16 %v6152_v17, %v6149_v46  ;;  %v6154_v21 = vpop.f32.mrb[27].mxu1  ;;  %v21938_v17 = vpack.c.bf16 %v19619_v56, %v19614_v49 }
 0x947   : > { %v6269_v21 = vld [vmem:[%s21191_s8 + $0x148] sm:$0xff] }
 0x948   : > { %v6350_v18 = vadd.bf16 %v6318_v10, %v6222_v35  ;;  %6885 = vmatmul.mubr.bf16.gmra.mrb[168].mxu0 %v15574_v50  ;;  %v6268_v35 = vld [vmem:[%s21191_s8 + $0x140] sm:$0xff] }
 0x949   : > { %6892 = vmatprep.mubr.bf16.mxu0 %v15575_v57  ;;  %v6343_v57 = vadd.bf16 %v6311_v29, %v21938_v17  ;;  %v6312_v55 = vpack.c.bf16 %v6269_v21, %v6268_v35  ;;  %v15581_v29 = vld [vmem:[%s21192_s9 + $0x1a4] ss:$16 sps:$4 sm:$0xff]   ;;  %v6287_v17 = vld [vmem:[%s21191_s8 + $0x1d8] sm:$0xff] }
 0x94a   : > { %v6382_v60 = vmax.bf16 %v21547_v4, %v6350_v18 }
 0x94b   : > { %v6157_v39 = vpop.f32.mrb[28].mxu1  ;;  %v6375_v56 = vmax.bf16 %v21547_v4, %v6343_v57 }
 0x94c   : > { %v6159_v34 = vpop.f32.mrb[29].mxu1  ;;  %14105 = vmatprep.subr.bf16.mxu0 %v6382_v60  ;;  %v15580_v60 = vld [vmem:[%s21192_s9 + $0x180] ss:$16 sps:$4 sm:$0xff]  }
 0x94d   : > { %v6160_v46 = vpop.f32.mrb[30].mxu1  ;;  %14106 = vmatpush3.bf16.msra.mxu0 %v6374_v15 }
 0x94e   : > { %v6223_v10 = vpack.c.bf16 %v6160_v46, %v6157_v39  ;;  %v6162_v50 = vpop.f32.mrb[31].mxu1  ;;  %v6270_v46 = vld [vmem:[%s21191_s8 + $0x150] sm:$0xff] }
 0x94f   : > { %v6286_v50 = vld [vmem:[%s21191_s8 + $0x1d0] sm:$0xff] }
 0x950   : > { %v6351_v41 = vadd.bf16 %v6319_v24, %v6223_v10  ;;  %6893 = vmatmul.mubr.bf16.gmra.mrb[172].mxu0 %v15577_v14  ;;  %v21939_v24 = vpack.c.bf16 %v19631_v27, %v19626_v13 }
 0x951   : > { %6900 = vmatprep.mubr.bf16.mxu0 %v15578_v31  ;;  %v6271_v31 = vld [vmem:[%s21191_s8 + $0x158] sm:$0xff] }
 0x952   : > { %v6383_v49 = vmax.bf16 %v21547_v4, %v6351_v41  ;;  %v6344_v14 = vadd.bf16 %v6312_v55, %v21939_v24  ;;  %v6313_v57 = vpack.c.bf16 %v6271_v31, %v6270_v46  ;;  %v6321_v41 = vpack.c.bf16 %v6287_v17, %v6286_v50  ;;  %v15586_v31 = vld [vmem:[%s21192_s9 + $0x1c0] ss:$16 sps:$4 sm:$0xff]   ;;  %v15587_v50 = vld [vmem:[%s21192_s9 + $0x1e4] ss:$16 sps:$4 sm:$0xff]  }
 0x953   : > { %v6165_v18 = vpop.f32.mrb[32].mxu1 }
 0x954   : > { %v6167_v54 = vpop.f32.mrb[33].mxu1  ;;  %14107 = vmatprep.subr.bf16.mxu0 %v6383_v49  ;;  %v6376_v27 = vmax.bf16 %v21547_v4, %v6344_v14  ;;  %v15584_v49 = vld [vmem:[%s21192_s9 + $0x1c4] ss:$16 sps:$4 sm:$0xff]  }
 0x955   : > { %v6168_v15 = vpop.f32.mrb[34].mxu1  ;;  %14108 = vmatpush3.bf16.msra.mxu0 %v6375_v56 }
 0x956   : > { %v6224_v39 = vpack.c.bf16 %v6168_v15, %v6165_v18  ;;  %v6170_v34 = vpop.f32.mrb[35].mxu1  ;;  %v21940_v18 = vpack.c.bf16 %v19643_v0, %v19638_v5 }
 0x958   : > { %v6352_v10 = vadd.bf16 %v6320_v45, %v6224_v39  ;;  %6901 = vmatmul.mubr.bf16.gmra.mrb[176].mxu0 %v15580_v60  ;;  %v6345_v54 = vadd.bf16 %v6313_v57, %v21940_v18  ;;  %v6272_v45 = vld [vmem:[%s21191_s8 + $0x160] sm:$0xff]  ;;  %v6273_v60 = vld [vmem:[%s21191_s8 + $0x168] sm:$0xff] }
 0x959   : > { %6908 = vmatprep.mubr.bf16.mxu0 %v15581_v29  ;;  %v6288_v29 = vld [vmem:[%s21191_s8 + $0x1e0] sm:$0xff]  ;;  %v6289_v39 = vld [vmem:[%s21191_s8 + $0x1e8] sm:$0xff]  ;;  %v6314_v34 = vpack.c.bf16 %v6273_v60, %v6272_v45 }
 0x95a   : > { %v6384_v13 = vmax.bf16 %v21547_v4, %v6352_v10  ;;  %v6377_v0 = vmax.bf16 %v21547_v4, %v6345_v54  ;;  %v6322_v46 = vpack.c.bf16 %v6289_v39, %v6288_v29  ;;  %v15589_v54 = vld [vmem:[%s21192_s9 + $0x1e0] ss:$16 sps:$4 sm:$0xff]   ;;  %v15592_v60 = vld [vmem:[%s21192_s9 + $0xc] ss:$16 sps:$4 sm:$0xff]   ;;  %v21942_v39 = vpack.c.bf16 %v19667_v20, %v19662_v58  ;;  %v15595_v58 = vld [vmem:[%s21192_s9 + $0x28] ss:$16 sps:$4 sm:$0xff]  }
 0x95b   : > { %v6173_v35 = vpop.f32.mrb[36].mxu1  ;;  %v15596_v20 = vld [vmem:[%s21192_s9 + $0x4c] ss:$16 sps:$4 sm:$0xff]  }
 0x95c   : > { %v6175_v21 = vpop.f32.mrb[37].mxu1  ;;  %14109 = vmatprep.subr.bf16.mxu0 %v6384_v13 }
 0x95d   : > { %v6176_v6 = vpop.f32.mrb[38].mxu1  ;;  %14110 = vmatpush3.bf16.msra.mxu0 %v6376_v27  ;;  %v21941_v27 = vpack.c.bf16 %v19655_v3, %v19650_v28  ;;  %v6275_v21 = vld [vmem:[%s21191_s8 + $0x178] sm:$0xff] }
 0x95e   : > { %v6225_v56 = vpack.c.bf16 %v6176_v6, %v6173_v35  ;;  %v6178_v55 = vpop.f32.mrb[39].mxu1  ;;  %v6274_v35 = vld [vmem:[%s21191_s8 + $0x170] sm:$0xff]  ;;  %v6291_v6 = vld [vmem:[%s21191_s8 + $0x1f8] sm:$0xff] }
 0x95f   : > { %v6346_v57 = vadd.bf16 %v6314_v34, %v21941_v27  ;;  %v15605_v27 = vld [vmem:[%s21192_s9 + $0xac] ss:$16 sps:$4 sm:$0xff]  }
 0x960   : > { %v6353_v15 = vadd.bf16 %v6321_v41, %v6225_v56  ;;  %6909 = vmatmul.mubr.bf16.gmra.mrb[180].mxu0 %v15583_v30  ;;  %v6290_v30 = vld [vmem:[%s21191_s8 + $0x1f0] sm:$0xff] }
 0x961   : > { %6916 = vmatprep.mubr.bf16.mxu0 %v15584_v49  ;;  %v6378_v3 = vmax.bf16 %v21547_v4, %v6346_v57  ;;  %v6315_v49 = vpack.c.bf16 %v6275_v21, %v6274_v35  ;;  %v6323_v18 = vpack.c.bf16 %v6291_v6, %v6290_v30  ;;  %v15607_v57 = vld [vmem:[%s21192_s9 + $0xa8] ss:$16 sps:$4 sm:$0xff]   ;;  %v15608_v35 = vld [vmem:[%s21192_s9 + $0xcc] ss:$16 sps:$4 sm:$0xff]  }
 0x962   : > { %v6385_v5 = vmax.bf16 %v21547_v4, %v6353_v15  ;;  %v15610_v21 = vld [vmem:[%s21192_s9 + $0xc8] ss:$16 sps:$4 sm:$0xff]   ;;  %v15614_v6 = vld [vmem:[%s21192_s9 + $0x10c] ss:$16 sps:$4 sm:$0xff]  }
 0x963   : > { %v6181_v24 = vpop.f32.mrb[40].mxu1  ;;  %v15613_v30 = vld [vmem:[%s21192_s9 + $0xe8] ss:$16 sps:$4 sm:$0xff]  }
 0x964   : > { %v6183_v14 = vpop.f32.mrb[41].mxu1  ;;  %14111 = vmatprep.subr.bf16.mxu0 %v6385_v5  ;;  %v6347_v5 = vadd.bf16 %v6315_v49, %v21942_v39  ;;  %v15619_v49 = vld [vmem:[%s21192_s9 + $0x128] ss:$16 sps:$4 sm:$0xff]  }
 0x965   : > { %v6184_v10 = vpop.f32.mrb[42].mxu1  ;;  %14112 = vmatpush3.bf16.msra.mxu0 %v6377_v0  ;;  %v15590_v14 = vld [vmem:[%s21192_s9 + $0x8] ss:$16 sps:$4 sm:$0xff]  }
 0x966   : > { %v6226_v17 = vpack.c.bf16 %v6184_v10, %v6181_v24  ;;  %v6186_v13 = vpop.f32.mrb[43].mxu1  ;;  %v6379_v24 = vmax.bf16 %v21547_v4, %v6347_v5  ;;  %v15599_v10 = vld [vmem:[%s21192_s9 + $0x6c] ss:$16 sps:$4 sm:$0xff]  }
 0x967   : > { %v15604_v13 = vld [vmem:[%s21192_s9 + $0x88] ss:$16 sps:$4 sm:$0xff]  }
 0x968   : > { %v6354_v41 = vadd.bf16 %v6322_v46, %v6226_v17  ;;  %6917 = vmatmul.mubr.bf16.gmra.mrb[184].mxu0 %v15586_v31  ;;  %v15593_v46 = vld [vmem:[%s21192_s9 + $0x2c] ss:$16 sps:$4 sm:$0xff]   ;;  %v15598_v31 = vld [vmem:[%s21192_s9 + $0x48] ss:$16 sps:$4 sm:$0xff]  }
 0x969   : > { %6924 = vmatprep.mubr.bf16.mxu0 %v15587_v50  ;;  %v15601_v50 = vld [vmem:[%s21192_s9 + $0x68] ss:$16 sps:$4 sm:$0xff]   ;;  %v15602_v17 = vld [vmem:[%s21192_s9 + $0x8c] ss:$16 sps:$4 sm:$0xff]  }
 0x96a   : > { %v6386_v28 = vmax.bf16 %v21547_v4, %v6354_v41  ;;  %v15611_v41 = vld [vmem:[%s21192_s9 + $0xec] ss:$16 sps:$4 sm:$0xff]  }
 0x96b   : > { %v6189_v56 = vpop.f32.mrb[44].mxu1 }
 0x96c   : > { %v6191_v55 = vpop.f32.mrb[45].mxu1  ;;  %14113 = vmatprep.subr.bf16.mxu0 %v6386_v28  ;;  %v15616_v28 = vld [vmem:[%s21192_s9 + $0x108] ss:$16 sps:$4 sm:$0xff]  }
 0x96d   : > { %v6192_v45 = vpop.f32.mrb[46].mxu1  ;;  %14114 = vmatpush3.bf16.msra.mxu0 %v6378_v3  ;;  %v15617_v3 = vld [vmem:[%s21192_s9 + $0x12c] ss:$16 sps:$4 sm:$0xff]   ;;  %v15622_v55 = vld [vmem:[%s21192_s9 + $0x148] ss:$16 sps:$4 sm:$0xff]  }
 0x96e   : > { %v6227_v15 = vpack.c.bf16 %v6192_v45, %v6189_v56  ;;  %v6194_v29 = vpop.f32.mrb[47].mxu1  ;;  %v15620_v56 = vld [vmem:[%s21192_s9 + $0x14c] ss:$16 sps:$4 sm:$0xff]   ;;  %v15625_v45 = vld [vmem:[%s21192_s9 + $0x168] ss:$16 sps:$4 sm:$0xff]  }
 0x970   : > { %v6355_v0 = vadd.bf16 %v6323_v18, %v6227_v15  ;;  %6925 = vmatmul.mubr.bf16.gmra.mrb[188].mxu0 %v15589_v54  ;;  %v15623_v18 = vld [vmem:[%s21192_s9 + $0x16c] ss:$16 sps:$4 sm:$0xff]  }
 0x971   : > { %6965 = vmatprep.mubr.bf16.mxu0 %v15592_v60  ;;  %v15626_v15 = vld [vmem:[%s21192_s9 + $0x18c] ss:$16 sps:$4 sm:$0xff]  }
 0x972   : > { %v6387_v34 = vmax.bf16 %v21547_v4, %v6355_v0 }
 0x974   : > { %14115 = vmatprep.subr.bf16.mxu0 %v6387_v34 }
 0x975   : > { %14116 = vmatpush3.bf16.msra.mxu0 %v6379_v24  ;;  %v15628_v24 = vld [vmem:[%s21192_s9 + $0x188] ss:$16 sps:$4 sm:$0xff]  }
 0x978   : > { %6966 = vmatmul.mubr.bf16.vlgmr.msra.gmra.mrb[192].mxu0 %v15590_v14 }
 0x979   : > { %6973 = vmatprep.mubr.bf16.mxu0 %v15593_v46  ;;  %v15629_v46 = vld [vmem:[%s21192_s9 + $0x1ac] ss:$16 sps:$4 sm:$0xff]  }
 0x980   : > { %6974 = vmatmul.mubr.bf16.gmra.mrb[196].mxu0 %v15595_v58 }
 0x981   : > { %6981 = vmatprep.mubr.bf16.mxu0 %v15596_v20 }
 0x988   : > { %6982 = vmatmul.mubr.bf16.gmra.mrb[200].mxu0 %v15598_v31 }
 0x989   : > { %6989 = vmatprep.mubr.bf16.mxu0 %v15599_v10 }
 0x990   : > { %6990 = vmatmul.mubr.bf16.gmra.mrb[204].mxu0 %v15601_v50 }
 0x991   : > { %6997 = vmatprep.mubr.bf16.mxu0 %v15602_v17  ;;  %v15631_v17 = vld [vmem:[%s21192_s9 + $0x1a8] ss:$16 sps:$4 sm:$0xff]  }
 0x998   : > { %6998 = vmatmul.mubr.bf16.gmra.mrb[208].mxu0 %v15604_v13 }
 0x999   : > { %7005 = vmatprep.mubr.bf16.mxu0 %v15605_v27  ;;  %v15632_v27 = vld [vmem:[%s21192_s9 + $0x1cc] ss:$16 sps:$4 sm:$0xff]  }
 0x9a0   : > { %7006 = vmatmul.mubr.bf16.gmra.mrb[212].mxu0 %v15607_v57 }
 0x9a1   : > { %7013 = vmatprep.mubr.bf16.mxu0 %v15608_v35 }
 0x9a8   : > { %7014 = vmatmul.mubr.bf16.gmra.mrb[216].mxu0 %v15610_v21 }
 0x9a9   : > { %7021 = vmatprep.mubr.bf16.mxu0 %v15611_v41 }
 0x9b0   : > { %7022 = vmatmul.mubr.bf16.gmra.mrb[220].mxu0 %v15613_v30 }
 0x9b1   : > { %7029 = vmatprep.mubr.bf16.mxu0 %v15614_v6  ;;  %v15634_v6 = vld [vmem:[%s21192_s9 + $0x1c8] ss:$16 sps:$4 sm:$0xff]  }
 0x9b8   : > { %7030 = vmatmul.mubr.bf16.gmra.mrb[224].mxu0 %v15616_v28 }
 0x9b9   : > { %7037 = vmatprep.mubr.bf16.mxu0 %v15617_v3  ;;  %v15635_v3 = vld [vmem:[%s21192_s9 + $0x1ec] ss:$16 sps:$4 sm:$0xff]  }
 0x9c0   : > { %7038 = vmatmul.mubr.bf16.gmra.mrb[228].mxu0 %v15619_v49 }
 0x9c1   : > { %7045 = vmatprep.mubr.bf16.mxu0 %v15620_v56 }
 0x9c8   : > { %7046 = vmatmul.mubr.bf16.gmra.mrb[232].mxu0 %v15622_v55 }
 0x9c9   : > { %7053 = vmatprep.mubr.bf16.mxu0 %v15623_v18 }
 0x9cb   : > { %v14005_v54 = vpop.f32.mrb[128].mxu0 }
 0x9cc   : > { %v14006_v60 = vpop.f32.mrb[129].mxu0 }
 0x9cd   : > { %v19930_v29 = vadd.f32 %v14006_v60, %v14005_v54  ;;  %v14008_v39 = vpop.f32.mrb[130].mxu0 }
 0x9ce   : > { %v14009_v5 = vpop.f32.mrb[131].mxu0 }
 0x9cf   : > { %v19932_v0 = vadd.f32 %v14009_v5, %v14008_v39 }
 0x9d0   : > { %7054 = vmatmul.mubr.bf16.gmra.mrb[236].mxu0 %v15625_v45  ;;  %v15637_v45 = vld [vmem:[%s21192_s9 + $0x1e8] ss:$16 sps:$4 sm:$0xff]  }
 0x9d1   : > { %7061 = vmatprep.mubr.bf16.mxu0 %v15626_v15 }
 0x9d3   : > { %v14011_v34 = vpop.f32.mrb[132].mxu0 }
 0x9d4   : > { %v14012_v14 = vpop.f32.mrb[133].mxu0 }
 0x9d5   : > { %v19940_v58 = vadd.f32 %v14012_v14, %v14011_v34  ;;  %v14014_v20 = vpop.f32.mrb[134].mxu0 }
 0x9d6   : > { %v14015_v31 = vpop.f32.mrb[135].mxu0 }
 0x9d7   : > { %v19942_v10 = vadd.f32 %v14015_v31, %v14014_v20 }
 0x9d8   : > { %7062 = vmatmul.mubr.bf16.gmra.mrb[240].mxu0 %v15628_v24 }
 0x9d9   : > { %7069 = vmatprep.mubr.bf16.mxu0 %v15629_v46 }
 0x9db   : > { %v14017_v50 = vpop.f32.mrb[136].mxu0 }
 0x9dc   : > { %v14018_v13 = vpop.f32.mrb[137].mxu0 }
 0x9dd   : > { %v19950_v57 = vadd.f32 %v14018_v13, %v14017_v50  ;;  %v14020_v35 = vpop.f32.mrb[138].mxu0 }
 0x9de   : > { %v14021_v21 = vpop.f32.mrb[139].mxu0 }
 0x9df   : > { %v19952_v41 = vadd.f32 %v14021_v21, %v14020_v35 }
 0x9e0   : > { %7070 = vmatmul.mubr.bf16.gmra.mrb[244].mxu0 %v15631_v17 }
 0x9e1   : > { %7077 = vmatprep.mubr.bf16.mxu0 %v15632_v27 }
 0x9e3   : > { %v14023_v30 = vpop.f32.mrb[140].mxu0 }
 0x9e4   : > { %v14024_v28 = vpop.f32.mrb[141].mxu0 }
 0x9e5   : > { %v19960_v49 = vadd.f32 %v14024_v28, %v14023_v30  ;;  %v14026_v56 = vpop.f32.mrb[142].mxu0 }
 0x9e6   : > { %v14027_v55 = vpop.f32.mrb[143].mxu0 }
 0x9e7   : > { %v19962_v18 = vadd.f32 %v14027_v55, %v14026_v56 }
 0x9e8   : > { %7078 = vmatmul.mubr.bf16.gmra.mrb[248].mxu0 %v15634_v6 }
 0x9e9   : > { %7085 = vmatprep.mubr.bf16.mxu0 %v15635_v3 }
 0x9eb   : > { %v14029_v54 = vpop.f32.mrb[144].mxu0 }
 0x9ec   : > { %v14030_v60 = vpop.f32.mrb[145].mxu0 }
 0x9ed   : > { %v19967_v15 = vadd.f32 %v14030_v60, %v14029_v54  ;;  %v14032_v39 = vpop.f32.mrb[146].mxu0 }
 0x9ee   : > { %v14033_v5 = vpop.f32.mrb[147].mxu0 }
 0x9ef   : > { %v19969_v34 = vadd.f32 %v14033_v5, %v14032_v39 }
 0x9f0   : > { %7086 = vmatmul.mubr.bf16.gmra.mrb[252].mxu0 %v15637_v45 }
 0x9f3   : > { %v14035_v24 = vpop.f32.mrb[148].mxu0 }
 0x9f4   : > { %v14036_v14 = vpop.f32.mrb[149].mxu0 }
 0x9f5   : > { %v19971_v46 = vadd.f32 %v14036_v14, %v14035_v24  ;;  %v14038_v20 = vpop.f32.mrb[150].mxu0 }
 0x9f6   : > { %v14039_v31 = vpop.f32.mrb[151].mxu0 }
 0x9f7   : > { %v19973_v50 = vadd.f32 %v14039_v31, %v14038_v20 }
 0x9fb   : > { %v14041_v17 = vpop.f32.mrb[152].mxu0 }
 0x9fc   : > { %v14042_v13 = vpop.f32.mrb[153].mxu0 }
 0x9fd   : > { %v19975_v27 = vadd.f32 %v14042_v13, %v14041_v17  ;;  %v14044_v35 = vpop.f32.mrb[154].mxu0 }
 0x9fe   : > { %v14045_v21 = vpop.f32.mrb[155].mxu0 }
 0x9ff   : > { %v19977_v30 = vadd.f32 %v14045_v21, %v14044_v35 }
 0xa03   : > { %v14047_v6 = vpop.f32.mrb[156].mxu0 }
 0xa04   : > { %v14048_v28 = vpop.f32.mrb[157].mxu0 }
 0xa05   : > { %v19979_v3 = vadd.f32 %v14048_v28, %v14047_v6  ;;  %v14050_v56 = vpop.f32.mrb[158].mxu0 }
 0xa06   : > { %v14051_v55 = vpop.f32.mrb[159].mxu0 }
 0xa07   : > { %v19981_v54 = vadd.f32 %v14051_v55, %v14050_v56 }
 0xa0b   : > { %v14053_v45 = vpop.f32.mrb[160].mxu0 }
 0xa0c   : > { %v14054_v60 = vpop.f32.mrb[161].mxu0 }
 0xa0d   : > { %v14056_v39 = vpop.f32.mrb[162].mxu0  ;;  %v19983_v5 = vadd.f32 %v14054_v60, %v14053_v45 }
 0xa0e   : > { %v14057_v24 = vpop.f32.mrb[163].mxu0 }
 0xa0f   : > { %v19985_v14 = vadd.f32 %v14057_v24, %v14056_v39 }
 0xa13   : > { %v14059_v20 = vpop.f32.mrb[164].mxu0 }
 0xa14   : > { %v14060_v31 = vpop.f32.mrb[165].mxu0 }
 0xa15   : > { %v14062_v17 = vpop.f32.mrb[166].mxu0  ;;  %v19987_v13 = vadd.f32 %v14060_v31, %v14059_v20 }
 0xa16   : > { %v14063_v35 = vpop.f32.mrb[167].mxu0 }
 0xa17   : > { %v19989_v21 = vadd.f32 %v14063_v35, %v14062_v17 }
 0xa1b   : > { %v14065_v6 = vpop.f32.mrb[168].mxu0 }
 0xa1c   : > { %v14066_v28 = vpop.f32.mrb[169].mxu0 }
 0xa1d   : > { %v14068_v56 = vpop.f32.mrb[170].mxu0  ;;  %v19991_v55 = vadd.f32 %v14066_v28, %v14065_v6 }
 0xa1e   : > { %v14069_v16 = vpop.f32.mrb[171].mxu0 }
 0xa1f   : > { %v19993_v19 = vadd.f32 %v14069_v16, %v14068_v56 }
 0xa23   : > { %v14071_v45 = vpop.f32.mrb[172].mxu0 }
 0xa24   : > { %v14072_v60 = vpop.f32.mrb[173].mxu0 }
 0xa25   : > { %v14074_v39 = vpop.f32.mrb[174].mxu0  ;;  %v19995_v24 = vadd.f32 %v14072_v60, %v14071_v45 }
 0xa26   : > { %v14075_v61 = vpop.f32.mrb[175].mxu0 }
 0xa27   : > { %v19997_v32 = vadd.f32 %v14075_v61, %v14074_v39 }
 0xa2b   : > { %v14077_v20 = vpop.f32.mrb[176].mxu0 }
 0xa2c   : > { %v14078_v31 = vpop.f32.mrb[177].mxu0 }
 0xa2d   : > { %v14080_v17 = vpop.f32.mrb[178].mxu0  ;;  %v19999_v35 = vadd.f32 %v14078_v31, %v14077_v20 }
 0xa2e   : > { %v14081_v9 = vpop.f32.mrb[179].mxu0 }
 0xa2f   : > { %v20001_v23 = vadd.f32 %v14081_v9, %v14080_v17 }
 0xa33   : > { %v14083_v6 = vpop.f32.mrb[180].mxu0 }
 0xa34   : > { %v14084_v28 = vpop.f32.mrb[181].mxu0 }
 0xa35   : > { %v14086_v16 = vpop.f32.mrb[182].mxu0  ;;  %v20003_v56 = vadd.f32 %v14084_v28, %v14083_v6 }
 0xa36   : > { %v14087_v12 = vpop.f32.mrb[183].mxu0 }
 0xa37   : > { %v20005_v43 = vadd.f32 %v14087_v12, %v14086_v16 }
 0xa3b   : > { %v14089_v45 = vpop.f32.mrb[184].mxu0 }
 0xa3c   : > { %v14090_v60 = vpop.f32.mrb[185].mxu0 }
 0xa3d   : > { %v14092_v61 = vpop.f32.mrb[186].mxu0  ;;  %v20007_v39 = vadd.f32 %v14090_v60, %v14089_v45  ;;  %v15640_v60 = vld [vmem:[#allocation2 + $0x4] ss:$8 sps:$4 sm:$0xff]  }
 0xa3e   : > { %v14093_v36 = vpop.f32.mrb[187].mxu0  ;;  %7318 = vmatprep.mubr.bf16.mxu0 %v15640_v60 }
 0xa3f   : > { %v20009_v38 = vadd.f32 %v14093_v36, %v14092_v61 }
 0xa43   : > { %v14095_v20 = vpop.f32.mrb[188].mxu0 }
 0xa44   : > { %v14096_v31 = vpop.f32.mrb[189].mxu0 }
 0xa45   : > { %v14098_v9 = vpop.f32.mrb[190].mxu0  ;;  %v20011_v17 = vadd.f32 %v14096_v31, %v14095_v20 }
 0xa46   : > { %v14099_v48 = vpop.f32.mrb[191].mxu0 }
 0xa47   : > { %v20013_v26 = vadd.f32 %v14099_v48, %v14098_v9 }
 0xa4b   : > { %v14117_v6 = vpop.f32.mrb[192].mxu0 }
 0xa4c   : > { %v14118_v28 = vpop.f32.mrb[193].mxu0 }
 0xa4d   : > { %v14119_v12 = vadd.f32 %v14118_v28, %v14117_v6  ;;  %v14120_v16 = vpop.f32.mrb[194].mxu0 }
 0xa4e   : > { %v14121_v63 = vpop.f32.mrb[195].mxu0 }
 0xa4f   : > { %v14122_v8 = vadd.f32 %v14121_v63, %v14120_v16  ;;  %v20016_v45 = vadd.f32 %v14119_v12, %v19930_v29 }
 0xa51   : > { %v20019_v36 = vadd.f32 %v14122_v8, %v19932_v0 }
 0xa53   : > { %v14123_v61 = vpop.f32.mrb[196].mxu0  ;;  %v21943_v8 = vpack.c.bf16 %v20019_v36, %v20016_v45  ;;  %v7129_v45 = vld [vmem:[%s21193_s10 + $0x98] sm:$0xff] }
 0xa54   : > { %v14124_v31 = vpop.f32.mrb[197].mxu0 }
 0xa55   : > { %v14125_v48 = vadd.f32 %v14124_v31, %v14123_v61  ;;  %v14126_v9 = vpop.f32.mrb[198].mxu0 }
 0xa56   : > { %v14127_v2 = vpop.f32.mrb[199].mxu0 }
 0xa57   : > { %v14128_v6 = vadd.f32 %v14127_v2, %v14126_v9  ;;  %v20024_v28 = vadd.f32 %v14125_v48, %v19940_v58 }
 0xa59   : > { %v20027_v63 = vadd.f32 %v14128_v6, %v19942_v10 }
 0xa5b   : > { %v14129_v29 = vpop.f32.mrb[200].mxu0 }
 0xa5c   : > { %v14130_v0 = vpop.f32.mrb[201].mxu0 }
 0xa5d   : > { %v14131_v12 = vadd.f32 %v14130_v0, %v14129_v29  ;;  %v14132_v16 = vpop.f32.mrb[202].mxu0 }
 0xa5e   : > { %v14133_v20 = vpop.f32.mrb[203].mxu0 }
 0xa5f   : > { %v14134_v42 = vadd.f32 %v14133_v20, %v14132_v16  ;;  %v20032_v60 = vadd.f32 %v14131_v12, %v19950_v57 }
 0xa61   : > { %v20035_v2 = vadd.f32 %v14134_v42, %v19952_v41 }
 0xa63   : > { %v14135_v58 = vpop.f32.mrb[204].mxu0 }
 0xa64   : > { %v14136_v61 = vpop.f32.mrb[205].mxu0 }
 0xa65   : > { %v14137_v31 = vadd.f32 %v14136_v61, %v14135_v58  ;;  %v14138_v48 = vpop.f32.mrb[206].mxu0 }
 0xa66   : > { %v14139_v9 = vpop.f32.mrb[207].mxu0 }
 0xa67   : > { %v14140_v6 = vadd.f32 %v14139_v9, %v14138_v48  ;;  %v20040_v29 = vadd.f32 %v14137_v31, %v19960_v49 }
 0xa69   : > { %v20043_v20 = vadd.f32 %v14140_v6, %v19962_v18 }
 0xa6b   : > { %v14141_v57 = vpop.f32.mrb[208].mxu0 }
 0xa6c   : > { %v14142_v41 = vpop.f32.mrb[209].mxu0 }
 0xa6d   : > { %v14143_v0 = vadd.f32 %v14142_v41, %v14141_v57  ;;  %v14144_v12 = vpop.f32.mrb[210].mxu0 }
 0xa6e   : > { %v14145_v16 = vpop.f32.mrb[211].mxu0 }
 0xa6f   : > { %v14146_v10 = vadd.f32 %v14145_v16, %v14144_v12  ;;  %v20048_v58 = vadd.f32 %v14143_v0, %v19967_v15 }
 0xa71   : > { %v20051_v61 = vadd.f32 %v14146_v10, %v19969_v34 }
 0xa73   : > { %v14147_v49 = vpop.f32.mrb[212].mxu0 }
 0xa74   : > { %v14148_v31 = vpop.f32.mrb[213].mxu0 }
 0xa75   : > { %v14149_v48 = vadd.f32 %v14148_v31, %v14147_v49  ;;  %v14150_v9 = vpop.f32.mrb[214].mxu0 }
 0xa76   : > { %v14151_v6 = vpop.f32.mrb[215].mxu0 }
 0xa77   : > { %v14152_v42 = vadd.f32 %v14151_v6, %v14150_v9  ;;  %v20056_v57 = vadd.f32 %v14149_v48, %v19971_v46 }
 0xa79   : > { %v20059_v41 = vadd.f32 %v14152_v42, %v19973_v50 }
 0xa7b   : > { %v14153_v15 = vpop.f32.mrb[216].mxu0 }
 0xa7c   : > { %v14154_v10 = vpop.f32.mrb[217].mxu0 }
 0xa7d   : > { %v14155_v0 = vadd.f32 %v14154_v10, %v14153_v15  ;;  %v14156_v12 = vpop.f32.mrb[218].mxu0 }
 0xa7e   : > { %v14157_v16 = vpop.f32.mrb[219].mxu0 }
 0xa7f   : > { %v14158_v18 = vadd.f32 %v14157_v16, %v14156_v12  ;;  %v20064_v49 = vadd.f32 %v14155_v0, %v19975_v27  ;;  %v7110_v16 = vld [vmem:[%s21193_s10] sm:$0xff] }
 0xa81   : > { %v20067_v31 = vadd.f32 %v14158_v18, %v19977_v30 }
 0xa83   : > { %v14159_v46 = vpop.f32.mrb[220].mxu0 }
 0xa84   : > { %v14160_v42 = vpop.f32.mrb[221].mxu0 }
 0xa85   : > { %v14161_v48 = vadd.f32 %v14160_v42, %v14159_v46  ;;  %v14162_v9 = vpop.f32.mrb[222].mxu0  ;;  %v7111_v46 = vld [vmem:[%s21193_s10 + $0x8] sm:$0xff] }
 0xa86   : > { %v14163_v6 = vpop.f32.mrb[223].mxu0 }
 0xa87   : > { %v14164_v34 = vadd.f32 %v14163_v6, %v14162_v9  ;;  %v20072_v15 = vadd.f32 %v14161_v48, %v19979_v3  ;;  %v7142_v9 = vpack.c.bf16 %v7111_v46, %v7110_v16 }
 0xa89   : > { %v20075_v10 = vadd.f32 %v14164_v34, %v19981_v54  ;;  %v7126_v54 = vld [vmem:[%s21193_s10 + $0x80] sm:$0xff]  ;;  %v7127_v34 = vld [vmem:[%s21193_s10 + $0x88] sm:$0xff]  ;;  %v7158_v1 = vadd.bf16 %v7142_v9, %v21943_v8 }
 0xa8b   : > { %v14165_v27 = vpop.f32.mrb[224].mxu0 }
 0xa8c   : > { %v14166_v18 = vpop.f32.mrb[225].mxu0 }
 0xa8d   : > { %v14167_v0 = vadd.f32 %v14166_v18, %v14165_v27  ;;  %v14168_v12 = vpop.f32.mrb[226].mxu0  ;;  %v7150_v27 = vpack.c.bf16 %v7127_v34, %v7126_v54 }
 0xa8e   : > { %v14169_v3 = vpop.f32.mrb[227].mxu0 }
 0xa8f   : > { %v7032_v42 = vadd.f32 %v14167_v0, %v19983_v5  ;;  %v14170_v48 = vadd.f32 %v14169_v3, %v14168_v12  ;;  %v7113_v5 = vld [vmem:[%s21193_s10 + $0x18] sm:$0xff]  ;;  %v7128_v0 = vld [vmem:[%s21193_s10 + $0x90] sm:$0xff] }
 0xa90   : > { %v7143_v12 = vpack.c.bf16 %v7113_v5, %v7112_v7  ;;  %v7151_v46 = vpack.c.bf16 %v7129_v45, %v7128_v0  ;;  %v7115_v7 = vld [vmem:[%s21193_s10 + $0x28] sm:$0xff] }
 0xa91   : > { %v7035_v6 = vadd.f32 %v14170_v48, %v19985_v14 }
 0xa93   : > { %v7102_v18 = vpack.c.bf16 %v7035_v6, %v7032_v42  ;;  %v14171_v30 = vpop.f32.mrb[228].mxu0  ;;  %v21944_v42 = vpack.c.bf16 %v20027_v63, %v20024_v28 }
 0xa94   : > { %v14172_v50 = vpop.f32.mrb[229].mxu0 }
 0xa95   : > { %v14173_v59 = vadd.f32 %v14172_v50, %v14171_v30  ;;  %v14174_v33 = vpop.f32.mrb[230].mxu0  ;;  %v7166_v37 = vadd.bf16 %v7150_v27, %v7102_v18  ;;  %v7174_v30 = vmax.bf16 %v21547_v4, %v7158_v1  ;;  %v7159_v48 = vadd.bf16 %v7143_v12, %v21944_v42  ;;  %v7114_v1 = vld [vmem:[%s21193_s10 + $0x20] sm:$0xff] }
 0xa96   : > { %v14175_v14 = vpop.f32.mrb[231].mxu0  ;;  %v7144_v18 = vpack.c.bf16 %v7115_v7, %v7114_v1 }
 0xa97   : > { %v7040_v36 = vadd.f32 %v14173_v59, %v19987_v13  ;;  %v14176_v8 = vadd.f32 %v14175_v14, %v14174_v33  ;;  %v7182_v50 = vmax.bf16 %v21547_v4, %v7166_v37  ;;  %v7130_v13 = vld [vmem:[%s21193_s10 + $0xa0] sm:$0xff]  ;;  %v7175_v27 = vmax.bf16 %v21547_v4, %v7159_v48 }
 0xa99   : > { %v7043_v16 = vadd.f32 %v14176_v8, %v19989_v21  ;;  %14213 = vmatprep.subr.bf16.mxu0 %v7182_v50  ;;  %v7131_v21 = vld [vmem:[%s21193_s10 + $0xa8] sm:$0xff]  ;;  %v21945_v8 = vpack.c.bf16 %v20035_v2, %v20032_v60  ;;  %v7133_v60 = vld [vmem:[%s21193_s10 + $0xb8] sm:$0xff] }
 0xa9a   : > { %14214 = vmatpush3.bf16.msra.mxu0 %v7174_v30  ;;  %v7152_v14 = vpack.c.bf16 %v7131_v21, %v7130_v13 }
 0xa9b   : > { %v7103_v3 = vpack.c.bf16 %v7043_v16, %v7040_v36  ;;  %v14177_v54 = vpop.f32.mrb[232].mxu0  ;;  %v7160_v50 = vadd.bf16 %v7144_v18, %v21945_v8  ;;  %v7116_v16 = vld [vmem:[%s21193_s10 + $0x30] sm:$0xff] }
 0xa9c   : > { %v14178_v34 = vpop.f32.mrb[233].mxu0 }
 0xa9d   : > { %v14179_v9 = vadd.f32 %v14178_v34, %v14177_v54  ;;  %v14180_v59 = vpop.f32.mrb[234].mxu0  ;;  %v7167_v33 = vadd.bf16 %v7151_v46, %v7103_v3  ;;  %v7132_v3 = vld [vmem:[%s21193_s10 + $0xb0] sm:$0xff]  ;;  %v7176_v42 = vmax.bf16 %v21547_v4, %v7160_v50 }
 0xa9e   : > { %v14181_v37 = vpop.f32.mrb[235].mxu0 }
 0xa9f   : > { %v7048_v28 = vadd.f32 %v14179_v9, %v19991_v55  ;;  %v14182_v63 = vadd.f32 %v14181_v37, %v14180_v59  ;;  %v7183_v6 = vmax.bf16 %v21547_v4, %v7167_v33  ;;  %v7153_v59 = vpack.c.bf16 %v7133_v60, %v7132_v3  ;;  %v7136_v60 = vld [vmem:[%s21193_s10 + $0xd0] sm:$0xff] }
 0xaa0   : > { %v21946_v37 = vpack.c.bf16 %v20043_v20, %v20040_v29  ;;  %v7135_v29 = vld [vmem:[%s21193_s10 + $0xc8] sm:$0xff] }
 0xaa1   : > { %v7051_v5 = vadd.f32 %v14182_v63, %v19993_v19  ;;  %14215 = vmatprep.subr.bf16.mxu0 %v7183_v6  ;;  %v7117_v19 = vld [vmem:[%s21193_s10 + $0x38] sm:$0xff]  ;;  %v7118_v63 = vld [vmem:[%s21193_s10 + $0x40] sm:$0xff] }
 0xaa2   : > { %14216 = vmatpush3.bf16.msra.mxu0 %v7175_v27  ;;  %v7145_v48 = vpack.c.bf16 %v7117_v19, %v7116_v16  ;;  %v7134_v27 = vld [vmem:[%s21193_s10 + $0xc0] sm:$0xff] }
 0xaa3   : > { %v7104_v0 = vpack.c.bf16 %v7051_v5, %v7048_v28  ;;  %v14183_v45 = vpop.f32.mrb[236].mxu0 }
 0xaa4   : > { %v14184_v36 = vpop.f32.mrb[237].mxu0  ;;  %v7161_v13 = vadd.bf16 %v7145_v48, %v21946_v37 }
 0xaa5   : > { %v14185_v30 = vadd.f32 %v14184_v36, %v14183_v45  ;;  %v14186_v55 = vpop.f32.mrb[238].mxu0  ;;  %v7168_v12 = vadd.bf16 %v7152_v14, %v7104_v0  ;;  %v7154_v36 = vpack.c.bf16 %v7135_v29, %v7134_v27 }
 0xaa6   : > { %v14187_v46 = vpop.f32.mrb[239].mxu0  ;;  %v7177_v14 = vmax.bf16 %v21547_v4, %v7161_v13 }
 0xaa7   : > { %v7056_v2 = vadd.f32 %v14185_v30, %v19995_v24  ;;  %v14188_v54 = vadd.f32 %v14187_v46, %v14186_v55  ;;  %v7184_v34 = vmax.bf16 %v21547_v4, %v7168_v12  ;;  %v21947_v55 = vpack.c.bf16 %v20051_v61, %v20048_v58  ;;  %v7120_v46 = vld [vmem:[%s21193_s10 + $0x50] sm:$0xff]  ;;  %v7137_v58 = vld [vmem:[%s21193_s10 + $0xd8] sm:$0xff] }
 0xaa9   : > { %v7059_v9 = vadd.f32 %v14188_v54, %v19997_v32  ;;  %14217 = vmatprep.subr.bf16.mxu0 %v7184_v34  ;;  %v7119_v32 = vld [vmem:[%s21193_s10 + $0x48] sm:$0xff] }
 0xaaa   : > { %14218 = vmatpush3.bf16.msra.mxu0 %v7176_v42  ;;  %v7146_v0 = vpack.c.bf16 %v7119_v32, %v7118_v63  ;;  %v7138_v63 = vld [vmem:[%s21193_s10 + $0xe0] sm:$0xff] }
 0xaab   : > { %v7105_v33 = vpack.c.bf16 %v7059_v9, %v7056_v2  ;;  %v14189_v1 = vpop.f32.mrb[240].mxu0  ;;  %v7155_v9 = vpack.c.bf16 %v7137_v58, %v7136_v60  ;;  %v21950_v58 = vpack.c.bf16 %v20075_v10, %v20072_v15  ;;  %v15647_v15 = vld [vmem:[#allocation2 + $0x30] ss:$8 sps:$4 sm:$0xff]   ;;  %v15652_v10 = vld [vmem:[#allocation2 + $0x44] ss:$8 sps:$4 sm:$0xff]  }
 0xaac   : > { %v14190_v7 = vpop.f32.mrb[241].mxu0  ;;  %v7162_v12 = vadd.bf16 %v7146_v0, %v21947_v55 }
 0xaad   : > { %v14191_v21 = vadd.f32 %v14190_v7, %v14189_v1  ;;  %v14192_v24 = vpop.f32.mrb[242].mxu0  ;;  %v7169_v28 = vadd.bf16 %v7153_v59, %v7105_v33  ;;  %v21948_v7 = vpack.c.bf16 %v20059_v41, %v20056_v57  ;;  %v7139_v57 = vld [vmem:[%s21193_s10 + $0xe8] sm:$0xff] }
 0xaae   : > { %v14193_v6 = vpop.f32.mrb[243].mxu0  ;;  %v7178_v34 = vmax.bf16 %v21547_v4, %v7162_v12  ;;  %v7140_v12 = vld [vmem:[%s21193_s10 + $0xf0] sm:$0xff] }
 0xaaf   : > { %v7064_v20 = vadd.f32 %v14191_v21, %v19999_v35  ;;  %v14194_v18 = vadd.f32 %v14193_v6, %v14192_v24  ;;  %v7185_v5 = vmax.bf16 %v21547_v4, %v7169_v28  ;;  %v7122_v24 = vld [vmem:[%s21193_s10 + $0x60] sm:$0xff] }
 0xab1   : > { %v7067_v45 = vadd.f32 %v14194_v18, %v20001_v23  ;;  %14219 = vmatprep.subr.bf16.mxu0 %v7185_v5  ;;  %v7121_v23 = vld [vmem:[%s21193_s10 + $0x58] sm:$0xff]  ;;  %v7156_v18 = vpack.c.bf16 %v7139_v57, %v7138_v63  ;;  %v7391_v63 = vld [vmem:[%s21195_s12] sm:$0xff]  ;;  %v7392_v57 = vld [vmem:[%s21195_s12 + $0x8] sm:$0xff] }
 0xab2   : > { %14220 = vmatpush3.bf16.msra.mxu0 %v7177_v14  ;;  %v7147_v42 = vpack.c.bf16 %v7121_v23, %v7120_v46 }
 0xab3   : > { %v7106_v8 = vpack.c.bf16 %v7067_v45, %v7064_v20  ;;  %v14195_v50 = vpop.f32.mrb[244].mxu0  ;;  %v21949_v45 = vpack.c.bf16 %v20067_v31, %v20064_v49  ;;  %v7141_v49 = vld [vmem:[%s21193_s10 + $0xf8] sm:$0xff] }
 0xab4   : > { %v14196_v30 = vpop.f32.mrb[245].mxu0  ;;  %v7163_v37 = vadd.bf16 %v7147_v42, %v21948_v7  ;;  %v15643_v42 = vld [vmem:[#allocation2 + $0x14] ss:$8 sps:$4 sm:$0xff]   ;;  %v15653_v7 = vld [vmem:[#allocation2 + $0x50] ss:$8 sps:$4 sm:$0xff]  }
 0xab5   : > { %v14197_v16 = vadd.f32 %v14196_v30, %v14195_v50  ;;  %v14198_v35 = vpop.f32.mrb[246].mxu0  ;;  %v7170_v19 = vadd.bf16 %v7154_v36, %v7106_v8  ;;  %v7124_v30 = vld [vmem:[%s21193_s10 + $0x70] sm:$0xff] }
 0xab6   : > { %v14199_v3 = vpop.f32.mrb[247].mxu0  ;;  %v7179_v27 = vmax.bf16 %v21547_v4, %v7163_v37  ;;  %v15658_v37 = vld [vmem:[#allocation2 + $0x64] ss:$8 sps:$4 sm:$0xff]  }
 0xab7   : > { %v7072_v61 = vadd.f32 %v14197_v16, %v20003_v56  ;;  %v14200_v2 = vadd.f32 %v14199_v3, %v14198_v35  ;;  %v7186_v54 = vmax.bf16 %v21547_v4, %v7170_v19  ;;  %v7157_v3 = vpack.c.bf16 %v7141_v49, %v7140_v12 }
 0xab9   : > { %v7075_v48 = vadd.f32 %v14200_v2, %v20005_v43  ;;  %14221 = vmatprep.subr.bf16.mxu0 %v7186_v54  ;;  %v7123_v43 = vld [vmem:[%s21193_s10 + $0x68] sm:$0xff] }
 0xaba   : > { %14222 = vmatpush3.bf16.msra.mxu0 %v7178_v34  ;;  %v7148_v29 = vpack.c.bf16 %v7123_v43, %v7122_v24  ;;  %v15638_v34 = vld [vmem:[#allocation2] ss:$8 sps:$4 sm:$0xff]  }
 0xabb   : > { %v7107_v59 = vpack.c.bf16 %v7075_v48, %v7072_v61  ;;  %v14201_v33 = vpop.f32.mrb[248].mxu0  ;;  %v15646_v48 = vld [vmem:[#allocation2 + $0x24] ss:$8 sps:$4 sm:$0xff]  }
 0xabc   : > { %v14202_v1 = vpop.f32.mrb[249].mxu0  ;;  %v7164_v36 = vadd.bf16 %v7148_v29, %v21949_v45  ;;  %v15662_v24 = vld [vmem:[#allocation7] sm:$0xff]   ;;  %v7407_v29 = vpack.c.bf16 %v7392_v57, %v7391_v63  ;;  %v7394_v45 = vld [vmem:[%s21195_s12 + $0x18] sm:$0xff] }
 0xabd   : > { %v14203_v13 = vadd.f32 %v14202_v1, %v14201_v33  ;;  %v14204_v56 = vpop.f32.mrb[250].mxu0  ;;  %v7171_v21 = vadd.bf16 %v7155_v9, %v7107_v59  ;;  %v15644_v9 = vld [vmem:[#allocation2 + $0x20] ss:$8 sps:$4 sm:$0xff]   ;;  %v15649_v59 = vld [vmem:[#allocation2 + $0x34] ss:$8 sps:$4 sm:$0xff]  }
 0xabe   : > { %v14205_v28 = vpop.f32.mrb[251].mxu0  ;;  %v7180_v19 = vmax.bf16 %v21547_v4, %v7164_v36  ;;  %v15650_v33 = vld [vmem:[#allocation2 + $0x40] ss:$8 sps:$4 sm:$0xff]   ;;  %v15655_v1 = vld [vmem:[#allocation2 + $0x54] ss:$8 sps:$4 sm:$0xff]  }
 0xabf   : > { %v7080_v41 = vadd.f32 %v14203_v13, %v20007_v39  ;;  %v14206_v32 = vadd.f32 %v14205_v28, %v14204_v56  ;;  %v7187_v6 = vmax.bf16 %v21547_v4, %v7171_v21  ;;  %v15656_v13 = vld [vmem:[#allocation2 + $0x60] ss:$8 sps:$4 sm:$0xff]   ;;  %v15661_v56 = vld [vmem:[#allocation2 + $0x74] ss:$8 sps:$4 sm:$0xff]   ;;  %v15659_v21 = vld [vmem:[#allocation2 + $0x70] ss:$8 sps:$4 sm:$0xff]  }
 0xac1   : > { %v7083_v20 = vadd.f32 %v14206_v32, %v20009_v38  ;;  %14223 = vmatprep.subr.bf16.mxu0 %v7187_v6  ;;  %v7125_v38 = vld [vmem:[%s21193_s10 + $0x78] sm:$0xff] }
 0xac2   : > { %14224 = vmatpush3.bf16.msra.mxu0 %v7179_v27  ;;  %v7149_v46 = vpack.c.bf16 %v7125_v38, %v7124_v30 }
 0xac3   : > { %v7108_v5 = vpack.c.bf16 %v7083_v20, %v7080_v41  ;;  %v14207_v14 = vpop.f32.mrb[252].mxu0 }
 0xac4   : > { %v14208_v0 = vpop.f32.mrb[253].mxu0  ;;  %v7165_v61 = vadd.bf16 %v7149_v46, %v21950_v58 }
 0xac5   : > { %v14209_v8 = vadd.f32 %v14208_v0, %v14207_v14  ;;  %v14210_v39 = vpop.f32.mrb[254].mxu0  ;;  %v7172_v50 = vadd.bf16 %v7156_v18, %v7108_v5  ;;  %v7393_v0 = vld [vmem:[%s21195_s12 + $0x10] sm:$0xff] }
 0xac6   : > { %v14211_v55 = vpop.f32.mrb[255].mxu0  ;;  %v7408_v38 = vpack.c.bf16 %v7394_v45, %v7393_v0 }
 0xac7   : > { %v7088_v31 = vadd.f32 %v14209_v8, %v20011_v17  ;;  %v14212_v16 = vadd.f32 %v14211_v55, %v14210_v39  ;;  %v7188_v35 = vmax.bf16 %v21547_v4, %v7172_v50  ;;  %v7181_v17 = vmax.bf16 %v21547_v4, %v7165_v61 }
 0xac9   : > { %v7091_v23 = vadd.f32 %v14212_v16, %v20013_v26  ;;  %14225 = vmatprep.subr.bf16.mxu0 %v7188_v35  ;;  %v15641_v26 = vld [vmem:[#allocation2 + $0x10] ss:$8 sps:$4 sm:$0xff]   ;;  %v7395_v16 = vld [vmem:[%s21195_s12 + $0x20] sm:$0xff]  ;;  %v7396_v35 = vld [vmem:[%s21195_s12 + $0x28] sm:$0xff] }
 0xaca   : > { %14226 = vmatpush3.bf16.msra.mxu0 %v7180_v19  ;;  %v7409_v58 = vpack.c.bf16 %v7396_v35, %v7395_v16 }
 0xacb   : > { %v7109_v60 = vpack.c.bf16 %v7091_v23, %v7088_v31 }
 0xacd   : > { %v7173_v2 = vadd.bf16 %v7157_v3, %v7109_v60 }
 0xacf   : > { %v7189_v54 = vmax.bf16 %v21547_v4, %v7173_v2 }
 0xad1   : > { %14227 = vmatprep.subr.bf16.mxu0 %v7189_v54 }
 0xad2   : > { %14228 = vmatpush3.bf16.msra.mxu0 %v7181_v17 }
 0xad5   : > { %7319 = vmatmul.mubr.bf16.vlgmr.msra.gmra.mrb[0].mxu0 %v15638_v34  ;;  %v7397_v34 = vld [vmem:[%s21195_s12 + $0x30] sm:$0xff] }
 0xad6   : > { %7326 = vmatprep.mubr.bf16.mxu0 %v15643_v42  ;;  %v7398_v42 = vld [vmem:[%s21195_s12 + $0x38] sm:$0xff] }
 0xadd   : > { %7327 = vmatmul.mubr.bf16.gmra.mrb[4].mxu0 %v15641_v26 }
 0xade   : > { %7334 = vmatprep.mubr.bf16.mxu0 %v15646_v48 }
 0xae5   : > { %7335 = vmatmul.mubr.bf16.gmra.mrb[8].mxu0 %v15644_v9 }
 0xae6   : > { %7342 = vmatprep.mubr.bf16.mxu0 %v15649_v59 }
 0xaed   : > { %7343 = vmatmul.mubr.bf16.gmra.mrb[12].mxu0 %v15647_v15 }
 0xaee   : > { %7350 = vmatprep.mubr.bf16.mxu0 %v15652_v10  ;;  %v7410_v10 = vpack.c.bf16 %v7398_v42, %v7397_v34 }
 0xaf5   : > { %7351 = vmatmul.mubr.bf16.gmra.mrb[16].mxu0 %v15650_v33 }
 0xaf6   : > { %7358 = vmatprep.mubr.bf16.mxu0 %v15655_v1 }
 0xafd   : > { %7359 = vmatmul.mubr.bf16.gmra.mrb[20].mxu0 %v15653_v7 }
 0xafe   : > { %7366 = vmatprep.mubr.bf16.mxu0 %v15658_v37 }
 0xb05   : > { %7367 = vmatmul.mubr.bf16.gmra.mrb[24].mxu0 %v15656_v13  ;;  %v7399_v13 = vld [vmem:[%s21195_s12 + $0x40] sm:$0xff] }
 0xb06   : > { %7374 = vmatprep.mubr.bf16.mxu0 %v15661_v56  ;;  %v7400_v56 = vld [vmem:[%s21195_s12 + $0x48] sm:$0xff] }
 0xb07   : > { %v7411_v57 = vpack.c.bf16 %v7400_v56, %v7399_v13  ;;  %v21954_v13 = vld [vmem:[#allocation25_spill] sm:$0xff]  ;;  %v15666_v56 = vld [vmem:[#allocation7 + $0x20] sm:$0xff]  }
 0xb0d   : > { %7375 = vmatmul.mubr.bf16.gmra.mrb[28].mxu0 %v15659_v21 }
 0xb0e   : > { %14333 = vmatprep.mubr.bf16.mxu0 %v15662_v24 }
 0xba8   : > { %v14229_v43 = vpop.f32.mrb[0].mxu0 }
 0xba9   : > { %v14230_v28 = vpop.f32.mrb[1].mxu0 }
 0xbaa   : > { %v14231_v41 = vadd.f32 %v14230_v28, %v14229_v43  ;;  %v14232_v32 = vpop.f32.mrb[2].mxu0 }
 0xbab   : > { %v14233_v6 = vpop.f32.mrb[3].mxu0 }
 0xbac   : > { %v14234_v27 = vadd.f32 %v14233_v6, %v14232_v32 }
 0xbae   : > { %v7383_v20 = vpack.c.bf16 %v14234_v27, %v14231_v41 }
 0xbb0   : > { %v7415_v18 = vadd.bf16 %v7407_v29, %v7383_v20  ;;  %v14235_v5 = vpop.f32.mrb[4].mxu0  ;;  %v7401_v29 = vld [vmem:[%s21195_s12 + $0x50] sm:$0xff]  ;;  %v7402_v20 = vld [vmem:[%s21195_s12 + $0x58] sm:$0xff] }
 0xbb1   : > { %v14236_v14 = vpop.f32.mrb[5].mxu0 }
 0xbb2   : > { %v14237_v36 = vadd.f32 %v14236_v14, %v14235_v5  ;;  %v14238_v8 = vpop.f32.mrb[6].mxu0  ;;  %v7423_v39 = vmax.bf16 %v21547_v4, %v7415_v18 }
 0xbb3   : > { %v14239_v50 = vpop.f32.mrb[7].mxu0 }
 0xbb4   : > { %v14240_v30 = vadd.f32 %v14239_v50, %v14238_v8  ;;  %14317 = vmatprep.subr.bf16.mxu0 %v7423_v39 }
 0xbb5   : > { %14318 = vmatpush3.bf16.msra.mxu0 %v7423_v39 }
 0xbb6   : > { %v7384_v55 = vpack.c.bf16 %v14240_v30, %v14237_v36  ;;  %v7412_v36 = vpack.c.bf16 %v7402_v20, %v7401_v29  ;;  %v21962_v29 = vld [vmem:[#allocation33_spill] sm:$0xff]  ;;  %v15670_v20 = vld [vmem:[#allocation7 + $0x40] sm:$0xff]  }
 0xbb8   : > { %v7416_v12 = vadd.bf16 %v7408_v38, %v7384_v55  ;;  %v14241_v49 = vpop.f32.mrb[8].mxu0  ;;  %v7403_v38 = vld [vmem:[%s21195_s12 + $0x60] sm:$0xff]  ;;  %v7404_v55 = vld [vmem:[%s21195_s12 + $0x68] sm:$0xff] }
 0xbb9   : > { %v14242_v31 = vpop.f32.mrb[9].mxu0 }
 0xbba   : > { %v14243_v19 = vadd.f32 %v14242_v31, %v14241_v49  ;;  %v14244_v46 = vpop.f32.mrb[10].mxu0  ;;  %v7424_v23 = vmax.bf16 %v21547_v4, %v7416_v12 }
 0xbbb   : > { %v14245_v3 = vpop.f32.mrb[11].mxu0 }
 0xbbc   : > { %v14246_v60 = vadd.f32 %v14245_v3, %v14244_v46  ;;  %14319 = vmatprep.subr.bf16.mxu0 %v7424_v23 }
 0xbbd   : > { %14320 = vmatpush3.bf16.msra.mxu0 %v7424_v23 }
 0xbbe   : > { %v7385_v61 = vpack.c.bf16 %v14246_v60, %v14243_v19  ;;  %v7413_v19 = vpack.c.bf16 %v7404_v55, %v7403_v38  ;;  %v21970_v38 = vld [vmem:[#allocation46_spill] sm:$0xff]  ;;  %v15674_v55 = vld [vmem:[#allocation7 + $0x60] sm:$0xff]  }
 0xbc0   : > { %v7417_v2 = vadd.bf16 %v7409_v58, %v7385_v61  ;;  %v14247_v54 = vpop.f32.mrb[12].mxu0  ;;  %v7405_v58 = vld [vmem:[%s21195_s12 + $0x70] sm:$0xff]  ;;  %v7406_v61 = vld [vmem:[%s21195_s12 + $0x78] sm:$0xff] }
 0xbc1   : > { %v14248_v17 = vpop.f32.mrb[13].mxu0 }
 0xbc2   : > { %v14249_v26 = vadd.f32 %v14248_v17, %v14247_v54  ;;  %v14250_v48 = vpop.f32.mrb[14].mxu0  ;;  %v7425_v9 = vmax.bf16 %v21547_v4, %v7417_v2 }
 0xbc3   : > { %v14251_v59 = vpop.f32.mrb[15].mxu0 }
 0xbc4   : > { %v14252_v15 = vadd.f32 %v14251_v59, %v14250_v48  ;;  %14321 = vmatprep.subr.bf16.mxu0 %v7425_v9 }
 0xbc5   : > { %14322 = vmatpush3.bf16.msra.mxu0 %v7425_v9 }
 0xbc6   : > { %v7386_v33 = vpack.c.bf16 %v14252_v15, %v14249_v26  ;;  %v7414_v26 = vpack.c.bf16 %v7406_v61, %v7405_v58  ;;  %v15663_v15 = vld [vmem:[#allocation7 + $0x8] sm:$0xff]   ;;  %v21978_v58 = vld [vmem:[#allocation69_spill] sm:$0xff]  ;;  %v15678_v61 = vld [vmem:[#allocation7 + $0x80] sm:$0xff]  }
 0xbc8   : > { %v7418_v1 = vadd.bf16 %v7410_v10, %v7386_v33  ;;  %v14253_v7 = vpop.f32.mrb[16].mxu0  ;;  %v15664_v10 = vld [vmem:[#allocation7 + $0x10] sm:$0xff]   ;;  %v21951_v33 = vld [vmem:[#allocation24_spill] sm:$0xff] }
 0xbc9   : > { %v14254_v37 = vpop.f32.mrb[17].mxu0 }
 0xbca   : > { %v14255_v21 = vadd.f32 %v14254_v37, %v14253_v7  ;;  %v14256_v24 = vpop.f32.mrb[18].mxu0  ;;  %v7426_v43 = vmax.bf16 %v21547_v4, %v7418_v1  ;;  %v21952_v1 = vld [vmem:[#allocation23_spill] sm:$0xff]  ;;  %v21953_v7 = vld [vmem:[#allocation26_spill] sm:$0xff] }
 0xbcb   : > { %v14257_v28 = vpop.f32.mrb[19].mxu0  ;;  %v15665_v37 = vld [vmem:[#allocation7 + $0x18] sm:$0xff]  }
 0xbcc   : > { %v14258_v63 = vadd.f32 %v14257_v28, %v14256_v24  ;;  %14323 = vmatprep.subr.bf16.mxu0 %v7426_v43  ;;  %v21956_v24 = vld [vmem:[#allocation27_spill] sm:$0xff]  ;;  %v15667_v28 = vld [vmem:[#allocation7 + $0x28] sm:$0xff]  }
 0xbcd   : > { %14324 = vmatpush3.bf16.msra.mxu0 %v7426_v43  ;;  %v21957_v43 = vld [vmem:[#allocation30_spill] sm:$0xff] }
 0xbce   : > { %v7387_v41 = vpack.c.bf16 %v14258_v63, %v14255_v21  ;;  %v21955_v21 = vld [vmem:[#allocation28_spill] sm:$0xff]  ;;  %v21958_v63 = vld [vmem:[#allocation29_spill] sm:$0xff] }
 0xbd0   : > { %v7419_v32 = vadd.bf16 %v7411_v57, %v7387_v41  ;;  %v14259_v6 = vpop.f32.mrb[20].mxu0  ;;  %v15668_v57 = vld [vmem:[#allocation7 + $0x30] sm:$0xff]   ;;  %v21959_v41 = vld [vmem:[#allocation32_spill] sm:$0xff] }
 0xbd1   : > { %v14260_v27 = vpop.f32.mrb[21].mxu0 }
 0xbd2   : > { %v14261_v18 = vadd.f32 %v14260_v27, %v14259_v6  ;;  %v14262_v5 = vpop.f32.mrb[22].mxu0  ;;  %v7427_v14 = vmax.bf16 %v21547_v4, %v7419_v32  ;;  %v21960_v32 = vld [vmem:[#allocation31_spill] sm:$0xff]  ;;  %v21961_v6 = vld [vmem:[#allocation34_spill] sm:$0xff] }
 0xbd3   : > { %v14263_v0 = vpop.f32.mrb[23].mxu0  ;;  %v15669_v27 = vld [vmem:[#allocation7 + $0x38] sm:$0xff]  }
 0xbd4   : > { %v14264_v45 = vadd.f32 %v14263_v0, %v14262_v5  ;;  %14325 = vmatprep.subr.bf16.mxu0 %v7427_v14  ;;  %v21964_v5 = vld [vmem:[#allocation35_spill] sm:$0xff]  ;;  %v15671_v0 = vld [vmem:[#allocation7 + $0x48] sm:$0xff]  }
 0xbd5   : > { %14326 = vmatpush3.bf16.msra.mxu0 %v7427_v14  ;;  %v21965_v14 = vld [vmem:[#allocation38_spill] sm:$0xff] }
 0xbd6   : > { %v7388_v8 = vpack.c.bf16 %v14264_v45, %v14261_v18  ;;  %v21963_v18 = vld [vmem:[#allocation36_spill] sm:$0xff]  ;;  %v21966_v45 = vld [vmem:[#allocation37_spill] sm:$0xff] }
 0xbd8   : > { %v7420_v39 = vadd.bf16 %v7412_v36, %v7388_v8  ;;  %v14265_v50 = vpop.f32.mrb[24].mxu0  ;;  %v15672_v36 = vld [vmem:[#allocation7 + $0x50] sm:$0xff]   ;;  %v21967_v8 = vld [vmem:[#allocation42_spill] sm:$0xff] }
 0xbd9   : > { %v14266_v30 = vpop.f32.mrb[25].mxu0 }
 0xbda   : > { %v14267_v12 = vadd.f32 %v14266_v30, %v14265_v50  ;;  %v14268_v49 = vpop.f32.mrb[26].mxu0  ;;  %v7428_v31 = vmax.bf16 %v21547_v4, %v7420_v39  ;;  %v21968_v39 = vld [vmem:[#allocation40_spill] sm:$0xff]  ;;  %v15673_v30 = vld [vmem:[#allocation7 + $0x58] sm:$0xff]  }
 0xbdb   : > { %v14269_v16 = vpop.f32.mrb[27].mxu0  ;;  %v21969_v50 = vld [vmem:[#allocation48_spill] sm:$0xff] }
 0xbdc   : > { %v14270_v35 = vadd.f32 %v14269_v16, %v14268_v49  ;;  %14327 = vmatprep.subr.bf16.mxu0 %v7428_v31  ;;  %v21972_v49 = vld [vmem:[#allocation51_spill] sm:$0xff]  ;;  %v15675_v16 = vld [vmem:[#allocation7 + $0x68] sm:$0xff]  }
 0xbdd   : > { %14328 = vmatpush3.bf16.msra.mxu0 %v7428_v31  ;;  %v21973_v31 = vld [vmem:[#allocation58_spill] sm:$0xff] }
 0xbde   : > { %v7389_v46 = vpack.c.bf16 %v14270_v35, %v14267_v12  ;;  %v21971_v12 = vld [vmem:[#allocation52_spill] sm:$0xff]  ;;  %v21974_v35 = vld [vmem:[#allocation57_spill] sm:$0xff] }
 0xbe0   : > { %v7421_v23 = vadd.bf16 %v7413_v19, %v7389_v46  ;;  %v14271_v3 = vpop.f32.mrb[28].mxu0  ;;  %v15676_v19 = vld [vmem:[#allocation7 + $0x70] sm:$0xff]   ;;  %v21975_v46 = vld [vmem:[#allocation64_spill] sm:$0xff] }
 0xbe1   : > { %v14272_v60 = vpop.f32.mrb[29].mxu0 }
 0xbe2   : > { %v14273_v2 = vadd.f32 %v14272_v60, %v14271_v3  ;;  %v14274_v54 = vpop.f32.mrb[30].mxu0  ;;  %v7429_v17 = vmax.bf16 %v21547_v4, %v7421_v23  ;;  %v21976_v23 = vld [vmem:[#allocation63_spill] sm:$0xff]  ;;  %v21977_v3 = vld [vmem:[#allocation70_spill] sm:$0xff] }
 0xbe3   : > { %v14275_v34 = vpop.f32.mrb[31].mxu0  ;;  %v15677_v60 = vld [vmem:[#allocation7 + $0x78] sm:$0xff]  }
 0xbe4   : > { %v14276_v42 = vadd.f32 %v14275_v34, %v14274_v54  ;;  %14329 = vmatprep.subr.bf16.mxu0 %v7429_v17  ;;  %v21980_v54 = vld [vmem:[#allocation75_spill] sm:$0xff]  ;;  %v15679_v34 = vld [vmem:[#allocation7 + $0x88] sm:$0xff]  }
 0xbe5   : > { %14330 = vmatpush3.bf16.msra.mxu0 %v7429_v17  ;;  %v21981_v17 = vld [vmem:[#allocation82_spill] sm:$0xff] }
 0xbe6   : > { %v7390_v48 = vpack.c.bf16 %v14276_v42, %v14273_v2  ;;  %v21979_v2 = vld [vmem:[#allocation76_spill] sm:$0xff]  ;;  %v21982_v42 = vld [vmem:[#allocation81_spill] sm:$0xff] }
 0xbe8   : > { %v7422_v9 = vadd.bf16 %v7414_v26, %v7390_v48  ;;  %v15680_v26 = vld [vmem:[#allocation7 + $0x90] sm:$0xff]   ;;  %v21983_v48 = vld [vmem:[#allocation160_spill] sm:$0xff] }
 0xbea   : > { %v7430_v59 = vmax.bf16 %v21547_v4, %v7422_v9  ;;  %v15681_v9 = vld [vmem:[#allocation7 + $0x98] sm:$0xff]  }
 0xbec   : > { %14331 = vmatprep.subr.bf16.mxu0 %v7430_v59 }
 0xbed   : > { %14332 = vmatpush3.bf16.msra.mxu0 %v7430_v59  ;;  %v15682_v59 = vld [vmem:[#allocation7 + $0xa0] sm:$0xff]  }
 0xbee   : > { %9832 = vmatprep.subr.bf16.mxu0 %v21951_v33  ;;  %v15685_v33 = vld [vmem:[#allocation7 + $0xb8] sm:$0xff]  }
 0xbf0   : > { %14334 = vmatmul.mubr.bf16.vlgmr.msra.gmra.mrb[32].mxu0 %v15663_v15  ;;  %v15683_v15 = vld [vmem:[#allocation7 + $0xa8] sm:$0xff]  }
 0xbf1   : > { %9833 = vmatpush1.bf16.msra.mxu0 %v21952_v1  ;;  %14337 = vmatprep.mubr.bf16.mxu0 %v15664_v10  ;;  %v15684_v10 = vld [vmem:[#allocation7 + $0xb0] sm:$0xff]   ;;  %v15686_v1 = vld [vmem:[#allocation7 + $0xc0] sm:$0xff]  }
 0xbf2   : > { %9834 = vmatprep.subr.bf16.mxu0 %v21953_v7  ;;  %v15687_v7 = vld [vmem:[#allocation7 + $0xc8] sm:$0xff]  }
 0xbf5   : > { %9835 = vmatpush1.bf16.msra.mxu0 %v21954_v13  ;;  %v15689_v13 = vld [vmem:[#allocation7 + $0xd8] sm:$0xff]  }
 0xbf6   : > { %9836 = vmatprep.subr.bf16.mxu0 %v21955_v21  ;;  %v15691_v21 = vld [vmem:[#allocation7 + $0xe8] sm:$0xff]  }
 0xbf8   : > { %14338 = vmatmul.mubr.bf16.gmra.mrb[36].mxu0 %v15665_v37  ;;  %v15688_v37 = vld [vmem:[#allocation7 + $0xd0] sm:$0xff]  }
 0xbf9   : > { %9837 = vmatpush1.bf16.msra.mxu0 %v21956_v24  ;;  %14341 = vmatprep.mubr.bf16.mxu0 %v15666_v56  ;;  %v15690_v56 = vld [vmem:[#allocation7 + $0xe0] sm:$0xff]   ;;  %v15692_v24 = vld [vmem:[#allocation7 + $0xf0] sm:$0xff]  }
 0xbfa   : > { %9838 = vmatprep.subr.bf16.mxu0 %v21957_v43  ;;  %v7431_v43 = vld [vmem:[#allocation5] sm:$0xff] }
 0xbfd   : > { %9839 = vmatpush1.bf16.msra.mxu0 %v21958_v63  ;;  %v15693_v63 = vld [vmem:[#allocation7 + $0xf8] sm:$0xff]  }
 0xbfe   : > { %9840 = vmatprep.subr.bf16.mxu0 %v21959_v41  ;;  %v7439_v41 = vld [vmem:[#allocation5 + $0x40] sm:$0xff] }
 0xc00   : > { %14342 = vmatmul.mubr.bf16.gmra.mrb[40].mxu0 %v15667_v28  ;;  %v7435_v28 = vld [vmem:[#allocation5 + $0x20] sm:$0xff] }
 0xc01   : > { %9841 = vmatpush1.bf16.msra.mxu0 %v21960_v32  ;;  %14345 = vmatprep.mubr.bf16.mxu0 %v15668_v57  ;;  %v13647_v57 = vcombine.high %v7431_v43, %v7435_v28  ;;  %v7443_v32 = vld [vmem:[#allocation5 + $0x60] sm:$0xff] }
 0xc02   : > { %9842 = vmatprep.subr.bf16.mxu0 %v21961_v6  ;;  %v13646_v6 = vcombine.low %v7431_v43, %v7435_v28  ;;  %v22006_v43 = vld [vmem:[#allocation127_spill] sm:$0xff] }
 0xc05   : > { %9843 = vmatpush1.bf16.msra.mxu0 %v21962_v29  ;;  %v21984_v29 = vld [vmem:[#allocation159_spill] sm:$0xff] }
 0xc06   : > { %9844 = vmatprep.subr.bf16.mxu0 %v21963_v18  ;;  %v7447_v18 = vld [vmem:[#allocation5 + $0x80] sm:$0xff] }
 0xc08   : > { %14346 = vmatmul.mubr.bf16.gmra.mrb[44].mxu0 %v15669_v27  ;;  %v13655_v27 = vcombine.high %v7439_v41, %v7443_v32 }
 0xc09   : > { %9845 = vmatpush1.bf16.msra.mxu0 %v21964_v5  ;;  %14349 = vmatprep.mubr.bf16.mxu0 %v15670_v20  ;;  %v21985_v20 = vld [vmem:[#allocation162_spill] sm:$0xff]  ;;  %v7451_v5 = vld [vmem:[#allocation5 + $0xa0] sm:$0xff] }
 0xc0a   : > { %9846 = vmatprep.subr.bf16.mxu0 %v21965_v14  ;;  %v13654_v14 = vcombine.low %v7439_v41, %v7443_v32  ;;  %v22009_v41 = vld [vmem:[#allocation49_spill] sm:$0xff]  ;;  %v7495_v32 = vld [vmem:[#allocation5 + $0x200] sm:$0xff] }
 0xc0d   : > { %9847 = vmatpush1.bf16.msra.mxu0 %v21966_v45  ;;  %v13663_v45 = vcombine.high %v7447_v18, %v7451_v5 }
 0xc0e   : > { %9848 = vmatprep.subr.bf16.mxu0 %v21967_v8  ;;  %v21988_v8 = vld [vmem:[#allocation163_spill] sm:$0xff] }
 0xc10   : > { %14350 = vmatmul.mubr.bf16.gmra.mrb[48].mxu0 %v15671_v0  ;;  %v21986_v0 = vld [vmem:[#allocation161_spill] sm:$0xff] }
 0xc11   : > { %9849 = vmatpush1.bf16.msra.mxu0 %v21968_v39  ;;  %14353 = vmatprep.mubr.bf16.mxu0 %v15672_v36  ;;  %v21987_v36 = vld [vmem:[#allocation164_spill] sm:$0xff]  ;;  %v21989_v39 = vld [vmem:[#allocation166_spill] sm:$0xff] }
 0xc12   : > { %9850 = vmatprep.subr.bf16.mxu0 %v21969_v50  ;;  %v7455_v50 = vld [vmem:[#allocation5 + $0xc0] sm:$0xff] }
 0xc15   : > { %9851 = vmatpush1.bf16.msra.mxu0 %v21970_v38  ;;  %v13662_v38 = vcombine.low %v7447_v18, %v7451_v5  ;;  %v22011_v18 = vld [vmem:[#allocation50_spill] sm:$0xff]  ;;  %v22012_v5 = vld [vmem:[#allocation45_spill] sm:$0xff] }
 0xc16   : > { %9852 = vmatprep.subr.bf16.mxu0 %v21971_v12 }
 0xc18   : > { %14354 = vmatmul.mubr.bf16.gmra.mrb[52].mxu0 %v15673_v30  ;;  %v7459_v30 = vld [vmem:[#allocation5 + $0xe0] sm:$0xff] }
 0xc19   : > { %9853 = vmatpush1.bf16.msra.mxu0 %v21972_v49  ;;  %14357 = vmatprep.mubr.bf16.mxu0 %v15674_v55  ;;  %v21990_v55 = vld [vmem:[#allocation165_spill] sm:$0xff]  ;;  %v13671_v12 = vcombine.high %v7455_v50, %v7459_v30  ;;  %v21991_v49 = vld [vmem:[#allocation168_spill] sm:$0xff] }
 0xc1a   : > { %9854 = vmatprep.subr.bf16.mxu0 %v21973_v31  ;;  %v21992_v31 = vld [vmem:[#allocation167_spill] sm:$0xff] }
 0xc1d   : > { %9855 = vmatpush1.bf16.msra.mxu0 %v21974_v35  ;;  %v7463_v35 = vld [vmem:[#allocation5 + $0x100] sm:$0xff] }
 0xc1e   : > { %9856 = vmatprep.subr.bf16.mxu0 %v21975_v46  ;;  %v13670_v46 = vcombine.low %v7455_v50, %v7459_v30  ;;  %v22015_v50 = vld [vmem:[#allocation60_spill] sm:$0xff]  ;;  %v7511_v30 = vld [vmem:[#allocation5 + $0x280] sm:$0xff] }
 0xc20   : > { %14358 = vmatmul.mubr.bf16.gmra.mrb[56].mxu0 %v15675_v16  ;;  %v21993_v16 = vld [vmem:[#allocation170_spill] sm:$0xff] }
 0xc21   : > { %9857 = vmatpush1.bf16.msra.mxu0 %v21976_v23  ;;  %14361 = vmatprep.mubr.bf16.mxu0 %v15676_v19  ;;  %v7467_v19 = vld [vmem:[#allocation5 + $0x120] sm:$0xff]  ;;  %v21994_v23 = vld [vmem:[#allocation169_spill] sm:$0xff] }
 0xc22   : > { %9858 = vmatprep.subr.bf16.mxu0 %v21977_v3  ;;  %v13679_v3 = vcombine.high %v7463_v35, %v7467_v19 }
 0xc25   : > { %9859 = vmatpush1.bf16.msra.mxu0 %v21978_v58  ;;  %v21996_v58 = vld [vmem:[#allocation171_spill] sm:$0xff] }
 0xc26   : > { %9860 = vmatprep.subr.bf16.mxu0 %v21979_v2  ;;  %v7471_v2 = vld [vmem:[#allocation5 + $0x140] sm:$0xff] }
 0xc28   : > { %14362 = vmatmul.mubr.bf16.gmra.mrb[60].mxu0 %v15677_v60  ;;  %v21995_v60 = vld [vmem:[#allocation172_spill] sm:$0xff] }
 0xc29   : > { %9861 = vmatpush1.bf16.msra.mxu0 %v21980_v54  ;;  %14365 = vmatprep.mubr.bf16.mxu0 %v15678_v61  ;;  %v21997_v61 = vld [vmem:[#allocation174_spill] sm:$0xff]  ;;  %v7475_v54 = vld [vmem:[#allocation5 + $0x160] sm:$0xff] }
 0xc2a   : > { %9862 = vmatprep.subr.bf16.mxu0 %v21981_v17  ;;  %v13678_v17 = vcombine.low %v7463_v35, %v7467_v19  ;;  %v7527_v19 = vld [vmem:[#allocation5 + $0x300] sm:$0xff] }
 0xc2d   : > { %9863 = vmatpush1.bf16.msra.mxu0 %v21982_v42  ;;  %v13687_v42 = vcombine.high %v7471_v2, %v7475_v54 }
 0xc2e   : > { %10185 = vmatprep.subr.bf16.mxu0 %v21983_v48  ;;  %v22000_v48 = vld [vmem:[#allocation175_spill] sm:$0xff] }
 0xc30   : > { %14366 = vmatmul.mubr.bf16.gmra.mrb[64].mxu0 %v15679_v34  ;;  %v21998_v34 = vld [vmem:[#allocation173_spill] sm:$0xff] }
 0xc31   : > { %14369 = vmatprep.mubr.bf16.mxu0 %v15680_v26  ;;  %v21999_v26 = vld [vmem:[#allocation176_spill] sm:$0xff] }
 0xc38   : > { %14370 = vmatmul.mubr.bf16.gmra.mrb[68].mxu0 %v15681_v9  ;;  %v22001_v9 = vld [vmem:[#allocation178_spill] sm:$0xff] }
 0xc39   : > { %14373 = vmatprep.mubr.bf16.mxu0 %v15682_v59  ;;  %v7479_v59 = vld [vmem:[#allocation5 + $0x180] sm:$0xff] }
 0xc40   : > { %14374 = vmatmul.mubr.bf16.gmra.mrb[72].mxu0 %v15683_v15  ;;  %v7483_v15 = vld [vmem:[#allocation5 + $0x1a0] sm:$0xff] }
 0xc41   : > { %14377 = vmatprep.mubr.bf16.mxu0 %v15684_v10  ;;  %v13686_v10 = vcombine.low %v7471_v2, %v7475_v54  ;;  %v11334_v54 = vld [vmem:[%s21198_s15 + $0xd0] sm:$0xff] }
 0xc48   : > { %14378 = vmatmul.mubr.bf16.gmra.mrb[76].mxu0 %v15685_v33  ;;  %v22002_v33 = vld [vmem:[#allocation177_spill] sm:$0xff] }
 0xc49   : > { %14381 = vmatprep.mubr.bf16.mxu0 %v15686_v1  ;;  %v13695_v1 = vcombine.high %v7479_v59, %v7483_v15 }
 0xc50   : > { %14382 = vmatmul.mubr.bf16.gmra.mrb[80].mxu0 %v15687_v7  ;;  %v22003_v7 = vld [vmem:[#allocation130_spill] sm:$0xff] }
 0xc51   : > { %14385 = vmatprep.mubr.bf16.mxu0 %v15688_v37  ;;  %v22004_v37 = vld [vmem:[#allocation179_spill] sm:$0xff] }
 0xc58   : > { %14386 = vmatmul.mubr.bf16.gmra.mrb[84].mxu0 %v15689_v13  ;;  %v22005_v13 = vld [vmem:[#allocation43_spill] sm:$0xff] }
 0xc59   : > { %14389 = vmatprep.mubr.bf16.mxu0 %v15690_v56  ;;  %v7487_v56 = vld [vmem:[#allocation5 + $0x1c0] sm:$0xff] }
 0xc60   : > { %14390 = vmatmul.mubr.bf16.gmra.mrb[88].mxu0 %v15691_v21  ;;  %v7491_v21 = vld [vmem:[#allocation5 + $0x1e0] sm:$0xff] }
 0xc61   : > { %14393 = vmatprep.mubr.bf16.mxu0 %v15692_v24  ;;  %v13694_v24 = vcombine.low %v7479_v59, %v7483_v15  ;;  %v13703_v28 = vcombine.high %v7487_v56, %v7491_v21 }
 0xc68   : > { %14394 = vmatmul.mubr.bf16.gmra.mrb[92].mxu0 %v15693_v63  ;;  %v22007_v63 = vld [vmem:[#allocation44_spill] sm:$0xff] }
 0xc69   : > { %9864 = vmatprep.mubr.bf16.mxu0 %v13647_v57  ;;  %v22008_v57 = vld [vmem:[#allocation39_spill] sm:$0xff] }
 0xc70   : > { %9865 = vmatmul.mubr.bf16.vlgmr.msra.gmra.mrb[96].mxu0 %v13646_v6  ;;  %v7499_v6 = vld [vmem:[#allocation5 + $0x220] sm:$0xff] }
 0xc71   : > { %10186 = vmatpush1.bf16.msra.mxu0 %v21984_v29  ;;  %9874 = vmatprep.mubr.bf16.mxu0 %v13655_v27  ;;  %v13702_v27 = vcombine.low %v7487_v56, %v7491_v21  ;;  %v22010_v29 = vld [vmem:[#allocation41_spill] sm:$0xff] }
 0xc72   : > { %10187 = vmatprep.subr.bf16.mxu0 %v21985_v20  ;;  %v13711_v20 = vcombine.high %v7495_v32, %v7499_v6 }
 0xc75   : > { %10188 = vmatpush1.bf16.msra.mxu0 %v21986_v0  ;;  %v7503_v0 = vld [vmem:[#allocation5 + $0x240] sm:$0xff] }
 0xc76   : > { %10189 = vmatprep.subr.bf16.mxu0 %v21987_v36  ;;  %v13710_v36 = vcombine.low %v7495_v32, %v7499_v6 }
 0xc78   : > { %9875 = vmatmul.mubr.bf16.gmra.mrb[100].mxu0 %v13654_v14  ;;  %v22013_v14 = vld [vmem:[#allocation55_spill] sm:$0xff] }
 0xc79   : > { %10190 = vmatpush1.bf16.msra.mxu0 %v21988_v8  ;;  %9884 = vmatprep.mubr.bf16.mxu0 %v13663_v45  ;;  %v7507_v45 = vld [vmem:[#allocation5 + $0x260] sm:$0xff] }
 0xc7a   : > { %10191 = vmatprep.subr.bf16.mxu0 %v21989_v39  ;;  %v22014_v8 = vld [vmem:[#allocation47_spill] sm:$0xff]  ;;  %v13719_v39 = vcombine.high %v7503_v0, %v7507_v45 }
 0xc7d   : > { %10192 = vmatpush1.bf16.msra.mxu0 %v21990_v55  ;;  %v13718_v55 = vcombine.low %v7503_v0, %v7507_v45 }
 0xc7e   : > { %10193 = vmatprep.subr.bf16.mxu0 %v21991_v49  ;;  %v7519_v49 = vld [vmem:[#allocation5 + $0x2c0] sm:$0xff] }
 0xc80   : > { %9885 = vmatmul.mubr.bf16.gmra.mrb[104].mxu0 %v13662_v38  ;;  %v7515_v38 = vld [vmem:[#allocation5 + $0x2a0] sm:$0xff] }
 0xc81   : > { %10194 = vmatpush1.bf16.msra.mxu0 %v21992_v31  ;;  %9894 = vmatprep.mubr.bf16.mxu0 %v13671_v12  ;;  %v13727_v12 = vcombine.high %v7511_v30, %v7515_v38  ;;  %v7523_v31 = vld [vmem:[#allocation5 + $0x2e0] sm:$0xff] }
 0xc82   : > { %10195 = vmatprep.subr.bf16.mxu0 %v21993_v16  ;;  %v13726_v16 = vcombine.low %v7511_v30, %v7515_v38  ;;  %v13735_v35 = vcombine.high %v7519_v49, %v7523_v31 }
 0xc85   : > { %10196 = vmatpush1.bf16.msra.mxu0 %v21994_v23 }
 0xc86   : > { %10197 = vmatprep.subr.bf16.mxu0 %v21995_v60  ;;  %v13734_v60 = vcombine.low %v7519_v49, %v7523_v31 }
 0xc88   : > { %9895 = vmatmul.mubr.bf16.gmra.mrb[108].mxu0 %v13670_v46  ;;  %v7531_v46 = vld [vmem:[#allocation5 + $0x320] sm:$0xff] }
 0xc89   : > { %10198 = vmatpush1.bf16.msra.mxu0 %v21996_v58  ;;  %9904 = vmatprep.mubr.bf16.mxu0 %v13679_v3  ;;  %v13742_v59 = vcombine.low %v7527_v19, %v7531_v46 }
 0xc8a   : > { %10199 = vmatprep.subr.bf16.mxu0 %v21997_v61  ;;  %v13743_v61 = vcombine.high %v7527_v19, %v7531_v46 }
 0xc8d   : > { %10200 = vmatpush1.bf16.msra.mxu0 %v21998_v34 }
 0xc8e   : > { %10201 = vmatprep.subr.bf16.mxu0 %v21999_v26  ;;  %v7539_v26 = vld [vmem:[#allocation5 + $0x360] sm:$0xff] }
 0xc90   : > { %9905 = vmatmul.mubr.bf16.gmra.mrb[112].mxu0 %v13678_v17  ;;  %v11335_v17 = vld [vmem:[%s21198_s15 + $0xd8] sm:$0xff] }
 0xc91   : > { %10202 = vmatpush1.bf16.msra.mxu0 %v22000_v48  ;;  %9914 = vmatprep.mubr.bf16.mxu0 %v13687_v42  ;;  %v11385_v34 = vpack.c.bf16 %v11335_v17, %v11334_v54  ;;  %v7535_v42 = vld [vmem:[#allocation5 + $0x340] sm:$0xff] }
 0xc92   : > { %10203 = vmatprep.subr.bf16.mxu0 %v22001_v9  ;;  %v13750_v56 = vcombine.low %v7535_v42, %v7539_v26 }
 0xc95   : > { %10204 = vmatpush1.bf16.msra.mxu0 %v22002_v33 }
 0xc96   : > { %10205 = vmatprep.subr.bf16.mxu0 %v22003_v7  ;;  %v7547_v7 = vld [vmem:[#allocation5 + $0x3a0] sm:$0xff] }
 0xc98   : > { %9915 = vmatmul.mubr.bf16.gmra.mrb[116].mxu0 %v13686_v10  ;;  %v13751_v10 = vcombine.high %v7535_v42, %v7539_v26  ;;  %v11336_v26 = vld [vmem:[%s21198_s15 + $0xe0] sm:$0xff] }
 0xc99   : > { %10206 = vmatpush1.bf16.msra.mxu0 %v22004_v37  ;;  %9924 = vmatprep.mubr.bf16.mxu0 %v13695_v1  ;;  %v7543_v1 = vld [vmem:[#allocation5 + $0x380] sm:$0xff] }
 0xc9a   : > { %10207 = vmatprep.subr.bf16.mxu0 %v22005_v13  ;;  %v13758_v32 = vcombine.low %v7543_v1, %v7547_v7 }
 0xc9d   : > { %10208 = vmatpush1.bf16.msra.mxu0 %v22006_v43 }
 0xc9e   : > { %10209 = vmatprep.subr.bf16.mxu0 %v22007_v63  ;;  %v7555_v63 = vld [vmem:[#allocation5 + $0x3e0] sm:$0xff] }
 0xca0   : > { %9925 = vmatmul.mubr.bf16.gmra.mrb[120].mxu0 %v13694_v24  ;;  %v13759_v24 = vcombine.high %v7543_v1, %v7547_v7  ;;  %v7591_v1 = vld [vmem:[#allocation5 + $0x500] sm:$0xff] }
 0xca1   : > { %10210 = vmatpush1.bf16.msra.mxu0 %v22008_v57  ;;  %9934 = vmatprep.mubr.bf16.mxu0 %v13703_v28  ;;  %v7551_v28 = vld [vmem:[#allocation5 + $0x3c0] sm:$0xff] }
 0xca2   : > { %10211 = vmatprep.subr.bf16.mxu0 %v22009_v41  ;;  %v13766_v0 = vcombine.low %v7551_v28, %v7555_v63  ;;  %v7595_v7 = vld [vmem:[#allocation5 + $0x520] sm:$0xff] }
 0xca5   : > { %10212 = vmatpush1.bf16.msra.mxu0 %v22010_v29 }
 0xca6   : > { %10213 = vmatprep.subr.bf16.mxu0 %v22011_v18  ;;  %v7563_v18 = vld [vmem:[#allocation5 + $0x420] sm:$0xff] }
 0xca8   : > { %9935 = vmatmul.mubr.bf16.gmra.mrb[124].mxu0 %v13702_v27  ;;  %v13767_v27 = vcombine.high %v7551_v28, %v7555_v63  ;;  %v11344_v28 = vld [vmem:[%s21198_s15 + $0x120] sm:$0xff]  ;;  %v11345_v63 = vld [vmem:[%s21198_s15 + $0x128] sm:$0xff] }
 0xca9   : > { %10214 = vmatpush1.bf16.msra.mxu0 %v22012_v5  ;;  %9944 = vmatprep.mubr.bf16.mxu0 %v13711_v20  ;;  %v7559_v20 = vld [vmem:[#allocation5 + $0x400] sm:$0xff] }
 0xcaa   : > { %10215 = vmatprep.subr.bf16.mxu0 %v22013_v14 }
 0xcad   : > { %10216 = vmatpush1.bf16.msra.mxu0 %v22014_v8 }
 0xcae   : > { %10538 = vmatprep.subr.bf16.mxu0 %v22015_v50  ;;  %v7571_v50 = vld [vmem:[#allocation5 + $0x460] sm:$0xff] }
 0xcb0   : > { %9945 = vmatmul.mubr.bf16.gmra.mrb[128].mxu0 %v13710_v36  ;;  %v13775_v36 = vcombine.high %v7559_v20, %v7563_v18 }
 0xcb1   : > { %9954 = vmatprep.mubr.bf16.mxu0 %v13719_v39  ;;  %v7567_v39 = vld [vmem:[#allocation5 + $0x440] sm:$0xff] }
 0xcb2   : > { %v13783_v49 = vcombine.high %v7567_v39, %v7571_v50 }
 0xcb8   : > { %9955 = vmatmul.mubr.bf16.gmra.mrb[132].mxu0 %v13718_v55  ;;  %v13774_v55 = vcombine.low %v7559_v20, %v7563_v18  ;;  %v11390_v20 = vpack.c.bf16 %v11345_v63, %v11344_v28  ;;  %v11348_v18 = vld [vmem:[%s21198_s15 + $0x140] sm:$0xff] }
 0xcb9   : > { %9964 = vmatprep.mubr.bf16.mxu0 %v13727_v12  ;;  %v7615_v63 = vld [vmem:[#allocation5 + $0x5c0] sm:$0xff] }
 0xcc0   : > { %9965 = vmatmul.mubr.bf16.gmra.mrb[136].mxu0 %v13726_v16  ;;  %v7575_v16 = vld [vmem:[#allocation5 + $0x480] sm:$0xff] }
 0xcc1   : > { %9974 = vmatprep.mubr.bf16.mxu0 %v13735_v35  ;;  %v7579_v35 = vld [vmem:[#allocation5 + $0x4a0] sm:$0xff] }
 0xcc3   : > { %v14335_v23 = vpop.f32.mrb[32].mxu0 }
 0xcc4   : > { %8244 = vperm.xlu0 %15462, %v14335_v23   ;;  %v7977_v3 = vpop.f32.mrb[33].mxu0  ;;  %v13782_v23 = vcombine.low %v7567_v39, %v7571_v50  ;;  %v13806_v50 = vcombine.low %v7591_v1, %v7595_v7 }
 0xcc5   : > { %v14336_v58 = vpop.f32.mrb[34].mxu0 }
 0xcc6   : > { %8249 = vperm.xlu1 %15463, %v14336_v58   ;;  %v7980_v2 = vpop.f32.mrb[35].mxu0 }
 0xcc8   : > { %9975 = vmatmul.mubr.bf16.gmra.mrb[140].mxu0 %v13734_v60  ;;  %8234 = vperm.xlu0 %15462, %v7977_v3   ;;  %v13791_v60 = vcombine.high %v7575_v16, %v7579_v35 }
 0xcc9   : > { %9984 = vmatprep.mubr.bf16.mxu0 %v13743_v61  ;;  %v7583_v61 = vld [vmem:[#allocation5 + $0x4c0] sm:$0xff] }
 0xcca   : > { %8239 = vperm.xlu1 %15463, %v7980_v2   ;;  %v7587_v2 = vld [vmem:[#allocation5 + $0x4e0] sm:$0xff] }
 0xccb   : > { %v14339_v48 = vpop.f32.mrb[36].mxu0 }
 0xccc   : > { %8264 = vperm.xlu0 %15462, %v14339_v48   ;;  %v7993_v9 = vpop.f32.mrb[37].mxu0  ;;  %v11337_v48 = vld [vmem:[%s21198_s15 + $0xe8] sm:$0xff] }
 0xccd   : > { %v14340_v15 = vpop.f32.mrb[38].mxu0 }
 0xcce   : > { %11471 = vperm.xlu1 %15463, %v11385_v34   ;;  %v7996_v33 = vpop.f32.mrb[39].mxu0  ;;  %v13790_v34 = vcombine.low %v7575_v16, %v7579_v35 }
 0xcd0   : > { %9985 = vmatmul.mubr.bf16.gmra.mrb[144].mxu0 %v13742_v59  ;;  %8259 = vperm.xlu0 %15462, %v7996_v33   ;;  %v11341_v33 = vld [vmem:[%s21198_s15 + $0x108] sm:$0xff] }
 0xcd1   : > { %9994 = vmatprep.mubr.bf16.mxu0 %v13751_v10  ;;  %v11340_v10 = vld [vmem:[%s21198_s15 + $0x100] sm:$0xff] }
 0xcd2   : > { %8254 = vperm.xlu1 %15463, %v7993_v9   ;;  %v13799_v9 = vcombine.high %v7583_v61, %v7587_v2 }
 0xcd3   : > { %v14343_v37 = vpop.f32.mrb[40].mxu0 }
 0xcd4   : > { %8284 = vperm.xlu0 %15462, %v14343_v37   ;;  %v8009_v13 = vpop.f32.mrb[41].mxu0  ;;  %v11338_v37 = vld [vmem:[%s21198_s15 + $0xf0] sm:$0xff] }
 0xcd5   : > { %v14344_v21 = vpop.f32.mrb[42].mxu0 }
 0xcd6   : > { %8269 = vperm.xlu1 %15463, %v14340_v15   ;;  %v8012_v43 = vpop.f32.mrb[43].mxu0  ;;  %v11386_v15 = vpack.c.bf16 %v11337_v48, %v11336_v26 }
 0xcd8   : > { %9995 = vmatmul.mubr.bf16.gmra.mrb[148].mxu0 %v13750_v56  ;;  %8279 = vperm.xlu0 %15462, %v8012_v43  }
 0xcd9   : > { %10004 = vmatprep.mubr.bf16.mxu0 %v13759_v24  ;;  %v11388_v24 = vpack.c.bf16 %v11341_v33, %v11340_v10 }
 0xcda   : > { %8274 = vperm.xlu1 %15463, %v8009_v13   ;;  %v11339_v13 = vld [vmem:[%s21198_s15 + $0xf8] sm:$0xff] }
 0xcdb   : > { %v14347_v57 = vpop.f32.mrb[44].mxu0 }
 0xcdc   : > { %8304 = vperm.xlu0 %15462, %v14347_v57   ;;  %v8025_v41 = vpop.f32.mrb[45].mxu0  ;;  %v13807_v57 = vcombine.high %v7591_v1, %v7595_v7  ;;  %v11358_v7 = vld [vmem:[%s21198_s15 + $0x190] sm:$0xff] }
 0xcdd   : > { %v14348_v6 = vpop.f32.mrb[46].mxu0 }
 0xcde   : > { %8289 = vperm.xlu1 %15463, %v14344_v21   ;;  %v8028_v29 = vpop.f32.mrb[47].mxu0  ;;  %v13798_v21 = vcombine.low %v7583_v61, %v7587_v2  ;;  %v7607_v61 = vld [vmem:[#allocation5 + $0x580] sm:$0xff] }
 0xcdf   : > { %v7611_v2 = vld [vmem:[#allocation5 + $0x5a0] sm:$0xff] }
 0xce0   : > { %10005 = vmatmul.mubr.bf16.gmra.mrb[152].mxu0 %v13758_v32  ;;  %8299 = vperm.xlu0 %15462, %v8028_v29   ;;  %v11387_v32 = vpack.c.bf16 %v11339_v13, %v11338_v37  ;;  %v11343_v29 = vld [vmem:[%s21198_s15 + $0x118] sm:$0xff] }
 0xce1   : > { %10014 = vmatprep.mubr.bf16.mxu0 %v13767_v27  ;;  %v11342_v27 = vld [vmem:[%s21198_s15 + $0x110] sm:$0xff]  ;;  %v11359_v37 = vld [vmem:[%s21198_s15 + $0x198] sm:$0xff] }
 0xce2   : > { %8294 = vperm.xlu1 %15463, %v8025_v41   ;;  %v11397_v28 = vpack.c.bf16 %v11359_v37, %v11358_v7 }
 0xce3   : > { %v14351_v5 = vpop.f32.mrb[48].mxu0 }
 0xce4   : > { %8324 = vperm.xlu0 %15462, %v14351_v5   ;;  %v8041_v14 = vpop.f32.mrb[49].mxu0  ;;  %v11349_v5 = vld [vmem:[%s21198_s15 + $0x148] sm:$0xff] }
 0xce5   : > { %v14352_v45 = vpop.f32.mrb[50].mxu0 }
 0xce6   : > { %8309 = vperm.xlu1 %15463, %v14348_v6   ;;  %v8044_v8 = vpop.f32.mrb[51].mxu0 }
 0xce8   : > { %10015 = vmatmul.mubr.bf16.gmra.mrb[156].mxu0 %v13766_v0  ;;  %8319 = vperm.xlu0 %15462, %v8044_v8   ;;  %v7599_v0 = vld [vmem:[#allocation5 + $0x540] sm:$0xff]  ;;  %v11347_v8 = vld [vmem:[%s21198_s15 + $0x138] sm:$0xff] }
 0xce9   : > { %10024 = vmatprep.mubr.bf16.mxu0 %v13775_v36  ;;  %v11346_v36 = vld [vmem:[%s21198_s15 + $0x130] sm:$0xff] }
 0xcea   : > { %8314 = vperm.xlu1 %15463, %v8041_v14   ;;  %v11389_v14 = vpack.c.bf16 %v11343_v29, %v11342_v27  ;;  %v11391_v16 = vpack.c.bf16 %v11347_v8, %v11346_v36  ;;  %v11363_v27 = vld [vmem:[%s21198_s15 + $0x1b8] sm:$0xff]  ;;  %v7623_v8 = vld [vmem:[#allocation5 + $0x600] sm:$0xff] }
 0xceb   : > { %v14355_v30 = vpop.f32.mrb[52].mxu0 }
 0xcec   : > { %8344 = vperm.xlu0 %15462, %v14355_v30   ;;  %v8057_v38 = vpop.f32.mrb[53].mxu0  ;;  %v11392_v30 = vpack.c.bf16 %v11349_v5, %v11348_v18 }
 0xced   : > { %v14356_v12 = vpop.f32.mrb[54].mxu0 }
 0xcee   : > { %8329 = vperm.xlu1 %15463, %v14352_v45   ;;  %v8060_v31 = vpop.f32.mrb[55].mxu0  ;;  %v7603_v45 = vld [vmem:[#allocation5 + $0x560] sm:$0xff] }
 0xcf0   : > { %10025 = vmatmul.mubr.bf16.gmra.mrb[160].mxu0 %v13774_v55  ;;  %8339 = vperm.xlu0 %15462, %v8060_v31   ;;  %v11352_v55 = vld [vmem:[%s21198_s15 + $0x160] sm:$0xff] }
 0xcf1   : > { %10034 = vmatprep.mubr.bf16.mxu0 %v13783_v49  ;;  %v13815_v49 = vcombine.high %v7599_v0, %v7603_v45 }
 0xcf2   : > { %8334 = vperm.xlu1 %15463, %v8057_v38  }
 0xcf3   : > { %v14359_v19 = vpop.f32.mrb[56].mxu0 }
 0xcf4   : > { %8364 = vperm.xlu0 %15462, %v14359_v19   ;;  %v8073_v46 = vpop.f32.mrb[57].mxu0  ;;  %v11350_v19 = vld [vmem:[%s21198_s15 + $0x150] sm:$0xff] }
 0xcf5   : > { %v14360_v3 = vpop.f32.mrb[58].mxu0 }
 0xcf6   : > { %8349 = vperm.xlu1 %15463, %v14356_v12   ;;  %v8076_v58 = vpop.f32.mrb[59].mxu0  ;;  %v11353_v12 = vld [vmem:[%s21198_s15 + $0x168] sm:$0xff] }
 0xcf8   : > { %10035 = vmatmul.mubr.bf16.gmra.mrb[164].mxu0 %v13782_v23  ;;  %8359 = vperm.xlu0 %15462, %v8076_v58   ;;  %v11394_v23 = vpack.c.bf16 %v11353_v12, %v11352_v55 }
 0xcf9   : > { %10044 = vmatprep.mubr.bf16.mxu0 %v13791_v60  ;;  %v11357_v60 = vld [vmem:[%s21198_s15 + $0x188] sm:$0xff] }
 0xcfa   : > { %8354 = vperm.xlu1 %15463, %v8073_v46   ;;  %v11351_v46 = vld [vmem:[%s21198_s15 + $0x158] sm:$0xff] }
 0xcfb   : > { %v14363_v54 = vpop.f32.mrb[60].mxu0  ;;  %v11393_v58 = vpack.c.bf16 %v11351_v46, %v11350_v19  ;;  %v11366_v46 = vld [vmem:[%s21198_s15 + $0x1d0] sm:$0xff] }
 0xcfc   : > { %8384 = vperm.xlu0 %15462, %v14363_v54   ;;  %v8089_v17 = vpop.f32.mrb[61].mxu0  ;;  %v11354_v54 = vld [vmem:[%s21198_s15 + $0x170] sm:$0xff] }
 0xcfd   : > { %v14364_v42 = vpop.f32.mrb[62].mxu0 }
 0xcfe   : > { %8369 = vperm.xlu1 %15463, %v14360_v3   ;;  %v8092_v59 = vpop.f32.mrb[63].mxu0  ;;  %v11356_v3 = vld [vmem:[%s21198_s15 + $0x180] sm:$0xff] }
 0xcff   : > { %v11396_v26 = vpack.c.bf16 %v11357_v60, %v11356_v3  ;;  %v7631_v3 = vld [vmem:[#allocation5 + $0x640] sm:$0xff] }
 0xd00   : > { %10045 = vmatmul.mubr.bf16.gmra.mrb[168].mxu0 %v13790_v34  ;;  %8379 = vperm.xlu0 %15462, %v8092_v59   ;;  %v11361_v59 = vld [vmem:[%s21198_s15 + $0x1a8] sm:$0xff]  ;;  %v7635_v60 = vld [vmem:[#allocation5 + $0x660] sm:$0xff] }
 0xd01   : > { %10054 = vmatprep.mubr.bf16.mxu0 %v13799_v9  ;;  %v11360_v9 = vld [vmem:[%s21198_s15 + $0x1a0] sm:$0xff] }
 0xd02   : > { %8374 = vperm.xlu1 %15463, %v8089_v17   ;;  %v11355_v17 = vld [vmem:[%s21198_s15 + $0x178] sm:$0xff]  ;;  %v11398_v13 = vpack.c.bf16 %v11361_v59, %v11360_v9 }
 0xd03   : > { %v20376_v56 = vpop.f32.mrb[64].mxu0  ;;  %v11395_v33 = vpack.c.bf16 %v11355_v17, %v11354_v54 }
 0xd04   : > { %11476 = vperm.xlu0 %15462, %v11386_v15   ;;  %v20378_v43 = vpop.f32.mrb[65].mxu0  ;;  %v13823_v15 = vcombine.high %v7607_v61, %v7611_v2 }
 0xd05   : > { %v20386_v41 = vpop.f32.mrb[66].mxu0 }
 0xd06   : > { %8389 = vperm.xlu1 %15463, %v14364_v42   ;;  %v20388_v6 = vpop.f32.mrb[67].mxu0  ;;  %v13814_v42 = vcombine.low %v7599_v0, %v7603_v45 }
 0xd08   : > { %10055 = vmatmul.mubr.bf16.gmra.mrb[172].mxu0 %v13798_v21  ;;  %11486 = vperm.xlu0 %15462, %v11388_v24   ;;  %v11364_v21 = vld [vmem:[%s21198_s15 + $0x1c0] sm:$0xff]  ;;  %v11365_v24 = vld [vmem:[%s21198_s15 + $0x1c8] sm:$0xff] }
 0xd09   : > { %10064 = vmatprep.mubr.bf16.mxu0 %v13807_v57  ;;  %v7619_v57 = vld [vmem:[#allocation5 + $0x5e0] sm:$0xff]  ;;  %v11400_v18 = vpack.c.bf16 %v11365_v24, %v11364_v21 }
 0xd0a   : > { %11481 = vperm.xlu1 %15463, %v11387_v32   ;;  %v11362_v32 = vld [vmem:[%s21198_s15 + $0x1b0] sm:$0xff]  ;;  %v13830_v55 = vcombine.low %v7615_v63, %v7619_v57 }
 0xd0b   : > { %v20408_v39 = vpop.f32.mrb[68].mxu0  ;;  %v11399_v45 = vpack.c.bf16 %v11363_v27, %v11362_v32  ;;  %v7671_v32 = vld [vmem:[#allocation5 + $0x780] sm:$0xff] }
 0xd0c   : > { %11496 = vperm.xlu0 %15462, %v11390_v20   ;;  %v20410_v38 = vpop.f32.mrb[69].mxu0  ;;  %v13822_v20 = vcombine.low %v7607_v61, %v7611_v2  ;;  %v13847_v2 = vcombine.high %v7631_v3, %v7635_v60  ;;  %v7675_v27 = vld [vmem:[#allocation5 + $0x7a0] sm:$0xff] }
 0xd0d   : > { %v20418_v31 = vpop.f32.mrb[70].mxu0 }
 0xd0e   : > { %11491 = vperm.xlu1 %15463, %v11389_v14   ;;  %v20420_v35 = vpop.f32.mrb[71].mxu0  ;;  %v13831_v14 = vcombine.high %v7615_v63, %v7619_v57  ;;  %v7667_v63 = vld [vmem:[#allocation5 + $0x760] sm:$0xff] }
 0xd10   : > { %10065 = vmatmul.mubr.bf16.gmra.mrb[176].mxu0 %v13806_v50  ;;  %11506 = vperm.xlu0 %15462, %v11392_v30   ;;  %v7627_v50 = vld [vmem:[#allocation5 + $0x620] sm:$0xff] }
 0xd11   : > { %10074 = vmatprep.mubr.bf16.mxu0 %v13815_v49  ;;  %v13839_v49 = vcombine.high %v7623_v8, %v7627_v50 }
 0xd12   : > { %11501 = vperm.xlu1 %15463, %v11391_v16  }
 0xd13   : > { %v20440_v34 = vpop.f32.mrb[72].mxu0 }
 0xd14   : > { %11516 = vperm.xlu0 %15462, %v11394_v23   ;;  %v20442_v48 = vpop.f32.mrb[73].mxu0  ;;  %v11367_v23 = vld [vmem:[%s21198_s15 + $0x1d8] sm:$0xff] }
 0xd15   : > { %v20450_v10 = vpop.f32.mrb[74].mxu0 }
 0xd16   : > { %11511 = vperm.xlu1 %15463, %v11393_v58   ;;  %v20452_v1 = vpop.f32.mrb[75].mxu0 }
 0xd18   : > { %10075 = vmatmul.mubr.bf16.gmra.mrb[180].mxu0 %v13814_v42  ;;  %11526 = vperm.xlu0 %15462, %v11396_v26   ;;  %v13846_v26 = vcombine.low %v7631_v3, %v7635_v60 }
 0xd19   : > { %10084 = vmatprep.mubr.bf16.mxu0 %v13823_v15 }
 0xd1a   : > { %11521 = vperm.xlu1 %15463, %v11395_v33  }
 0xd1b   : > { %v14379_v29 = vpop.f32.mrb[76].mxu0 }
 0xd1c   : > { %11536 = vperm.xlu0 %15462, %v11398_v13   ;;  %v20472_v5 = vpop.f32.mrb[77].mxu0 }
 0xd1d   : > { %v20474_v0 = vpop.f32.mrb[78].mxu0 }
 0xd1e   : > { %11531 = vperm.xlu1 %15463, %v11397_v28   ;;  %v8156_v36 = vpop.f32.mrb[79].mxu0  ;;  %v7663_v28 = vld [vmem:[#allocation5 + $0x740] sm:$0xff] }
 0xd1f   : > { %v13879_v57 = vcombine.high %v7663_v28, %v7667_v63 }
 0xd20   : > { %10085 = vmatmul.mubr.bf16.gmra.mrb[184].mxu0 %v13822_v20  ;;  %11546 = vperm.xlu0 %15462, %v11400_v18   ;;  %v13887_v20 = vcombine.high %v7671_v32, %v7675_v27  ;;  %v20501_v18 = vpop.permute.xlu0 %11406 }
 0xd21   : > { %10094 = vmatprep.mubr.bf16.mxu0 %v13831_v14  ;;  %v7683_v14 = vld [vmem:[#allocation5 + $0x7e0] sm:$0xff] }
 0xd22   : > { %11541 = vperm.xlu1 %15463, %v11399_v45   ;;  %v11368_v45 = vld [vmem:[%s21198_s15 + $0x1e0] sm:$0xff] }
 0xd23   : > { %v14383_v30 = vpop.f32.mrb[80].mxu0 }
 0xd24   : > { %8404 = vperm.xlu0 %15462, %v20376_v56   ;;  %v8169_v12 = vpop.f32.mrb[81].mxu0  ;;  %v11401_v56 = vpack.c.bf16 %v11367_v23, %v11366_v46  ;;  %v11370_v46 = vld [vmem:[%s21198_s15 + $0x1f0] sm:$0xff]  ;;  %v11371_v23 = vld [vmem:[%s21198_s15 + $0x1f8] sm:$0xff] }
 0xd25   : > { %v20477_v16 = vpop.f32.mrb[82].mxu0 }
 0xd26   : > { %8409 = vperm.xlu1 %15463, %v20386_v41   ;;  %v8172_v19 = vpop.f32.mrb[83].mxu0  ;;  %v13838_v41 = vcombine.low %v7623_v8, %v7627_v50  ;;  %v20509_v50 = vpop.permute.xlu0 %11416 }
 0xd28   : > { %10095 = vmatmul.mubr.bf16.gmra.mrb[188].mxu0 %v13830_v55  ;;  %8394 = vperm.xlu0 %15462, %v20378_v43   ;;  %v7639_v43 = vld [vmem:[#allocation5 + $0x680] sm:$0xff] }
 0xd29   : > { %10104 = vmatprep.mubr.bf16.mxu0 %v13839_v49  ;;  %v12495_v49 = vld [vmem:[%s21200_s17 + $0x8] sm:$0xff] }
 0xd2a   : > { %8399 = vperm.xlu1 %15463, %v20388_v6   ;;  %v7643_v6 = vld [vmem:[#allocation5 + $0x6a0] sm:$0xff] }
 0xd2b   : > { %v14387_v58 = vpop.f32.mrb[84].mxu0  ;;  %v13854_v7 = vcombine.low %v7639_v43, %v7643_v6 }
 0xd2c   : > { %8424 = vperm.xlu0 %15462, %v20408_v39   ;;  %v8185_v61 = vpop.f32.mrb[85].mxu0  ;;  %v13855_v39 = vcombine.high %v7639_v43, %v7643_v6  ;;  %v12497_v43 = vld [vmem:[%s21200_s17 + $0x18] sm:$0xff] }
 0xd2d   : > { %v14388_v54 = vpop.f32.mrb[86].mxu0 }
 0xd2e   : > { %11551 = vperm.xlu1 %15463, %v11401_v56   ;;  %v8188_v17 = vpop.f32.mrb[87].mxu0  ;;  %v20525_v56 = vpop.permute.xlu0 %11426 }
 0xd30   : > { %10105 = vmatmul.mubr.bf16.gmra.mrb[192].mxu0 %v13838_v41  ;;  %8419 = vperm.xlu0 %15462, %v20420_v35   ;;  %v7647_v35 = vld [vmem:[#allocation5 + $0x6c0] sm:$0xff]  ;;  %v12499_v41 = vld [vmem:[%s21200_s17 + $0x28] sm:$0xff] }
 0xd31   : > { %10114 = vmatprep.mubr.bf16.mxu0 %v13847_v2 }
 0xd32   : > { %8414 = vperm.xlu1 %15463, %v20410_v38   ;;  %v7651_v38 = vld [vmem:[#allocation5 + $0x6e0] sm:$0xff] }
 0xd33   : > { %v14391_v42 = vpop.f32.mrb[88].mxu0 }
 0xd34   : > { %8444 = vperm.xlu0 %15462, %v20440_v34   ;;  %v8201_v9 = vpop.f32.mrb[89].mxu0  ;;  %v13863_v34 = vcombine.high %v7647_v35, %v7651_v38 }
 0xd35   : > { %v14392_v59 = vpop.f32.mrb[90].mxu0 }
 0xd36   : > { %8429 = vperm.xlu1 %15463, %v20418_v31   ;;  %v8204_v15 = vpop.f32.mrb[91].mxu0  ;;  %v7655_v31 = vld [vmem:[#allocation5 + $0x700] sm:$0xff] }
 0xd38   : > { %10115 = vmatmul.mubr.bf16.gmra.mrb[196].mxu0 %v13846_v26  ;;  %8439 = vperm.xlu0 %15462, %v20452_v1   ;;  %v7659_v1 = vld [vmem:[#allocation5 + $0x720] sm:$0xff]  ;;  %v12503_v26 = vld [vmem:[%s21200_s17 + $0x48] sm:$0xff] }
 0xd39   : > { %10124 = vmatprep.mubr.bf16.mxu0 %v13855_v39  ;;  %v13871_v24 = vcombine.high %v7655_v31, %v7659_v1 }
 0xd3a   : > { %8434 = vperm.xlu1 %15463, %v20442_v48   ;;  %v13862_v48 = vcombine.low %v7647_v35, %v7651_v38  ;;  %v12500_v35 = vld [vmem:[%s21200_s17 + $0x30] sm:$0xff]  ;;  %v12501_v38 = vld [vmem:[%s21200_s17 + $0x38] sm:$0xff] }
 0xd3b   : > { %v14395_v33 = vpop.f32.mrb[92].mxu0 }
 0xd3c   : > { %8464 = vperm.xlu0 %15462, %v14379_v29   ;;  %v8217_v37 = vpop.f32.mrb[93].mxu0  ;;  %v13878_v29 = vcombine.low %v7663_v28, %v7667_v63  ;;  %v22016_v63 = vld [vmem:[#allocation62_spill] sm:$0xff] }
 0xd3d   : > { %v20495_v13 = vpop.f32.mrb[94].mxu0 }
 0xd3e   : > { %8449 = vperm.xlu1 %15463, %v20450_v10   ;;  %v8220_v21 = vpop.f32.mrb[95].mxu0  ;;  %v13870_v10 = vcombine.low %v7655_v31, %v7659_v1  ;;  %v12529_v31 = vpack.c.bf16 %v12501_v38, %v12500_v35  ;;  %v12504_v1 = vld [vmem:[%s21200_s17 + $0x50] sm:$0xff] }
 0xd3f   : > { %v22022_v38 = vld [vmem:[#allocation73_spill] sm:$0xff] }
 0xd40   : > { %10125 = vmatmul.mubr.bf16.gmra.mrb[200].mxu0 %v13854_v7  ;;  %8459 = vperm.xlu0 %15462, %v8156_v36   ;;  %v11369_v36 = vld [vmem:[%s21198_s15 + $0x1e8] sm:$0xff] }
 0xd41   : > { %10134 = vmatprep.mubr.bf16.mxu0 %v13863_v34  ;;  %v11402_v55 = vpack.c.bf16 %v11369_v36, %v11368_v45  ;;  %v12506_v34 = vld [vmem:[%s21200_s17 + $0x60] sm:$0xff] }
 0xd42   : > { %8454 = vperm.xlu1 %15463, %v20472_v5   ;;  %v7679_v5 = vld [vmem:[#allocation5 + $0x7c0] sm:$0xff] }
 0xd43   : > { %v13895_v8 = vcombine.high %v7679_v5, %v7683_v14  ;;  %v13894_v3 = vcombine.low %v7679_v5, %v7683_v14  ;;  %v7452_v5 = vld [vmem:[#allocation5 + $0xa8] sm:$0xff]  ;;  %v12508_v14 = vld [vmem:[%s21200_s17 + $0x70] sm:$0xff] }
 0xd44   : > { %8484 = vperm.xlu0 %15462, %v14383_v30   ;;  %v20511_v30 = vpop.permute.xlu1 %11411 }
 0xd46   : > { %8469 = vperm.xlu1 %15463, %v20474_v0   ;;  %v13886_v0 = vcombine.low %v7671_v32, %v7675_v27  ;;  %v22017_v27 = vld [vmem:[#allocation65_spill] sm:$0xff] }
 0xd48   : > { %10135 = vmatmul.mubr.bf16.gmra.mrb[204].mxu0 %v13862_v48  ;;  %8479 = vperm.xlu0 %15462, %v8172_v19   ;;  %v7436_v19 = vld [vmem:[#allocation5 + $0x28] sm:$0xff]  ;;  %v20533_v2 = vpop.permute.xlu1 %11421  ;;  %v12505_v48 = vld [vmem:[%s21200_s17 + $0x58] sm:$0xff] }
 0xd49   : > { %10144 = vmatprep.mubr.bf16.mxu0 %v13871_v24 }
 0xd4a   : > { %8474 = vperm.xlu1 %15463, %v8169_v12   ;;  %v12494_v12 = vld [vmem:[%s21200_s17] sm:$0xff] }
 0xd4b   : > { %v12526_v60 = vpack.c.bf16 %v12495_v49, %v12494_v12  ;;  %v12515_v12 = vld [vmem:[%s21200_s17 + $0xa8] sm:$0xff] }
 0xd4c   : > { %8504 = vperm.xlu0 %15462, %v14387_v58   ;;  %v12498_v58 = vld [vmem:[%s21200_s17 + $0x20] sm:$0xff] }
 0xd4d   : > { %v12528_v6 = vpack.c.bf16 %v12499_v41, %v12498_v58  ;;  %v22020_v41 = vld [vmem:[#allocation68_spill] sm:$0xff] }
 0xd4e   : > { %8489 = vperm.xlu1 %15463, %v20477_v16   ;;  %v7432_v16 = vld [vmem:[#allocation5 + $0x8] sm:$0xff] }
 0xd4f   : > { %v13648_v7 = vcombine.low %v7432_v16, %v7436_v19 }
 0xd50   : > { %10145 = vmatmul.mubr.bf16.gmra.mrb[208].mxu0 %v13870_v10  ;;  %8499 = vperm.xlu0 %15462, %v8188_v17   ;;  %v12496_v17 = vld [vmem:[%s21200_s17 + $0x10] sm:$0xff]  ;;  %v12510_v10 = vld [vmem:[%s21200_s17 + $0x80] sm:$0xff] }
 0xd51   : > { %10154 = vmatprep.mubr.bf16.mxu0 %v13879_v57  ;;  %v12527_v39 = vpack.c.bf16 %v12497_v43, %v12496_v17  ;;  %v12511_v57 = vld [vmem:[%s21200_s17 + $0x88] sm:$0xff]  ;;  %v22021_v17 = vld [vmem:[#allocation71_spill] sm:$0xff] }
 0xd52   : > { %8494 = vperm.xlu1 %15463, %v8185_v61   ;;  %v13649_v61 = vcombine.high %v7432_v16, %v7436_v19  ;;  %v12534_v36 = vpack.c.bf16 %v12511_v57, %v12510_v10  ;;  %v22019_v19 = vld [vmem:[#allocation66_spill] sm:$0xff]  ;;  %v12911_v57 = vld [vmem:[%s21202_s19] sm:$0xff] }
 0xd53   : > { %v22024_v10 = vld [vmem:[#allocation74_spill] sm:$0xff] }
 0xd54   : > { %8524 = vperm.xlu0 %15462, %v14391_v42   ;;  %v12502_v42 = vld [vmem:[%s21200_s17 + $0x40] sm:$0xff] }
 0xd56   : > { %8509 = vperm.xlu1 %15463, %v14388_v54   ;;  %v11403_v54 = vpack.c.bf16 %v11371_v23, %v11370_v46  ;;  %v12512_v23 = vld [vmem:[%s21200_s17 + $0x90] sm:$0xff] }
 0xd58   : > { %10155 = vmatmul.mubr.bf16.gmra.mrb[212].mxu0 %v13878_v29  ;;  %8519 = vperm.xlu0 %15462, %v8204_v15   ;;  %v7444_v15 = vld [vmem:[#allocation5 + $0x68] sm:$0xff]  ;;  %v12531_v29 = vpack.c.bf16 %v12505_v48, %v12504_v1  ;;  %v12520_v1 = vld [vmem:[%s21200_s17 + $0xd0] sm:$0xff]  ;;  %v12521_v48 = vld [vmem:[%s21200_s17 + $0xd8] sm:$0xff] }
 0xd59   : > { %10164 = vmatprep.mubr.bf16.mxu0 %v13887_v20  ;;  %v7448_v20 = vld [vmem:[#allocation5 + $0x88] sm:$0xff] }
 0xd5a   : > { %8514 = vperm.xlu1 %15463, %v8201_v9   ;;  %v20548_v9 = vpop.permute.xlu0 %11436  ;;  %v13665_v49 = vcombine.high %v7448_v20, %v7452_v5 }
 0xd5c   : > { %8544 = vperm.xlu0 %15462, %v14395_v33   ;;  %v20556_v33 = vpop.permute.xlu1 %11431 }
 0xd5e   : > { %8529 = vperm.xlu1 %15463, %v14392_v59   ;;  %v7440_v59 = vld [vmem:[#allocation5 + $0x48] sm:$0xff]  ;;  %v20570_v24 = vpop.permute.xlu0 %11446 }
 0xd5f   : > { %v13656_v45 = vcombine.low %v7440_v59, %v7444_v15 }
 0xd60   : > { %10165 = vmatmul.mubr.bf16.gmra.mrb[216].mxu0 %v13886_v0  ;;  %8539 = vperm.xlu0 %15462, %v8220_v21   ;;  %v13657_v21 = vcombine.high %v7440_v59, %v7444_v15  ;;  %v20579_v32 = vpop.permute.xlu1 %11441  ;;  %v12509_v0 = vld [vmem:[%s21200_s17 + $0x78] sm:$0xff]  ;;  %v13664_v15 = vcombine.low %v7448_v20, %v7452_v5  ;;  %v22025_v20 = vld [vmem:[#allocation77_spill] sm:$0xff]  ;;  %v12539_v5 = vpack.c.bf16 %v12521_v48, %v12520_v1  ;;  %v12923_v1 = vld [vmem:[%s21202_s19 + $0x60] sm:$0xff] }
 0xd61   : > { %10174 = vmatprep.mubr.bf16.mxu0 %v13895_v8  ;;  %v22018_v8 = vld [vmem:[#allocation67_spill] sm:$0xff]  ;;  %v12533_v46 = vpack.c.bf16 %v12509_v0, %v12508_v14  ;;  %v7464_v14 = vld [vmem:[#allocation5 + $0x108] sm:$0xff] }
 0xd62   : > { %8534 = vperm.xlu1 %15463, %v8217_v37   ;;  %v12530_v37 = vpack.c.bf16 %v12503_v26, %v12502_v42  ;;  %v20595_v16 = vpop.permute.xlu0 %11456  ;;  %v7460_v42 = vld [vmem:[#allocation5 + $0xe8] sm:$0xff]  ;;  %v12516_v26 = vld [vmem:[%s21200_s17 + $0xb0] sm:$0xff] }
 0xd63   : > { %v7468_v0 = vld [vmem:[#allocation5 + $0x128] sm:$0xff] }
 0xd64   : > { %11556 = vperm.xlu0 %15462, %v11402_v55   ;;  %v12514_v55 = vld [vmem:[%s21200_s17 + $0xa0] sm:$0xff]  ;;  %v12924_v48 = vld [vmem:[%s21202_s19 + $0x68] sm:$0xff] }
 0xd65   : > { %v12536_v58 = vpack.c.bf16 %v12515_v12, %v12514_v55  ;;  %v22026_v12 = vld [vmem:[#allocation79_spill] sm:$0xff] }
 0xd66   : > { %8549 = vperm.xlu1 %15463, %v20495_v13   ;;  %v12507_v13 = vld [vmem:[%s21200_s17 + $0x68] sm:$0xff]  ;;  %v20620_v59 = vpop.permute.xlu0 %11466 }
 0xd67   : > { %v12532_v28 = vpack.c.bf16 %v12507_v13, %v12506_v34 }
 0xd68   : > { %10175 = vmatmul.mubr.bf16.gmra.mrb[220].mxu0 %v13894_v3  ;;  %12544 = vperm.xlu0 %15462, %v12526_v60   ;;  %v12513_v3 = vld [vmem:[%s21200_s17 + $0x98] sm:$0xff]  ;;  %v20604_v60 = vpop.permute.xlu1 %11451 }
 0xd69   : > { %10217 = vmatprep.mubr.bf16.mxu0 %v13649_v61  ;;  %v12518_v61 = vld [vmem:[%s21200_s17 + $0xc0] sm:$0xff]  ;;  %v12535_v43 = vpack.c.bf16 %v12513_v3, %v12512_v23  ;;  %v22027_v3 = vld [vmem:[#allocation78_spill] sm:$0xff] }
 0xd6a   : > { %11561 = vperm.xlu1 %15463, %v11403_v54   ;;  %v12519_v54 = vld [vmem:[%s21200_s17 + $0xc8] sm:$0xff] }
 0xd6b   : > { %v12538_v35 = vpack.c.bf16 %v12519_v54, %v12518_v61  ;;  %v12914_v61 = vld [vmem:[%s21202_s19 + $0x18] sm:$0xff] }
 0xd6c   : > { %12554 = vperm.xlu0 %15462, %v12528_v6   ;;  %v7456_v6 = vld [vmem:[#allocation5 + $0xc8] sm:$0xff]  ;;  %v20629_v13 = vpop.permute.xlu1 %11461 }
 0xd6d   : > { %v13673_v34 = vcombine.high %v7456_v6, %v7460_v42 }
 0xd6e   : > { %12549 = vperm.xlu1 %15463, %v12527_v39   ;;  %v12517_v39 = vld [vmem:[%s21200_s17 + $0xb8] sm:$0xff] }
 0xd70   : > { %10218 = vmatmul.mubr.bf16.vlgmr.msra.gmra.mrb[96].mxu0 %v13648_v7  ;;  %12564 = vperm.xlu0 %15462, %v12530_v37   ;;  %v12522_v7 = vld [vmem:[%s21200_s17 + $0xe0] sm:$0xff]  ;;  %v12523_v37 = vld [vmem:[%s21200_s17 + $0xe8] sm:$0xff] }
 0xd71   : > { %10539 = vmatpush1.bf16.msra.mxu0 %v22016_v63  ;;  %10227 = vmatprep.mubr.bf16.mxu0 %v13657_v21  ;;  %v22023_v21 = vld [vmem:[#allocation72_spill] sm:$0xff]  ;;  %v12540_v63 = vpack.c.bf16 %v12523_v37, %v12522_v7  ;;  %v12918_v7 = vld [vmem:[%s21202_s19 + $0x38] sm:$0xff] }
 0xd72   : > { %10540 = vmatprep.subr.bf16.mxu0 %v22017_v27  ;;  %12559 = vperm.xlu1 %15463, %v12529_v31   ;;  %v12537_v31 = vpack.c.bf16 %v12517_v39, %v12516_v26  ;;  %v12912_v27 = vld [vmem:[%s21202_s19 + $0x8] sm:$0xff]  ;;  %v22029_v26 = vld [vmem:[#allocation83_spill] sm:$0xff] }
 0xd73   : > { %v12927_v55 = vpack.c.bf16 %v12912_v27, %v12911_v57  ;;  %v22031_v57 = vld [vmem:[#allocation84_spill] sm:$0xff] }
 0xd74   : > { %12574 = vperm.xlu0 %15462, %v12532_v28   ;;  %v20638_v28 = vpop.permute.xlu0 %8244 }
 0xd75   : > { %10541 = vmatpush1.bf16.msra.mxu0 %v22018_v8  ;;  %v13672_v8 = vcombine.low %v7456_v6, %v7460_v42  ;;  %v12919_v6 = vld [vmem:[%s21202_s19 + $0x40] sm:$0xff]  ;;  %v12920_v42 = vld [vmem:[%s21202_s19 + $0x48] sm:$0xff] }
 0xd76   : > { %10542 = vmatprep.subr.bf16.mxu0 %v22019_v19  ;;  %12569 = vperm.xlu1 %15463, %v12531_v29   ;;  %v20647_v29 = vpop.permute.xlu1 %8249  ;;  %v12916_v19 = vld [vmem:[%s21202_s19 + $0x28] sm:$0xff] }
 0xd78   : > { %10228 = vmatmul.mubr.bf16.gmra.mrb[100].mxu0 %v13656_v45  ;;  %12584 = vperm.xlu0 %15462, %v12534_v36   ;;  %v12524_v45 = vld [vmem:[%s21200_s17 + $0xf0] sm:$0xff]  ;;  %v12525_v36 = vld [vmem:[%s21200_s17 + $0xf8] sm:$0xff]  ;;  %v20663_v23 = vpop.permute.xlu0 %8234 }
 0xd79   : > { %10543 = vmatpush1.bf16.msra.mxu0 %v22020_v41  ;;  %10237 = vmatprep.mubr.bf16.mxu0 %v13665_v49  ;;  %v12915_v49 = vld [vmem:[%s21202_s19 + $0x20] sm:$0xff]  ;;  %v12913_v41 = vld [vmem:[%s21202_s19 + $0x10] sm:$0xff] }
 0xd7a   : > { %10544 = vmatprep.subr.bf16.mxu0 %v22021_v17  ;;  %12579 = vperm.xlu1 %15463, %v12533_v46   ;;  %v13681_v46 = vcombine.high %v7464_v14, %v7468_v0  ;;  %v20672_v54 = vpop.permute.xlu1 %8239  ;;  %v12929_v17 = vpack.c.bf16 %v12916_v19, %v12915_v49  ;;  %v12928_v39 = vpack.c.bf16 %v12914_v61, %v12913_v41  ;;  %v12925_v49 = vld [vmem:[%s21202_s19 + $0x70] sm:$0xff]  ;;  %v12926_v19 = vld [vmem:[%s21202_s19 + $0x78] sm:$0xff]  ;;  %v13008_v41 = vld [vmem:[%s21204_s21] sm:$0xff] }
 0xd7c   : > { %12594 = vperm.xlu0 %15462, %v12536_v58   ;;  %v12541_v58 = vpack.c.bf16 %v12525_v36, %v12524_v45  ;;  %v20688_v37 = vpop.permute.xlu0 %8264  ;;  %v22033_v36 = vld [vmem:[#allocation87_spill] sm:$0xff] }
 0xd7d   : > { %10545 = vmatpush1.bf16.msra.mxu0 %v22022_v38  ;;  %v12917_v38 = vld [vmem:[%s21202_s19 + $0x30] sm:$0xff] }
 0xd7e   : > { %10546 = vmatprep.subr.bf16.mxu0 %v22023_v21  ;;  %12589 = vperm.xlu1 %15463, %v12535_v43   ;;  %v22028_v43 = vld [vmem:[#allocation80_spill] sm:$0xff]  ;;  %v12931_v21 = vpack.c.bf16 %v12920_v42, %v12919_v6  ;;  %v12930_v27 = vpack.c.bf16 %v12918_v7, %v12917_v38  ;;  %v22036_v42 = vld [vmem:[#allocation90_spill] sm:$0xff]  ;;  %v22038_v7 = vld [vmem:[#allocation93_spill] sm:$0xff] }
 0xd80   : > { %10238 = vmatmul.mubr.bf16.gmra.mrb[104].mxu0 %v13664_v15  ;;  %12604 = vperm.xlu0 %15462, %v12538_v35   ;;  %v7472_v15 = vld [vmem:[#allocation5 + $0x148] sm:$0xff]  ;;  %v20707_v45 = vpop.permute.xlu0 %8259 }
 0xd81   : > { %10547 = vmatpush1.bf16.msra.mxu0 %v22024_v10  ;;  %10247 = vmatprep.mubr.bf16.mxu0 %v13673_v34  ;;  %v7476_v35 = vld [vmem:[#allocation5 + $0x168] sm:$0xff]  ;;  %v13680_v34 = vcombine.low %v7464_v14, %v7468_v0  ;;  %v20697_v10 = vpop.permute.xlu1 %11471  ;;  %v12933_v14 = vpack.c.bf16 %v12924_v48, %v12923_v1  ;;  %v22032_v0 = vld [vmem:[#allocation86_spill] sm:$0xff]  ;;  %v22041_v1 = vld [vmem:[#allocation95_spill] sm:$0xff] }
 0xd82   : > { %10548 = vmatprep.subr.bf16.mxu0 %v22025_v20  ;;  %12599 = vperm.xlu1 %15463, %v12537_v31   ;;  %v22030_v31 = vld [vmem:[#allocation85_spill] sm:$0xff]  ;;  %v7496_v48 = vld [vmem:[#allocation5 + $0x208] sm:$0xff] }
 0xd83   : > { %v12921_v20 = vld [vmem:[%s21202_s19 + $0x50] sm:$0xff] }
 0xd84   : > { %12614 = vperm.xlu0 %15462, %v12540_v63   ;;  %v13689_v63 = vcombine.high %v7472_v15, %v7476_v35  ;;  %v20723_v6 = vpop.permute.xlu0 %8284 }
 0xd85   : > { %10549 = vmatpush1.bf16.msra.mxu0 %v22026_v12  ;;  %v7484_v12 = vld [vmem:[#allocation5 + $0x1a8] sm:$0xff] }
 0xd86   : > { %10550 = vmatprep.subr.bf16.mxu0 %v22027_v3  ;;  %12609 = vperm.xlu1 %15463, %v12539_v5   ;;  %v12922_v5 = vld [vmem:[%s21202_s19 + $0x58] sm:$0xff]  ;;  %v13688_v3 = vcombine.low %v7472_v15, %v7476_v35  ;;  %v7488_v15 = vld [vmem:[#allocation5 + $0x1c8] sm:$0xff] }
 0xd87   : > { %v7492_v35 = vld [vmem:[#allocation5 + $0x1e8] sm:$0xff] }
 0xd88   : > { %10248 = vmatmul.mubr.bf16.gmra.mrb[108].mxu0 %v13672_v8  ;;  %12937 = vperm.xlu0 %15462, %v12927_v55   ;;  %v12932_v8 = vpack.c.bf16 %v12922_v5, %v12921_v20  ;;  %v7480_v55 = vld [vmem:[#allocation5 + $0x188] sm:$0xff] }
 0xd89   : > { %10551 = vmatpush1.bf16.msra.mxu0 %v22028_v43  ;;  %10257 = vmatprep.mubr.bf16.mxu0 %v13681_v46  ;;  %v20716_v46 = vpop.permute.xlu1 %8254  ;;  %v13697_v61 = vcombine.high %v7480_v55, %v7484_v12  ;;  %v12934_v43 = vpack.c.bf16 %v12926_v19, %v12925_v49  ;;  %v13696_v38 = vcombine.low %v7480_v55, %v7484_v12  ;;  %v22043_v5 = vld [vmem:[#allocation96_spill] sm:$0xff]  ;;  %v22046_v12 = vld [vmem:[#allocation101_spill] sm:$0xff] }
 0xd8a   : > { %10552 = vmatprep.subr.bf16.mxu0 %v22029_v26  ;;  %12619 = vperm.xlu1 %15463, %v12541_v58   ;;  %v22034_v58 = vld [vmem:[#allocation89_spill] sm:$0xff]  ;;  %v7512_v19 = vld [vmem:[#allocation5 + $0x288] sm:$0xff] }
 0xd8c   : > { %12947 = vperm.xlu0 %15462, %v12929_v17   ;;  %v22035_v17 = vld [vmem:[#allocation88_spill] sm:$0xff] }
 0xd8d   : > { %10553 = vmatpush1.bf16.msra.mxu0 %v22030_v31  ;;  %v20726_v26 = vpop.permute.xlu1 %8269  ;;  %v22040_v31 = vld [vmem:[#allocation94_spill] sm:$0xff] }
 0xd8e   : > { %10554 = vmatprep.subr.bf16.mxu0 %v22031_v57  ;;  %12942 = vperm.xlu1 %15463, %v12928_v39   ;;  %v22037_v39 = vld [vmem:[#allocation91_spill] sm:$0xff]  ;;  %v13704_v57 = vcombine.low %v7488_v15, %v7492_v35 }
 0xd90   : > { %10258 = vmatmul.mubr.bf16.gmra.mrb[112].mxu0 %v13680_v34  ;;  %12957 = vperm.xlu0 %15462, %v12931_v21   ;;  %v13705_v34 = vcombine.high %v7488_v15, %v7492_v35  ;;  %v22039_v21 = vld [vmem:[#allocation92_spill] sm:$0xff] }
 0xd91   : > { %10555 = vmatpush1.bf16.msra.mxu0 %v22032_v0  ;;  %10267 = vmatprep.mubr.bf16.mxu0 %v13689_v63  ;;  %v7500_v63 = vld [vmem:[#allocation5 + $0x228] sm:$0xff]  ;;  %v22045_v0 = vld [vmem:[#allocation99_spill] sm:$0xff] }
 0xd92   : > { %10556 = vmatprep.subr.bf16.mxu0 %v22033_v36  ;;  %12952 = vperm.xlu1 %15463, %v12930_v27   ;;  %v22042_v27 = vld [vmem:[#allocation97_spill] sm:$0xff]  ;;  %v13713_v20 = vcombine.high %v7496_v48, %v7500_v63  ;;  %v7504_v36 = vld [vmem:[#allocation5 + $0x248] sm:$0xff]  ;;  %v13712_v55 = vcombine.low %v7496_v48, %v7500_v63 }
 0xd93   : > { %v7532_v15 = vld [vmem:[#allocation5 + $0x328] sm:$0xff] }
 0xd94   : > { %12967 = vperm.xlu0 %15462, %v12933_v14   ;;  %v22044_v14 = vld [vmem:[#allocation98_spill] sm:$0xff] }
 0xd95   : > { %10557 = vmatpush1.bf16.msra.mxu0 %v22034_v58 }
 0xd96   : > { %10558 = vmatprep.subr.bf16.mxu0 %v22035_v17  ;;  %12962 = vperm.xlu1 %15463, %v12932_v8   ;;  %v7508_v8 = vld [vmem:[#allocation5 + $0x268] sm:$0xff] }
 0xd97   : > { %v13721_v49 = vcombine.high %v7504_v36, %v7508_v8  ;;  %v13720_v58 = vcombine.low %v7504_v36, %v7508_v8  ;;  %v7524_v17 = vld [vmem:[#allocation5 + $0x2e8] sm:$0xff] }
 0xd98   : > { %10268 = vmatmul.mubr.bf16.gmra.mrb[116].mxu0 %v13688_v3  ;;  %13011 = vperm.xlu0 %15462, %v13008_v41   ;;  %v7516_v3 = vld [vmem:[#allocation5 + $0x2a8] sm:$0xff] }
 0xd99   : > { %10559 = vmatpush1.bf16.msra.mxu0 %v22036_v42  ;;  %10277 = vmatprep.mubr.bf16.mxu0 %v13697_v61  ;;  %v13729_v41 = vcombine.high %v7512_v19, %v7516_v3  ;;  %v7520_v61 = vld [vmem:[#allocation5 + $0x2c8] sm:$0xff] }
 0xd9a   : > { %10560 = vmatprep.subr.bf16.mxu0 %v22037_v39  ;;  %12972 = vperm.xlu1 %15463, %v12934_v43   ;;  %v13728_v43 = vcombine.low %v7512_v19, %v7516_v3  ;;  %v13737_v42 = vcombine.high %v7520_v61, %v7524_v17  ;;  %v7528_v39 = vld [vmem:[#allocation5 + $0x308] sm:$0xff]  ;;  %v13736_v35 = vcombine.low %v7520_v61, %v7524_v17 }
 0xd9b   : > { %v7576_v3 = vld [vmem:[#allocation5 + $0x488] sm:$0xff] }
 0xd9c   : > { %v7584_v17 = vld [vmem:[#allocation5 + $0x4c8] sm:$0xff] }
 0xd9d   : > { %10561 = vmatpush1.bf16.msra.mxu0 %v22038_v7  ;;  %v7540_v7 = vld [vmem:[#allocation5 + $0x368] sm:$0xff] }
 0xd9e   : > { %10562 = vmatprep.subr.bf16.mxu0 %v22039_v21 }
 0xda0   : > { %10278 = vmatmul.mubr.bf16.gmra.mrb[120].mxu0 %v13696_v38  ;;  %v13745_v38 = vcombine.high %v7528_v39, %v7532_v15 }
 0xda1   : > { %10563 = vmatpush1.bf16.msra.mxu0 %v22040_v31  ;;  %10287 = vmatprep.mubr.bf16.mxu0 %v13705_v34  ;;  %v13744_v34 = vcombine.low %v7528_v39, %v7532_v15  ;;  %v7544_v31 = vld [vmem:[#allocation5 + $0x388] sm:$0xff] }
 0xda2   : > { %10564 = vmatprep.subr.bf16.mxu0 %v22041_v1  ;;  %v7548_v1 = vld [vmem:[#allocation5 + $0x3a8] sm:$0xff] }
 0xda3   : > { %v13761_v63 = vcombine.high %v7544_v31, %v7548_v1  ;;  %v7592_v15 = vld [vmem:[#allocation5 + $0x508] sm:$0xff] }
 0xda5   : > { %10565 = vmatpush1.bf16.msra.mxu0 %v22042_v27  ;;  %v7556_v27 = vld [vmem:[#allocation5 + $0x3e8] sm:$0xff] }
 0xda6   : > { %10566 = vmatprep.subr.bf16.mxu0 %v22043_v5 }
 0xda8   : > { %10288 = vmatmul.mubr.bf16.gmra.mrb[124].mxu0 %v13704_v57  ;;  %v7552_v57 = vld [vmem:[#allocation5 + $0x3c8] sm:$0xff] }
 0xda9   : > { %10567 = vmatpush1.bf16.msra.mxu0 %v22044_v14  ;;  %10297 = vmatprep.mubr.bf16.mxu0 %v13713_v20  ;;  %v13760_v20 = vcombine.low %v7544_v31, %v7548_v1  ;;  %v13769_v5 = vcombine.high %v7552_v57, %v7556_v27  ;;  %v7560_v14 = vld [vmem:[#allocation5 + $0x408] sm:$0xff]  ;;  %v13768_v36 = vcombine.low %v7552_v57, %v7556_v27 }
 0xdaa   : > { %10568 = vmatprep.subr.bf16.mxu0 %v22045_v0  ;;  %v7564_v0 = vld [vmem:[#allocation5 + $0x428] sm:$0xff] }
 0xdab   : > { %v13777_v8 = vcombine.high %v7560_v14, %v7564_v0  ;;  %v7608_v1 = vld [vmem:[#allocation5 + $0x588] sm:$0xff] }
 0xdac   : > { %v7616_v27 = vld [vmem:[#allocation5 + $0x5c8] sm:$0xff] }
 0xdad   : > { %10569 = vmatpush1.bf16.msra.mxu0 %v22046_v12  ;;  %v7572_v12 = vld [vmem:[#allocation5 + $0x468] sm:$0xff] }
 0xdae   : > { %10891 = vmatprep.subr.bf16.mxu0 %v18672_v47  ;;  %v7536_v47 = vld [vmem:[#allocation5 + $0x348] sm:$0xff] }
 0xdaf   : > { %v13753_v21 = vcombine.high %v7536_v47, %v7540_v7  ;;  %v13752_v48 = vcombine.low %v7536_v47, %v7540_v7  ;;  %v7600_v7 = vld [vmem:[#allocation5 + $0x548] sm:$0xff] }
 0xdb0   : > { %10298 = vmatmul.mubr.bf16.gmra.mrb[128].mxu0 %v13712_v55  ;;  %v7568_v55 = vld [vmem:[#allocation5 + $0x448] sm:$0xff] }
 0xdb1   : > { %10307 = vmatprep.mubr.bf16.mxu0 %v13721_v49  ;;  %v13776_v49 = vcombine.low %v7560_v14, %v7564_v0  ;;  %v13785_v19 = vcombine.high %v7568_v55, %v7572_v12  ;;  %v7624_v0 = vld [vmem:[#allocation5 + $0x608] sm:$0xff] }
 0xdb8   : > { %10308 = vmatmul.mubr.bf16.gmra.mrb[132].mxu0 %v13720_v58  ;;  %v7580_v58 = vld [vmem:[#allocation5 + $0x4a8] sm:$0xff] }
 0xdb9   : > { %10317 = vmatprep.mubr.bf16.mxu0 %v13729_v41  ;;  %v13784_v41 = vcombine.low %v7568_v55, %v7572_v12  ;;  %v13793_v61 = vcombine.high %v7576_v3, %v7580_v58  ;;  %v7632_v12 = vld [vmem:[#allocation5 + $0x648] sm:$0xff] }
 0xdc0   : > { %10318 = vmatmul.mubr.bf16.gmra.mrb[136].mxu0 %v13728_v43  ;;  %v7588_v43 = vld [vmem:[#allocation5 + $0x4e8] sm:$0xff] }
 0xdc1   : > { %10327 = vmatprep.mubr.bf16.mxu0 %v13737_v42  ;;  %v13792_v42 = vcombine.low %v7576_v3, %v7580_v58  ;;  %v13801_v39 = vcombine.high %v7584_v17, %v7588_v43  ;;  %v7640_v58 = vld [vmem:[#allocation5 + $0x688] sm:$0xff] }
 0xdc8   : > { %10328 = vmatmul.mubr.bf16.gmra.mrb[140].mxu0 %v13736_v35  ;;  %v7596_v35 = vld [vmem:[#allocation5 + $0x528] sm:$0xff] }
 0xdc9   : > { %10337 = vmatprep.mubr.bf16.mxu0 %v13745_v38  ;;  %v13800_v38 = vcombine.low %v7584_v17, %v7588_v43  ;;  %v13809_v47 = vcombine.high %v7592_v15, %v7596_v35  ;;  %v7648_v43 = vld [vmem:[#allocation5 + $0x6c8] sm:$0xff] }
 0xdd0   : > { %10338 = vmatmul.mubr.bf16.gmra.mrb[144].mxu0 %v13744_v34  ;;  %v7604_v34 = vld [vmem:[#allocation5 + $0x568] sm:$0xff] }
 0xdd1   : > { %10347 = vmatprep.mubr.bf16.mxu0 %v13753_v21  ;;  %v13808_v21 = vcombine.low %v7592_v15, %v7596_v35  ;;  %v13817_v31 = vcombine.high %v7600_v7, %v7604_v34  ;;  %v7656_v35 = vld [vmem:[#allocation5 + $0x708] sm:$0xff] }
 0xdd8   : > { %10348 = vmatmul.mubr.bf16.gmra.mrb[148].mxu0 %v13752_v48  ;;  %v7612_v48 = vld [vmem:[#allocation5 + $0x5a8] sm:$0xff] }
 0xdd9   : > { %10357 = vmatprep.mubr.bf16.mxu0 %v13761_v63  ;;  %v13816_v63 = vcombine.low %v7600_v7, %v7604_v34  ;;  %v13825_v57 = vcombine.high %v7608_v1, %v7612_v48  ;;  %v7664_v34 = vld [vmem:[#allocation5 + $0x748] sm:$0xff] }
 0xde0   : > { %10358 = vmatmul.mubr.bf16.gmra.mrb[152].mxu0 %v13760_v20  ;;  %v7620_v20 = vld [vmem:[#allocation5 + $0x5e8] sm:$0xff] }
 0xde1   : > { %10367 = vmatprep.mubr.bf16.mxu0 %v13769_v5  ;;  %v13824_v5 = vcombine.low %v7608_v1, %v7612_v48  ;;  %v13833_v14 = vcombine.high %v7616_v27, %v7620_v20  ;;  %v7672_v48 = vld [vmem:[#allocation5 + $0x788] sm:$0xff] }
 0xde8   : > { %10368 = vmatmul.mubr.bf16.gmra.mrb[156].mxu0 %v13768_v36  ;;  %v7628_v36 = vld [vmem:[#allocation5 + $0x628] sm:$0xff] }
 0xde9   : > { %10377 = vmatprep.mubr.bf16.mxu0 %v13777_v8  ;;  %v13832_v8 = vcombine.low %v7616_v27, %v7620_v20  ;;  %v13841_v55 = vcombine.high %v7624_v0, %v7628_v36  ;;  %v7680_v20 = vld [vmem:[#allocation5 + $0x7c8] sm:$0xff] }
 0xdf0   : > { %10378 = vmatmul.mubr.bf16.gmra.mrb[160].mxu0 %v13776_v49  ;;  %v7636_v49 = vld [vmem:[#allocation5 + $0x668] sm:$0xff] }
 0xdf1   : > { %10387 = vmatprep.mubr.bf16.mxu0 %v13785_v19  ;;  %v13840_v19 = vcombine.low %v7624_v0, %v7628_v36  ;;  %v13849_v3 = vcombine.high %v7632_v12, %v7636_v49  ;;  %v7433_v36 = vld [vmem:[#allocation5 + $0x10] sm:$0xff] }
 0xdf8   : > { %10388 = vmatmul.mubr.bf16.gmra.mrb[164].mxu0 %v13784_v41  ;;  %v7644_v41 = vld [vmem:[#allocation5 + $0x6a8] sm:$0xff] }
 0xdf9   : > { %10397 = vmatprep.mubr.bf16.mxu0 %v13793_v61  ;;  %v13848_v61 = vcombine.low %v7632_v12, %v7636_v49  ;;  %v13857_v17 = vcombine.high %v7640_v58, %v7644_v41  ;;  %v7441_v49 = vld [vmem:[#allocation5 + $0x50] sm:$0xff] }
 0xe00   : > { %10398 = vmatmul.mubr.bf16.gmra.mrb[168].mxu0 %v13792_v42  ;;  %v7652_v42 = vld [vmem:[#allocation5 + $0x6e8] sm:$0xff] }
 0xe01   : > { %10407 = vmatprep.mubr.bf16.mxu0 %v13801_v39  ;;  %v13856_v39 = vcombine.low %v7640_v58, %v7644_v41  ;;  %v13865_v15 = vcombine.high %v7648_v43, %v7652_v42  ;;  %v7449_v41 = vld [vmem:[#allocation5 + $0x90] sm:$0xff] }
 0xe08   : > { %10408 = vmatmul.mubr.bf16.gmra.mrb[172].mxu0 %v13800_v38  ;;  %v7660_v38 = vld [vmem:[#allocation5 + $0x728] sm:$0xff] }
 0xe09   : > { %10417 = vmatprep.mubr.bf16.mxu0 %v13809_v47  ;;  %v13864_v47 = vcombine.low %v7648_v43, %v7652_v42  ;;  %v13873_v7 = vcombine.high %v7656_v35, %v7660_v38  ;;  %v7457_v42 = vld [vmem:[#allocation5 + $0xd0] sm:$0xff] }
 0xe10   : > { %10418 = vmatmul.mubr.bf16.gmra.mrb[176].mxu0 %v13808_v21  ;;  %v7668_v21 = vld [vmem:[#allocation5 + $0x768] sm:$0xff] }
 0xe11   : > { %10427 = vmatprep.mubr.bf16.mxu0 %v13817_v31  ;;  %v13872_v31 = vcombine.low %v7656_v35, %v7660_v38  ;;  %v13881_v1 = vcombine.high %v7664_v34, %v7668_v21  ;;  %v22048_v35 = vld [vmem:[#allocation100_spill] sm:$0xff] }
 0xe12   : > { %v22049_v38 = vld [vmem:[#allocation104_spill] sm:$0xff] }
 0xe18   : > { %10428 = vmatmul.mubr.bf16.gmra.mrb[180].mxu0 %v13816_v63  ;;  %v7676_v63 = vld [vmem:[#allocation5 + $0x7a8] sm:$0xff] }
 0xe19   : > { %10437 = vmatprep.mubr.bf16.mxu0 %v13825_v57  ;;  %v13880_v57 = vcombine.low %v7664_v34, %v7668_v21  ;;  %v13889_v27 = vcombine.high %v7672_v48, %v7676_v63  ;;  %v7477_v34 = vld [vmem:[#allocation5 + $0x170] sm:$0xff] }
 0xe1a   : > { %v22052_v21 = vld [vmem:[#allocation105_spill] sm:$0xff] }
 0xe20   : > { %10438 = vmatmul.mubr.bf16.gmra.mrb[184].mxu0 %v13824_v5  ;;  %v7684_v5 = vld [vmem:[#allocation5 + $0x7e8] sm:$0xff] }
 0xe21   : > { %10447 = vmatprep.mubr.bf16.mxu0 %v13833_v14  ;;  %v13888_v14 = vcombine.low %v7672_v48, %v7676_v63  ;;  %v13897_v0 = vcombine.high %v7680_v20, %v7684_v5  ;;  %v22055_v48 = vld [vmem:[#allocation107_spill] sm:$0xff]  ;;  %v7481_v63 = vld [vmem:[#allocation5 + $0x190] sm:$0xff] }
 0xe28   : > { %10448 = vmatmul.mubr.bf16.gmra.mrb[188].mxu0 %v13832_v8  ;;  %v7437_v8 = vld [vmem:[#allocation5 + $0x30] sm:$0xff] }
 0xe29   : > { %10457 = vmatprep.mubr.bf16.mxu0 %v13841_v55  ;;  %v13896_v55 = vcombine.low %v7680_v20, %v7684_v5  ;;  %v13651_v12 = vcombine.high %v7433_v36, %v7437_v8  ;;  %v22056_v20 = vld [vmem:[#allocation109_spill] sm:$0xff] }
 0xe30   : > { %10458 = vmatmul.mubr.bf16.gmra.mrb[192].mxu0 %v13840_v19  ;;  %v7445_v19 = vld [vmem:[#allocation5 + $0x70] sm:$0xff] }
 0xe31   : > { %10467 = vmatprep.mubr.bf16.mxu0 %v13849_v3  ;;  %v13650_v3 = vcombine.low %v7433_v36, %v7437_v8  ;;  %v13659_v58 = vcombine.high %v7441_v49, %v7445_v19  ;;  %v22059_v36 = vld [vmem:[#allocation111_spill] sm:$0xff]  ;;  %v7489_v8 = vld [vmem:[#allocation5 + $0x1d0] sm:$0xff] }
 0xe38   : > { %10468 = vmatmul.mubr.bf16.gmra.mrb[196].mxu0 %v13848_v61  ;;  %v7453_v61 = vld [vmem:[#allocation5 + $0xb0] sm:$0xff] }
 0xe39   : > { %10477 = vmatprep.mubr.bf16.mxu0 %v13857_v17  ;;  %v13658_v17 = vcombine.low %v7441_v49, %v7445_v19  ;;  %v13667_v43 = vcombine.high %v7449_v41, %v7453_v61  ;;  %v22060_v49 = vld [vmem:[#allocation113_spill] sm:$0xff] }
 0xe40   : > { %10478 = vmatmul.mubr.bf16.gmra.mrb[200].mxu0 %v13856_v39  ;;  %v7461_v39 = vld [vmem:[#allocation5 + $0xf0] sm:$0xff] }
 0xe41   : > { %10487 = vmatprep.mubr.bf16.mxu0 %v13865_v15  ;;  %v22047_v15 = vld [vmem:[#allocation102_spill] sm:$0xff] }
 0xe48   : > { %10488 = vmatmul.mubr.bf16.gmra.mrb[204].mxu0 %v13864_v47  ;;  %v22050_v47 = vld [vmem:[#allocation106_spill] sm:$0xff] }
 0xe49   : > { %10497 = vmatprep.mubr.bf16.mxu0 %v13873_v7  ;;  %v22051_v7 = vld [vmem:[#allocation103_spill] sm:$0xff] }
 0xe50   : > { %10498 = vmatmul.mubr.bf16.gmra.mrb[208].mxu0 %v13872_v31  ;;  %v22053_v31 = vld [vmem:[#allocation108_spill] sm:$0xff] }
 0xe51   : > { %10507 = vmatprep.mubr.bf16.mxu0 %v13881_v1  ;;  %v22054_v1 = vld [vmem:[#allocation110_spill] sm:$0xff] }
 0xe58   : > { %10508 = vmatmul.mubr.bf16.gmra.mrb[212].mxu0 %v13880_v57  ;;  %v7485_v57 = vld [vmem:[#allocation5 + $0x1b0] sm:$0xff] }
 0xe59   : > { %10517 = vmatprep.mubr.bf16.mxu0 %v13889_v27  ;;  %v13699_v5 = vcombine.high %v7481_v63, %v7485_v57 }
 0xe60   : > { %10518 = vmatmul.mubr.bf16.gmra.mrb[216].mxu0 %v13888_v14  ;;  %v22057_v14 = vld [vmem:[#allocation112_spill] sm:$0xff] }
 0xe61   : > { %10527 = vmatprep.mubr.bf16.mxu0 %v13897_v0  ;;  %v22058_v0 = vld [vmem:[#allocation114_spill] sm:$0xff] }
 0xe68   : > { %10528 = vmatmul.mubr.bf16.gmra.mrb[220].mxu0 %v13896_v55  ;;  %v7493_v55 = vld [vmem:[#allocation5 + $0x1f0] sm:$0xff] }
 0xe69   : > { %10570 = vmatprep.mubr.bf16.mxu0 %v13651_v12  ;;  %v13698_v12 = vcombine.low %v7481_v63, %v7485_v57  ;;  %v13707_v19 = vcombine.high %v7489_v8, %v7493_v55  ;;  %v7537_v57 = vld [vmem:[#allocation5 + $0x350] sm:$0xff] }
 0xe70   : > { %10571 = vmatmul.mubr.bf16.vlgmr.msra.gmra.mrb[96].mxu0 %v13650_v3  ;;  %v22061_v3 = vld [vmem:[#allocation116_spill] sm:$0xff] }
 0xe71   : > { %10892 = vmatpush1.bf16.msra.mxu0 %v18669_v44  ;;  %10580 = vmatprep.mubr.bf16.mxu0 %v13659_v58  ;;  %v13666_v44 = vcombine.low %v7449_v41, %v7453_v61  ;;  %v22062_v58 = vld [vmem:[#allocation118_spill] sm:$0xff]  ;;  %v22063_v41 = vld [vmem:[#allocation115_spill] sm:$0xff]  ;;  %v7497_v61 = vld [vmem:[#allocation5 + $0x210] sm:$0xff] }
 0xe72   : > { %10893 = vmatprep.subr.bf16.mxu0 %v18652_v25  ;;  %v13675_v25 = vcombine.high %v7457_v42, %v7461_v39 }
 0xe75   : > { %10894 = vmatpush1.bf16.msra.mxu0 %v18649_v40  ;;  %v7465_v40 = vld [vmem:[#allocation5 + $0x110] sm:$0xff] }
 0xe76   : > { %10895 = vmatprep.subr.bf16.mxu0 %v18701_v11  ;;  %v7469_v11 = vld [vmem:[#allocation5 + $0x130] sm:$0xff] }
 0xe78   : > { %10581 = vmatmul.mubr.bf16.gmra.mrb[100].mxu0 %v13658_v17  ;;  %v7501_v17 = vld [vmem:[#allocation5 + $0x230] sm:$0xff] }
 0xe79   : > { %10896 = vmatpush1.bf16.msra.mxu0 %v18698_v53  ;;  %10590 = vmatprep.mubr.bf16.mxu0 %v13667_v43  ;;  %v13674_v53 = vcombine.low %v7457_v42, %v7461_v39  ;;  %v13706_v43 = vcombine.low %v7489_v8, %v7493_v55  ;;  %v22064_v42 = vld [vmem:[#allocation117_spill] sm:$0xff]  ;;  %v13715_v39 = vcombine.high %v7497_v61, %v7501_v17 }
 0xe7a   : > { %10897 = vmatprep.subr.bf16.mxu0 %v18684_v22  ;;  %v13683_v22 = vcombine.high %v7465_v40, %v7469_v11  ;;  %v7553_v55 = vld [vmem:[#allocation5 + $0x3d0] sm:$0xff] }
 0xe7d   : > { %10898 = vmatpush1.bf16.msra.mxu0 %v22047_v15  ;;  %v22066_v15 = vld [vmem:[#allocation122_spill] sm:$0xff] }
 0xe7e   : > { %10899 = vmatprep.subr.bf16.mxu0 %v18735_v62  ;;  %v7473_v62 = vld [vmem:[#allocation5 + $0x150] sm:$0xff] }
 0xe7f   : > { %v13690_v27 = vcombine.low %v7473_v62, %v7477_v34 }
 0xe80   : > { %10591 = vmatmul.mubr.bf16.gmra.mrb[104].mxu0 %v13666_v44  ;;  %v22065_v44 = vld [vmem:[#allocation120_spill] sm:$0xff] }
 0xe81   : > { %10900 = vmatpush1.bf16.msra.mxu0 %v18732_v52  ;;  %10600 = vmatprep.mubr.bf16.mxu0 %v13675_v25  ;;  %v13682_v52 = vcombine.low %v7465_v40, %v7469_v11  ;;  %v22067_v25 = vld [vmem:[#allocation119_spill] sm:$0xff]  ;;  %v7505_v40 = vld [vmem:[#allocation5 + $0x250] sm:$0xff] }
 0xe82   : > { %10901 = vmatprep.subr.bf16.mxu0 %v18718_v51  ;;  %v13691_v51 = vcombine.high %v7473_v62, %v7477_v34  ;;  %v7509_v11 = vld [vmem:[#allocation5 + $0x270] sm:$0xff] }
 0xe83   : > { %v7521_v34 = vld [vmem:[#allocation5 + $0x2d0] sm:$0xff] }
 0xe85   : > { %10902 = vmatpush1.bf16.msra.mxu0 %v22048_v35  ;;  %v22068_v35 = vld [vmem:[#allocation121_spill] sm:$0xff] }
 0xe86   : > { %10903 = vmatprep.subr.bf16.mxu0 %v22049_v38  ;;  %v7513_v38 = vld [vmem:[#allocation5 + $0x290] sm:$0xff] }
 0xe88   : > { %10601 = vmatmul.mubr.bf16.gmra.mrb[108].mxu0 %v13674_v53  ;;  %v13714_v53 = vcombine.low %v7497_v61, %v7501_v17  ;;  %v7569_v17 = vld [vmem:[#allocation5 + $0x450] sm:$0xff] }
 0xe89   : > { %10904 = vmatpush1.bf16.msra.mxu0 %v22050_v47  ;;  %10610 = vmatprep.mubr.bf16.mxu0 %v13683_v22  ;;  %v13723_v22 = vcombine.high %v7505_v40, %v7509_v11  ;;  %v7517_v47 = vld [vmem:[#allocation5 + $0x2b0] sm:$0xff] }
 0xe8a   : > { %10905 = vmatprep.subr.bf16.mxu0 %v22051_v7  ;;  %v13722_v7 = vcombine.low %v7505_v40, %v7509_v11  ;;  %v13731_v62 = vcombine.high %v7513_v38, %v7517_v47  ;;  %v7585_v11 = vld [vmem:[#allocation5 + $0x4d0] sm:$0xff] }
 0xe8d   : > { %10906 = vmatpush1.bf16.msra.mxu0 %v22052_v21  ;;  %v13730_v21 = vcombine.low %v7513_v38, %v7517_v47  ;;  %v7593_v38 = vld [vmem:[#allocation5 + $0x510] sm:$0xff] }
 0xe8e   : > { %10907 = vmatprep.subr.bf16.mxu0 %v22053_v31  ;;  %v7529_v31 = vld [vmem:[#allocation5 + $0x310] sm:$0xff] }
 0xe8f   : > { %v7597_v47 = vld [vmem:[#allocation5 + $0x530] sm:$0xff] }
 0xe90   : > { %10611 = vmatmul.mubr.bf16.gmra.mrb[112].mxu0 %v13682_v52  ;;  %v7525_v52 = vld [vmem:[#allocation5 + $0x2f0] sm:$0xff] }
 0xe91   : > { %10908 = vmatpush1.bf16.msra.mxu0 %v22054_v1  ;;  %10620 = vmatprep.mubr.bf16.mxu0 %v13691_v51  ;;  %v13739_v51 = vcombine.high %v7521_v34, %v7525_v52  ;;  %v7533_v1 = vld [vmem:[#allocation5 + $0x330] sm:$0xff] }
 0xe92   : > { %10909 = vmatprep.subr.bf16.mxu0 %v22055_v48  ;;  %v13738_v48 = vcombine.low %v7521_v34, %v7525_v52  ;;  %v13747_v63 = vcombine.high %v7529_v31, %v7533_v1  ;;  %v7601_v34 = vld [vmem:[#allocation5 + $0x550] sm:$0xff] }
 0xe93   : > { %v7605_v52 = vld [vmem:[#allocation5 + $0x570] sm:$0xff] }
 0xe95   : > { %10910 = vmatpush1.bf16.msra.mxu0 %v22056_v20  ;;  %v13746_v20 = vcombine.low %v7529_v31, %v7533_v1  ;;  %v7609_v31 = vld [vmem:[#allocation5 + $0x590] sm:$0xff] }
 0xe96   : > { %10911 = vmatprep.subr.bf16.mxu0 %v22057_v14  ;;  %v7545_v14 = vld [vmem:[#allocation5 + $0x390] sm:$0xff] }
 0xe97   : > { %v7613_v1 = vld [vmem:[#allocation5 + $0x5b0] sm:$0xff] }
 0xe98   : > { %10621 = vmatmul.mubr.bf16.gmra.mrb[116].mxu0 %v13690_v27  ;;  %v7541_v27 = vld [vmem:[#allocation5 + $0x370] sm:$0xff] }
 0xe99   : > { %10912 = vmatpush1.bf16.msra.mxu0 %v22058_v0  ;;  %10630 = vmatprep.mubr.bf16.mxu0 %v13699_v5  ;;  %v13755_v5 = vcombine.high %v7537_v57, %v7541_v27  ;;  %v7549_v0 = vld [vmem:[#allocation5 + $0x3b0] sm:$0xff] }
 0xe9a   : > { %10913 = vmatprep.subr.bf16.mxu0 %v22059_v36  ;;  %v13754_v36 = vcombine.low %v7537_v57, %v7541_v27  ;;  %v13763_v8 = vcombine.high %v7545_v14, %v7549_v0  ;;  %v7617_v57 = vld [vmem:[#allocation5 + $0x5d0] sm:$0xff] }
 0xe9b   : > { %v7621_v27 = vld [vmem:[#allocation5 + $0x5f0] sm:$0xff] }
 0xe9d   : > { %10914 = vmatpush1.bf16.msra.mxu0 %v22060_v49  ;;  %v13762_v49 = vcombine.low %v7545_v14, %v7549_v0  ;;  %v7625_v14 = vld [vmem:[#allocation5 + $0x610] sm:$0xff] }
 0xe9e   : > { %10915 = vmatprep.subr.bf16.mxu0 %v22061_v3  ;;  %v7561_v3 = vld [vmem:[#allocation5 + $0x410] sm:$0xff] }
 0xe9f   : > { %v7629_v0 = vld [vmem:[#allocation5 + $0x630] sm:$0xff] }
 0xea0   : > { %10631 = vmatmul.mubr.bf16.gmra.mrb[120].mxu0 %v13698_v12  ;;  %v7557_v12 = vld [vmem:[#allocation5 + $0x3f0] sm:$0xff] }
 0xea1   : > { %10916 = vmatpush1.bf16.msra.mxu0 %v22062_v58  ;;  %10640 = vmatprep.mubr.bf16.mxu0 %v13707_v19  ;;  %v13771_v19 = vcombine.high %v7553_v55, %v7557_v12  ;;  %v7565_v58 = vld [vmem:[#allocation5 + $0x430] sm:$0xff] }
 0xea2   : > { %10917 = vmatprep.subr.bf16.mxu0 %v22063_v41  ;;  %v13770_v41 = vcombine.low %v7553_v55, %v7557_v12  ;;  %v13779_v61 = vcombine.high %v7561_v3, %v7565_v58  ;;  %v7633_v55 = vld [vmem:[#allocation5 + $0x650] sm:$0xff] }
 0xea3   : > { %v7637_v12 = vld [vmem:[#allocation5 + $0x670] sm:$0xff] }
 0xea5   : > { %10918 = vmatpush1.bf16.msra.mxu0 %v22064_v42  ;;  %v13778_v42 = vcombine.low %v7561_v3, %v7565_v58  ;;  %v7641_v3 = vld [vmem:[#allocation5 + $0x690] sm:$0xff] }
 0xea6   : > { %10919 = vmatprep.subr.bf16.mxu0 %v22065_v44  ;;  %v7577_v44 = vld [vmem:[#allocation5 + $0x490] sm:$0xff] }
 0xea7   : > { %v7645_v58 = vld [vmem:[#allocation5 + $0x6b0] sm:$0xff] }
 0xea8   : > { %10641 = vmatmul.mubr.bf16.gmra.mrb[124].mxu0 %v13706_v43  ;;  %v7573_v43 = vld [vmem:[#allocation5 + $0x470] sm:$0xff] }
 0xea9   : > { %10920 = vmatpush1.bf16.msra.mxu0 %v22066_v15  ;;  %10650 = vmatprep.mubr.bf16.mxu0 %v13715_v39  ;;  %v13787_v39 = vcombine.high %v7569_v17, %v7573_v43  ;;  %v7581_v15 = vld [vmem:[#allocation5 + $0x4b0] sm:$0xff] }
 0xeaa   : > { %10921 = vmatprep.subr.bf16.mxu0 %v22067_v25  ;;  %v13786_v25 = vcombine.low %v7569_v17, %v7573_v43  ;;  %v13795_v40 = vcombine.high %v7577_v44, %v7581_v15  ;;  %v7649_v17 = vld [vmem:[#allocation5 + $0x6d0] sm:$0xff] }
 0xeab   : > { %v7653_v43 = vld [vmem:[#allocation5 + $0x6f0] sm:$0xff] }
 0xead   : > { %10922 = vmatpush1.bf16.msra.mxu0 %v22068_v35  ;;  %v13794_v35 = vcombine.low %v7577_v44, %v7581_v15  ;;  %v7657_v44 = vld [vmem:[#allocation5 + $0x710] sm:$0xff] }
 0xeae   : > { %v7661_v15 = vld [vmem:[#allocation5 + $0x730] sm:$0xff] }
 0xeb0   : > { %10651 = vmatmul.mubr.bf16.gmra.mrb[128].mxu0 %v13714_v53  ;;  %v7589_v53 = vld [vmem:[#allocation5 + $0x4f0] sm:$0xff] }
 0xeb1   : > { %10660 = vmatprep.mubr.bf16.mxu0 %v13723_v22  ;;  %v13803_v22 = vcombine.high %v7585_v11, %v7589_v53 }
 0xeb8   : > { %10661 = vmatmul.mubr.bf16.gmra.mrb[132].mxu0 %v13722_v7  ;;  %v13802_v7 = vcombine.low %v7585_v11, %v7589_v53  ;;  %v7665_v11 = vld [vmem:[#allocation5 + $0x750] sm:$0xff] }
 0xeb9   : > { %10670 = vmatprep.mubr.bf16.mxu0 %v13731_v62  ;;  %v13811_v62 = vcombine.high %v7593_v38, %v7597_v47  ;;  %v7669_v53 = vld [vmem:[#allocation5 + $0x770] sm:$0xff] }
 0xec0   : > { %10671 = vmatmul.mubr.bf16.gmra.mrb[136].mxu0 %v13730_v21  ;;  %v13810_v21 = vcombine.low %v7593_v38, %v7597_v47  ;;  %v7673_v38 = vld [vmem:[#allocation5 + $0x790] sm:$0xff] }
 0xec1   : > { %10680 = vmatprep.mubr.bf16.mxu0 %v13739_v51  ;;  %v13819_v51 = vcombine.high %v7601_v34, %v7605_v52  ;;  %v7677_v47 = vld [vmem:[#allocation5 + $0x7b0] sm:$0xff] }
 0xec8   : > { %10681 = vmatmul.mubr.bf16.gmra.mrb[140].mxu0 %v13738_v48  ;;  %v13818_v48 = vcombine.low %v7601_v34, %v7605_v52  ;;  %v7681_v34 = vld [vmem:[#allocation5 + $0x7d0] sm:$0xff] }
 0xec9   : > { %10690 = vmatprep.mubr.bf16.mxu0 %v13747_v63  ;;  %v13827_v63 = vcombine.high %v7609_v31, %v7613_v1  ;;  %v7685_v52 = vld [vmem:[#allocation5 + $0x7f0] sm:$0xff] }
 0xed0   : > { %10691 = vmatmul.mubr.bf16.gmra.mrb[144].mxu0 %v13746_v20  ;;  %v13826_v20 = vcombine.low %v7609_v31, %v7613_v1  ;;  %v7434_v31 = vld [vmem:[#allocation5 + $0x18] sm:$0xff] }
 0xed1   : > { %10700 = vmatprep.mubr.bf16.mxu0 %v13755_v5  ;;  %v13835_v5 = vcombine.high %v7617_v57, %v7621_v27  ;;  %v7438_v1 = vld [vmem:[#allocation5 + $0x38] sm:$0xff] }
 0xed8   : > { %10701 = vmatmul.mubr.bf16.gmra.mrb[148].mxu0 %v13754_v36  ;;  %v13834_v36 = vcombine.low %v7617_v57, %v7621_v27  ;;  %v7442_v57 = vld [vmem:[#allocation5 + $0x58] sm:$0xff] }
 0xed9   : > { %10710 = vmatprep.mubr.bf16.mxu0 %v13763_v8  ;;  %v13843_v8 = vcombine.high %v7625_v14, %v7629_v0  ;;  %v7446_v27 = vld [vmem:[#allocation5 + $0x78] sm:$0xff] }
 0xee0   : > { %10711 = vmatmul.mubr.bf16.gmra.mrb[152].mxu0 %v13762_v49  ;;  %v13842_v49 = vcombine.low %v7625_v14, %v7629_v0  ;;  %v7450_v14 = vld [vmem:[#allocation5 + $0x98] sm:$0xff] }
 0xee1   : > { %10720 = vmatprep.mubr.bf16.mxu0 %v13771_v19  ;;  %v13851_v19 = vcombine.high %v7633_v55, %v7637_v12  ;;  %v7454_v0 = vld [vmem:[#allocation5 + $0xb8] sm:$0xff] }
 0xee8   : > { %10721 = vmatmul.mubr.bf16.gmra.mrb[156].mxu0 %v13770_v41  ;;  %v13850_v41 = vcombine.low %v7633_v55, %v7637_v12  ;;  %v7458_v55 = vld [vmem:[#allocation5 + $0xd8] sm:$0xff] }
 0xee9   : > { %10730 = vmatprep.mubr.bf16.mxu0 %v13779_v61  ;;  %v13859_v61 = vcombine.high %v7641_v3, %v7645_v58  ;;  %v7462_v12 = vld [vmem:[#allocation5 + $0xf8] sm:$0xff] }
 0xef0   : > { %10731 = vmatmul.mubr.bf16.gmra.mrb[160].mxu0 %v13778_v42  ;;  %v13858_v42 = vcombine.low %v7641_v3, %v7645_v58  ;;  %v7466_v3 = vld [vmem:[#allocation5 + $0x118] sm:$0xff] }
 0xef1   : > { %10740 = vmatprep.mubr.bf16.mxu0 %v13787_v39  ;;  %v13867_v39 = vcombine.high %v7649_v17, %v7653_v43  ;;  %v7470_v58 = vld [vmem:[#allocation5 + $0x138] sm:$0xff] }
 0xef8   : > { %10741 = vmatmul.mubr.bf16.gmra.mrb[164].mxu0 %v13786_v25  ;;  %v13866_v25 = vcombine.low %v7649_v17, %v7653_v43  ;;  %v7474_v17 = vld [vmem:[#allocation5 + $0x158] sm:$0xff] }
 0xef9   : > { %10750 = vmatprep.mubr.bf16.mxu0 %v13795_v40  ;;  %v13875_v40 = vcombine.high %v7657_v44, %v7661_v15  ;;  %v7478_v43 = vld [vmem:[#allocation5 + $0x178] sm:$0xff] }
 0xf00   : > { %10751 = vmatmul.mubr.bf16.gmra.mrb[168].mxu0 %v13794_v35  ;;  %v13874_v35 = vcombine.low %v7657_v44, %v7661_v15  ;;  %v7482_v44 = vld [vmem:[#allocation5 + $0x198] sm:$0xff] }
 0xf01   : > { %10760 = vmatprep.mubr.bf16.mxu0 %v13803_v22  ;;  %v13883_v22 = vcombine.high %v7665_v11, %v7669_v53  ;;  %v7486_v15 = vld [vmem:[#allocation5 + $0x1b8] sm:$0xff] }
 0xf08   : > { %10761 = vmatmul.mubr.bf16.gmra.mrb[172].mxu0 %v13802_v7  ;;  %v13882_v7 = vcombine.low %v7665_v11, %v7669_v53  ;;  %v7490_v11 = vld [vmem:[#allocation5 + $0x1d8] sm:$0xff] }
 0xf09   : > { %10770 = vmatprep.mubr.bf16.mxu0 %v13811_v62  ;;  %v13891_v62 = vcombine.high %v7673_v38, %v7677_v47  ;;  %v7494_v53 = vld [vmem:[#allocation5 + $0x1f8] sm:$0xff] }
 0xf10   : > { %10771 = vmatmul.mubr.bf16.gmra.mrb[176].mxu0 %v13810_v21  ;;  %v13890_v21 = vcombine.low %v7673_v38, %v7677_v47  ;;  %v7498_v38 = vld [vmem:[#allocation5 + $0x218] sm:$0xff] }
 0xf11   : > { %10780 = vmatprep.mubr.bf16.mxu0 %v13819_v51  ;;  %v13899_v51 = vcombine.high %v7681_v34, %v7685_v52  ;;  %v7502_v47 = vld [vmem:[#allocation5 + $0x238] sm:$0xff] }
 0xf18   : > { %10781 = vmatmul.mubr.bf16.gmra.mrb[180].mxu0 %v13818_v48  ;;  %v13898_v48 = vcombine.low %v7681_v34, %v7685_v52  ;;  %v7506_v34 = vld [vmem:[#allocation5 + $0x258] sm:$0xff] }
 0xf19   : > { %10790 = vmatprep.mubr.bf16.mxu0 %v13827_v63  ;;  %v13653_v63 = vcombine.high %v7434_v31, %v7438_v1  ;;  %v7510_v52 = vld [vmem:[#allocation5 + $0x278] sm:$0xff] }
 0xf20   : > { %10791 = vmatmul.mubr.bf16.gmra.mrb[184].mxu0 %v13826_v20  ;;  %v13652_v20 = vcombine.low %v7434_v31, %v7438_v1  ;;  %v7514_v31 = vld [vmem:[#allocation5 + $0x298] sm:$0xff] }
 0xf21   : > { %10800 = vmatprep.mubr.bf16.mxu0 %v13835_v5  ;;  %v13661_v5 = vcombine.high %v7442_v57, %v7446_v27  ;;  %v7518_v1 = vld [vmem:[#allocation5 + $0x2b8] sm:$0xff] }
 0xf28   : > { %10801 = vmatmul.mubr.bf16.gmra.mrb[188].mxu0 %v13834_v36  ;;  %v13660_v36 = vcombine.low %v7442_v57, %v7446_v27  ;;  %v7522_v57 = vld [vmem:[#allocation5 + $0x2d8] sm:$0xff] }
 0xf29   : > { %10810 = vmatprep.mubr.bf16.mxu0 %v13843_v8  ;;  %v13669_v8 = vcombine.high %v7450_v14, %v7454_v0  ;;  %v7526_v27 = vld [vmem:[#allocation5 + $0x2f8] sm:$0xff] }
 0xf30   : > { %10811 = vmatmul.mubr.bf16.gmra.mrb[192].mxu0 %v13842_v49  ;;  %v13668_v49 = vcombine.low %v7450_v14, %v7454_v0  ;;  %v7530_v14 = vld [vmem:[#allocation5 + $0x318] sm:$0xff] }
 0xf31   : > { %10820 = vmatprep.mubr.bf16.mxu0 %v13851_v19  ;;  %v13677_v19 = vcombine.high %v7458_v55, %v7462_v12  ;;  %v7534_v0 = vld [vmem:[#allocation5 + $0x338] sm:$0xff] }
 0xf38   : > { %10821 = vmatmul.mubr.bf16.gmra.mrb[196].mxu0 %v13850_v41  ;;  %v13676_v41 = vcombine.low %v7458_v55, %v7462_v12  ;;  %v7538_v55 = vld [vmem:[#allocation5 + $0x358] sm:$0xff] }
 0xf39   : > { %10830 = vmatprep.mubr.bf16.mxu0 %v13859_v61  ;;  %v13685_v61 = vcombine.high %v7466_v3, %v7470_v58  ;;  %v7542_v12 = vld [vmem:[#allocation5 + $0x378] sm:$0xff] }
 0xf40   : > { %10831 = vmatmul.mubr.bf16.gmra.mrb[200].mxu0 %v13858_v42  ;;  %v13684_v42 = vcombine.low %v7466_v3, %v7470_v58  ;;  %v7546_v3 = vld [vmem:[#allocation5 + $0x398] sm:$0xff] }
 0xf41   : > { %10840 = vmatprep.mubr.bf16.mxu0 %v13867_v39  ;;  %v13693_v39 = vcombine.high %v7474_v17, %v7478_v43  ;;  %v7550_v58 = vld [vmem:[#allocation5 + $0x3b8] sm:$0xff] }
 0xf48   : > { %10841 = vmatmul.mubr.bf16.gmra.mrb[204].mxu0 %v13866_v25  ;;  %v13692_v25 = vcombine.low %v7474_v17, %v7478_v43  ;;  %v7554_v17 = vld [vmem:[#allocation5 + $0x3d8] sm:$0xff] }
 0xf49   : > { %10850 = vmatprep.mubr.bf16.mxu0 %v13875_v40  ;;  %v13701_v40 = vcombine.high %v7482_v44, %v7486_v15  ;;  %v7558_v43 = vld [vmem:[#allocation5 + $0x3f8] sm:$0xff] }
 0xf50   : > { %10851 = vmatmul.mubr.bf16.gmra.mrb[208].mxu0 %v13874_v35  ;;  %v13700_v35 = vcombine.low %v7482_v44, %v7486_v15  ;;  %v7562_v44 = vld [vmem:[#allocation5 + $0x418] sm:$0xff] }
 0xf51   : > { %10860 = vmatprep.mubr.bf16.mxu0 %v13883_v22  ;;  %v13709_v22 = vcombine.high %v7490_v11, %v7494_v53  ;;  %v7566_v15 = vld [vmem:[#allocation5 + $0x438] sm:$0xff] }
 0xf58   : > { %10861 = vmatmul.mubr.bf16.gmra.mrb[212].mxu0 %v13882_v7  ;;  %v13708_v7 = vcombine.low %v7490_v11, %v7494_v53  ;;  %v7570_v11 = vld [vmem:[#allocation5 + $0x458] sm:$0xff] }
 0xf59   : > { %10870 = vmatprep.mubr.bf16.mxu0 %v13891_v62  ;;  %v13717_v62 = vcombine.high %v7498_v38, %v7502_v47  ;;  %v7574_v53 = vld [vmem:[#allocation5 + $0x478] sm:$0xff] }
 0xf60   : > { %10871 = vmatmul.mubr.bf16.gmra.mrb[216].mxu0 %v13890_v21  ;;  %v13716_v21 = vcombine.low %v7498_v38, %v7502_v47  ;;  %v7578_v38 = vld [vmem:[#allocation5 + $0x498] sm:$0xff] }
 0xf61   : > { %10880 = vmatprep.mubr.bf16.mxu0 %v13899_v51  ;;  %v13725_v51 = vcombine.high %v7506_v34, %v7510_v52  ;;  %v7582_v47 = vld [vmem:[#allocation5 + $0x4b8] sm:$0xff] }
 0xf68   : > { %10881 = vmatmul.mubr.bf16.gmra.mrb[220].mxu0 %v13898_v48  ;;  %v13724_v48 = vcombine.low %v7506_v34, %v7510_v52  ;;  %v7586_v34 = vld [vmem:[#allocation5 + $0x4d8] sm:$0xff] }
 0xf69   : > { %10923 = vmatprep.mubr.bf16.mxu0 %v13653_v63  ;;  %v13733_v63 = vcombine.high %v7514_v31, %v7518_v1  ;;  %v7590_v52 = vld [vmem:[#allocation5 + $0x4f8] sm:$0xff] }
 0xf70   : > { %10924 = vmatmul.mubr.bf16.vlgmr.msra.gmra.mrb[96].mxu0 %v13652_v20  ;;  %v13732_v20 = vcombine.low %v7514_v31, %v7518_v1  ;;  %v7594_v31 = vld [vmem:[#allocation5 + $0x518] sm:$0xff] }
 0xf71   : > { %10933 = vmatprep.mubr.bf16.mxu0 %v13661_v5  ;;  %v13741_v5 = vcombine.high %v7522_v57, %v7526_v27  ;;  %v7598_v1 = vld [vmem:[#allocation5 + $0x538] sm:$0xff] }
 0xf78   : > { %10934 = vmatmul.mubr.bf16.gmra.mrb[100].mxu0 %v13660_v36  ;;  %v13740_v36 = vcombine.low %v7522_v57, %v7526_v27  ;;  %v7602_v57 = vld [vmem:[#allocation5 + $0x558] sm:$0xff] }
 0xf79   : > { %10943 = vmatprep.mubr.bf16.mxu0 %v13669_v8  ;;  %v13749_v8 = vcombine.high %v7530_v14, %v7534_v0  ;;  %v7606_v27 = vld [vmem:[#allocation5 + $0x578] sm:$0xff] }
 0xf80   : > { %10944 = vmatmul.mubr.bf16.gmra.mrb[104].mxu0 %v13668_v49  ;;  %v13748_v49 = vcombine.low %v7530_v14, %v7534_v0  ;;  %v7610_v14 = vld [vmem:[#allocation5 + $0x598] sm:$0xff] }
 0xf81   : > { %10953 = vmatprep.mubr.bf16.mxu0 %v13677_v19  ;;  %v13757_v19 = vcombine.high %v7538_v55, %v7542_v12  ;;  %v7614_v0 = vld [vmem:[#allocation5 + $0x5b8] sm:$0xff] }
 0xf88   : > { %10954 = vmatmul.mubr.bf16.gmra.mrb[108].mxu0 %v13676_v41  ;;  %v13756_v41 = vcombine.low %v7538_v55, %v7542_v12  ;;  %v7618_v55 = vld [vmem:[#allocation5 + $0x5d8] sm:$0xff] }
 0xf89   : > { %10963 = vmatprep.mubr.bf16.mxu0 %v13685_v61  ;;  %v13765_v61 = vcombine.high %v7546_v3, %v7550_v58  ;;  %v7622_v12 = vld [vmem:[#allocation5 + $0x5f8] sm:$0xff] }
 0xf90   : > { %10964 = vmatmul.mubr.bf16.gmra.mrb[112].mxu0 %v13684_v42  ;;  %v13764_v42 = vcombine.low %v7546_v3, %v7550_v58  ;;  %v7626_v3 = vld [vmem:[#allocation5 + $0x618] sm:$0xff] }
 0xf91   : > { %10973 = vmatprep.mubr.bf16.mxu0 %v13693_v39  ;;  %v13773_v39 = vcombine.high %v7554_v17, %v7558_v43  ;;  %v7630_v58 = vld [vmem:[#allocation5 + $0x638] sm:$0xff] }
 0xf98   : > { %10974 = vmatmul.mubr.bf16.gmra.mrb[116].mxu0 %v13692_v25  ;;  %v13772_v25 = vcombine.low %v7554_v17, %v7558_v43  ;;  %v7634_v17 = vld [vmem:[#allocation5 + $0x658] sm:$0xff] }
 0xf99   : > { %10983 = vmatprep.mubr.bf16.mxu0 %v13701_v40  ;;  %v13781_v40 = vcombine.high %v7562_v44, %v7566_v15  ;;  %v7638_v43 = vld [vmem:[#allocation5 + $0x678] sm:$0xff] }
 0xfa0   : > { %10984 = vmatmul.mubr.bf16.gmra.mrb[120].mxu0 %v13700_v35  ;;  %v13780_v35 = vcombine.low %v7562_v44, %v7566_v15  ;;  %v7642_v44 = vld [vmem:[#allocation5 + $0x698] sm:$0xff] }
 0xfa1   : > { %10993 = vmatprep.mubr.bf16.mxu0 %v13709_v22  ;;  %v13789_v22 = vcombine.high %v7570_v11, %v7574_v53  ;;  %v7646_v15 = vld [vmem:[#allocation5 + $0x6b8] sm:$0xff] }
 0xfa8   : > { %10994 = vmatmul.mubr.bf16.gmra.mrb[124].mxu0 %v13708_v7  ;;  %v13788_v7 = vcombine.low %v7570_v11, %v7574_v53  ;;  %v7650_v11 = vld [vmem:[#allocation5 + $0x6d8] sm:$0xff] }
 0xfa9   : > { %11003 = vmatprep.mubr.bf16.mxu0 %v13717_v62  ;;  %v13797_v62 = vcombine.high %v7578_v38, %v7582_v47  ;;  %v7654_v53 = vld [vmem:[#allocation5 + $0x6f8] sm:$0xff] }
 0xfb0   : > { %11004 = vmatmul.mubr.bf16.gmra.mrb[128].mxu0 %v13716_v21  ;;  %v13796_v21 = vcombine.low %v7578_v38, %v7582_v47  ;;  %v7658_v38 = vld [vmem:[#allocation5 + $0x718] sm:$0xff] }
 0xfb1   : > { %11013 = vmatprep.mubr.bf16.mxu0 %v13725_v51  ;;  %v13805_v51 = vcombine.high %v7586_v34, %v7590_v52  ;;  %v7662_v47 = vld [vmem:[#allocation5 + $0x738] sm:$0xff] }
 0xfb8   : > { %11014 = vmatmul.mubr.bf16.gmra.mrb[132].mxu0 %v13724_v48  ;;  %v13804_v48 = vcombine.low %v7586_v34, %v7590_v52  ;;  %v13868_v34 = vcombine.low %v7650_v11, %v7654_v53 }
 0xfb9   : > { %11023 = vmatprep.mubr.bf16.mxu0 %v13733_v63  ;;  %v13813_v63 = vcombine.high %v7594_v31, %v7598_v1 }
 0xfc0   : > { %11024 = vmatmul.mubr.bf16.gmra.mrb[136].mxu0 %v13732_v20  ;;  %v13812_v20 = vcombine.low %v7594_v31, %v7598_v1 }
 0xfc1   : > { %11033 = vmatprep.mubr.bf16.mxu0 %v13741_v5  ;;  %v13821_v5 = vcombine.high %v7602_v57, %v7606_v27 }
 0xfc8   : > { %11034 = vmatmul.mubr.bf16.gmra.mrb[140].mxu0 %v13740_v36  ;;  %v13820_v36 = vcombine.low %v7602_v57, %v7606_v27 }
 0xfc9   : > { %11043 = vmatprep.mubr.bf16.mxu0 %v13749_v8  ;;  %v13829_v8 = vcombine.high %v7610_v14, %v7614_v0 }
 0xfd0   : > { %11044 = vmatmul.mubr.bf16.gmra.mrb[144].mxu0 %v13748_v49  ;;  %v13828_v49 = vcombine.low %v7610_v14, %v7614_v0  ;;  %v7670_v14 = vld [vmem:[#allocation5 + $0x778] sm:$0xff]  ;;  %v15696_v0 = vld [vmem:[#allocation8 + $0x4] ss:$16 sps:$4 sm:$0xff]  }
 0xfd1   : > { %11053 = vmatprep.mubr.bf16.mxu0 %v13757_v19  ;;  %v13837_v19 = vcombine.high %v7618_v55, %v7622_v12  ;;  %12108 = vmatprep.mubr.bf16.mxu1 %v15696_v0 }
 0xfd8   : > { %11054 = vmatmul.mubr.bf16.gmra.mrb[148].mxu0 %v13756_v41  ;;  %v13836_v41 = vcombine.low %v7618_v55, %v7622_v12  ;;  %v20776_v55 = vpop.permute.xlu0 %8279 }
 0xfd9   : > { %11063 = vmatprep.mubr.bf16.mxu0 %v13765_v61  ;;  %v13845_v61 = vcombine.high %v7626_v3, %v7630_v58 }
 0xfe0   : > { %11064 = vmatmul.mubr.bf16.gmra.mrb[152].mxu0 %v13764_v42  ;;  %v13844_v42 = vcombine.low %v7626_v3, %v7630_v58 }
 0xfe1   : > { %11073 = vmatprep.mubr.bf16.mxu0 %v13773_v39  ;;  %v13853_v39 = vcombine.high %v7634_v17, %v7638_v43 }
 0xfe8   : > { %11074 = vmatmul.mubr.bf16.gmra.mrb[156].mxu0 %v13772_v25  ;;  %v13852_v25 = vcombine.low %v7634_v17, %v7638_v43 }
 0xfe9   : > { %11083 = vmatprep.mubr.bf16.mxu0 %v13781_v40  ;;  %v13861_v40 = vcombine.high %v7642_v44, %v7646_v15 }
 0xff0   : > { %11084 = vmatmul.mubr.bf16.gmra.mrb[160].mxu0 %v13780_v35  ;;  %v13860_v35 = vcombine.low %v7642_v44, %v7646_v15  ;;  %v20786_v44 = vpop.permute.xlu0 %8304 }
 0xff1   : > { %11093 = vmatprep.mubr.bf16.mxu0 %v13789_v22  ;;  %v13869_v22 = vcombine.high %v7650_v11, %v7654_v53 }
 0xff8   : > { %11094 = vmatmul.mubr.bf16.gmra.mrb[164].mxu0 %v13788_v7 }
 0xff9   : > { %11103 = vmatprep.mubr.bf16.mxu0 %v13797_v62 }
0x1000   : > { %11104 = vmatmul.mubr.bf16.gmra.mrb[168].mxu0 %v13796_v21  ;;  %v13877_v21 = vcombine.high %v7658_v38, %v7662_v47 }
0x1001   : > { %11113 = vmatprep.mubr.bf16.mxu0 %v13805_v51 }
0x1008   : > { %11114 = vmatmul.mubr.bf16.gmra.mrb[172].mxu0 %v13804_v48 }
0x1009   : > { %11123 = vmatprep.mubr.bf16.mxu0 %v13813_v63 }
0x1010   : > { %11124 = vmatmul.mubr.bf16.gmra.mrb[176].mxu0 %v13812_v20 }
0x1011   : > { %11133 = vmatprep.mubr.bf16.mxu0 %v13821_v5  ;;  %v7666_v5 = vld [vmem:[#allocation5 + $0x758] sm:$0xff] }
0x1012   : > { %v13885_v3 = vcombine.high %v7666_v5, %v7670_v14 }
0x1018   : > { %11134 = vmatmul.mubr.bf16.gmra.mrb[180].mxu0 %v13820_v36 }
0x1019   : > { %11143 = vmatprep.mubr.bf16.mxu0 %v13829_v8 }
0x1020   : > { %11144 = vmatmul.mubr.bf16.gmra.mrb[184].mxu0 %v13828_v49  ;;  %v13876_v49 = vcombine.low %v7658_v38, %v7662_v47 }
0x1021   : > { %11153 = vmatprep.mubr.bf16.mxu0 %v13837_v19 }
0x1028   : > { %11154 = vmatmul.mubr.bf16.gmra.mrb[188].mxu0 %v13836_v41 }
0x1029   : > { %11163 = vmatprep.mubr.bf16.mxu0 %v13845_v61 }
0x1030   : > { %11164 = vmatmul.mubr.bf16.gmra.mrb[192].mxu0 %v13844_v42 }
0x1031   : > { %11173 = vmatprep.mubr.bf16.mxu0 %v13853_v39 }
0x1038   : > { %11174 = vmatmul.mubr.bf16.gmra.mrb[196].mxu0 %v13852_v25  ;;  %v7674_v25 = vld [vmem:[#allocation5 + $0x798] sm:$0xff] }
0x1039   : > { %11183 = vmatprep.mubr.bf16.mxu0 %v13861_v40  ;;  %v7678_v40 = vld [vmem:[#allocation5 + $0x7b8] sm:$0xff] }
0x103a   : > { %v13893_v47 = vcombine.high %v7674_v25, %v7678_v40 }
0x1040   : > { %11184 = vmatmul.mubr.bf16.gmra.mrb[200].mxu0 %v13860_v35 }
0x1041   : > { %11193 = vmatprep.mubr.bf16.mxu0 %v13869_v22  ;;  %v13884_v22 = vcombine.low %v7666_v5, %v7670_v14  ;;  %v13892_v14 = vcombine.low %v7674_v25, %v7678_v40 }
0x1043   : > { %v10925_v7 = vpop.f32.mrb[96].mxu0 }
0x1044   : > { %v10927_v62 = vpop.f32.mrb[97].mxu0  ;;  %v14413_v51 = vadd.f32 %v10925_v7, %v20663_v23 }
0x1045   : > { %v10929_v52 = vpop.f32.mrb[98].mxu0  ;;  %v14414_v48 = vadd.f32 %v10927_v62, %v20663_v23  ;;  %v20778_v23 = vpop.permute.xlu1 %8274 }
0x1046   : > { %v14415_v31 = vadd.f32 %v10929_v52, %v20672_v54  ;;  %v10931_v1 = vpop.f32.mrb[99].mxu0 }
0x1047   : > { %v14416_v63 = vadd.f32 %v10931_v1, %v20672_v54 }
0x1048   : > { %v11244_v57 = vpack.c.bf16 %v14415_v31, %v14413_v51  ;;  %11194 = vmatmul.mubr.bf16.gmra.mrb[204].mxu0 %v13868_v34 }
0x1049   : > { %v11245_v27 = vpack.c.bf16 %v14416_v63, %v14414_v48  ;;  %11203 = vmatprep.mubr.bf16.mxu0 %v13877_v21  ;;  %v20789_v11 = vpop.permute.xlu1 %8289 }
0x104a   : > { %v11564_v20 = vadd.bf16 %v20501_v18, %v11244_v57  ;;  %v7682_v57 = vld [vmem:[#allocation5 + $0x7d8] sm:$0xff] }
0x104b   : > { %v11565_v36 = vadd.bf16 %v20501_v18, %v11245_v27  ;;  %v10935_v8 = vpop.f32.mrb[100].mxu0  ;;  %v7686_v27 = vld [vmem:[#allocation5 + $0x7f8] sm:$0xff] }
0x104c   : > { %v10937_v12 = vpop.f32.mrb[101].mxu0  ;;  %v11628_v58 = vmax.bf16 %v21547_v4, %v11564_v20  ;;  %v14417_v41 = vadd.f32 %v10935_v8, %v20638_v28 }
0x104d   : > { %v10939_v54 = vpop.f32.mrb[102].mxu0  ;;  %v11629_v19 = vmax.bf16 %v21547_v4, %v11565_v36  ;;  %v14418_v18 = vadd.f32 %v10937_v12, %v20638_v28  ;;  %v20800_v1 = vpop.permute.xlu1 %8294  ;;  %v13901_v36 = vcombine.high %v7682_v57, %v7686_v27 }
0x104e   : > { %v14419_v61 = vadd.f32 %v10939_v54, %v20647_v29  ;;  %v10941_v17 = vpop.f32.mrb[103].mxu0 }
0x104f   : > { %v14420_v43 = vadd.f32 %v10941_v17, %v20647_v29  ;;  %12076 = vmatprep.subr.bf16.mxu1 %v11629_v19 }
0x1050   : > { %v11246_v42 = vpack.c.bf16 %v14419_v61, %v14417_v41  ;;  %11204 = vmatmul.mubr.bf16.gmra.mrb[208].mxu0 %v13876_v49  ;;  %12077 = vmatpush1.bf16.msra.mxu1 %v11628_v58 }
0x1051   : > { %v11247_v39 = vpack.c.bf16 %v14420_v43, %v14418_v18  ;;  %11213 = vmatprep.mubr.bf16.mxu0 %v13885_v3  ;;  %v20810_v3 = vpop.permute.xlu1 %8309 }
0x1052   : > { %v11566_v15 = vadd.bf16 %v20511_v30, %v11246_v42 }
0x1053   : > { %v11567_v53 = vadd.bf16 %v20511_v30, %v11247_v39  ;;  %v10945_v35 = vpop.f32.mrb[104].mxu0  ;;  %v20798_v30 = vpop.permute.xlu0 %8299 }
0x1054   : > { %v10947_v28 = vpop.f32.mrb[105].mxu0  ;;  %v11630_v7 = vmax.bf16 %v21547_v4, %v11566_v15  ;;  %v14421_v62 = vadd.f32 %v10945_v35, %v20716_v46  ;;  %v13900_v15 = vcombine.low %v7682_v57, %v7686_v27 }
0x1055   : > { %v10949_v29 = vpop.f32.mrb[106].mxu0  ;;  %v11631_v38 = vmax.bf16 %v21547_v4, %v11567_v53  ;;  %v14422_v21 = vadd.f32 %v10947_v28, %v20716_v46  ;;  %v20818_v25 = vpop.permute.xlu1 %8314 }
0x1056   : > { %v14423_v34 = vadd.f32 %v10949_v29, %v20707_v45  ;;  %v10951_v52 = vpop.f32.mrb[107].mxu0 }
0x1057   : > { %v14424_v51 = vadd.f32 %v10951_v52, %v20707_v45  ;;  %12078 = vmatprep.subr.bf16.mxu1 %v11631_v38  ;;  %v20805_v8 = vpop.permute.xlu0 %8324 }
0x1058   : > { %v11248_v31 = vpack.c.bf16 %v14423_v34, %v14421_v62  ;;  %11214 = vmatmul.mubr.bf16.gmra.mrb[212].mxu0 %v13884_v22  ;;  %12079 = vmatpush1.bf16.msra.mxu1 %v11630_v7 }
0x1059   : > { %v11249_v48 = vpack.c.bf16 %v14424_v51, %v14422_v21  ;;  %11223 = vmatprep.mubr.bf16.mxu0 %v13893_v47  ;;  %v20829_v62 = vpop.permute.xlu1 %8329 }
0x105a   : > { %v11568_v63 = vadd.bf16 %v20509_v50, %v11248_v31 }
0x105b   : > { %v11569_v20 = vadd.bf16 %v20509_v50, %v11249_v48  ;;  %v10955_v5 = vpop.f32.mrb[108].mxu0  ;;  %v20816_v42 = vpop.permute.xlu0 %8319 }
0x105c   : > { %v10957_v46 = vpop.f32.mrb[109].mxu0  ;;  %v11632_v12 = vmax.bf16 %v21547_v4, %v11568_v63  ;;  %v14425_v49 = vadd.f32 %v10955_v5, %v20688_v37 }
0x105d   : > { %v10959_v45 = vpop.f32.mrb[110].mxu0  ;;  %v11633_v0 = vmax.bf16 %v21547_v4, %v11569_v20  ;;  %v14426_v50 = vadd.f32 %v10957_v46, %v20688_v37  ;;  %v20840_v5 = vpop.permute.xlu1 %8334 }
0x105e   : > { %v14427_v54 = vadd.f32 %v10959_v45, %v20726_v26  ;;  %v10961_v19 = vpop.f32.mrb[111].mxu0 }
0x105f   : > { %v14428_v58 = vadd.f32 %v10961_v19, %v20726_v26  ;;  %12080 = vmatprep.subr.bf16.mxu1 %v11633_v0  ;;  %v20826_v47 = vpop.permute.xlu0 %8344 }
0x1060   : > { %v11250_v41 = vpack.c.bf16 %v14427_v54, %v14425_v49  ;;  %11224 = vmatmul.mubr.bf16.gmra.mrb[216].mxu0 %v13892_v14  ;;  %12081 = vmatpush1.bf16.msra.mxu1 %v11632_v12 }
0x1061   : > { %v11251_v61 = vpack.c.bf16 %v14428_v58, %v14426_v50  ;;  %11233 = vmatprep.mubr.bf16.mxu0 %v13901_v36  ;;  %v20850_v58 = vpop.permute.xlu1 %8349 }
0x1062   : > { %v11570_v17 = vadd.bf16 %v20533_v2, %v11250_v41 }
0x1063   : > { %v11571_v18 = vadd.bf16 %v20533_v2, %v11251_v61  ;;  %v10965_v43 = vpop.f32.mrb[112].mxu0  ;;  %v20838_v20 = vpop.permute.xlu0 %8339 }
0x1064   : > { %v10967_v39 = vpop.f32.mrb[113].mxu0  ;;  %v11634_v40 = vmax.bf16 %v21547_v4, %v11570_v17  ;;  %v14429_v53 = vadd.f32 %v10965_v43, %v20778_v23 }
0x1065   : > { %v10969_v37 = vpop.f32.mrb[114].mxu0  ;;  %v11635_v26 = vmax.bf16 %v21547_v4, %v11571_v18  ;;  %v14430_v22 = vadd.f32 %v10967_v39, %v20778_v23 }
0x1066   : > { %v14431_v35 = vadd.f32 %v10969_v37, %v20776_v55  ;;  %v10971_v28 = vpop.f32.mrb[115].mxu0 }
0x1067   : > { %v14432_v2 = vadd.f32 %v10971_v28, %v20776_v55  ;;  %12082 = vmatprep.subr.bf16.mxu1 %v11635_v26  ;;  %v20858_v26 = vpop.permute.xlu1 %8354 }
0x1068   : > { %v11252_v29 = vpack.c.bf16 %v14431_v35, %v14429_v53  ;;  %11234 = vmatmul.mubr.bf16.gmra.mrb[220].mxu0 %v13900_v15  ;;  %12083 = vmatpush1.bf16.msra.mxu1 %v11634_v40 }
0x1069   : > { %v11253_v38 = vpack.c.bf16 %v14432_v2, %v14430_v22 }
0x106a   : > { %v11572_v7 = vadd.bf16 %v20525_v56, %v11252_v29 }
0x106b   : > { %v11573_v34 = vadd.bf16 %v20525_v56, %v11253_v38  ;;  %v10975_v52 = vpop.f32.mrb[116].mxu0 }
0x106c   : > { %v10977_v21 = vpop.f32.mrb[117].mxu0  ;;  %v11636_v55 = vmax.bf16 %v21547_v4, %v11572_v7  ;;  %v14433_v31 = vadd.f32 %v10975_v52, %v20723_v6 }
0x106d   : > { %v10979_v51 = vpop.f32.mrb[118].mxu0  ;;  %v11637_v23 = vmax.bf16 %v21547_v4, %v11573_v34  ;;  %v14434_v57 = vadd.f32 %v10977_v21, %v20723_v6  ;;  %v20845_v6 = vpop.permute.xlu0 %8364 }
0x106e   : > { %v14435_v48 = vadd.f32 %v10979_v51, %v20789_v11  ;;  %v10981_v63 = vpop.f32.mrb[119].mxu0  ;;  %v20869_v34 = vpop.permute.xlu1 %8369 }
0x106f   : > { %v14436_v27 = vadd.f32 %v10981_v63, %v20789_v11  ;;  %12084 = vmatprep.subr.bf16.mxu1 %v11637_v23 }
0x1070   : > { %v11254_v56 = vpack.c.bf16 %v14435_v48, %v14433_v31  ;;  %12085 = vmatpush1.bf16.msra.mxu1 %v11636_v55 }
0x1071   : > { %v11255_v46 = vpack.c.bf16 %v14436_v27, %v14434_v57  ;;  %v20856_v15 = vpop.permute.xlu0 %8359 }
0x1072   : > { %v11574_v14 = vadd.bf16 %v20556_v33, %v11254_v56  ;;  %v20880_v56 = vpop.permute.xlu1 %8374 }
0x1073   : > { %v11575_v45 = vadd.bf16 %v20556_v33, %v11255_v46  ;;  %v10985_v0 = vpop.f32.mrb[120].mxu0 }
0x1074   : > { %v10987_v36 = vpop.f32.mrb[121].mxu0  ;;  %v11638_v11 = vmax.bf16 %v21547_v4, %v11574_v14  ;;  %v14437_v54 = vadd.f32 %v10985_v0, %v20800_v1 }
0x1075   : > { %v10989_v12 = vpop.f32.mrb[122].mxu0  ;;  %v11639_v49 = vmax.bf16 %v21547_v4, %v11575_v45  ;;  %v14438_v41 = vadd.f32 %v10987_v36, %v20800_v1  ;;  %v20866_v38 = vpop.permute.xlu0 %8384 }
0x1076   : > { %v14439_v19 = vadd.f32 %v10989_v12, %v20798_v30  ;;  %v10991_v50 = vpop.f32.mrb[123].mxu0 }
0x1077   : > { %v14440_v33 = vadd.f32 %v10991_v50, %v20798_v30  ;;  %12086 = vmatprep.subr.bf16.mxu1 %v11639_v49  ;;  %v20890_v50 = vpop.permute.xlu1 %8389 }
0x1078   : > { %v11256_v61 = vpack.c.bf16 %v14439_v19, %v14437_v54  ;;  %12087 = vmatpush1.bf16.msra.mxu1 %v11638_v11 }
0x1079   : > { %v11257_v17 = vpack.c.bf16 %v14440_v33, %v14438_v41  ;;  %v20878_v27 = vpop.permute.xlu0 %8379 }
0x107a   : > { %v11576_v18 = vadd.bf16 %v20548_v9, %v11256_v61 }
0x107b   : > { %v11577_v43 = vadd.bf16 %v20548_v9, %v11257_v17  ;;  %v10995_v39 = vpop.f32.mrb[124].mxu0 }
0x107c   : > { %v10997_v37 = vpop.f32.mrb[125].mxu0  ;;  %v11640_v1 = vmax.bf16 %v21547_v4, %v11576_v18  ;;  %v14441_v30 = vadd.f32 %v10995_v39, %v20786_v44 }
0x107d   : > { %v10999_v40 = vpop.f32.mrb[126].mxu0  ;;  %v11641_v53 = vmax.bf16 %v21547_v4, %v11577_v43  ;;  %v14442_v22 = vadd.f32 %v10997_v37, %v20786_v44 }
0x107e   : > { %v14443_v35 = vadd.f32 %v10999_v40, %v20810_v3  ;;  %v11001_v28 = vpop.f32.mrb[127].mxu0  ;;  %v20898_v40 = vpop.permute.xlu1 %11481 }
0x107f   : > { %v14444_v9 = vadd.f32 %v11001_v28, %v20810_v3  ;;  %12088 = vmatprep.subr.bf16.mxu1 %v11641_v53 }
0x1080   : > { %v11258_v2 = vpack.c.bf16 %v14443_v35, %v14441_v30  ;;  %12089 = vmatpush1.bf16.msra.mxu1 %v11640_v1 }
0x1081   : > { %v11259_v29 = vpack.c.bf16 %v14444_v9, %v14442_v22 }
0x1082   : > { %v11578_v7 = vadd.bf16 %v20579_v32, %v11258_v2 }
0x1083   : > { %v11579_v52 = vadd.bf16 %v20579_v32, %v11259_v29  ;;  %v11005_v21 = vpop.f32.mrb[128].mxu0 }
0x1084   : > { %v11007_v51 = vpop.f32.mrb[129].mxu0  ;;  %v11642_v44 = vmax.bf16 %v21547_v4, %v11578_v7  ;;  %v14445_v3 = vadd.f32 %v11005_v21, %v20818_v25  ;;  %v20909_v7 = vpop.permute.xlu1 %11491 }
0x1085   : > { %v11009_v23 = vpop.f32.mrb[130].mxu0  ;;  %v11643_v55 = vmax.bf16 %v21547_v4, %v11579_v52  ;;  %v14446_v63 = vadd.f32 %v11007_v51, %v20818_v25  ;;  %v20885_v25 = vpop.permute.xlu0 %11476 }
0x1086   : > { %v14447_v31 = vadd.f32 %v11009_v23, %v20816_v42  ;;  %v11011_v48 = vpop.f32.mrb[131].mxu0 }
0x1087   : > { %v14448_v57 = vadd.f32 %v11011_v48, %v20816_v42  ;;  %12090 = vmatprep.subr.bf16.mxu1 %v11643_v55 }
0x1088   : > { %v11260_v32 = vpack.c.bf16 %v14447_v31, %v14445_v3  ;;  %12091 = vmatpush1.bf16.msra.mxu1 %v11642_v44 }
0x1089   : > { %v11261_v46 = vpack.c.bf16 %v14448_v57, %v14446_v63  ;;  %v20896_v39 = vpop.permute.xlu0 %11486  ;;  %v20920_v57 = vpop.permute.xlu1 %11501 }
0x108a   : > { %v11580_v14 = vadd.bf16 %v20570_v24, %v11260_v32 }
0x108b   : > { %v11581_v45 = vadd.bf16 %v20570_v24, %v11261_v46  ;;  %v11015_v0 = vpop.f32.mrb[132].mxu0 }
0x108c   : > { %v11017_v36 = vpop.f32.mrb[133].mxu0  ;;  %v11644_v42 = vmax.bf16 %v21547_v4, %v11580_v14  ;;  %v14449_v11 = vadd.f32 %v11015_v0, %v20805_v8 }
0x108d   : > { %v11019_v12 = vpop.f32.mrb[134].mxu0  ;;  %v11645_v49 = vmax.bf16 %v21547_v4, %v11581_v45  ;;  %v14450_v41 = vadd.f32 %v11017_v36, %v20805_v8  ;;  %v20906_v2 = vpop.permute.xlu0 %11496 }
0x108e   : > { %v14451_v54 = vadd.f32 %v11019_v12, %v20829_v62  ;;  %v11021_v19 = vpop.f32.mrb[135].mxu0 }
0x108f   : > { %v14452_v24 = vadd.f32 %v11021_v19, %v20829_v62  ;;  %12092 = vmatprep.subr.bf16.mxu1 %v11645_v49 }
0x1090   : > { %v11262_v33 = vpack.c.bf16 %v14451_v54, %v14449_v11  ;;  %12093 = vmatpush1.bf16.msra.mxu1 %v11644_v42  ;;  %v20930_v54 = vpop.permute.xlu1 %11511 }
0x1091   : > { %v11263_v61 = vpack.c.bf16 %v14452_v24, %v14450_v41  ;;  %v20918_v63 = vpop.permute.xlu0 %11506 }
0x1092   : > { %v11582_v17 = vadd.bf16 %v20604_v60, %v11262_v33 }
0x1093   : > { %v11583_v18 = vadd.bf16 %v20604_v60, %v11263_v61  ;;  %v11025_v43 = vpop.f32.mrb[136].mxu0 }
0x1094   : > { %v11027_v37 = vpop.f32.mrb[137].mxu0  ;;  %v11646_v8 = vmax.bf16 %v21547_v4, %v11582_v17  ;;  %v14453_v62 = vadd.f32 %v11025_v43, %v20840_v5 }
0x1095   : > { %v11029_v53 = vpop.f32.mrb[138].mxu0  ;;  %v11647_v1 = vmax.bf16 %v21547_v4, %v11583_v18  ;;  %v14454_v28 = vadd.f32 %v11027_v37, %v20840_v5  ;;  %v20938_v37 = vpop.permute.xlu1 %11521 }
0x1096   : > { %v14455_v30 = vadd.f32 %v11029_v53, %v20838_v20  ;;  %v11031_v35 = vpop.f32.mrb[139].mxu0 }
0x1097   : > { %v14456_v60 = vadd.f32 %v11031_v35, %v20838_v20  ;;  %12094 = vmatprep.subr.bf16.mxu1 %v11647_v1 }
0x1098   : > { %v11264_v22 = vpack.c.bf16 %v14455_v30, %v14453_v62  ;;  %12095 = vmatpush1.bf16.msra.mxu1 %v11646_v8 }
0x1099   : > { %v11265_v9 = vpack.c.bf16 %v14456_v60, %v14454_v28 }
0x109a   : > { %v11584_v29 = vadd.bf16 %v20595_v16, %v11264_v22 }
0x109b   : > { %v11585_v52 = vadd.bf16 %v20595_v16, %v11265_v9  ;;  %v11035_v21 = vpop.f32.mrb[140].mxu0  ;;  %v20949_v9 = vpop.permute.xlu1 %11531 }
0x109c   : > { %v11037_v51 = vpop.f32.mrb[141].mxu0  ;;  %v11648_v5 = vmax.bf16 %v21547_v4, %v11584_v29  ;;  %v14457_v20 = vadd.f32 %v11035_v21, %v20826_v47 }
0x109d   : > { %v11039_v23 = vpop.f32.mrb[142].mxu0  ;;  %v11649_v55 = vmax.bf16 %v21547_v4, %v11585_v52  ;;  %v14458_v31 = vadd.f32 %v11037_v51, %v20826_v47  ;;  %v20925_v47 = vpop.permute.xlu0 %11516 }
0x109e   : > { %v14459_v44 = vadd.f32 %v11039_v23, %v20850_v58  ;;  %v11041_v3 = vpop.f32.mrb[143].mxu0 }
0x109f   : > { %v14460_v48 = vadd.f32 %v11041_v3, %v20850_v58  ;;  %12096 = vmatprep.subr.bf16.mxu1 %v11649_v55 }
0x10a0   : > { %v11266_v16 = vpack.c.bf16 %v14459_v44, %v14457_v20  ;;  %12097 = vmatpush1.bf16.msra.mxu1 %v11648_v5 }
0x10a1   : > { %v11267_v32 = vpack.c.bf16 %v14460_v48, %v14458_v31  ;;  %v20936_v18 = vpop.permute.xlu0 %11526  ;;  %v20960_v31 = vpop.permute.xlu1 %11541 }
0x10a2   : > { %v11586_v46 = vadd.bf16 %v20629_v13, %v11266_v16 }
0x10a3   : > { %v11587_v14 = vadd.bf16 %v20629_v13, %v11267_v32  ;;  %v11045_v45 = vpop.f32.mrb[144].mxu0 }
0x10a4   : > { %v11047_v0 = vpop.f32.mrb[145].mxu0  ;;  %v11650_v58 = vmax.bf16 %v21547_v4, %v11586_v46  ;;  %v14461_v49 = vadd.f32 %v11045_v45, %v20858_v26 }
0x10a5   : > { %v11049_v36 = vpop.f32.mrb[146].mxu0  ;;  %v11651_v12 = vmax.bf16 %v21547_v4, %v11587_v14  ;;  %v14462_v19 = vadd.f32 %v11047_v0, %v20858_v26  ;;  %v20946_v60 = vpop.permute.xlu0 %11536 }
0x10a6   : > { %v14463_v42 = vadd.f32 %v11049_v36, %v20856_v15  ;;  %v11051_v11 = vpop.f32.mrb[147].mxu0 }
0x10a7   : > { %v14464_v13 = vadd.f32 %v11051_v11, %v20856_v15  ;;  %12098 = vmatprep.subr.bf16.mxu1 %v11651_v12 }
0x10a8   : > { %v11268_v41 = vpack.c.bf16 %v14463_v42, %v14461_v49  ;;  %12099 = vmatpush1.bf16.msra.mxu1 %v11650_v58  ;;  %v8410_v49 = vpop.permute.xlu1 %8409 }
0x10a9   : > { %v11269_v24 = vpack.c.bf16 %v14464_v13, %v14462_v19  ;;  %v20958_v3 = vpop.permute.xlu0 %11546 }
0x10aa   : > { %v11588_v33 = vadd.bf16 %v20620_v59, %v11268_v41 }
0x10ab   : > { %v11589_v61 = vadd.bf16 %v20620_v59, %v11269_v24  ;;  %v11055_v17 = vpop.f32.mrb[148].mxu0 }
0x10ac   : > { %v11057_v43 = vpop.f32.mrb[149].mxu0  ;;  %v11652_v26 = vmax.bf16 %v21547_v4, %v11588_v33  ;;  %v14465_v15 = vadd.f32 %v11055_v17, %v20845_v6  ;;  %v8400_v17 = vpop.permute.xlu1 %8399 }
0x10ad   : > { %v11059_v53 = vpop.f32.mrb[150].mxu0  ;;  %v11653_v1 = vmax.bf16 %v21547_v4, %v11589_v61  ;;  %v14466_v30 = vadd.f32 %v11057_v43, %v20845_v6 }
0x10ae   : > { %v14467_v8 = vadd.f32 %v11059_v53, %v20869_v34  ;;  %v11061_v62 = vpop.f32.mrb[151].mxu0 }
0x10af   : > { %v14468_v59 = vadd.f32 %v11061_v62, %v20869_v34  ;;  %12100 = vmatprep.subr.bf16.mxu1 %v11653_v1  ;;  %v15694_v62 = vld [vmem:[#allocation8] ss:$16 sps:$4 sm:$0xff]  }
0x10b0   : > { %v11270_v35 = vpack.c.bf16 %v14467_v8, %v14465_v15  ;;  %12101 = vmatpush1.bf16.msra.mxu1 %v11652_v26 }
0x10b1   : > { %v11271_v28 = vpack.c.bf16 %v14468_v59, %v14466_v30  ;;  %v15699_v59 = vld [vmem:[#allocation8 + $0x24] ss:$16 sps:$4 sm:$0xff]  }
0x10b2   : > { %v11590_v22 = vadd.bf16 %v20697_v10, %v11270_v35 }
0x10b3   : > { %v11591_v29 = vadd.bf16 %v20697_v10, %v11271_v28  ;;  %v11065_v52 = vpop.f32.mrb[152].mxu0 }
0x10b4   : > { %v11067_v21 = vpop.f32.mrb[153].mxu0  ;;  %v11654_v6 = vmax.bf16 %v21547_v4, %v11590_v22  ;;  %v14469_v34 = vadd.f32 %v11065_v52, %v20880_v56 }
0x10b5   : > { %v11069_v51 = vpop.f32.mrb[154].mxu0  ;;  %v11655_v23 = vmax.bf16 %v21547_v4, %v11591_v29  ;;  %v14470_v20 = vadd.f32 %v11067_v21, %v20880_v56  ;;  %v8405_v56 = vpop.permute.xlu0 %8404 }
0x10b6   : > { %v14471_v55 = vadd.f32 %v11069_v51, %v20878_v27  ;;  %v11071_v5 = vpop.f32.mrb[155].mxu0 }
0x10b7   : > { %v14472_v44 = vadd.f32 %v11071_v5, %v20878_v27  ;;  %12102 = vmatprep.subr.bf16.mxu1 %v11655_v23  ;;  %v20978_v5 = vpop.permute.xlu1 %11551 }
0x10b8   : > { %v11272_v10 = vpack.c.bf16 %v14471_v55, %v14469_v34  ;;  %12103 = vmatpush1.bf16.msra.mxu1 %v11654_v6 }
0x10b9   : > { %v11273_v48 = vpack.c.bf16 %v14472_v44, %v14470_v20  ;;  %v8395_v33 = vpop.permute.xlu0 %8394 }
0x10ba   : > { %v11592_v16 = vadd.bf16 %v20885_v25, %v11272_v10  ;;  %v15697_v10 = vld [vmem:[#allocation8 + $0x20] ss:$16 sps:$4 sm:$0xff]  }
0x10bb   : > { %v11593_v32 = vadd.bf16 %v20885_v25, %v11273_v48  ;;  %v11075_v46 = vpop.f32.mrb[156].mxu0  ;;  %v15702_v48 = vld [vmem:[#allocation8 + $0x44] ss:$16 sps:$4 sm:$0xff]  }
0x10bc   : > { %v11077_v14 = vpop.f32.mrb[157].mxu0  ;;  %v11656_v27 = vmax.bf16 %v21547_v4, %v11592_v16  ;;  %v14473_v36 = vadd.f32 %v11075_v46, %v20866_v38 }
0x10bd   : > { %v11079_v45 = vpop.f32.mrb[158].mxu0  ;;  %v11657_v0 = vmax.bf16 %v21547_v4, %v11593_v32  ;;  %v14474_v42 = vadd.f32 %v11077_v14, %v20866_v38  ;;  %v8425_v51 = vpop.permute.xlu0 %8424 }
0x10be   : > { %v14475_v12 = vadd.f32 %v11079_v45, %v20890_v50  ;;  %v11081_v58 = vpop.f32.mrb[159].mxu0 }
0x10bf   : > { %v14476_v11 = vadd.f32 %v11081_v58, %v20890_v50  ;;  %12104 = vmatprep.subr.bf16.mxu1 %v11657_v0 }
0x10c0   : > { %v11274_v25 = vpack.c.bf16 %v14475_v12, %v14473_v36  ;;  %12105 = vmatpush1.bf16.msra.mxu1 %v11656_v27  ;;  %v8415_v27 = vpop.permute.xlu1 %8414 }
0x10c1   : > { %v11275_v19 = vpack.c.bf16 %v14476_v11, %v14474_v42  ;;  %v8420_v45 = vpop.permute.xlu0 %8419 }
0x10c2   : > { %v11594_v13 = vadd.bf16 %v20898_v40, %v11274_v25 }
0x10c3   : > { %v11595_v41 = vadd.bf16 %v20898_v40, %v11275_v19  ;;  %v11085_v24 = vpop.f32.mrb[160].mxu0  ;;  %v15700_v19 = vld [vmem:[#allocation8 + $0x40] ss:$16 sps:$4 sm:$0xff]  }
0x10c4   : > { %v11087_v61 = vpop.f32.mrb[161].mxu0  ;;  %v11658_v1 = vmax.bf16 %v21547_v4, %v11594_v13  ;;  %v14477_v38 = vadd.f32 %v11085_v24, %v8395_v33 }
0x10c5   : > { %v11089_v43 = vpop.f32.mrb[162].mxu0  ;;  %v11659_v53 = vmax.bf16 %v21547_v4, %v11595_v41  ;;  %v14478_v15 = vadd.f32 %v11087_v61, %v8395_v33 }
0x10c6   : > { %v14479_v26 = vadd.f32 %v11089_v43, %v8400_v17  ;;  %v11091_v50 = vpop.f32.mrb[163].mxu0  ;;  %v8430_v43 = vpop.permute.xlu1 %8429 }
0x10c7   : > { %v14480_v8 = vadd.f32 %v11091_v50, %v8400_v17  ;;  %12106 = vmatprep.subr.bf16.mxu1 %v11659_v53 }
0x10c8   : > { %v11276_v30 = vpack.c.bf16 %v14479_v26, %v14477_v38  ;;  %12107 = vmatpush1.bf16.msra.mxu1 %v11658_v1  ;;  %v8445_v38 = vpop.permute.xlu0 %8444 }
0x10c9   : > { %v11277_v40 = vpack.c.bf16 %v14480_v8, %v14478_v15 }
0x10ca   : > { %v11596_v35 = vadd.bf16 %v20896_v39, %v11276_v30 }
0x10cb   : > { %v11597_v28 = vadd.bf16 %v20896_v39, %v11277_v40  ;;  %v11095_v22 = vpop.f32.mrb[164].mxu0  ;;  %12109 = vmatmul.mubr.bf16.vlgmr.msra.gmra.mrb[48].mxu1 %v15694_v62 }
0x10cc   : > { %v11097_v29 = vpop.f32.mrb[165].mxu0  ;;  %12118 = vmatprep.mubr.bf16.mxu1 %v15699_v59  ;;  %v11660_v23 = vmax.bf16 %v21547_v4, %v11596_v35  ;;  %v14481_v6 = vadd.f32 %v11095_v22, %v8405_v56  ;;  %v15703_v59 = vld [vmem:[#allocation8 + $0x60] ss:$16 sps:$4 sm:$0xff]  }
0x10cd   : > { %v11099_v52 = vpop.f32.mrb[166].mxu0  ;;  %v11661_v21 = vmax.bf16 %v21547_v4, %v11597_v28  ;;  %v14482_v20 = vadd.f32 %v11097_v29, %v8405_v56 }
0x10ce   : > { %v14483_v34 = vadd.f32 %v11099_v52, %v8410_v49  ;;  %v11101_v55 = vpop.f32.mrb[167].mxu0  ;;  %v8440_v52 = vpop.permute.xlu0 %8439 }
0x10cf   : > { %v14484_v44 = vadd.f32 %v11101_v55, %v8410_v49  ;;  %12269 = vmatprep.subr.bf16.mxu1 %v11661_v21 }
0x10d0   : > { %v11278_v39 = vpack.c.bf16 %v14483_v34, %v14481_v6  ;;  %12270 = vmatpush1.bf16.msra.mxu1 %v11660_v23  ;;  %v8435_v23 = vpop.permute.xlu1 %8434 }
0x10d1   : > { %v11279_v16 = vpack.c.bf16 %v14484_v44, %v14482_v20 }
0x10d2   : > { %v11598_v32 = vadd.bf16 %v20909_v7, %v11278_v39 }
0x10d3   : > { %v11599_v46 = vadd.bf16 %v20909_v7, %v11279_v16  ;;  %v11105_v14 = vpop.f32.mrb[168].mxu0  ;;  %12119 = vmatmul.mubr.bf16.gmra.mrb[52].mxu1 %v15697_v10  ;;  %v15705_v7 = vld [vmem:[#allocation8 + $0x64] ss:$16 sps:$4 sm:$0xff]  }
0x10d4   : > { %v11107_v0 = vpop.f32.mrb[169].mxu0  ;;  %12128 = vmatprep.mubr.bf16.mxu1 %v15702_v48  ;;  %v11662_v12 = vmax.bf16 %v21547_v4, %v11598_v32  ;;  %v14485_v58 = vadd.f32 %v11105_v14, %v8415_v27  ;;  %v15706_v48 = vld [vmem:[#allocation8 + $0x80] ss:$16 sps:$4 sm:$0xff]  }
0x10d5   : > { %v11109_v36 = vpop.f32.mrb[170].mxu0  ;;  %v11663_v56 = vmax.bf16 %v21547_v4, %v11599_v46  ;;  %v14486_v11 = vadd.f32 %v11107_v0, %v8415_v27  ;;  %v8450_v27 = vpop.permute.xlu1 %8449 }
0x10d6   : > { %v14487_v49 = vadd.f32 %v11109_v36, %v8420_v45  ;;  %v11111_v42 = vpop.f32.mrb[171].mxu0 }
0x10d7   : > { %v14488_v25 = vadd.f32 %v11111_v42, %v8420_v45  ;;  %12271 = vmatprep.subr.bf16.mxu1 %v11663_v56 }
0x10d8   : > { %v11280_v13 = vpack.c.bf16 %v14487_v49, %v14485_v58  ;;  %12272 = vmatpush1.bf16.msra.mxu1 %v11662_v12  ;;  %v8465_v12 = vpop.permute.xlu0 %8464 }
0x10d9   : > { %v11281_v41 = vpack.c.bf16 %v14488_v25, %v14486_v11 }
0x10da   : > { %v11600_v24 = vadd.bf16 %v20906_v2, %v11280_v13  ;;  %v15709_v13 = vld [vmem:[#allocation8 + $0xa0] ss:$16 sps:$4 sm:$0xff]  }
0x10db   : > { %v11601_v33 = vadd.bf16 %v20906_v2, %v11281_v41  ;;  %v11115_v61 = vpop.f32.mrb[172].mxu0  ;;  %12129 = vmatmul.mubr.bf16.gmra.mrb[56].mxu1 %v15700_v19  ;;  %v15708_v2 = vld [vmem:[#allocation8 + $0x84] ss:$16 sps:$4 sm:$0xff]  }
0x10dc   : > { %v11117_v17 = vpop.f32.mrb[173].mxu0  ;;  %12138 = vmatprep.mubr.bf16.mxu1 %v15705_v7  ;;  %v11664_v26 = vmax.bf16 %v21547_v4, %v11600_v24  ;;  %v14489_v50 = vadd.f32 %v11115_v61, %v8425_v51 }
0x10dd   : > { %v11119_v53 = vpop.f32.mrb[174].mxu0  ;;  %v11665_v1 = vmax.bf16 %v21547_v4, %v11601_v33  ;;  %v14490_v62 = vadd.f32 %v11117_v17, %v8425_v51  ;;  %v8460_v17 = vpop.permute.xlu0 %8459 }
0x10de   : > { %v14491_v15 = vadd.f32 %v11119_v53, %v8430_v43  ;;  %v11121_v8 = vpop.f32.mrb[175].mxu0  ;;  %v8455_v53 = vpop.permute.xlu1 %8454 }
0x10df   : > { %v14492_v30 = vadd.f32 %v11121_v8, %v8430_v43  ;;  %12273 = vmatprep.subr.bf16.mxu1 %v11665_v1 }
0x10e0   : > { %v11282_v40 = vpack.c.bf16 %v14491_v15, %v14489_v50  ;;  %12274 = vmatpush1.bf16.msra.mxu1 %v11664_v26 }
0x10e1   : > { %v11283_v35 = vpack.c.bf16 %v14492_v30, %v14490_v62 }
0x10e2   : > { %v11602_v28 = vadd.bf16 %v20920_v57, %v11282_v40 }
0x10e3   : > { %v11603_v22 = vadd.bf16 %v20920_v57, %v11283_v35  ;;  %v11125_v29 = vpop.f32.mrb[176].mxu0  ;;  %12139 = vmatmul.mubr.bf16.gmra.mrb[60].mxu1 %v15703_v59  ;;  %v15711_v57 = vld [vmem:[#allocation8 + $0xa4] ss:$16 sps:$4 sm:$0xff]   ;;  %v15712_v59 = vld [vmem:[#allocation8 + $0xc0] ss:$16 sps:$4 sm:$0xff]  }
0x10e4   : > { %v11127_v21 = vpop.f32.mrb[177].mxu0  ;;  %12148 = vmatprep.mubr.bf16.mxu1 %v15708_v2  ;;  %v11666_v34 = vmax.bf16 %v21547_v4, %v11602_v28  ;;  %v14493_v55 = vadd.f32 %v11125_v29, %v8435_v23 }
0x10e5   : > { %v11129_v6 = vpop.f32.mrb[178].mxu0  ;;  %v11667_v51 = vmax.bf16 %v21547_v4, %v11603_v22  ;;  %v14494_v10 = vadd.f32 %v11127_v21, %v8435_v23 }
0x10e6   : > { %v14495_v20 = vadd.f32 %v11129_v6, %v8440_v52  ;;  %v11131_v44 = vpop.f32.mrb[179].mxu0  ;;  %v8485_v6 = vpop.permute.xlu0 %8484 }
0x10e7   : > { %v14496_v39 = vadd.f32 %v11131_v44, %v8440_v52  ;;  %12275 = vmatprep.subr.bf16.mxu1 %v11667_v51  ;;  %v8470_v52 = vpop.permute.xlu1 %8469 }
0x10e8   : > { %v11284_v16 = vpack.c.bf16 %v14495_v20, %v14493_v55  ;;  %12276 = vmatpush1.bf16.msra.mxu1 %v11666_v34 }
0x10e9   : > { %v11285_v32 = vpack.c.bf16 %v14496_v39, %v14494_v10  ;;  %v15715_v39 = vld [vmem:[#allocation8 + $0xe0] ss:$16 sps:$4 sm:$0xff]  }
0x10ea   : > { %v11604_v46 = vadd.bf16 %v20918_v63, %v11284_v16 }
0x10eb   : > { %v11605_v14 = vadd.bf16 %v20918_v63, %v11285_v32  ;;  %v11135_v45 = vpop.f32.mrb[180].mxu0  ;;  %12149 = vmatmul.mubr.bf16.gmra.mrb[64].mxu1 %v15706_v48  ;;  %v15714_v63 = vld [vmem:[#allocation8 + $0xc4] ss:$16 sps:$4 sm:$0xff]  }
0x10ec   : > { %v11137_v0 = vpop.f32.mrb[181].mxu0  ;;  %12158 = vmatprep.mubr.bf16.mxu1 %v15711_v57  ;;  %v11668_v58 = vmax.bf16 %v21547_v4, %v11604_v46  ;;  %v14497_v49 = vadd.f32 %v11135_v45, %v8445_v38 }
0x10ed   : > { %v11139_v36 = vpop.f32.mrb[182].mxu0  ;;  %v11669_v56 = vmax.bf16 %v21547_v4, %v11605_v14  ;;  %v14498_v25 = vadd.f32 %v11137_v0, %v8445_v38  ;;  %v8480_v14 = vpop.permute.xlu0 %8479 }
0x10ee   : > { %v14499_v42 = vadd.f32 %v11139_v36, %v8450_v27  ;;  %v11141_v11 = vpop.f32.mrb[183].mxu0  ;;  %v8475_v0 = vpop.permute.xlu1 %8474 }
0x10ef   : > { %v14500_v19 = vadd.f32 %v11141_v11, %v8450_v27  ;;  %12277 = vmatprep.subr.bf16.mxu1 %v11669_v56 }
0x10f0   : > { %v11286_v7 = vpack.c.bf16 %v14499_v42, %v14497_v49  ;;  %12278 = vmatpush1.bf16.msra.mxu1 %v11668_v58 }
0x10f1   : > { %v11287_v41 = vpack.c.bf16 %v14500_v19, %v14498_v25  ;;  %v15718_v25 = vld [vmem:[#allocation8 + $0x100] ss:$16 sps:$4 sm:$0xff]  }
0x10f2   : > { %v11606_v24 = vadd.bf16 %v20930_v54, %v11286_v7 }
0x10f3   : > { %v11607_v33 = vadd.bf16 %v20930_v54, %v11287_v41  ;;  %v11145_v61 = vpop.f32.mrb[184].mxu0  ;;  %12159 = vmatmul.mubr.bf16.gmra.mrb[68].mxu1 %v15709_v13  ;;  %v15717_v54 = vld [vmem:[#allocation8 + $0xe4] ss:$16 sps:$4 sm:$0xff]  }
0x10f4   : > { %v11147_v43 = vpop.f32.mrb[185].mxu0  ;;  %12168 = vmatprep.mubr.bf16.mxu1 %v15714_v63  ;;  %v11670_v26 = vmax.bf16 %v21547_v4, %v11606_v24  ;;  %v14501_v50 = vadd.f32 %v11145_v61, %v8455_v53 }
0x10f5   : > { %v11149_v1 = vpop.f32.mrb[186].mxu0  ;;  %v11671_v38 = vmax.bf16 %v21547_v4, %v11607_v33  ;;  %v14502_v62 = vadd.f32 %v11147_v43, %v8455_v53  ;;  %v8490_v33 = vpop.permute.xlu1 %8489 }
0x10f6   : > { %v14503_v15 = vadd.f32 %v11149_v1, %v8460_v17  ;;  %v11151_v8 = vpop.f32.mrb[187].mxu0  ;;  %v8505_v43 = vpop.permute.xlu0 %8504 }
0x10f7   : > { %v14504_v30 = vadd.f32 %v11151_v8, %v8460_v17  ;;  %12279 = vmatprep.subr.bf16.mxu1 %v11671_v38  ;;  %v15721_v8 = vld [vmem:[#allocation8 + $0x120] ss:$16 sps:$4 sm:$0xff]  }
0x10f8   : > { %v11288_v40 = vpack.c.bf16 %v14503_v15, %v14501_v50  ;;  %12280 = vmatpush1.bf16.msra.mxu1 %v11670_v26 }
0x10f9   : > { %v11289_v2 = vpack.c.bf16 %v14504_v30, %v14502_v62 }
0x10fa   : > { %v11608_v35 = vadd.bf16 %v20925_v47, %v11288_v40 }
0x10fb   : > { %v11609_v28 = vadd.bf16 %v20925_v47, %v11289_v2  ;;  %v11155_v22 = vpop.f32.mrb[188].mxu0  ;;  %12169 = vmatmul.mubr.bf16.gmra.mrb[72].mxu1 %v15712_v59  ;;  %v15720_v47 = vld [vmem:[#allocation8 + $0x104] ss:$16 sps:$4 sm:$0xff]   ;;  %v8500_v2 = vpop.permute.xlu0 %8499 }
0x10fc   : > { %v11157_v29 = vpop.f32.mrb[189].mxu0  ;;  %12178 = vmatprep.mubr.bf16.mxu1 %v15717_v54  ;;  %v11672_v51 = vmax.bf16 %v21547_v4, %v11608_v35  ;;  %v14505_v34 = vadd.f32 %v11155_v22, %v8465_v12 }
0x10fd   : > { %v11159_v21 = vpop.f32.mrb[190].mxu0  ;;  %v11673_v23 = vmax.bf16 %v21547_v4, %v11609_v28  ;;  %v14506_v44 = vadd.f32 %v11157_v29, %v8465_v12  ;;  %v8495_v28 = vpop.permute.xlu1 %8494 }
0x10fe   : > { %v14507_v55 = vadd.f32 %v11159_v21, %v8470_v52  ;;  %v11161_v20 = vpop.f32.mrb[191].mxu0 }
0x10ff   : > { %v14508_v10 = vadd.f32 %v11161_v20, %v8470_v52  ;;  %12281 = vmatprep.subr.bf16.mxu1 %v11673_v23 }
0x1100   : > { %v11290_v48 = vpack.c.bf16 %v14507_v55, %v14505_v34  ;;  %12282 = vmatpush1.bf16.msra.mxu1 %v11672_v51  ;;  %v15724_v55 = vld [vmem:[#allocation8 + $0x140] ss:$16 sps:$4 sm:$0xff]  }
0x1101   : > { %v11291_v16 = vpack.c.bf16 %v14508_v10, %v14506_v44 }
0x1102   : > { %v11610_v57 = vadd.bf16 %v20938_v37, %v11290_v48 }
0x1103   : > { %v11611_v32 = vadd.bf16 %v20938_v37, %v11291_v16  ;;  %v11165_v46 = vpop.f32.mrb[192].mxu0  ;;  %12179 = vmatmul.mubr.bf16.gmra.mrb[76].mxu1 %v15715_v39  ;;  %v15723_v37 = vld [vmem:[#allocation8 + $0x124] ss:$16 sps:$4 sm:$0xff]   ;;  %v8510_v16 = vpop.permute.xlu1 %8509 }
0x1104   : > { %v11167_v45 = vpop.f32.mrb[193].mxu0  ;;  %12188 = vmatprep.mubr.bf16.mxu1 %v15720_v47  ;;  %v11674_v56 = vmax.bf16 %v21547_v4, %v11610_v57  ;;  %v14509_v12 = vadd.f32 %v11165_v46, %v8475_v0  ;;  %v8525_v46 = vpop.permute.xlu0 %8524 }
0x1105   : > { %v11169_v27 = vpop.f32.mrb[194].mxu0  ;;  %v11675_v36 = vmax.bf16 %v21547_v4, %v11611_v32  ;;  %v14510_v42 = vadd.f32 %v11167_v45, %v8475_v0 }
0x1106   : > { %v14511_v58 = vadd.f32 %v11169_v27, %v8480_v14  ;;  %v11171_v49 = vpop.f32.mrb[195].mxu0 }
0x1107   : > { %v14512_v11 = vadd.f32 %v11171_v49, %v8480_v14  ;;  %12283 = vmatprep.subr.bf16.mxu1 %v11675_v36 }
0x1108   : > { %v11292_v19 = vpack.c.bf16 %v14511_v58, %v14509_v12  ;;  %12284 = vmatpush1.bf16.msra.mxu1 %v11674_v56  ;;  %v15727_v12 = vld [vmem:[#allocation8 + $0x160] ss:$16 sps:$4 sm:$0xff]  }
0x1109   : > { %v11293_v13 = vpack.c.bf16 %v14512_v11, %v14510_v42 }
0x110a   : > { %v11612_v7 = vadd.bf16 %v20936_v18, %v11292_v19  ;;  %v8520_v19 = vpop.permute.xlu0 %8519 }
0x110b   : > { %v11613_v63 = vadd.bf16 %v20936_v18, %v11293_v13  ;;  %v11175_v41 = vpop.f32.mrb[196].mxu0  ;;  %12189 = vmatmul.mubr.bf16.gmra.mrb[80].mxu1 %v15718_v25  ;;  %v15726_v18 = vld [vmem:[#allocation8 + $0x144] ss:$16 sps:$4 sm:$0xff]   ;;  %v8515_v13 = vpop.permute.xlu1 %8514 }
0x110c   : > { %v11177_v24 = vpop.f32.mrb[197].mxu0  ;;  %12198 = vmatprep.mubr.bf16.mxu1 %v15723_v37  ;;  %v11676_v53 = vmax.bf16 %v21547_v4, %v11612_v7  ;;  %v14513_v1 = vadd.f32 %v11175_v41, %v8485_v6 }
0x110d   : > { %v11179_v61 = vpop.f32.mrb[198].mxu0  ;;  %v11677_v17 = vmax.bf16 %v21547_v4, %v11613_v63  ;;  %v14514_v50 = vadd.f32 %v11177_v24, %v8485_v6 }
0x110e   : > { %v14515_v38 = vadd.f32 %v11179_v61, %v8490_v33  ;;  %v11181_v26 = vpop.f32.mrb[199].mxu0 }
0x110f   : > { %v14516_v15 = vadd.f32 %v11181_v26, %v8490_v33  ;;  %12285 = vmatprep.subr.bf16.mxu1 %v11677_v17 }
0x1110   : > { %v11294_v62 = vpack.c.bf16 %v14515_v38, %v14513_v1  ;;  %12286 = vmatpush1.bf16.msra.mxu1 %v11676_v53  ;;  %v15730_v53 = vld [vmem:[#allocation8 + $0x180] ss:$16 sps:$4 sm:$0xff]  }
0x1111   : > { %v11295_v30 = vpack.c.bf16 %v14516_v15, %v14514_v50 }
0x1112   : > { %v11614_v59 = vadd.bf16 %v20949_v9, %v11294_v62 }
0x1113   : > { %v11615_v40 = vadd.bf16 %v20949_v9, %v11295_v30  ;;  %v11185_v54 = vpop.f32.mrb[200].mxu0  ;;  %12199 = vmatmul.mubr.bf16.gmra.mrb[84].mxu1 %v15721_v8  ;;  %v15729_v9 = vld [vmem:[#allocation8 + $0x164] ss:$16 sps:$4 sm:$0xff]   ;;  %v8545_v8 = vpop.permute.xlu0 %8544 }
0x1114   : > { %v11187_v35 = vpop.f32.mrb[201].mxu0  ;;  %12208 = vmatprep.mubr.bf16.mxu1 %v15726_v18  ;;  %v11678_v52 = vmax.bf16 %v21547_v4, %v11614_v59  ;;  %v14517_v21 = vadd.f32 %v11185_v54, %v8495_v28  ;;  %v8530_v18 = vpop.permute.xlu1 %8529 }
0x1115   : > { %v11189_v22 = vpop.f32.mrb[202].mxu0  ;;  %v11679_v29 = vmax.bf16 %v21547_v4, %v11615_v40  ;;  %v14518_v51 = vadd.f32 %v11187_v35, %v8495_v28 }
0x1116   : > { %v14519_v23 = vadd.f32 %v11189_v22, %v8500_v2  ;;  %v11191_v6 = vpop.f32.mrb[203].mxu0 }
0x1117   : > { %v14520_v34 = vadd.f32 %v11191_v6, %v8500_v2  ;;  %12287 = vmatprep.subr.bf16.mxu1 %v11679_v29  ;;  %v15733_v29 = vld [vmem:[#allocation8 + $0x1a0] ss:$16 sps:$4 sm:$0xff]   ;;  %v8540_v6 = vpop.permute.xlu0 %8539 }
0x1118   : > { %v11296_v20 = vpack.c.bf16 %v14519_v23, %v14517_v21  ;;  %12288 = vmatpush1.bf16.msra.mxu1 %v11678_v52 }
0x1119   : > { %v11297_v44 = vpack.c.bf16 %v14520_v34, %v14518_v51 }
0x111a   : > { %v11616_v10 = vadd.bf16 %v20946_v60, %v11296_v20  ;;  %v8535_v20 = vpop.permute.xlu1 %8534 }
0x111b   : > { %v11617_v39 = vadd.bf16 %v20946_v60, %v11297_v44  ;;  %v11195_v48 = vpop.f32.mrb[204].mxu0  ;;  %12209 = vmatmul.mubr.bf16.gmra.mrb[88].mxu1 %v15724_v55  ;;  %v15732_v60 = vld [vmem:[#allocation8 + $0x184] ss:$16 sps:$4 sm:$0xff]  }
0x111c   : > { %v11197_v47 = vpop.f32.mrb[205].mxu0  ;;  %12218 = vmatprep.mubr.bf16.mxu1 %v15729_v9  ;;  %v11680_v14 = vmax.bf16 %v21547_v4, %v11616_v10  ;;  %v14521_v45 = vadd.f32 %v11195_v48, %v8505_v43 }
0x111d   : > { %v11199_v57 = vpop.f32.mrb[206].mxu0  ;;  %v11681_v32 = vmax.bf16 %v21547_v4, %v11617_v39  ;;  %v14522_v36 = vadd.f32 %v11197_v47, %v8505_v43 }
0x111e   : > { %v14523_v0 = vadd.f32 %v11199_v57, %v8510_v16  ;;  %v11201_v27 = vpop.f32.mrb[207].mxu0 }
0x111f   : > { %v14524_v56 = vadd.f32 %v11201_v27, %v8510_v16  ;;  %12289 = vmatprep.subr.bf16.mxu1 %v11681_v32  ;;  %v15736_v32 = vld [vmem:[#allocation8 + $0x1c0] ss:$16 sps:$4 sm:$0xff]   ;;  %v8550_v27 = vpop.permute.xlu1 %8549 }
0x1120   : > { %v11298_v58 = vpack.c.bf16 %v14523_v0, %v14521_v45  ;;  %12290 = vmatpush1.bf16.msra.mxu1 %v11680_v14  ;;  %v11557_v14 = vpop.permute.xlu0 %11556 }
0x1121   : > { %v11299_v49 = vpack.c.bf16 %v14524_v56, %v14522_v36 }
0x1122   : > { %v11618_v42 = vadd.bf16 %v20960_v31, %v11298_v58 }
0x1123   : > { %v11619_v11 = vadd.bf16 %v20960_v31, %v11299_v49  ;;  %v11205_v25 = vpop.f32.mrb[208].mxu0  ;;  %12219 = vmatmul.mubr.bf16.gmra.mrb[92].mxu1 %v15727_v12  ;;  %v15735_v31 = vld [vmem:[#allocation8 + $0x1a4] ss:$16 sps:$4 sm:$0xff]  }
0x1124   : > { %v11207_v37 = vpop.f32.mrb[209].mxu0  ;;  %12228 = vmatprep.mubr.bf16.mxu1 %v15732_v60  ;;  %v11682_v41 = vmax.bf16 %v21547_v4, %v11618_v42  ;;  %v14525_v24 = vadd.f32 %v11205_v25, %v8515_v13 }
0x1125   : > { %v11209_v7 = vpop.f32.mrb[210].mxu0  ;;  %v11683_v63 = vmax.bf16 %v21547_v4, %v11619_v11  ;;  %v14526_v17 = vadd.f32 %v11207_v37, %v8515_v13  ;;  %v15739_v13 = vld [vmem:[#allocation8 + $0x1e0] ss:$16 sps:$4 sm:$0xff]  }
0x1126   : > { %v14527_v33 = vadd.f32 %v11209_v7, %v8520_v19  ;;  %v11211_v61 = vpop.f32.mrb[211].mxu0 }
0x1127   : > { %v14528_v43 = vadd.f32 %v11211_v61, %v8520_v19  ;;  %12291 = vmatprep.subr.bf16.mxu1 %v11683_v63  ;;  %v15744_v63 = vld [vmem:[#allocation8 + $0xc] ss:$16 sps:$4 sm:$0xff]  }
0x1128   : > { %v11300_v1 = vpack.c.bf16 %v14527_v33, %v14525_v24  ;;  %12292 = vmatpush1.bf16.msra.mxu1 %v11682_v41  ;;  %v11562_v41 = vpop.permute.xlu1 %11561 }
0x1129   : > { %v11301_v38 = vpack.c.bf16 %v14528_v43, %v14526_v17 }
0x112a   : > { %v11620_v26 = vadd.bf16 %v20958_v3, %v11300_v1  ;;  %v15747_v1 = vld [vmem:[#allocation8 + $0x2c] ss:$16 sps:$4 sm:$0xff]  }
0x112b   : > { %v11621_v50 = vadd.bf16 %v20958_v3, %v11301_v38  ;;  %v11215_v15 = vpop.f32.mrb[212].mxu0  ;;  %12229 = vmatmul.mubr.bf16.gmra.mrb[96].mxu1 %v15730_v53  ;;  %v15738_v3 = vld [vmem:[#allocation8 + $0x1c4] ss:$16 sps:$4 sm:$0xff]   ;;  %v15742_v53 = vld [vmem:[#allocation8 + $0x8] ss:$16 sps:$4 sm:$0xff]  }
0x112c   : > { %v11217_v62 = vpop.f32.mrb[213].mxu0  ;;  %12238 = vmatprep.mubr.bf16.mxu1 %v15735_v31  ;;  %v11684_v40 = vmax.bf16 %v21547_v4, %v11620_v26  ;;  %v14529_v54 = vadd.f32 %v11215_v15, %v8525_v46  ;;  %v15745_v31 = vld [vmem:[#allocation8 + $0x28] ss:$16 sps:$4 sm:$0xff]   ;;  %v15750_v38 = vld [vmem:[#allocation8 + $0x4c] ss:$16 sps:$4 sm:$0xff]  }
0x112d   : > { %v11219_v30 = vpop.f32.mrb[214].mxu0  ;;  %v11685_v59 = vmax.bf16 %v21547_v4, %v11621_v50  ;;  %v14530_v28 = vadd.f32 %v11217_v62, %v8525_v46  ;;  %v15748_v26 = vld [vmem:[#allocation8 + $0x48] ss:$16 sps:$4 sm:$0xff]   ;;  %v15753_v50 = vld [vmem:[#allocation8 + $0x6c] ss:$16 sps:$4 sm:$0xff]  }
0x112e   : > { %v14531_v2 = vadd.f32 %v11219_v30, %v8530_v18  ;;  %v11221_v35 = vpop.f32.mrb[215].mxu0  ;;  %v15751_v15 = vld [vmem:[#allocation8 + $0x68] ss:$16 sps:$4 sm:$0xff]  }
0x112f   : > { %v14532_v22 = vadd.f32 %v11221_v35, %v8530_v18  ;;  %12293 = vmatprep.subr.bf16.mxu1 %v11685_v59  ;;  %v15754_v62 = vld [vmem:[#allocation8 + $0x88] ss:$16 sps:$4 sm:$0xff]   ;;  %v15759_v18 = vld [vmem:[#allocation8 + $0xac] ss:$16 sps:$4 sm:$0xff]  }
0x1130   : > { %v11302_v52 = vpack.c.bf16 %v14531_v2, %v14529_v54  ;;  %12294 = vmatpush1.bf16.msra.mxu1 %v11684_v40  ;;  %v15757_v30 = vld [vmem:[#allocation8 + $0xa8] ss:$16 sps:$4 sm:$0xff]   ;;  %v15762_v59 = vld [vmem:[#allocation8 + $0xcc] ss:$16 sps:$4 sm:$0xff]  }
0x1131   : > { %v11303_v21 = vpack.c.bf16 %v14532_v22, %v14530_v28  ;;  %v15760_v40 = vld [vmem:[#allocation8 + $0xc8] ss:$16 sps:$4 sm:$0xff]   ;;  %v15765_v54 = vld [vmem:[#allocation8 + $0xec] ss:$16 sps:$4 sm:$0xff]  }
0x1132   : > { %v11622_v23 = vadd.bf16 %v20978_v5, %v11302_v52  ;;  %v15763_v2 = vld [vmem:[#allocation8 + $0xe8] ss:$16 sps:$4 sm:$0xff]   ;;  %v15768_v35 = vld [vmem:[#allocation8 + $0x10c] ss:$16 sps:$4 sm:$0xff]  }
0x1133   : > { %v11623_v51 = vadd.bf16 %v20978_v5, %v11303_v21  ;;  %v11225_v34 = vpop.f32.mrb[216].mxu0  ;;  %12239 = vmatmul.mubr.bf16.gmra.mrb[100].mxu1 %v15733_v29  ;;  %v15741_v5 = vld [vmem:[#allocation8 + $0x1e4] ss:$16 sps:$4 sm:$0xff]   ;;  %v15766_v28 = vld [vmem:[#allocation8 + $0x108] ss:$16 sps:$4 sm:$0xff]  }
0x1134   : > { %v11227_v55 = vpop.f32.mrb[217].mxu0  ;;  %12248 = vmatprep.mubr.bf16.mxu1 %v15738_v3  ;;  %v11686_v10 = vmax.bf16 %v21547_v4, %v11622_v23  ;;  %v14533_v39 = vadd.f32 %v11225_v34, %v8535_v20  ;;  %v15771_v22 = vld [vmem:[#allocation8 + $0x12c] ss:$16 sps:$4 sm:$0xff]   ;;  %v15769_v29 = vld [vmem:[#allocation8 + $0x128] ss:$16 sps:$4 sm:$0xff]  }
0x1135   : > { %v11229_v9 = vpop.f32.mrb[218].mxu0  ;;  %v11687_v44 = vmax.bf16 %v21547_v4, %v11623_v51  ;;  %v14534_v16 = vadd.f32 %v11227_v55, %v8535_v20  ;;  %v15774_v52 = vld [vmem:[#allocation8 + $0x14c] ss:$16 sps:$4 sm:$0xff]   ;;  %v15772_v3 = vld [vmem:[#allocation8 + $0x148] ss:$16 sps:$4 sm:$0xff]  }
0x1136   : > { %v14535_v48 = vadd.f32 %v11229_v9, %v8540_v6  ;;  %v11231_v47 = vpop.f32.mrb[219].mxu0  ;;  %v15777_v21 = vld [vmem:[#allocation8 + $0x16c] ss:$16 sps:$4 sm:$0xff]   ;;  %v15775_v23 = vld [vmem:[#allocation8 + $0x168] ss:$16 sps:$4 sm:$0xff]  }
0x1137   : > { %v14536_v57 = vadd.f32 %v11231_v47, %v8540_v6  ;;  %12295 = vmatprep.subr.bf16.mxu1 %v11687_v44  ;;  %v15780_v6 = vld [vmem:[#allocation8 + $0x18c] ss:$16 sps:$4 sm:$0xff]   ;;  %v15778_v51 = vld [vmem:[#allocation8 + $0x188] ss:$16 sps:$4 sm:$0xff]  }
0x1138   : > { %v11304_v46 = vpack.c.bf16 %v14535_v48, %v14533_v39  ;;  %12296 = vmatpush1.bf16.msra.mxu1 %v11686_v10  ;;  %v15783_v34 = vld [vmem:[#allocation8 + $0x1ac] ss:$16 sps:$4 sm:$0xff]   ;;  %v15781_v55 = vld [vmem:[#allocation8 + $0x1a8] ss:$16 sps:$4 sm:$0xff]  }
0x1139   : > { %v11305_v45 = vpack.c.bf16 %v14536_v57, %v14534_v16  ;;  %v15786_v20 = vld [vmem:[#allocation8 + $0x1cc] ss:$16 sps:$4 sm:$0xff]   ;;  %v15784_v9 = vld [vmem:[#allocation8 + $0x1c8] ss:$16 sps:$4 sm:$0xff]  }
0x113a   : > { %v11624_v0 = vadd.bf16 %v11557_v14, %v11304_v46  ;;  %v15789_v44 = vld [vmem:[#allocation8 + $0x1ec] ss:$16 sps:$4 sm:$0xff]   ;;  %v15787_v10 = vld [vmem:[#allocation8 + $0x1e8] ss:$16 sps:$4 sm:$0xff]   ;;  %v12545_v46 = vpop.permute.xlu0 %12544 }
0x113b   : > { %v11625_v36 = vadd.bf16 %v11557_v14, %v11305_v45  ;;  %v11235_v56 = vpop.f32.mrb[220].mxu0  ;;  %12249 = vmatmul.mubr.bf16.gmra.mrb[104].mxu1 %v15736_v32  ;;  %v15792_v32 = vld [vmem:[%s21201_s18 + $0x4] ss:$8 sps:$4 sm:$0xff]  }
0x113c   : > { %v11237_v12 = vpop.f32.mrb[221].mxu0  ;;  %12258 = vmatprep.mubr.bf16.mxu1 %v15741_v5  ;;  %v11688_v49 = vmax.bf16 %v21547_v4, %v11624_v0  ;;  %v14537_v42 = vadd.f32 %v11235_v56, %v8545_v8 }
0x113d   : > { %v11239_v58 = vpop.f32.mrb[222].mxu0  ;;  %v11689_v60 = vmax.bf16 %v21547_v4, %v11625_v36  ;;  %v14538_v19 = vadd.f32 %v11237_v12, %v8545_v8  ;;  %v15756_v8 = vld [vmem:[#allocation8 + $0x8c] ss:$16 sps:$4 sm:$0xff]  }
0x113e   : > { %v14539_v11 = vadd.f32 %v11239_v58, %v8550_v27  ;;  %v11241_v25 = vpop.f32.mrb[223].mxu0 }
0x113f   : > { %v14540_v37 = vadd.f32 %v11241_v25, %v8550_v27  ;;  %12297 = vmatprep.subr.bf16.mxu1 %v11689_v60 }
0x1140   : > { %v11306_v7 = vpack.c.bf16 %v14539_v11, %v14537_v42  ;;  %12298 = vmatpush1.bf16.msra.mxu1 %v11688_v49  ;;  %v12550_v49 = vpop.permute.xlu1 %12549 }
0x1141   : > { %v11307_v24 = vpack.c.bf16 %v14540_v37, %v14538_v19 }
0x1142   : > { %v11626_v33 = vadd.bf16 %v11562_v41, %v11306_v7 }
0x1143   : > { %v11627_v61 = vadd.bf16 %v11562_v41, %v11307_v24  ;;  %12259 = vmatmul.mubr.bf16.gmra.mrb[108].mxu1 %v15739_v13 }
0x1144   : > { %12301 = vmatprep.mubr.bf16.mxu1 %v15744_v63  ;;  %v11690_v43 = vmax.bf16 %v21547_v4, %v11626_v33  ;;  %v12555_v33 = vpop.permute.xlu0 %12554 }
0x1145   : > { %v11691_v17 = vmax.bf16 %v21547_v4, %v11627_v61 }
0x1147   : > { %12299 = vmatprep.subr.bf16.mxu1 %v11691_v17 }
0x1148   : > { %12300 = vmatpush1.bf16.msra.mxu1 %v11690_v43 }
0x114b   : > { %12302 = vmatmul.mubr.bf16.vlgmr.msra.gmra.mrb[48].mxu1 %v15742_v53 }
0x114c   : > { %12311 = vmatprep.mubr.bf16.mxu1 %v15747_v1 }
0x1153   : > { %12312 = vmatmul.mubr.bf16.gmra.mrb[52].mxu1 %v15745_v31 }
0x1154   : > { %12321 = vmatprep.mubr.bf16.mxu1 %v15750_v38 }
0x115b   : > { %12322 = vmatmul.mubr.bf16.gmra.mrb[56].mxu1 %v15748_v26 }
0x115c   : > { %12331 = vmatprep.mubr.bf16.mxu1 %v15753_v50 }
0x1163   : > { %12332 = vmatmul.mubr.bf16.gmra.mrb[60].mxu1 %v15751_v15 }
0x1164   : > { %12341 = vmatprep.mubr.bf16.mxu1 %v15756_v8  ;;  %v12560_v8 = vpop.permute.xlu1 %12559 }
0x116b   : > { %12342 = vmatmul.mubr.bf16.gmra.mrb[64].mxu1 %v15754_v62 }
0x116c   : > { %12351 = vmatprep.mubr.bf16.mxu1 %v15759_v18 }
0x1173   : > { %12352 = vmatmul.mubr.bf16.gmra.mrb[68].mxu1 %v15757_v30 }
0x1174   : > { %12361 = vmatprep.mubr.bf16.mxu1 %v15762_v59 }
0x117b   : > { %12362 = vmatmul.mubr.bf16.gmra.mrb[72].mxu1 %v15760_v40 }
0x117c   : > { %12371 = vmatprep.mubr.bf16.mxu1 %v15765_v54 }
0x1183   : > { %12372 = vmatmul.mubr.bf16.gmra.mrb[76].mxu1 %v15763_v2 }
0x1184   : > { %12381 = vmatprep.mubr.bf16.mxu1 %v15768_v35 }
0x118b   : > { %12382 = vmatmul.mubr.bf16.gmra.mrb[80].mxu1 %v15766_v28 }
0x118c   : > { %12391 = vmatprep.mubr.bf16.mxu1 %v15771_v22 }
0x1193   : > { %12392 = vmatmul.mubr.bf16.gmra.mrb[84].mxu1 %v15769_v29  ;;  %v12565_v29 = vpop.permute.xlu0 %12564 }
0x1194   : > { %12401 = vmatprep.mubr.bf16.mxu1 %v15774_v52 }
0x119b   : > { %12402 = vmatmul.mubr.bf16.gmra.mrb[88].mxu1 %v15772_v3 }
0x119c   : > { %12411 = vmatprep.mubr.bf16.mxu1 %v15777_v21 }
0x11a3   : > { %12412 = vmatmul.mubr.bf16.gmra.mrb[92].mxu1 %v15775_v23 }
0x11a4   : > { %12421 = vmatprep.mubr.bf16.mxu1 %v15780_v6 }
0x11ab   : > { %12422 = vmatmul.mubr.bf16.gmra.mrb[96].mxu1 %v15778_v51 }
0x11ac   : > { %12431 = vmatprep.mubr.bf16.mxu1 %v15783_v34 }
0x11b3   : > { %12432 = vmatmul.mubr.bf16.gmra.mrb[100].mxu1 %v15781_v55 }
0x11b4   : > { %12441 = vmatprep.mubr.bf16.mxu1 %v15786_v20 }
0x11bb   : > { %12442 = vmatmul.mubr.bf16.gmra.mrb[104].mxu1 %v15784_v9 }
0x11bc   : > { %12451 = vmatprep.mubr.bf16.mxu1 %v15789_v44  ;;  %v12570_v44 = vpop.permute.xlu1 %12569 }
0x11c3   : > { %12452 = vmatmul.mubr.bf16.gmra.mrb[108].mxu1 %v15787_v10 }
0x11c4   : > { %12814 = vmatprep.mubr.bf16.mxu1 %v15792_v32 }
0x121e   : > { %v12303_v39 = vpop.f32.mrb[48].mxu1 }
0x121f   : > { %v12305_v48 = vpop.f32.mrb[49].mxu1 }
0x1220   : > { %v12307_v47 = vpop.f32.mrb[50].mxu1 }
0x1221   : > { %v12462_v16 = vpack.c.bf16 %v12307_v47, %v12303_v39  ;;  %v12309_v57 = vpop.f32.mrb[51].mxu1 }
0x1222   : > { %v12463_v5 = vpack.c.bf16 %v12309_v57, %v12305_v48 }
0x1223   : > { %v12622_v14 = vadd.bf16 %v12545_v46, %v12462_v16 }
0x1224   : > { %v12623_v45 = vadd.bf16 %v12545_v46, %v12463_v5 }
0x1225   : > { %v12654_v36 = vmax.bf16 %v21547_v4, %v12622_v14 }
0x1226   : > { %v12313_v0 = vpop.f32.mrb[52].mxu1  ;;  %v12655_v27 = vmax.bf16 %v21547_v4, %v12623_v45  ;;  %v12575_v45 = vpop.permute.xlu0 %12574 }
0x1227   : > { %v12315_v56 = vpop.f32.mrb[53].mxu1 }
0x1228   : > { %v12317_v12 = vpop.f32.mrb[54].mxu1  ;;  %12782 = vmatprep.subr.bf16.mxu1 %v12655_v27 }
0x1229   : > { %v12464_v58 = vpack.c.bf16 %v12317_v12, %v12313_v0  ;;  %v12319_v60 = vpop.f32.mrb[55].mxu1  ;;  %12783 = vmatpush1.bf16.msra.mxu1 %v12654_v36 }
0x122a   : > { %v12465_v42 = vpack.c.bf16 %v12319_v60, %v12315_v56 }
0x122b   : > { %v12624_v11 = vadd.bf16 %v12550_v49, %v12464_v58 }
0x122c   : > { %v12625_v25 = vadd.bf16 %v12550_v49, %v12465_v42 }
0x122d   : > { %v12656_v13 = vmax.bf16 %v21547_v4, %v12624_v11 }
0x122e   : > { %v12323_v19 = vpop.f32.mrb[56].mxu1  ;;  %v12657_v37 = vmax.bf16 %v21547_v4, %v12625_v25  ;;  %v12580_v25 = vpop.permute.xlu1 %12579 }
0x122f   : > { %v12325_v7 = vpop.f32.mrb[57].mxu1 }
0x1230   : > { %v12327_v63 = vpop.f32.mrb[58].mxu1  ;;  %12784 = vmatprep.subr.bf16.mxu1 %v12657_v37 }
0x1231   : > { %v12466_v41 = vpack.c.bf16 %v12327_v63, %v12323_v19  ;;  %v12329_v24 = vpop.f32.mrb[59].mxu1  ;;  %12785 = vmatpush1.bf16.msra.mxu1 %v12656_v13 }
0x1232   : > { %v12467_v61 = vpack.c.bf16 %v12329_v24, %v12325_v7 }
0x1233   : > { %v12626_v17 = vadd.bf16 %v12555_v33, %v12466_v41 }
0x1234   : > { %v12627_v43 = vadd.bf16 %v12555_v33, %v12467_v61 }
0x1235   : > { %v12658_v31 = vmax.bf16 %v21547_v4, %v12626_v17 }
0x1236   : > { %v12333_v53 = vpop.f32.mrb[60].mxu1  ;;  %v12659_v1 = vmax.bf16 %v21547_v4, %v12627_v43  ;;  %v12585_v43 = vpop.permute.xlu0 %12584 }
0x1237   : > { %v12335_v38 = vpop.f32.mrb[61].mxu1 }
0x1238   : > { %v12337_v26 = vpop.f32.mrb[62].mxu1  ;;  %12786 = vmatprep.subr.bf16.mxu1 %v12659_v1 }
0x1239   : > { %v12468_v50 = vpack.c.bf16 %v12337_v26, %v12333_v53  ;;  %v12339_v15 = vpop.f32.mrb[63].mxu1  ;;  %12787 = vmatpush1.bf16.msra.mxu1 %v12658_v31 }
0x123a   : > { %v12469_v62 = vpack.c.bf16 %v12339_v15, %v12335_v38 }
0x123b   : > { %v12628_v18 = vadd.bf16 %v12560_v8, %v12468_v50 }
0x123c   : > { %v12629_v30 = vadd.bf16 %v12560_v8, %v12469_v62 }
0x123d   : > { %v12660_v54 = vmax.bf16 %v21547_v4, %v12628_v18 }
0x123e   : > { %v12343_v59 = vpop.f32.mrb[64].mxu1  ;;  %v12661_v40 = vmax.bf16 %v21547_v4, %v12629_v30  ;;  %v12590_v30 = vpop.permute.xlu1 %12589 }
0x123f   : > { %v12345_v2 = vpop.f32.mrb[65].mxu1 }
0x1240   : > { %v12347_v35 = vpop.f32.mrb[66].mxu1  ;;  %12788 = vmatprep.subr.bf16.mxu1 %v12661_v40 }
0x1241   : > { %v12470_v28 = vpack.c.bf16 %v12347_v35, %v12343_v59  ;;  %v12349_v22 = vpop.f32.mrb[67].mxu1  ;;  %12789 = vmatpush1.bf16.msra.mxu1 %v12660_v54 }
0x1242   : > { %v12471_v52 = vpack.c.bf16 %v12349_v22, %v12345_v2 }
0x1243   : > { %v12630_v3 = vadd.bf16 %v12565_v29, %v12470_v28 }
0x1244   : > { %v12631_v21 = vadd.bf16 %v12565_v29, %v12471_v52 }
0x1245   : > { %v12662_v51 = vmax.bf16 %v21547_v4, %v12630_v3 }
0x1246   : > { %v12353_v23 = vpop.f32.mrb[68].mxu1  ;;  %v12663_v6 = vmax.bf16 %v21547_v4, %v12631_v21  ;;  %v12595_v21 = vpop.permute.xlu0 %12594 }
0x1247   : > { %v12355_v34 = vpop.f32.mrb[69].mxu1 }
0x1248   : > { %v12357_v55 = vpop.f32.mrb[70].mxu1  ;;  %12790 = vmatprep.subr.bf16.mxu1 %v12663_v6 }
0x1249   : > { %v12472_v20 = vpack.c.bf16 %v12357_v55, %v12353_v23  ;;  %v12359_v9 = vpop.f32.mrb[71].mxu1  ;;  %12791 = vmatpush1.bf16.msra.mxu1 %v12662_v51 }
0x124a   : > { %v12473_v10 = vpack.c.bf16 %v12359_v9, %v12355_v34 }
0x124b   : > { %v12632_v39 = vadd.bf16 %v12570_v44, %v12472_v20 }
0x124c   : > { %v12633_v48 = vadd.bf16 %v12570_v44, %v12473_v10 }
0x124d   : > { %v12664_v57 = vmax.bf16 %v21547_v4, %v12632_v39 }
0x124e   : > { %v12363_v47 = vpop.f32.mrb[72].mxu1  ;;  %v12665_v16 = vmax.bf16 %v21547_v4, %v12633_v48  ;;  %v12600_v48 = vpop.permute.xlu1 %12599 }
0x124f   : > { %v12365_v32 = vpop.f32.mrb[73].mxu1 }
0x1250   : > { %v12367_v46 = vpop.f32.mrb[74].mxu1  ;;  %12792 = vmatprep.subr.bf16.mxu1 %v12665_v16 }
0x1251   : > { %v12474_v5 = vpack.c.bf16 %v12367_v46, %v12363_v47  ;;  %v12369_v14 = vpop.f32.mrb[75].mxu1  ;;  %12793 = vmatpush1.bf16.msra.mxu1 %v12664_v57 }
0x1252   : > { %v12475_v0 = vpack.c.bf16 %v12369_v14, %v12365_v32 }
0x1253   : > { %v12634_v27 = vadd.bf16 %v12575_v45, %v12474_v5 }
0x1254   : > { %v12635_v36 = vadd.bf16 %v12575_v45, %v12475_v0 }
0x1255   : > { %v12666_v58 = vmax.bf16 %v21547_v4, %v12634_v27 }
0x1256   : > { %v12373_v56 = vpop.f32.mrb[76].mxu1  ;;  %v12667_v12 = vmax.bf16 %v21547_v4, %v12635_v36  ;;  %v12605_v36 = vpop.permute.xlu0 %12604 }
0x1257   : > { %v12375_v60 = vpop.f32.mrb[77].mxu1 }
0x1258   : > { %v12377_v49 = vpop.f32.mrb[78].mxu1  ;;  %12794 = vmatprep.subr.bf16.mxu1 %v12667_v12 }
0x1259   : > { %v12476_v42 = vpack.c.bf16 %v12377_v49, %v12373_v56  ;;  %v12379_v11 = vpop.f32.mrb[79].mxu1  ;;  %12795 = vmatpush1.bf16.msra.mxu1 %v12666_v58 }
0x125a   : > { %v12477_v19 = vpack.c.bf16 %v12379_v11, %v12375_v60 }
0x125b   : > { %v12636_v37 = vadd.bf16 %v12580_v25, %v12476_v42 }
0x125c   : > { %v12637_v13 = vadd.bf16 %v12580_v25, %v12477_v19 }
0x125d   : > { %v12668_v41 = vmax.bf16 %v21547_v4, %v12636_v37 }
0x125e   : > { %v12383_v7 = vpop.f32.mrb[80].mxu1  ;;  %v12669_v63 = vmax.bf16 %v21547_v4, %v12637_v13  ;;  %v12610_v13 = vpop.permute.xlu1 %12609 }
0x125f   : > { %v12385_v24 = vpop.f32.mrb[81].mxu1 }
0x1260   : > { %v12387_v33 = vpop.f32.mrb[82].mxu1  ;;  %12796 = vmatprep.subr.bf16.mxu1 %v12669_v63 }
0x1261   : > { %v12478_v61 = vpack.c.bf16 %v12387_v33, %v12383_v7  ;;  %v12389_v17 = vpop.f32.mrb[83].mxu1  ;;  %12797 = vmatpush1.bf16.msra.mxu1 %v12668_v41 }
0x1262   : > { %v12479_v53 = vpack.c.bf16 %v12389_v17, %v12385_v24 }
0x1263   : > { %v12638_v1 = vadd.bf16 %v12585_v43, %v12478_v61 }
0x1264   : > { %v12639_v31 = vadd.bf16 %v12585_v43, %v12479_v53 }
0x1265   : > { %v12670_v50 = vmax.bf16 %v21547_v4, %v12638_v1 }
0x1266   : > { %v12393_v38 = vpop.f32.mrb[84].mxu1  ;;  %v12671_v26 = vmax.bf16 %v21547_v4, %v12639_v31  ;;  %v12615_v31 = vpop.permute.xlu0 %12614 }
0x1267   : > { %v12395_v15 = vpop.f32.mrb[85].mxu1 }
0x1268   : > { %v12397_v8 = vpop.f32.mrb[86].mxu1  ;;  %12798 = vmatprep.subr.bf16.mxu1 %v12671_v26 }
0x1269   : > { %v12480_v62 = vpack.c.bf16 %v12397_v8, %v12393_v38  ;;  %v12399_v18 = vpop.f32.mrb[87].mxu1  ;;  %12799 = vmatpush1.bf16.msra.mxu1 %v12670_v50 }
0x126a   : > { %v12481_v59 = vpack.c.bf16 %v12399_v18, %v12395_v15 }
0x126b   : > { %v12640_v40 = vadd.bf16 %v12590_v30, %v12480_v62 }
0x126c   : > { %v12641_v54 = vadd.bf16 %v12590_v30, %v12481_v59 }
0x126d   : > { %v12672_v28 = vmax.bf16 %v21547_v4, %v12640_v40 }
0x126e   : > { %v12403_v2 = vpop.f32.mrb[88].mxu1  ;;  %v12673_v35 = vmax.bf16 %v21547_v4, %v12641_v54  ;;  %v12620_v54 = vpop.permute.xlu1 %12619 }
0x126f   : > { %v12405_v22 = vpop.f32.mrb[89].mxu1 }
0x1270   : > { %v12407_v29 = vpop.f32.mrb[90].mxu1  ;;  %12800 = vmatprep.subr.bf16.mxu1 %v12673_v35 }
0x1271   : > { %v12482_v52 = vpack.c.bf16 %v12407_v29, %v12403_v2  ;;  %v12409_v3 = vpop.f32.mrb[91].mxu1  ;;  %12801 = vmatpush1.bf16.msra.mxu1 %v12672_v28 }
0x1272   : > { %v12483_v23 = vpack.c.bf16 %v12409_v3, %v12405_v22  ;;  %v15795_v3 = vld [vmem:[%s21201_s18 + $0x14] ss:$8 sps:$4 sm:$0xff]  }
0x1273   : > { %v12642_v6 = vadd.bf16 %v12595_v21, %v12482_v52  ;;  %v15790_v52 = vld [vmem:[%s21201_s18] ss:$8 sps:$4 sm:$0xff]  }
0x1274   : > { %v12643_v51 = vadd.bf16 %v12595_v21, %v12483_v23  ;;  %v15793_v21 = vld [vmem:[%s21201_s18 + $0x10] ss:$8 sps:$4 sm:$0xff]   ;;  %v15798_v23 = vld [vmem:[%s21201_s18 + $0x24] ss:$8 sps:$4 sm:$0xff]  }
0x1275   : > { %v12674_v20 = vmax.bf16 %v21547_v4, %v12642_v6  ;;  %v15796_v6 = vld [vmem:[%s21201_s18 + $0x20] ss:$8 sps:$4 sm:$0xff]  }
0x1276   : > { %v12413_v34 = vpop.f32.mrb[92].mxu1  ;;  %v12675_v55 = vmax.bf16 %v21547_v4, %v12643_v51  ;;  %v15801_v51 = vld [vmem:[%s21201_s18 + $0x34] ss:$8 sps:$4 sm:$0xff]  }
0x1277   : > { %v12415_v9 = vpop.f32.mrb[93].mxu1 }
0x1278   : > { %v12417_v44 = vpop.f32.mrb[94].mxu1  ;;  %12802 = vmatprep.subr.bf16.mxu1 %v12675_v55  ;;  %v15804_v55 = vld [vmem:[%s21201_s18 + $0x44] ss:$8 sps:$4 sm:$0xff]  }
0x1279   : > { %v12484_v10 = vpack.c.bf16 %v12417_v44, %v12413_v34  ;;  %v12419_v39 = vpop.f32.mrb[95].mxu1  ;;  %12803 = vmatpush1.bf16.msra.mxu1 %v12674_v20  ;;  %v15799_v34 = vld [vmem:[%s21201_s18 + $0x30] ss:$8 sps:$4 sm:$0xff]   ;;  %v15802_v20 = vld [vmem:[%s21201_s18 + $0x40] ss:$8 sps:$4 sm:$0xff]  }
0x127a   : > { %v12485_v47 = vpack.c.bf16 %v12419_v39, %v12415_v9  ;;  %v15807_v9 = vld [vmem:[%s21201_s18 + $0x54] ss:$8 sps:$4 sm:$0xff]   ;;  %v15805_v44 = vld [vmem:[%s21201_s18 + $0x50] ss:$8 sps:$4 sm:$0xff]   ;;  %v15808_v39 = vld [vmem:[%s21201_s18 + $0x60] ss:$8 sps:$4 sm:$0xff]  }
0x127b   : > { %v12644_v16 = vadd.bf16 %v12600_v48, %v12484_v10  ;;  %v15810_v10 = vld [vmem:[%s21201_s18 + $0x64] ss:$8 sps:$4 sm:$0xff]  }
0x127c   : > { %v12645_v57 = vadd.bf16 %v12600_v48, %v12485_v47  ;;  %v15813_v48 = vld [vmem:[%s21201_s18 + $0x74] ss:$8 sps:$4 sm:$0xff]   ;;  %v15811_v47 = vld [vmem:[%s21201_s18 + $0x70] ss:$8 sps:$4 sm:$0xff]  }
0x127d   : > { %v12676_v5 = vmax.bf16 %v21547_v4, %v12644_v16 }
0x127e   : > { %v12423_v32 = vpop.f32.mrb[96].mxu1  ;;  %v12677_v46 = vmax.bf16 %v21547_v4, %v12645_v57 }
0x127f   : > { %v12425_v14 = vpop.f32.mrb[97].mxu1 }
0x1280   : > { %v12427_v45 = vpop.f32.mrb[98].mxu1  ;;  %12804 = vmatprep.subr.bf16.mxu1 %v12677_v46 }
0x1281   : > { %v12486_v0 = vpack.c.bf16 %v12427_v45, %v12423_v32  ;;  %v12429_v27 = vpop.f32.mrb[99].mxu1  ;;  %12805 = vmatpush1.bf16.msra.mxu1 %v12676_v5 }
0x1282   : > { %v12487_v56 = vpack.c.bf16 %v12429_v27, %v12425_v14  ;;  %v12938_v14 = vpop.permute.xlu0 %12937 }
0x1283   : > { %v12646_v12 = vadd.bf16 %v12605_v36, %v12486_v0 }
0x1284   : > { %v12647_v58 = vadd.bf16 %v12605_v36, %v12487_v56 }
0x1285   : > { %v12678_v42 = vmax.bf16 %v21547_v4, %v12646_v12 }
0x1286   : > { %v12433_v60 = vpop.f32.mrb[100].mxu1  ;;  %v12679_v49 = vmax.bf16 %v21547_v4, %v12647_v58 }
0x1287   : > { %v12435_v11 = vpop.f32.mrb[101].mxu1 }
0x1288   : > { %v12437_v25 = vpop.f32.mrb[102].mxu1  ;;  %12806 = vmatprep.subr.bf16.mxu1 %v12679_v49 }
0x1289   : > { %v12488_v19 = vpack.c.bf16 %v12437_v25, %v12433_v60  ;;  %v12439_v37 = vpop.f32.mrb[103].mxu1  ;;  %12807 = vmatpush1.bf16.msra.mxu1 %v12678_v42 }
0x128a   : > { %v12489_v7 = vpack.c.bf16 %v12439_v37, %v12435_v11  ;;  %v12943_v11 = vpop.permute.xlu1 %12942 }
0x128b   : > { %v12648_v63 = vadd.bf16 %v12610_v13, %v12488_v19 }
0x128c   : > { %v12649_v41 = vadd.bf16 %v12610_v13, %v12489_v7 }
0x128d   : > { %v12680_v61 = vmax.bf16 %v21547_v4, %v12648_v63 }
0x128e   : > { %v12443_v24 = vpop.f32.mrb[104].mxu1  ;;  %v12681_v33 = vmax.bf16 %v21547_v4, %v12649_v41 }
0x128f   : > { %v12445_v17 = vpop.f32.mrb[105].mxu1 }
0x1290   : > { %v12447_v43 = vpop.f32.mrb[106].mxu1  ;;  %12808 = vmatprep.subr.bf16.mxu1 %v12681_v33 }
0x1291   : > { %v12490_v53 = vpack.c.bf16 %v12447_v43, %v12443_v24  ;;  %v12449_v1 = vpop.f32.mrb[107].mxu1  ;;  %12809 = vmatpush1.bf16.msra.mxu1 %v12680_v61 }
0x1292   : > { %v12491_v38 = vpack.c.bf16 %v12449_v1, %v12445_v17  ;;  %v12948_v17 = vpop.permute.xlu0 %12947 }
0x1293   : > { %v12650_v26 = vadd.bf16 %v12615_v31, %v12490_v53 }
0x1294   : > { %v12651_v50 = vadd.bf16 %v12615_v31, %v12491_v38 }
0x1295   : > { %v12682_v62 = vmax.bf16 %v21547_v4, %v12650_v26 }
0x1296   : > { %v12453_v15 = vpop.f32.mrb[108].mxu1  ;;  %v12683_v8 = vmax.bf16 %v21547_v4, %v12651_v50 }
0x1297   : > { %v12455_v18 = vpop.f32.mrb[109].mxu1 }
0x1298   : > { %v12457_v30 = vpop.f32.mrb[110].mxu1  ;;  %12810 = vmatprep.subr.bf16.mxu1 %v12683_v8 }
0x1299   : > { %v12492_v59 = vpack.c.bf16 %v12457_v30, %v12453_v15  ;;  %v12459_v40 = vpop.f32.mrb[111].mxu1  ;;  %12811 = vmatpush1.bf16.msra.mxu1 %v12682_v62 }
0x129a   : > { %v12493_v2 = vpack.c.bf16 %v12459_v40, %v12455_v18  ;;  %v12953_v18 = vpop.permute.xlu1 %12952 }
0x129b   : > { %v12652_v35 = vadd.bf16 %v12620_v54, %v12492_v59 }
0x129c   : > { %v12653_v28 = vadd.bf16 %v12620_v54, %v12493_v2 }
0x129d   : > { %v12684_v29 = vmax.bf16 %v21547_v4, %v12652_v35 }
0x129e   : > { %v12685_v22 = vmax.bf16 %v21547_v4, %v12653_v28 }
0x12a0   : > { %12812 = vmatprep.subr.bf16.mxu1 %v12685_v22 }
0x12a1   : > { %12813 = vmatpush1.bf16.msra.mxu1 %v12684_v29 }
0x12a4   : > { %12815 = vmatmul.mubr.bf16.vlgmr.msra.gmra.mrb[112].mxu1 %v15790_v52 }
0x12a5   : > { %12824 = vmatprep.mubr.bf16.mxu1 %v15795_v3  ;;  %v12958_v3 = vpop.permute.xlu0 %12957 }
0x12ac   : > { %12825 = vmatmul.mubr.bf16.gmra.mrb[116].mxu1 %v15793_v21 }
0x12ad   : > { %12834 = vmatprep.mubr.bf16.mxu1 %v15798_v23 }
0x12b4   : > { %12835 = vmatmul.mubr.bf16.gmra.mrb[120].mxu1 %v15796_v6 }
0x12b5   : > { %12844 = vmatprep.mubr.bf16.mxu1 %v15801_v51 }
0x12bc   : > { %12845 = vmatmul.mubr.bf16.gmra.mrb[124].mxu1 %v15799_v34 }
0x12bd   : > { %12854 = vmatprep.mubr.bf16.mxu1 %v15804_v55 }
0x12c4   : > { %12855 = vmatmul.mubr.bf16.gmra.mrb[128].mxu1 %v15802_v20 }
0x12c5   : > { %12864 = vmatprep.mubr.bf16.mxu1 %v15807_v9 }
0x12cc   : > { %12865 = vmatmul.mubr.bf16.gmra.mrb[132].mxu1 %v15805_v44 }
0x12cd   : > { %12874 = vmatprep.mubr.bf16.mxu1 %v15810_v10 }
0x12d4   : > { %12875 = vmatmul.mubr.bf16.gmra.mrb[136].mxu1 %v15808_v39  ;;  %v12963_v39 = vpop.permute.xlu1 %12962 }
0x12d5   : > { %12884 = vmatprep.mubr.bf16.mxu1 %v15813_v48 }
0x12dc   : > { %12885 = vmatmul.mubr.bf16.gmra.mrb[140].mxu1 %v15811_v47 }
0x12dd   : > { %13046 = vmatprep.mubr.bf16.mxu1 %v21547_v4 }
0x1377   : > { %v12816_v16 = vpop.f32.mrb[112].mxu1 }
0x1378   : > { %v12818_v57 = vpop.f32.mrb[113].mxu1 }
0x1379   : > { %v12820_v32 = vpop.f32.mrb[114].mxu1 }
0x137a   : > { %v12895_v46 = vpack.c.bf16 %v12820_v32, %v12816_v16  ;;  %v12822_v5 = vpop.f32.mrb[115].mxu1 }
0x137b   : > { %v12896_v45 = vpack.c.bf16 %v12822_v5, %v12818_v57 }
0x137c   : > { %v12975_v0 = vadd.bf16 %v12938_v14, %v12895_v46 }
0x137d   : > { %v12976_v27 = vadd.bf16 %v12938_v14, %v12896_v45 }
0x137e   : > { %v12991_v12 = vmax.bf16 %v21547_v4, %v12975_v0 }
0x137f   : > { %v12826_v36 = vpop.f32.mrb[116].mxu1  ;;  %v12992_v56 = vmax.bf16 %v21547_v4, %v12976_v27  ;;  %v12968_v27 = vpop.permute.xlu0 %12967 }
0x1380   : > { %v12828_v58 = vpop.f32.mrb[117].mxu1 }
0x1381   : > { %v12830_v60 = vpop.f32.mrb[118].mxu1  ;;  %13014 = vmatprep.subr.bf16.mxu1 %v12992_v56 }
0x1382   : > { %v12897_v49 = vpack.c.bf16 %v12830_v60, %v12826_v36  ;;  %v12832_v42 = vpop.f32.mrb[119].mxu1  ;;  %13015 = vmatpush1.bf16.msra.mxu1 %v12991_v12 }
0x1383   : > { %v12898_v25 = vpack.c.bf16 %v12832_v42, %v12828_v58 }
0x1384   : > { %v12977_v19 = vadd.bf16 %v12943_v11, %v12897_v49 }
0x1385   : > { %v12978_v37 = vadd.bf16 %v12943_v11, %v12898_v25 }
0x1386   : > { %v12993_v63 = vmax.bf16 %v21547_v4, %v12977_v19 }
0x1387   : > { %v12836_v13 = vpop.f32.mrb[120].mxu1  ;;  %v12994_v7 = vmax.bf16 %v21547_v4, %v12978_v37  ;;  %v12973_v37 = vpop.permute.xlu1 %12972 }
0x1388   : > { %v12838_v41 = vpop.f32.mrb[121].mxu1 }
0x1389   : > { %v12840_v24 = vpop.f32.mrb[122].mxu1  ;;  %13016 = vmatprep.subr.bf16.mxu1 %v12994_v7 }
0x138a   : > { %v12899_v33 = vpack.c.bf16 %v12840_v24, %v12836_v13  ;;  %v12842_v61 = vpop.f32.mrb[123].mxu1  ;;  %13017 = vmatpush1.bf16.msra.mxu1 %v12993_v63 }
0x138b   : > { %v12900_v43 = vpack.c.bf16 %v12842_v61, %v12838_v41  ;;  %v13012_v61 = vpop.permute.xlu0 %13011 }
0x138c   : > { %v12979_v53 = vadd.bf16 %v12948_v17, %v12899_v33  ;;  %v13007_v33 = vld [vmem:[%s22070_s2] sm:$0xf] }
0x138d   : > { %v12980_v1 = vadd.bf16 %v12948_v17, %v12900_v43 }
0x138e   : > { %v12995_v26 = vmax.bf16 %v21547_v4, %v12979_v53 }
0x138f   : > { %v12846_v31 = vpop.f32.mrb[124].mxu1  ;;  %v12996_v38 = vmax.bf16 %v21547_v4, %v12980_v1 }
0x1390   : > { %v12848_v50 = vpop.f32.mrb[125].mxu1 }
0x1391   : > { %v12850_v15 = vpop.f32.mrb[126].mxu1  ;;  %13018 = vmatprep.subr.bf16.mxu1 %v12996_v38 }
0x1392   : > { %v12901_v8 = vpack.c.bf16 %v12850_v15, %v12846_v31  ;;  %v12852_v62 = vpop.f32.mrb[127].mxu1  ;;  %13019 = vmatpush1.bf16.msra.mxu1 %v12995_v26 }
0x1393   : > { %v12902_v30 = vpack.c.bf16 %v12852_v62, %v12848_v50 }
0x1394   : > { %v12981_v59 = vadd.bf16 %v12953_v18, %v12901_v8 }
0x1395   : > { %v12982_v40 = vadd.bf16 %v12953_v18, %v12902_v30 }
0x1396   : > { %v12997_v35 = vmax.bf16 %v21547_v4, %v12981_v59 }
0x1397   : > { %v12856_v54 = vpop.f32.mrb[128].mxu1  ;;  %v12998_v2 = vmax.bf16 %v21547_v4, %v12982_v40 }
0x1398   : > { %v12858_v28 = vpop.f32.mrb[129].mxu1 }
0x1399   : > { %v12860_v22 = vpop.f32.mrb[130].mxu1  ;;  %13020 = vmatprep.subr.bf16.mxu1 %v12998_v2 }
0x139a   : > { %v12903_v29 = vpack.c.bf16 %v12860_v22, %v12856_v54  ;;  %v12862_v52 = vpop.f32.mrb[131].mxu1  ;;  %13021 = vmatpush1.bf16.msra.mxu1 %v12997_v35 }
0x139b   : > { %v12904_v21 = vpack.c.bf16 %v12862_v52, %v12858_v28 }
0x139c   : > { %v12983_v23 = vadd.bf16 %v12958_v3, %v12903_v29 }
0x139d   : > { %v12984_v6 = vadd.bf16 %v12958_v3, %v12904_v21 }
0x139e   : > { %v12999_v55 = vmax.bf16 %v21547_v4, %v12983_v23 }
0x139f   : > { %v12866_v51 = vpop.f32.mrb[132].mxu1  ;;  %v13000_v34 = vmax.bf16 %v21547_v4, %v12984_v6 }
0x13a0   : > { %v12868_v20 = vpop.f32.mrb[133].mxu1 }
0x13a1   : > { %v12870_v9 = vpop.f32.mrb[134].mxu1  ;;  %13022 = vmatprep.subr.bf16.mxu1 %v13000_v34 }
0x13a2   : > { %v12905_v44 = vpack.c.bf16 %v12870_v9, %v12866_v51  ;;  %v12872_v10 = vpop.f32.mrb[135].mxu1  ;;  %13023 = vmatpush1.bf16.msra.mxu1 %v12999_v55 }
0x13a3   : > { %v12906_v48 = vpack.c.bf16 %v12872_v10, %v12868_v20 }
0x13a4   : > { %v12985_v47 = vadd.bf16 %v12963_v39, %v12905_v44 }
0x13a5   : > { %v12986_v16 = vadd.bf16 %v12963_v39, %v12906_v48 }
0x13a6   : > { %v13001_v46 = vmax.bf16 %v21547_v4, %v12985_v47 }
0x13a7   : > { %v12876_v57 = vpop.f32.mrb[136].mxu1  ;;  %v13002_v32 = vmax.bf16 %v21547_v4, %v12986_v16 }
0x13a8   : > { %v12878_v5 = vpop.f32.mrb[137].mxu1 }
0x13a9   : > { %v12880_v14 = vpop.f32.mrb[138].mxu1  ;;  %13024 = vmatprep.subr.bf16.mxu1 %v13002_v32 }
0x13aa   : > { %v12907_v45 = vpack.c.bf16 %v12880_v14, %v12876_v57  ;;  %v12882_v0 = vpop.f32.mrb[139].mxu1  ;;  %13025 = vmatpush1.bf16.msra.mxu1 %v13001_v46 }
0x13ab   : > { %v12908_v36 = vpack.c.bf16 %v12882_v0, %v12878_v5 }
0x13ac   : > { %v12987_v56 = vadd.bf16 %v12968_v27, %v12907_v45 }
0x13ad   : > { %v12988_v12 = vadd.bf16 %v12968_v27, %v12908_v36 }
0x13ae   : > { %v13003_v49 = vmax.bf16 %v21547_v4, %v12987_v56 }
0x13af   : > { %v12886_v58 = vpop.f32.mrb[140].mxu1  ;;  %v13004_v60 = vmax.bf16 %v21547_v4, %v12988_v12 }
0x13b0   : > { %v12888_v42 = vpop.f32.mrb[141].mxu1 }
0x13b1   : > { %v12890_v11 = vpop.f32.mrb[142].mxu1  ;;  %13026 = vmatprep.subr.bf16.mxu1 %v13004_v60 }
0x13b2   : > { %v12909_v25 = vpack.c.bf16 %v12890_v11, %v12886_v58  ;;  %v12892_v19 = vpop.f32.mrb[143].mxu1  ;;  %13027 = vmatpush1.bf16.msra.mxu1 %v13003_v49 }
0x13b3   : > { %v12910_v13 = vpack.c.bf16 %v12892_v19, %v12888_v42 }
0x13b4   : > { %v12989_v7 = vadd.bf16 %v12973_v37, %v12909_v25 }
0x13b5   : > { %v12990_v63 = vadd.bf16 %v12973_v37, %v12910_v13 }
0x13b6   : > { %v13005_v24 = vmax.bf16 %v21547_v4, %v12989_v7 }
0x13b7   : > { %v13006_v41 = vmax.bf16 %v21547_v4, %v12990_v63 }
0x13b9   : > { %13028 = vmatprep.subr.bf16.mxu1 %v13006_v41 }
0x13ba   : > { %13029 = vmatpush1.bf16.msra.mxu1 %v13005_v24 }
0x13bd   : > { %13047 = vmatmul.mubr.bf16.vlgmr.msra.gmra.mrb[144].mxu1 %v13007_v33 }
0x1490   : > { %v13048_v17 = vpop.f32.mrb[144].mxu1 }
0x1491   : > { %v13049_v43 = vadd.f32 %v13048_v17, %v13012_v61  ;;  %v13050_v53 = vpop.f32.mrb[145].mxu1 }
0x1492   : > { %v13051_v1 = vadd.f32 %v13050_v53, %v13012_v61  ;;  %v13052_v31 = vpop.f32.mrb[146].mxu1 }
0x1493   : > { %13055 = vst [vmem:[%s735_s23] sm:$0xff] %v13049_v43  ;;  %v13053_v4 = vpop.f32.mrb[147].mxu1 }
0x1494   : > { %13056 = vst [vmem:[%s735_s23 + $0x8] sm:$0xff] %v13051_v1 }
0x1495   : > { %15939 = shalt.err (!%p15936_p5)
}
0x1496   : > { %s15940_s2 = scalar_lea.hbm %s21141_s5, 256  ;;  %s15944_s30 = scalar_lea.hbm %s22072_s1, 512 }
0x1497   : > { %p15941_p0 = scmp.ne.s32.totalorder %s21141_s5, %s15940_s2  ;;  %p15945_p10 = scmp.lt.u32.totalorder %s21141_s5, %s22072_s1 }
0x1498   : > { %p15946_p12 = scmp.lt.u32.totalorder %s15944_s30, %s15940_s2  ;;  %p15948_p2 = scmp.lt.u32.totalorder %s15940_s2, %s21141_s5 }
0x1499   : > { %p15942_p6 = pnand %p15941_p0, %p22073_p3 }
0x149a   : > { %p15947_p1 = por %p15946_p12, %p15945_p10 }
0x149b   : > { %p15943_p9 = pneg %p15942_p6 }
0x149c   : > { %p15949_p4 = por %p15948_p2, %p15947_p1 }
0x149e   : > { %p15950_p7 = pnand %p15949_p4, %p15943_p9 }
0x14a0   : > { %15953 = shalt.err (!%p15950_p7)
}
0x14a1   : > { %15389 = dma.vmem_to_hbm [thread:$0]  (%p22073_p3), %s21143_s27, 256, %s21141_s5, %s13058_s4  }
0x14a2 PF: > { %s22074_s22 = sld [smem:[#allocation18_spill]]  ;;  %s22075_s28 = sld [smem:[#allocation15_spill]] }
0x14a3   : > { %s22076_s26 = sld [smem:[#allocation22_spill]] }
0x14a8   : > { %p15416_p8 = scmp.ge.s32.totalorder %s22074_s22, 2  ;;  %s13084_s0 = sand.u32 1, %s22075_s28  }
0x14a9   : > { %p22077_p11 = scmp.ne.s32.totalorder %s22076_s26, 0  ;;  %s13085_s6 = scalar_lea.sflag [#allocation4], %s13084_s0 }
0x14ab   : > { %p15405_p13 = pnand %p15416_p8, %p22077_p11 }
0x14ad   : > { %15983 = dma.done.wait (!%p15405_p13), %s13085_s6, 256  }
0x14ae   : > { %15985 = vsyncadd (!%p15405_p13), %s13085_s6, 4294967040  ;;  %s22078_s30 = sld [smem:[#allocation19_spill]]  ;;  %s22079_s3 = sld [smem:[#allocation16_spill]] }
0x14af   : > { %s22080_s28 = sld [smem:[#allocation17_spill]]  ;;  %s22081_s29 = sld [smem:[#allocation20_spill]] }
0x14b4   : > { %p35_p5 = scmp.ge.s32.totalorder %s22078_s30, 4  }
0x14b6   :  { %37 = sbr.rel (!%p35_p5) target bundleno = 17 (0x11), region = 160 }
0x14bd   :  { %13090 = vsyncpa [#allocation3], 1 }
0x14be   :  { %13092 = vsyncpa [#allocation3 + $0x1], 1 }
0x14bf   :  { %13093 = vsyncpa [#allocation6], 1 }
0x14c0   :  { %13094 = vsyncpa [#allocation9], 1 }
0x14c1   :  { %13095 = vsyncpa [#allocation4], 1 }
0x14c2   :  { %13097 = vsyncpa [#allocation4 + $0x1], 1 }

</bundles_post_ra>
